<compile_context>
chip_gen: v7x
topology: tpu7x:2x2x1
jax: 0.10.0
libtpu: 0.0.40
codegen_flags: <defaults>
</compile_context>

<pallas_src>
import functools

import numpy as np
import jax
import jax.numpy as jnp
from jax.experimental import pallas as pl
from jax.experimental.pallas import tpu as pltpu

EPS = 1e-5  # PyTorch BatchNorm default eps


# --------------------------------------------------------------------------
# Pallas kernels
# --------------------------------------------------------------------------
def conv_bn_relu_pool_kernel(p_ref, w_ref, shift_ref, o_ref):
    # p_ref     : (1, 4, M, K) bf16  pool-grouped im2col patches; axis 1 indexes
    #                                the 4 members of each 2x2 avg-pool window,
    #                                M = pooled pixels in this spatial tile.
    # w_ref     : (K, Cout)    bf16  conv weight (kh,kw,cin order) * BN scale * 0.25.
    # shift_ref : (1, Cout)    f32   (conv bias + BN shift) * 0.25.
    # o_ref     : (1, M, Cout) bf16  pooled output tile.
    _, Q, M, K = p_ref.shape
    Cout = o_ref.shape[-1]
    # One big (4M, K) x (K, Cout) GEMM (amortizes MXU fill/drain; K is tiny for
    # conv1), then a single fused shift + ReLU pass.
    z = jnp.dot(p_ref[0].reshape(Q * M, K), w_ref[...],
                preferred_element_type=jnp.float32)
    z = jnp.maximum(z + shift_ref[...], 0.0)
    # AvgPool numerator: sum the 4 pool-window slabs on the VPU (0.25 already
    # folded into weights/shift on the host).
    z = z.reshape(Q, M, Cout)
    o_ref[0] = (z[0] + z[1] + z[2] + z[3]).astype(o_ref.dtype)


def fc_kernel(x_ref, w_ref, shift_ref, o_ref, acc_ref, *, apply_relu):
    # Grid: axis 0 tiles N (parallel), axis 1 tiles the reduction K (arbitrary).
    k = pl.program_id(1)

    @pl.when(k == 0)
    def _():
        acc_ref[...] = jnp.zeros_like(acc_ref)

    acc_ref[...] += jnp.dot(x_ref[...], w_ref[...],
                            preferred_element_type=jnp.float32)

    @pl.when(k == pl.num_programs(1) - 1)
    def _():
        y = acc_ref[...] + shift_ref[...]        # folded bias + BN shift
        if apply_relu:
            y = jnp.maximum(y, 0.0)
        o_ref[...] = y.astype(o_ref.dtype)


def fc23_kernel(x_ref, w2_ref, s2_ref, w3_ref, s3_ref, o_ref):
    # Fused fc2 -> bn4 -> relu -> fc3 (weights are tiny; single grid step).
    h = jnp.dot(x_ref[...], w2_ref[...], preferred_element_type=jnp.float32)
    h = jnp.maximum(h + s2_ref[...], 0.0).astype(jnp.bfloat16)
    y = jnp.dot(h, w3_ref[...], preferred_element_type=jnp.float32)
    o_ref[...] = (y + s3_ref[...]).astype(o_ref.dtype)


# --------------------------------------------------------------------------
# Tile selection helpers
# --------------------------------------------------------------------------
def _pick_tp(Hp, Wp, K, target_bytes=4 << 20):
    """Pooled-row tile: divides Hp, (t*Wp) % 8 == 0 (sublane align), and the
    bf16 pool-grouped patch block 4*t*Wp*K*2B stays within ~target_bytes."""
    max_rows = max(1, target_bytes // (4 * Wp * K * 2))
    cands = [t for t in range(1, Hp + 1) if Hp % t == 0 and (t * Wp) % 8 == 0]
    if not cands:
        return Hp  # single tile: block dim equals full array dim (always legal)
    good = [t for t in cands if t <= max_rows]
    return max(good) if good else min(cands)


def _pick_fc_tiles(B, K, N, budget_bytes=10 << 20):
    """Tile sizes for the K-reduced FC GEMM.

    tn keeps >= 2 N-tiles when possible so the 'parallel' N axis can shard
    across v7x's two TensorCores; tk is the largest 128-multiple divisor of K
    (or K itself) <= 8192 whose double-buffered blocks stay under
    `budget_bytes` (fits v5e's 16 MiB / v7x's 32 MiB default scoped VMEM)."""
    if N > 256 and N % 256 == 0:
        tn = 256
    elif N % 128 == 0:
        tn = 128
    else:
        tn = N

    cands = [t for t in range(128, min(K, 8192) + 1, 128) if K % t == 0]
    if K <= 8192:
        cands.append(K)
    cands = sorted(set(cands), reverse=True)

    def need(tk):
        # double-buffered x, w, out blocks + f32 accumulator + shift
        return (2 * (B * tk * 2 + tk * tn * 2 + B * tn * 4)
                + B * tn * 4 + 4 * N)

    for tk in cands:
        if need(tk) <= budget_bytes:
            return tk, tn
    return (cands[-1] if cands else K), tn


# --------------------------------------------------------------------------
# Layer wrappers (host glue + pallas_call)
# --------------------------------------------------------------------------
def conv_bn_relu_pool(x_nhwc, w2, shift):
    """Conv2d(k=4,s=1,p=2) -> BN(eval) -> ReLU -> AvgPool2d(2,2), NHWC.

    `w2` is the preprocessed bf16 (K, Cout) weight with BN scale and the 0.25
    pool factor already folded in; `shift` is the matching (1, Cout) f32 shift.
    """
    B, H, W, Cin = x_nhwc.shape
    K, Cout = w2.shape
    KH = KW = 4
    pad = 2
    Ho, Wo = H + 2 * pad - KH + 1, W + 2 * pad - KW + 1
    Hp, Wp = Ho // 2, Wo // 2                    # AvgPool2d floor mode

    # Pool-grouped im2col (bf16): only conv positions surviving the pool are
    # built; pool offset q=(dh,dw) gets its own plane.
    # TODO(synk): replace with in-kernel halo-DMA im2col to avoid the 16x HBM
    # amplification of the layer input.
    xp = jnp.pad(x_nhwc.astype(jnp.bfloat16),
                 ((0, 0), (pad, pad), (pad, pad), (0, 0)))

    def build(dh, dw):
        cols = [xp[:, dh + kh: dh + kh + 2 * Hp: 2,
                   dw + kw: dw + kw + 2 * Wp: 2, :]
                for kh in range(KH) for kw in range(KW)]
        return jnp.concatenate(cols, axis=-1).reshape(B, Hp * Wp, K)

    patches = jnp.stack([build(0, 0), build(0, 1), build(1, 0), build(1, 1)],
                        axis=1)                  # (B, 4, Hp*Wp, K) bf16

    Tp = _pick_tp(Hp, Wp, K)
    nt = Hp // Tp
    M = Tp * Wp

    out = pl.pallas_call(
        conv_bn_relu_pool_kernel,
        out_shape=jax.ShapeDtypeStruct((B, Hp * Wp, Cout), jnp.bfloat16),
        grid=(B, nt),
        in_specs=[
            pl.BlockSpec((1, 4, M, K), lambda bi, ti: (bi, 0, ti, 0)),
            pl.BlockSpec((K, Cout), lambda bi, ti: (0, 0)),
            pl.BlockSpec((1, Cout), lambda bi, ti: (0, 0)),
        ],
        out_specs=pl.BlockSpec((1, M, Cout), lambda bi, ti: (bi, ti, 0)),
        compiler_params=pltpu.CompilerParams(
            dimension_semantics=("parallel", "parallel")),
    )(patches, w2, shift)

    return out.reshape(B, Hp, Wp, Cout)


def fc_layer(x, w, shift, *, apply_relu, out_dtype):
    """x @ w + shift (+ReLU). `w` is preprocessed bf16 (K, N) with BN scale
    folded in; `shift` is (1, N) f32."""
    B, K = x.shape
    _, N = w.shape
    tk, tn = _pick_fc_tiles(B, K, N)

    kernel = functools.partial(fc_kernel, apply_relu=apply_relu)
    return pl.pallas_call(
        kernel,
        out_shape=jax.ShapeDtypeStruct((B, N), out_dtype),
        grid=(N // tn, K // tk),
        in_specs=[
            pl.BlockSpec((B, tk), lambda n, k: (0, k)),
            pl.BlockSpec((tk, tn), lambda n, k: (k, n)),
            pl.BlockSpec((1, tn), lambda n, k: (0, n)),
        ],
        out_specs=pl.BlockSpec((B, tn), lambda n, k: (0, n)),
        scratch_shapes=[pltpu.VMEM((B, tn), jnp.float32)],
        compiler_params=pltpu.CompilerParams(
            dimension_semantics=("parallel", "arbitrary")),
    )(x.astype(jnp.bfloat16), w, shift)


def fc2_fc3(x, w2, s2, w3, s3):
    """Fused fc2 -> bn4 -> relu -> fc3 in one pallas_call (tiny weights)."""
    B, K2 = x.shape
    N2 = w2.shape[1]
    N3 = w3.shape[1]
    return pl.pallas_call(
        fc23_kernel,
        out_shape=jax.ShapeDtypeStruct((B, N3), jnp.float32),
        grid=(1,),
        in_specs=[
            pl.BlockSpec((B, K2), lambda i: (0, 0)),
            pl.BlockSpec((K2, N2), lambda i: (0, 0)),
            pl.BlockSpec((1, N2), lambda i: (0, 0)),
            pl.BlockSpec((N2, N3), lambda i: (0, 0)),
            pl.BlockSpec((1, N3), lambda i: (0, 0)),
        ],
        out_specs=pl.BlockSpec((B, N3), lambda i: (0, 0)),
        compiler_params=pltpu.CompilerParams(
            dimension_semantics=("arbitrary",)),
    )(x.astype(jnp.bfloat16), w2, s2, w3, s3)


# --------------------------------------------------------------------------
# One-time parameter preprocessing (kept OUT of the jitted forward)
# --------------------------------------------------------------------------
def prepare_params(p, spatial):
    """Fold BN(eval) + bias (+0.25 AvgPool for convs) into the weights,
    transpose to (K, N), permute fc1 columns to match PyTorch's NCHW flatten,
    and cast weights to bf16.  Call once; feed the result to the forward."""
    prep = {}

    def conv_prep(w_pt, b, g, bb, m, v):
        Cout, Cin, KH, KW = w_pt.shape
        scale = g / jnp.sqrt(v + EPS)
        shift = bb - m * scale + b * scale
        w2 = jnp.transpose(w_pt, (2, 3, 1, 0)).reshape(KH * KW * Cin, Cout)
        w2 = 0.25 * w2 * scale[None, :]          # BN scale + AvgPool 1/4
        return (w2.astype(jnp.bfloat16),
                (0.25 * shift).astype(jnp.float32).reshape(1, Cout))

    prep["conv1_w"], prep["conv1_shift"] = conv_prep(
        p["conv1_w"], p["conv1_b"], p["bn1_g"], p["bn1_b"], p["bn1_m"], p["bn1_v"])
    prep["conv2_w"], prep["conv2_shift"] = conv_prep(
        p["conv2_w"], p["conv2_b"], p["bn2_g"], p["bn2_b"], p["bn2_m"], p["bn2_v"])

    # fc1: permute columns once so the forward can use a cheap NHWC (h, w, c)
    # flatten while matching PyTorch's NCHW (c, h, w) flatten numerics.
    Hf = Wf = ((spatial + 1) // 2 + 1) // 2
    Cf = p["conv2_w"].shape[0]
    j = np.arange(Hf * Wf * Cf)
    c_idx = j % Cf
    w_idx = (j // Cf) % Wf
    h_idx = j // (Cf * Wf)
    perm = jnp.asarray(c_idx * (Hf * Wf) + h_idx * Wf + w_idx, dtype=jnp.int32)
    fc1_w = jnp.take(p["fc1_w"], perm, axis=1)

    def fc_prep(w_pt, b, bn):
        N = w_pt.shape[0]
        if bn is not None:
            g, bb, m, v = bn
            scale = g / jnp.sqrt(v + EPS)
            shift = bb - m * scale + b * scale
        else:
            scale = jnp.ones((N,), jnp.float32)
            shift = b
        w = (jnp.transpose(w_pt) * scale[None, :]).astype(jnp.bfloat16)  # (K, N)
        return w, shift.astype(jnp.float32).reshape(1, N)

    prep["fc1_w"], prep["fc1_shift"] = fc_prep(
        fc1_w, p["fc1_b"], (p["bn3_g"], p["bn3_b"], p["bn3_m"], p["bn3_v"]))
    prep["fc2_w"], prep["fc2_shift"] = fc_prep(
        p["fc2_w"], p["fc2_b"], (p["bn4_g"], p["bn4_b"], p["bn4_m"], p["bn4_v"]))
    prep["fc3_w"], prep["fc3_shift"] = fc_prep(p["fc3_w"], p["fc3_b"], None)
    return prep


# --------------------------------------------------------------------------
# Full forward pass (mirrors LoRaCNN.forward, eval-mode BN)
# --------------------------------------------------------------------------
def lora_cnn_forward(x_nchw, prep):
    B = x_nchw.shape[0]
    x = jnp.transpose(x_nchw, (0, 2, 3, 1))      # NCHW -> NHWC (glue)

    # conv1 -> bn1 -> relu -> pool ; conv2 -> bn2 -> relu -> pool
    y = conv_bn_relu_pool(x, prep["conv1_w"], prep["conv1_shift"])
    y = conv_bn_relu_pool(y, prep["conv2_w"], prep["conv2_shift"])

    # Flatten in (h, w, c) order; fc1's columns were pre-permuted to match
    # PyTorch's (c, h, w) flatten.
    _, Hf, Wf, Cf = y.shape
    y = y.reshape(B, Hf * Wf * Cf)

    # fc1 -> bn3 -> relu (K-tiled, f32 accumulator)
    y = fc_layer(y, prep["fc1_w"], prep["fc1_shift"],
                 apply_relu=True, out_dtype=jnp.bfloat16)
    # fc2 -> bn4 -> relu -> fc3 (fused, single grid step)
    y = fc2_fc3(y, prep["fc2_w"], prep["fc2_shift"],
                prep["fc3_w"], prep["fc3_shift"])
    return y


# --------------------------------------------------------------------------
# Deterministic parameter construction + demo
# --------------------------------------------------------------------------
def make_params(key, spatial):
    # feature_size for this (smaller) spatial size, computed exactly like
    # LoRaCNN._get_conv_output: conv(p=2,k=4) -> H+1, pool -> //2, twice.
    h = ((spatial + 1) // 2 + 1) // 2
    feature_size = 64 * h * h

    keys = jax.random.split(key, 24)
    n = lambda k, shape, s=0.05: s * jax.random.normal(k, shape, jnp.float32)
    u = lambda k, shape: jax.random.uniform(k, shape, jnp.float32, 0.5, 1.5)

    p = {
        "conv1_w": n(keys[0], (32, 1, 4, 4)),  "conv1_b": n(keys[1], (32,)),
        "conv2_w": n(keys[2], (64, 32, 4, 4)), "conv2_b": n(keys[3], (64,)),
        "bn1_g": u(keys[4], (32,)), "bn1_b": n(keys[5], (32,)),
        "bn1_m": n(keys[6], (32,)), "bn1_v": u(keys[7], (32,)),
        "bn2_g": u(keys[8], (64,)), "bn2_b": n(keys[9], (64,)),
        "bn2_m": n(keys[10], (64,)), "bn2_v": u(keys[11], (64,)),
        "fc1_w": n(keys[12], (512, feature_size)), "fc1_b": n(keys[13], (512,)),
        "fc2_w": n(keys[14], (256, 512)),          "fc2_b": n(keys[15], (256,)),
        "fc3_w": n(keys[16], (128, 256)),          "fc3_b": n(keys[17], (128,)),
        "bn3_g": u(keys[18], (512,)), "bn3_b": n(keys[19], (512,)),
        "bn3_m": n(keys[20], (512,)), "bn3_v": u(keys[21], (512,)),
        "bn4_g": u(keys[22], (256,)), "bn4_b": n(keys[23], (256,)),
        "bn4_m": jnp.zeros((256,), jnp.float32),
        "bn4_v": jnp.ones((256,), jnp.float32),
    }
    return p, feature_size


if __name__ == "__main__":
    key = jax.random.PRNGKey(0)
    k_param, k_x = jax.random.split(key)

    B, C, H, W = 2, 1, 32, 32               # small shapes; module uses 128x128
    params, feat = make_params(k_param, H)

    # One-time weight preprocessing, outside the jitted forward.
    prep = jax.tree_util.tree_map(jax.block_until_ready,
                                  prepare_params(params, H))

    x = jax.random.normal(k_x, (B, C, H, W), jnp.float32)  # NCHW like PyTorch

    fwd = jax.jit(lora_cnn_forward)
    out = jax.block_until_ready(fwd(x, prep))

    assert out.shape == (B, 128), out.shape
    assert bool(jnp.all(jnp.isfinite(out)))
    print("KERNEL_OK")
</pallas_src>

<mosaic_0001>
module attributes {stable_mosaic.version = 11 : i64} {
  func.func @conv_bn_relu_pool_kernel(%arg0: i32, %arg1: i32, %arg2: memref<1x4x256x16xbf16, #tpu.memory_space<vmem>>, %arg3: memref<16x32xbf16, #tpu.memory_space<vmem>>, %arg4: memref<1x32xf32, #tpu.memory_space<vmem>>, %arg5: memref<1x256x32xbf16, #tpu.memory_space<vmem>>) attributes {dimension_semantics = [#tpu.dimension_semantics<parallel>, #tpu.dimension_semantics<parallel>], iteration_bounds = array<i64: 2, 1>, scalar_prefetch = 0 : i64, scratch_operands = 0 : i64, tpu.core_type = #tpu.core_type<tc>, window_params = [{transform_indices = @transform_0, window_bounds = array<i64: 1, 4, 256, 16>}, {pipeline_mode = #tpu.pipeline_mode<synchronous>, transform_indices = @transform_1, window_bounds = array<i64: 16, 32>}, {pipeline_mode = #tpu.pipeline_mode<synchronous>, transform_indices = @transform_2, window_bounds = array<i64: 1, 32>}, {transform_indices = @transform_3, window_bounds = array<i64: 1, 256, 32>}]} {
    %c0 = arith.constant 0 : index
    %c0_0 = arith.constant 0 : index
    %c0_1 = arith.constant 0 : index
    %c0_2 = arith.constant 0 : index
    %0 = vector.load %arg2[%c0, %c0_0, %c0_1, %c0_2] : memref<1x4x256x16xbf16, #tpu.memory_space<vmem>>, vector<1x4x256x16xbf16>
    %1 = vector.shape_cast %0 : vector<1x4x256x16xbf16> to vector<4x256x16xbf16>
    %2 = vector.shape_cast %1 : vector<4x256x16xbf16> to vector<1024x16xbf16>
    %c0_3 = arith.constant 0 : index
    %c0_4 = arith.constant 0 : index
    %3 = vector.load %arg3[%c0_3, %c0_4] : memref<16x32xbf16, #tpu.memory_space<vmem>>, vector<16x32xbf16>
    %cst = arith.constant dense<0.000000e+00> : vector<1024x32xf32>
    %4 = tpu.matmul %2, %3, %cst {dimension_numbers = #tpu.dot_dimension_numbers<[1], [0], [0], [1], [0, 0, 1, 1], [], []>} : vector<1024x16xbf16>, vector<16x32xbf16>, vector<1024x32xf32> -> vector<1024x32xf32>
    %c0_5 = arith.constant 0 : index
    %c0_6 = arith.constant 0 : index
    %5 = vector.load %arg4[%c0_5, %c0_6] : memref<1x32xf32, #tpu.memory_space<vmem>>, vector<1x32xf32>
    %6 = vector.broadcast %5 : vector<1x32xf32> to vector<1024x32xf32>
    %7 = arith.addf %4, %6 : vector<1024x32xf32>
    %cst_7 = arith.constant 0.000000e+00 : f32
    %8 = vector.broadcast %cst_7 : f32 to vector<1024x32xf32>
    %9 = arith.maximumf %7, %8 : vector<1024x32xf32>
    %10 = vector.shape_cast %9 : vector<1024x32xf32> to vector<4x256x32xf32>
    %11 = vector.extract_strided_slice %10 {offsets = [0, 0, 0], sizes = [1, 256, 32], strides = [1, 1, 1]} : vector<4x256x32xf32> to vector<1x256x32xf32>
    %12 = vector.shape_cast %11 : vector<1x256x32xf32> to vector<256x32xf32>
    %13 = vector.extract_strided_slice %10 {offsets = [1, 0, 0], sizes = [1, 256, 32], strides = [1, 1, 1]} : vector<4x256x32xf32> to vector<1x256x32xf32>
    %14 = vector.shape_cast %13 : vector<1x256x32xf32> to vector<256x32xf32>
    %15 = arith.addf %12, %14 : vector<256x32xf32>
    %16 = vector.extract_strided_slice %10 {offsets = [2, 0, 0], sizes = [1, 256, 32], strides = [1, 1, 1]} : vector<4x256x32xf32> to vector<1x256x32xf32>
    %17 = vector.shape_cast %16 : vector<1x256x32xf32> to vector<256x32xf32>
    %18 = arith.addf %15, %17 : vector<256x32xf32>
    %19 = vector.extract_strided_slice %10 {offsets = [3, 0, 0], sizes = [1, 256, 32], strides = [1, 1, 1]} : vector<4x256x32xf32> to vector<1x256x32xf32>
    %20 = vector.shape_cast %19 : vector<1x256x32xf32> to vector<256x32xf32>
    %21 = arith.addf %18, %20 : vector<256x32xf32>
    %22 = arith.truncf %21 : vector<256x32xf32> to vector<256x32xbf16>
    %c0_8 = arith.constant 0 : index
    %c0_9 = arith.constant 0 : index
    %c0_10 = arith.constant 0 : index
    %23 = vector.load %arg5[%c0_8, %c0_9, %c0_10] : memref<1x256x32xbf16, #tpu.memory_space<vmem>>, vector<1x256x32xbf16>
    %24 = vector.shape_cast %23 : vector<1x256x32xbf16> to vector<256x32xbf16>
    %25 = vector.shape_cast %22 : vector<256x32xbf16> to vector<1x256x32xbf16>
    tpu.vector_store %arg5[%c0_8, %c0_9, %c0_10], %25 {strides = array<i32>} : memref<1x256x32xbf16, #tpu.memory_space<vmem>>, vector<1x256x32xbf16>,
    return
  }
  func.func @transform_0(%arg0: i32, %arg1: i32) -> (i32, i32, i32, i32) {
    %c0_i32 = arith.constant 0 : i32
    %c0_i32_0 = arith.constant 0 : i32
    %c0_i32_1 = arith.constant 0 : i32
    return %arg0, %c0_i32, %arg1, %c0_i32_0 : i32, i32, i32, i32
  }
  func.func @transform_1(%arg0: i32, %arg1: i32) -> (i32, i32) {
    %c0_i32 = arith.constant 0 : i32
    %c0_i32_0 = arith.constant 0 : i32
    %c0_i32_1 = arith.constant 0 : i32
    return %c0_i32, %c0_i32_0 : i32, i32
  }
  func.func @transform_2(%arg0: i32, %arg1: i32) -> (i32, i32) {
    %c0_i32 = arith.constant 0 : i32
    %c0_i32_0 = arith.constant 0 : i32
    %c0_i32_1 = arith.constant 0 : i32
    return %c0_i32, %c0_i32_0 : i32, i32
  }
  func.func @transform_3(%arg0: i32, %arg1: i32) -> (i32, i32, i32) {
    %c0_i32 = arith.constant 0 : i32
    %c0_i32_0 = arith.constant 0 : i32
    return %arg0, %arg1, %c0_i32 : i32, i32, i32
  }
}

module attributes {stable_mosaic.version = 11 : i64} {
  func.func @conv_bn_relu_pool_kernel(%arg0: i32, %arg1: i32, %arg2: memref<1x4x64x512xbf16, #tpu.memory_space<vmem>>, %arg3: memref<512x64xbf16, #tpu.memory_space<vmem>>, %arg4: memref<1x64xf32, #tpu.memory_space<vmem>>, %arg5: memref<1x64x64xbf16, #tpu.memory_space<vmem>>) attributes {dimension_semantics = [#tpu.dimension_semantics<parallel>, #tpu.dimension_semantics<parallel>], iteration_bounds = array<i64: 2, 1>, scalar_prefetch = 0 : i64, scratch_operands = 0 : i64, tpu.core_type = #tpu.core_type<tc>, window_params = [{transform_indices = @transform_0, window_bounds = array<i64: 1, 4, 64, 512>}, {pipeline_mode = #tpu.pipeline_mode<synchronous>, transform_indices = @transform_1, window_bounds = array<i64: 512, 64>}, {pipeline_mode = #tpu.pipeline_mode<synchronous>, transform_indices = @transform_2, window_bounds = array<i64: 1, 64>}, {transform_indices = @transform_3, window_bounds = array<i64: 1, 64, 64>}]} {
    %c0 = arith.constant 0 : index
    %c0_0 = arith.constant 0 : index
    %c0_1 = arith.constant 0 : index
    %c0_2 = arith.constant 0 : index
    %0 = vector.load %arg2[%c0, %c0_0, %c0_1, %c0_2] : memref<1x4x64x512xbf16, #tpu.memory_space<vmem>>, vector<1x4x64x512xbf16>
    %1 = vector.shape_cast %0 : vector<1x4x64x512xbf16> to vector<4x64x512xbf16>
    %2 = vector.shape_cast %1 : vector<4x64x512xbf16> to vector<256x512xbf16>
    %c0_3 = arith.constant 0 : index
    %c0_4 = arith.constant 0 : index
    %3 = vector.load %arg3[%c0_3, %c0_4] : memref<512x64xbf16, #tpu.memory_space<vmem>>, vector<512x64xbf16>
    %cst = arith.constant dense<0.000000e+00> : vector<256x64xf32>
    %4 = tpu.matmul %2, %3, %cst {dimension_numbers = #tpu.dot_dimension_numbers<[1], [0], [0], [1], [0, 0, 1, 1], [], []>} : vector<256x512xbf16>, vector<512x64xbf16>, vector<256x64xf32> -> vector<256x64xf32>
    %c0_5 = arith.constant 0 : index
    %c0_6 = arith.constant 0 : index
    %5 = vector.load %arg4[%c0_5, %c0_6] : memref<1x64xf32, #tpu.memory_space<vmem>>, vector<1x64xf32>
    %6 = vector.broadcast %5 : vector<1x64xf32> to vector<256x64xf32>
    %7 = arith.addf %4, %6 : vector<256x64xf32>
    %cst_7 = arith.constant 0.000000e+00 : f32
    %8 = vector.broadcast %cst_7 : f32 to vector<256x64xf32>
    %9 = arith.maximumf %7, %8 : vector<256x64xf32>
    %10 = vector.shape_cast %9 : vector<256x64xf32> to vector<4x64x64xf32>
    %11 = vector.extract_strided_slice %10 {offsets = [0, 0, 0], sizes = [1, 64, 64], strides = [1, 1, 1]} : vector<4x64x64xf32> to vector<1x64x64xf32>
    %12 = vector.shape_cast %11 : vector<1x64x64xf32> to vector<64x64xf32>
    %13 = vector.extract_strided_slice %10 {offsets = [1, 0, 0], sizes = [1, 64, 64], strides = [1, 1, 1]} : vector<4x64x64xf32> to vector<1x64x64xf32>
    %14 = vector.shape_cast %13 : vector<1x64x64xf32> to vector<64x64xf32>
    %15 = arith.addf %12, %14 : vector<64x64xf32>
    %16 = vector.extract_strided_slice %10 {offsets = [2, 0, 0], sizes = [1, 64, 64], strides = [1, 1, 1]} : vector<4x64x64xf32> to vector<1x64x64xf32>
    %17 = vector.shape_cast %16 : vector<1x64x64xf32> to vector<64x64xf32>
    %18 = arith.addf %15, %17 : vector<64x64xf32>
    %19 = vector.extract_strided_slice %10 {offsets = [3, 0, 0], sizes = [1, 64, 64], strides = [1, 1, 1]} : vector<4x64x64xf32> to vector<1x64x64xf32>
    %20 = vector.shape_cast %19 : vector<1x64x64xf32> to vector<64x64xf32>
    %21 = arith.addf %18, %20 : vector<64x64xf32>
    %22 = arith.truncf %21 : vector<64x64xf32> to vector<64x64xbf16>
    %c0_8 = arith.constant 0 : index
    %c0_9 = arith.constant 0 : index
    %c0_10 = arith.constant 0 : index
    %23 = vector.load %arg5[%c0_8, %c0_9, %c0_10] : memref<1x64x64xbf16, #tpu.memory_space<vmem>>, vector<1x64x64xbf16>
    %24 = vector.shape_cast %23 : vector<1x64x64xbf16> to vector<64x64xbf16>
    %25 = vector.shape_cast %22 : vector<64x64xbf16> to vector<1x64x64xbf16>
    tpu.vector_store %arg5[%c0_8, %c0_9, %c0_10], %25 {strides = array<i32>} : memref<1x64x64xbf16, #tpu.memory_space<vmem>>, vector<1x64x64xbf16>,
    return
  }
  func.func @transform_0(%arg0: i32, %arg1: i32) -> (i32, i32, i32, i32) {
    %c0_i32 = arith.constant 0 : i32
    %c0_i32_0 = arith.constant 0 : i32
    %c0_i32_1 = arith.constant 0 : i32
    return %arg0, %c0_i32, %arg1, %c0_i32_0 : i32, i32, i32, i32
  }
  func.func @transform_1(%arg0: i32, %arg1: i32) -> (i32, i32) {
    %c0_i32 = arith.constant 0 : i32
    %c0_i32_0 = arith.constant 0 : i32
    %c0_i32_1 = arith.constant 0 : i32
    return %c0_i32, %c0_i32_0 : i32, i32
  }
  func.func @transform_2(%arg0: i32, %arg1: i32) -> (i32, i32) {
    %c0_i32 = arith.constant 0 : i32
    %c0_i32_0 = arith.constant 0 : i32
    %c0_i32_1 = arith.constant 0 : i32
    return %c0_i32, %c0_i32_0 : i32, i32
  }
  func.func @transform_3(%arg0: i32, %arg1: i32) -> (i32, i32, i32) {
    %c0_i32 = arith.constant 0 : i32
    %c0_i32_0 = arith.constant 0 : i32
    return %arg0, %arg1, %c0_i32 : i32, i32, i32
  }
}

module attributes {stable_mosaic.version = 11 : i64} {
  func.func @fc_kernel(%arg0: i32, %arg1: i32, %arg2: memref<2x4096xbf16, #tpu.memory_space<vmem>>, %arg3: memref<4096x256xbf16, #tpu.memory_space<vmem>>, %arg4: memref<1x256xf32, #tpu.memory_space<vmem>>, %arg5: memref<2x256xbf16, #tpu.memory_space<vmem>>, %arg6: memref<2x256xf32, #tpu.memory_space<vmem>>) attributes {dimension_semantics = [#tpu.dimension_semantics<parallel>, #tpu.dimension_semantics<arbitrary>], iteration_bounds = array<i64: 2, 1>, scalar_prefetch = 0 : i64, scratch_operands = 1 : i64, tpu.core_type = #tpu.core_type<tc>, window_params = [{transform_indices = @transform_0, window_bounds = array<i64: 2, 4096>}, {transform_indices = @transform_1, window_bounds = array<i64: 4096, 256>}, {transform_indices = @transform_2, window_bounds = array<i64: 1, 256>}, {transform_indices = @transform_3, window_bounds = array<i64: 2, 256>}]} {
    %c0_i32 = arith.constant 0 : i32
    %0 = arith.cmpi eq, %arg1, %c0_i32 : i32
    %1 = arith.extui %0 : i1 to i32
    %c0_i32_0 = arith.constant 0 : i32
    %2 = arith.cmpi ne, %1, %c0_i32_0 : i32
    scf.if %2 {
      %cst_10 = arith.constant 0.000000e+00 : f32
      %12 = vector.broadcast %cst_10 : f32 to vector<2x256xf32>
      %c0_11 = arith.constant 0 : index
      %c0_12 = arith.constant 0 : index
      %13 = vector.load %arg6[%c0_11, %c0_12] : memref<2x256xf32, #tpu.memory_space<vmem>>, vector<2x256xf32>
      tpu.vector_store %arg6[%c0_11, %c0_12], %12 {strides = array<i32>} : memref<2x256xf32, #tpu.memory_space<vmem>>, vector<2x256xf32>,
    } else {
    }
    %c0 = arith.constant 0 : index
    %c0_1 = arith.constant 0 : index
    %3 = vector.load %arg6[%c0, %c0_1] : memref<2x256xf32, #tpu.memory_space<vmem>>, vector<2x256xf32>
    %c0_2 = arith.constant 0 : index
    %c0_3 = arith.constant 0 : index
    %4 = vector.load %arg2[%c0_2, %c0_3] : memref<2x4096xbf16, #tpu.memory_space<vmem>>, vector<2x4096xbf16>
    %c0_4 = arith.constant 0 : index
    %c0_5 = arith.constant 0 : index
    %5 = vector.load %arg3[%c0_4, %c0_5] : memref<4096x256xbf16, #tpu.memory_space<vmem>>, vector<4096x256xbf16>
    %cst = arith.constant dense<0.000000e+00> : vector<2x256xf32>
    %6 = tpu.matmul %4, %5, %cst {dimension_numbers = #tpu.dot_dimension_numbers<[1], [0], [0], [1], [0, 0, 1, 1], [], []>} : vector<2x4096xbf16>, vector<4096x256xbf16>, vector<2x256xf32> -> vector<2x256xf32>
    %7 = arith.addf %3, %6 : vector<2x256xf32>
    %c0_6 = arith.constant 0 : index
    %c0_7 = arith.constant 0 : index
    %8 = vector.load %arg6[%c0_6, %c0_7] : memref<2x256xf32, #tpu.memory_space<vmem>>, vector<2x256xf32>
    tpu.vector_store %arg6[%c0_6, %c0_7], %7 {strides = array<i32>} : memref<2x256xf32, #tpu.memory_space<vmem>>, vector<2x256xf32>,
    %c0_i32_8 = arith.constant 0 : i32
    %9 = arith.cmpi eq, %arg1, %c0_i32_8 : i32
    %10 = arith.extui %9 : i1 to i32
    %c0_i32_9 = arith.constant 0 : i32
    %11 = arith.cmpi ne, %10, %c0_i32_9 : i32
    scf.if %11 {
      %c0_10 = arith.constant 0 : index
      %c0_11 = arith.constant 0 : index
      %12 = vector.load %arg6[%c0_10, %c0_11] : memref<2x256xf32, #tpu.memory_space<vmem>>, vector<2x256xf32>
      %c0_12 = arith.constant 0 : index
      %c0_13 = arith.constant 0 : index
      %13 = vector.load %arg4[%c0_12, %c0_13] : memref<1x256xf32, #tpu.memory_space<vmem>>, vector<1x256xf32>
      %14 = vector.broadcast %13 : vector<1x256xf32> to vector<2x256xf32>
      %15 = arith.addf %12, %14 : vector<2x256xf32>
      %cst_14 = arith.constant 0.000000e+00 : f32
      %16 = vector.broadcast %cst_14 : f32 to vector<2x256xf32>
      %17 = arith.maximumf %15, %16 : vector<2x256xf32>
      %18 = arith.truncf %17 : vector<2x256xf32> to vector<2x256xbf16>
      %c0_15 = arith.constant 0 : index
      %c0_16 = arith.constant 0 : index
      %19 = vector.load %arg5[%c0_15, %c0_16] : memref<2x256xbf16, #tpu.memory_space<vmem>>, vector<2x256xbf16>
      tpu.vector_store %arg5[%c0_15, %c0_16], %18 {strides = array<i32>} : memref<2x256xbf16, #tpu.memory_space<vmem>>, vector<2x256xbf16>,
    } else {
    }
    return
  }
  func.func @transform_0(%arg0: i32, %arg1: i32) -> (i32, i32) {
    %c0_i32 = arith.constant 0 : i32
    %c0_i32_0 = arith.constant 0 : i32
    return %c0_i32, %arg1 : i32, i32
  }
  func.func @transform_1(%arg0: i32, %arg1: i32) -> (i32, i32) {
    %c0_i32 = arith.constant 0 : i32
    return %arg1, %arg0 : i32, i32
  }
  func.func @transform_2(%arg0: i32, %arg1: i32) -> (i32, i32) {
    %c0_i32 = arith.constant 0 : i32
    %c0_i32_0 = arith.constant 0 : i32
    return %c0_i32, %arg0 : i32, i32
  }
  func.func @transform_3(%arg0: i32, %arg1: i32) -> (i32, i32) {
    %c0_i32 = arith.constant 0 : i32
    %c0_i32_0 = arith.constant 0 : i32
    return %c0_i32, %arg0 : i32, i32
  }
}

module attributes {stable_mosaic.version = 11 : i64} {
  func.func @fc23_kernel(%arg0: i32, %arg1: memref<2x512xbf16, #tpu.memory_space<vmem>>, %arg2: memref<512x256xbf16, #tpu.memory_space<vmem>>, %arg3: memref<1x256xf32, #tpu.memory_space<vmem>>, %arg4: memref<256x128xbf16, #tpu.memory_space<vmem>>, %arg5: memref<1x128xf32, #tpu.memory_space<vmem>>, %arg6: memref<2x128xf32, #tpu.memory_space<vmem>>) attributes {dimension_semantics = [#tpu.dimension_semantics<arbitrary>], iteration_bounds = array<i64: 1>, scalar_prefetch = 0 : i64, scratch_operands = 0 : i64, tpu.core_type = #tpu.core_type<tc>, window_params = [{pipeline_mode = #tpu.pipeline_mode<synchronous>, transform_indices = @transform_0, window_bounds = array<i64: 2, 512>}, {pipeline_mode = #tpu.pipeline_mode<synchronous>, transform_indices = @transform_1, window_bounds = array<i64: 512, 256>}, {pipeline_mode = #tpu.pipeline_mode<synchronous>, transform_indices = @transform_2, window_bounds = array<i64: 1, 256>}, {pipeline_mode = #tpu.pipeline_mode<synchronous>, transform_indices = @transform_3, window_bounds = array<i64: 256, 128>}, {pipeline_mode = #tpu.pipeline_mode<synchronous>, transform_indices = @transform_4, window_bounds = array<i64: 1, 128>}, {pipeline_mode = #tpu.pipeline_mode<synchronous>, transform_indices = @transform_5, window_bounds = array<i64: 2, 128>}]} {
    %c0 = arith.constant 0 : index
    %c0_0 = arith.constant 0 : index
    %0 = vector.load %arg1[%c0, %c0_0] : memref<2x512xbf16, #tpu.memory_space<vmem>>, vector<2x512xbf16>
    %c0_1 = arith.constant 0 : index
    %c0_2 = arith.constant 0 : index
    %1 = vector.load %arg2[%c0_1, %c0_2] : memref<512x256xbf16, #tpu.memory_space<vmem>>, vector<512x256xbf16>
    %cst = arith.constant dense<0.000000e+00> : vector<2x256xf32>
    %2 = tpu.matmul %0, %1, %cst {dimension_numbers = #tpu.dot_dimension_numbers<[1], [0], [0], [1], [0, 0, 1, 1], [], []>} : vector<2x512xbf16>, vector<512x256xbf16>, vector<2x256xf32> -> vector<2x256xf32>
    %c0_3 = arith.constant 0 : index
    %c0_4 = arith.constant 0 : index
    %3 = vector.load %arg3[%c0_3, %c0_4] : memref<1x256xf32, #tpu.memory_space<vmem>>, vector<1x256xf32>
    %4 = vector.broadcast %3 : vector<1x256xf32> to vector<2x256xf32>
    %5 = arith.addf %2, %4 : vector<2x256xf32>
    %cst_5 = arith.constant 0.000000e+00 : f32
    %6 = vector.broadcast %cst_5 : f32 to vector<2x256xf32>
    %7 = arith.maximumf %5, %6 : vector<2x256xf32>
    %8 = arith.truncf %7 : vector<2x256xf32> to vector<2x256xbf16>
    %c0_6 = arith.constant 0 : index
    %c0_7 = arith.constant 0 : index
    %9 = vector.load %arg4[%c0_6, %c0_7] : memref<256x128xbf16, #tpu.memory_space<vmem>>, vector<256x128xbf16>
    %cst_8 = arith.constant dense<0.000000e+00> : vector<2x128xf32>
    %10 = tpu.matmul %8, %9, %cst_8 {dimension_numbers = #tpu.dot_dimension_numbers<[1], [0], [0], [1], [0, 0, 1, 1], [], []>} : vector<2x256xbf16>, vector<256x128xbf16>, vector<2x128xf32> -> vector<2x128xf32>
    %c0_9 = arith.constant 0 : index
    %c0_10 = arith.constant 0 : index
    %11 = vector.load %arg5[%c0_9, %c0_10] : memref<1x128xf32, #tpu.memory_space<vmem>>, vector<1x128xf32>
    %12 = vector.broadcast %11 : vector<1x128xf32> to vector<2x128xf32>
    %13 = arith.addf %10, %12 : vector<2x128xf32>
    %c0_11 = arith.constant 0 : index
    %c0_12 = arith.constant 0 : index
    %14 = vector.load %arg6[%c0_11, %c0_12] : memref<2x128xf32, #tpu.memory_space<vmem>>, vector<2x128xf32>
    tpu.vector_store %arg6[%c0_11, %c0_12], %13 {strides = array<i32>} : memref<2x128xf32, #tpu.memory_space<vmem>>, vector<2x128xf32>,
    return
  }
  func.func @transform_0(%arg0: i32) -> (i32, i32) {
    %c0_i32 = arith.constant 0 : i32
    %c0_i32_0 = arith.constant 0 : i32
    %c0_i32_1 = arith.constant 0 : i32
    return %c0_i32, %c0_i32_0 : i32, i32
  }
  func.func @transform_1(%arg0: i32) -> (i32, i32) {
    %c0_i32 = arith.constant 0 : i32
    %c0_i32_0 = arith.constant 0 : i32
    %c0_i32_1 = arith.constant 0 : i32
    return %c0_i32, %c0_i32_0 : i32, i32
  }
  func.func @transform_2(%arg0: i32) -> (i32, i32) {
    %c0_i32 = arith.constant 0 : i32
    %c0_i32_0 = arith.constant 0 : i32
    %c0_i32_1 = arith.constant 0 : i32
    return %c0_i32, %c0_i32_0 : i32, i32
  }
  func.func @transform_3(%arg0: i32) -> (i32, i32) {
    %c0_i32 = arith.constant 0 : i32
    %c0_i32_0 = arith.constant 0 : i32
    %c0_i32_1 = arith.constant 0 : i32
    return %c0_i32, %c0_i32_0 : i32, i32
  }
  func.func @transform_4(%arg0: i32) -> (i32, i32) {
    %c0_i32 = arith.constant 0 : i32
    %c0_i32_0 = arith.constant 0 : i32
    %c0_i32_1 = arith.constant 0 : i32
    return %c0_i32, %c0_i32_0 : i32, i32
  }
  func.func @transform_5(%arg0: i32) -> (i32, i32) {
    %c0_i32 = arith.constant 0 : i32
    %c0_i32_0 = arith.constant 0 : i32
    %c0_i32_1 = arith.constant 0 : i32
    return %c0_i32, %c0_i32_0 : i32, i32
  }
}

</mosaic_0001>

<bundles_post_ra>
// kernel: lora_cnn_forward.4
= control target key start
LH: loop header
LB: loop body
LE: loop exit
PB: predicated region body
PF: predicated region fallthrough
CT: control target
= control target key end

     0   :  { %8 = vsyncpa [#allocation3], 0  ;;  %s3398_s0 = inlined_call_operand.vmem [shape: bf16[2,4,256,16], index: 0, kind: input, shape index: {}]   ;;  %s3399_s1 = inlined_call_operand.hbm [shape: bf16[16,32], index: 1, kind: input, shape index: {}]   ;;  %s3400_s2 = inlined_call_operand.hbm [shape: f32[1,32], index: 2, kind: input, shape index: {}]   ;;  %s3401_s3 = inlined_call_operand.vmem [shape: bf16[2,256,32], index: 3, kind: output, shape index: {}]  }
   0x1   :  { %9 = vsyncpa [#allocation5], 0  ;;  %s2566_s12 = smov 0   ;;  %s2568_s13 = smov 0  }
   0x2   :  { %s2570_s14 = smov 0  }
   0x3 LB: > { %s1934_s15 = sadd.s32 4294967295, %s2540_s14   ;;  %s27_s16 = sadd.s32 1, %s2536_s13  ;;  %s2540_s14 = sphi %s2570_s14, %s15_s14   ;;  %s2536_s13 = sphi %s2568_s13, %s3536_s13   ;;  %s2532_s12 = sphi %s2566_s12, %s3535_s12  }
   0x4   : > { %p29_p0 = scmp.ge.s32.totalorder %s27_s16, 2  ;;  %p1936_p1 = scmp.ge.s32.totalorder %s2540_s14, 1 }
   0x5   : > { %p130_p2 = scmp.lt.s32.totalorder %s2540_s14, 3  ;;  %p2591_p4 = scmp.eq.s32.totalorder %s1934_s15, 0 }
   0x6   : > { %s3538_s16 = smov (%p29_p0, %s27_s16), 0  ;;  %s2542_s19 = smov [#allocation2]  }
   0x7   : > { %p2587_p3 = pnand %p1936_p1, %p130_p2  ;;  %s142_s20 = sshll.u32 %s2542_s19, 4  ;;  %s143_s20 = int_to_ptr.vmem [resolvable:$true] %s142_s20 }
   0x8   : > { %s3427_s18 = scalar_select %p2591_p4, 1, 0 }
   0x9   : > { %s3426_s17 = scalar_select %p2587_p3, 1, 0 }
   0xa   : > { %p2350_p5 = pneg %p2587_p3  ;;  %s2543_s22 = smov [#allocation4]  }
   0xb   : > { %s156_s23 = sshll.u32 %s2543_s22, 4  ;;  %s2454_s26 = scalar_lea.hbm %s3399_s1, 128  ;;  %s2603_s23 = int_to_ptr.vmem [resolvable:$true] %s156_s23 }
   0xc   : > { %p2599_p6 = pnand %p2591_p4, %p2350_p5  ;;  %p2455_p7 = scmp.ne.s32.totalorder %s3399_s1, %s2454_s26 }
   0xd   : > { %p2461_p11 = scmp.lt.u32.totalorder %s2454_s26, %s3399_s1 }
   0xe   : > { %p2456_p8 = pneg %p2599_p6 }
  0x10   : > { %p2457_p9 = pnand %p2456_p8, %p2455_p7 }
  0x12   : > { %p2458_p10 = pneg %p2457_p9 }
  0x14   : > { %p2463_p12 = pnand %p2461_p11, %p2458_p10 }
  0x16   : > { %2466 = shalt.err (!%p2463_p12)
}
  0x17   : > { %s2467_s4 = scalar_lea.vmem %s143_s20, 128  ;;  %p2475_p2 = scmp.lt.s32.totalorder %s143_s20, %s143_s20 }
  0x18   : > { %p2468_p13 = scmp.ne.s32.totalorder %s143_s20, %s2467_s4  ;;  %p2476_p5 = scmp.lt.s32.totalorder %s2467_s4, %s2467_s4 }
  0x1a   : > { %p2470_p0 = pnand %p2468_p13, %p2456_p8  ;;  %p2477_p4 = por %p2476_p5, %p2475_p2 }
  0x1c   : > { %p2471_p1 = pneg %p2470_p0 }
  0x1e   : > { %p2478_p3 = pnand %p2477_p4, %p2471_p1 }
  0x20   : > { %2481 = shalt.err (!%p2478_p3)
}
  0x21   : > { %s2544_s5 = smov 64   ;;  %s2545_s6 = smov 4  }
  0x22   : > { %2353 = dma.hbm_to_vmem [thread:$0]  (!%p2599_p6), %s3399_s1, 128, %s143_s20, [#allocation3], %s2544_s5, %s2544_s5, %s2545_s6  }
  0x23   : > { %s2482_s11 = scalar_lea.hbm %s3400_s2, 16 }
  0x24   : > { %p2483_p7 = scmp.ne.s32.totalorder %s3400_s2, %s2482_s11  ;;  %p2489_p9 = scmp.lt.u32.totalorder %s2482_s11, %s3400_s2 }
  0x26   : > { %p2485_p3 = pnand %p2483_p7, %p2456_p8 }
  0x28   : > { %p2486_p4 = pneg %p2485_p3 }
  0x2a   : > { %p2491_p10 = pnand %p2489_p9, %p2486_p4 }
  0x2c   : > { %2494 = shalt.err (!%p2491_p10)
}
  0x2d   : > { %s2495_s20 = scalar_lea.vmem %s2603_s23, 16  ;;  %s2502_s25 = scalar_lea.vmem %s2603_s23, 32 }
  0x2e   : > { %p2496_p11 = scmp.ne.s32.totalorder %s2603_s23, %s2495_s20  ;;  %p2503_p0 = scmp.lt.s32.totalorder %s2603_s23, %s2603_s23 }
  0x2f   : > { %p2504_p1 = scmp.lt.s32.totalorder %s2502_s25, %s2495_s20 }
  0x30   : > { %p2498_p12 = pnand %p2496_p11, %p2456_p8 }
  0x31   : > { %p2505_p2 = por %p2504_p1, %p2503_p0 }
  0x32   : > { %p2499_p13 = pneg %p2498_p12 }
  0x34   : > { %p2506_p5 = pnand %p2505_p2, %p2499_p13 }
  0x36   : > { %2509 = shalt.err (!%p2506_p5)
}
  0x37   : > { %2356 = dma.hbm_to_vmem [thread:$0]  (!%p2599_p6), %s3400_s2, 16, %s2603_s23, [#allocation5]  }
  0x38   : > { %p3429_p7 = scmp.ne.s32.totalorder %s3426_s17, 0 }
  0x3a   : > { %182 = sbr.rel (%p3429_p7) target bundleno = 440 (0x1b8), region = 32 }
  0x41   : > { %p3430_p8 = scmp.ne.s32.totalorder %s3427_s18, 0 }
  0x43   : > { %2523 = dma.done.wait (%p3430_p8), [#allocation3], 128  }
  0x44   : > { %2525 = vsyncadd (%p3430_p8), [#allocation3], 4294967168 }
  0x45   : > { %2527 = dma.done.wait (%p3430_p8), [#allocation5], 16  }
  0x46   : > { %2529 = vsyncadd (%p3430_p8), [#allocation5], 4294967280  ;;  %p219_p3 = scmp.lt.s32.totalorder %s2532_s12, 1  ;;  %v2389_v0 = vld [vmem:[#allocation2] sm:$0xff]   ;;  %vm702_vm0 = vcmask 130048   ;;  %vm1792_vm1 = vcmask 257024  }
  0x47   : > { %2210 = vmatprep.subr.bf16.mxu0 %v2389_v0  ;;  %2340 = vmatprep.subr.bf16.mxu1 %v2389_v0 }
  0x48   : > { %s3540_s12 = smov (!%p219_p3, %s2532_s12), 1  ;;  %2211 = vmatpush3.bf16.msra.mxu0 %v2389_v0  ;;  %2341 = vmatpush3.bf16.msra.mxu1 %v2389_v0 }
  0x49   : > { %s2111_s17 = sshll.u32 %s3540_s12, 9  ;;  %s2112_s18 = sshll.u32 %s3540_s12, 7 }
  0x4a   : > { %s2671_s28 = scalar_lea.vmem %s3398_s0, %s2111_s17  ;;  %s3155_s30 = scalar_lea.vmem %s3401_s3, %s2112_s18 }
  0x4b   : > { %v2390_v1 = vld [vmem:[%s2671_s28] sm:$0xff]   ;;  %v2391_v2 = vld [vmem:[%s2671_s28 + $0x8] sm:$0xff]   ;;  %v2394_v5 = vld [vmem:[%s2671_s28 + $0x10] sm:$0xff]  }
  0x4c   : > { %v2392_v3 = vld [vmem:[%s2671_s28 + $0x100] sm:$0xff]   ;;  %2212 = vmatprep.mubr.msk.bf16.mxu0 %vm702_vm0, %v2390_v1  ;;  %v2393_v4 = vld [vmem:[%s2671_s28 + $0x108] sm:$0xff]   ;;  %v2396_v6 = vld [vmem:[%s2671_s28 + $0x110] sm:$0xff]  }
  0x4d   : > { %2276 = vmatprep.mubr.msk.bf16.mxu1 %vm702_vm0, %v2392_v3  ;;  %2213 = vmatmul.mubr.msk.bf16.vlgmr.msra.gmra.mrb[0].mxu0 %vm702_vm0, %v2391_v2  ;;  %v2395_v7 = vld [vmem:[%s2671_s28 + $0x18] sm:$0xff]   ;;  %v2398_v9 = vld [vmem:[%s2671_s28 + $0x20] sm:$0xff]   ;;  %v2399_v11 = vld [vmem:[%s2671_s28 + $0x28] sm:$0xff]  }
  0x4e   : > { %2277 = vmatmul.mubr.msk.bf16.vlgmr.msra.gmra.mrb[0].mxu1 %vm702_vm0, %v2393_v4  ;;  %2216 = vmatprep.mubr.msk.bf16.mxu0 %vm702_vm0, %v2394_v5  ;;  %v2397_v8 = vld [vmem:[%s2671_s28 + $0x118] sm:$0xff]   ;;  %v2400_v10 = vld [vmem:[%s2671_s28 + $0x120] sm:$0xff]   ;;  %v2401_v12 = vld [vmem:[%s2671_s28 + $0x128] sm:$0xff]  }
  0x4f   : > { %2280 = vmatprep.mubr.msk.bf16.mxu1 %vm702_vm0, %v2396_v6  ;;  %v2402_v13 = vld [vmem:[%s2671_s28 + $0x30] sm:$0xff]   ;;  %v2403_v15 = vld [vmem:[%s2671_s28 + $0x38] sm:$0xff]   ;;  %v2406_v17 = vld [vmem:[%s2671_s28 + $0x40] sm:$0xff]  }
  0x50   : > { %v2404_v14 = vld [vmem:[%s2671_s28 + $0x130] sm:$0xff]   ;;  %v2405_v16 = vld [vmem:[%s2671_s28 + $0x138] sm:$0xff]   ;;  %v2408_v18 = vld [vmem:[%s2671_s28 + $0x140] sm:$0xff]  }
  0x51   : > { %v2407_v19 = vld [vmem:[%s2671_s28 + $0x48] sm:$0xff]   ;;  %v2410_v21 = vld [vmem:[%s2671_s28 + $0x50] sm:$0xff]   ;;  %v2411_v23 = vld [vmem:[%s2671_s28 + $0x58] sm:$0xff]  }
  0x52   : > { %v2409_v20 = vld [vmem:[%s2671_s28 + $0x148] sm:$0xff]   ;;  %v2412_v22 = vld [vmem:[%s2671_s28 + $0x150] sm:$0xff]   ;;  %v2413_v24 = vld [vmem:[%s2671_s28 + $0x158] sm:$0xff]  }
  0x53   : > { %v2414_v25 = vld [vmem:[%s2671_s28 + $0x60] sm:$0xff]   ;;  %v2415_v27 = vld [vmem:[%s2671_s28 + $0x68] sm:$0xff]   ;;  %v2418_v29 = vld [vmem:[%s2671_s28 + $0x70] sm:$0xff]  }
  0x54   : > { %v2416_v26 = vld [vmem:[%s2671_s28 + $0x160] sm:$0xff]   ;;  %v2417_v28 = vld [vmem:[%s2671_s28 + $0x168] sm:$0xff]   ;;  %v2420_v30 = vld [vmem:[%s2671_s28 + $0x170] sm:$0xff]  }
  0x55   : > { %2217 = vmatmul.mubr.msk.bf16.gmra.mrb[4].mxu0 %vm702_vm0, %v2395_v7  ;;  %v2419_v31 = vld [vmem:[%s2671_s28 + $0x78] sm:$0xff]   ;;  %v2422_v33 = vld [vmem:[%s2671_s28 + $0x80] sm:$0xff]   ;;  %v2423_v35 = vld [vmem:[%s2671_s28 + $0x88] sm:$0xff]  }
  0x56   : > { %2281 = vmatmul.mubr.msk.bf16.gmra.mrb[4].mxu1 %vm702_vm0, %v2397_v8  ;;  %2220 = vmatprep.mubr.msk.bf16.mxu0 %vm702_vm0, %v2398_v9  ;;  %v2421_v32 = vld [vmem:[%s2671_s28 + $0x178] sm:$0xff]   ;;  %v2424_v34 = vld [vmem:[%s2671_s28 + $0x180] sm:$0xff]   ;;  %v2425_v36 = vld [vmem:[%s2671_s28 + $0x188] sm:$0xff]  }
  0x57   : > { %2284 = vmatprep.mubr.msk.bf16.mxu1 %vm702_vm0, %v2400_v10  ;;  %v2426_v37 = vld [vmem:[%s2671_s28 + $0x90] sm:$0xff]   ;;  %v2427_v39 = vld [vmem:[%s2671_s28 + $0x98] sm:$0xff]   ;;  %v2430_v41 = vld [vmem:[%s2671_s28 + $0xa0] sm:$0xff]  }
  0x58   : > { %v2428_v38 = vld [vmem:[%s2671_s28 + $0x190] sm:$0xff]   ;;  %v2429_v40 = vld [vmem:[%s2671_s28 + $0x198] sm:$0xff]   ;;  %v2432_v42 = vld [vmem:[%s2671_s28 + $0x1a0] sm:$0xff]  }
  0x59   : > { %v2431_v43 = vld [vmem:[%s2671_s28 + $0xa8] sm:$0xff]   ;;  %v2434_v45 = vld [vmem:[%s2671_s28 + $0xb0] sm:$0xff]   ;;  %v2435_v47 = vld [vmem:[%s2671_s28 + $0xb8] sm:$0xff]  }
  0x5a   : > { %v2433_v44 = vld [vmem:[%s2671_s28 + $0x1a8] sm:$0xff]   ;;  %v2436_v46 = vld [vmem:[%s2671_s28 + $0x1b0] sm:$0xff]   ;;  %v2437_v48 = vld [vmem:[%s2671_s28 + $0x1b8] sm:$0xff]  }
  0x5b   : > { %v2438_v49 = vld [vmem:[%s2671_s28 + $0xc0] sm:$0xff]   ;;  %v2439_v51 = vld [vmem:[%s2671_s28 + $0xc8] sm:$0xff]   ;;  %v2442_v53 = vld [vmem:[%s2671_s28 + $0xd0] sm:$0xff]  }
  0x5c   : > { %v2440_v50 = vld [vmem:[%s2671_s28 + $0x1c0] sm:$0xff]   ;;  %v2441_v52 = vld [vmem:[%s2671_s28 + $0x1c8] sm:$0xff]   ;;  %v2444_v54 = vld [vmem:[%s2671_s28 + $0x1d0] sm:$0xff]  }
  0x5d   : > { %2221 = vmatmul.mubr.msk.bf16.gmra.mrb[8].mxu0 %vm702_vm0, %v2399_v11  ;;  %v2443_v55 = vld [vmem:[%s2671_s28 + $0xd8] sm:$0xff]   ;;  %v2446_v57 = vld [vmem:[%s2671_s28 + $0xe0] sm:$0xff]   ;;  %v2447_v59 = vld [vmem:[%s2671_s28 + $0xe8] sm:$0xff]  }
  0x5e   : > { %2285 = vmatmul.mubr.msk.bf16.gmra.mrb[8].mxu1 %vm702_vm0, %v2401_v12  ;;  %2224 = vmatprep.mubr.msk.bf16.mxu0 %vm702_vm0, %v2402_v13  ;;  %v2445_v56 = vld [vmem:[%s2671_s28 + $0x1d8] sm:$0xff]   ;;  %v2448_v58 = vld [vmem:[%s2671_s28 + $0x1e0] sm:$0xff]   ;;  %v2449_v60 = vld [vmem:[%s2671_s28 + $0x1e8] sm:$0xff]  }
  0x5f   : > { %2288 = vmatprep.mubr.msk.bf16.mxu1 %vm702_vm0, %v2404_v14  ;;  %v2450_v61 = vld [vmem:[%s2671_s28 + $0xf0] sm:$0xff]   ;;  %v2451_v63 = vld [vmem:[%s2671_s28 + $0xf8] sm:$0xff]  }
  0x60   : > { %v2452_v62 = vld [vmem:[%s2671_s28 + $0x1f0] sm:$0xff]   ;;  %v2453_v0 = vld [vmem:[%s2671_s28 + $0x1f8] sm:$0xff]  }
  0x65   : > { %2225 = vmatmul.mubr.msk.bf16.gmra.mrb[12].mxu0 %vm702_vm0, %v2403_v15 }
  0x66   : > { %2289 = vmatmul.mubr.msk.bf16.gmra.mrb[12].mxu1 %vm702_vm0, %v2405_v16  ;;  %2228 = vmatprep.mubr.msk.bf16.mxu0 %vm702_vm0, %v2406_v17 }
  0x67   : > { %2292 = vmatprep.mubr.msk.bf16.mxu1 %vm702_vm0, %v2408_v18 }
  0x6d   : > { %2229 = vmatmul.mubr.msk.bf16.gmra.mrb[16].mxu0 %vm702_vm0, %v2407_v19 }
  0x6e   : > { %2293 = vmatmul.mubr.msk.bf16.gmra.mrb[16].mxu1 %vm702_vm0, %v2409_v20  ;;  %2232 = vmatprep.mubr.msk.bf16.mxu0 %vm702_vm0, %v2410_v21 }
  0x6f   : > { %2296 = vmatprep.mubr.msk.bf16.mxu1 %vm702_vm0, %v2412_v22 }
  0x75   : > { %2233 = vmatmul.mubr.msk.bf16.gmra.mrb[20].mxu0 %vm702_vm0, %v2411_v23 }
  0x76   : > { %2297 = vmatmul.mubr.msk.bf16.gmra.mrb[20].mxu1 %vm702_vm0, %v2413_v24  ;;  %2236 = vmatprep.mubr.msk.bf16.mxu0 %vm702_vm0, %v2414_v25 }
  0x77   : > { %2300 = vmatprep.mubr.msk.bf16.mxu1 %vm702_vm0, %v2416_v26 }
  0x7d   : > { %2237 = vmatmul.mubr.msk.bf16.gmra.mrb[24].mxu0 %vm702_vm0, %v2415_v27 }
  0x7e   : > { %2301 = vmatmul.mubr.msk.bf16.gmra.mrb[24].mxu1 %vm702_vm0, %v2417_v28  ;;  %2240 = vmatprep.mubr.msk.bf16.mxu0 %vm702_vm0, %v2418_v29 }
  0x7f   : > { %2304 = vmatprep.mubr.msk.bf16.mxu1 %vm702_vm0, %v2420_v30 }
  0x85   : > { %2241 = vmatmul.mubr.msk.bf16.gmra.mrb[28].mxu0 %vm702_vm0, %v2419_v31 }
  0x86   : > { %2305 = vmatmul.mubr.msk.bf16.gmra.mrb[28].mxu1 %vm702_vm0, %v2421_v32  ;;  %2244 = vmatprep.mubr.msk.bf16.mxu0 %vm702_vm0, %v2422_v33  ;;  %v2817_v33 = vld [vmem:[#allocation4] ss:$0 sm:$0xff] }
  0x87   : > { %2308 = vmatprep.mubr.msk.bf16.mxu1 %vm702_vm0, %v2424_v34 }
  0x8d   : > { %2245 = vmatmul.mubr.msk.bf16.gmra.mrb[32].mxu0 %vm702_vm0, %v2423_v35 }
  0x8e   : > { %2309 = vmatmul.mubr.msk.bf16.gmra.mrb[32].mxu1 %vm702_vm0, %v2425_v36  ;;  %2248 = vmatprep.mubr.msk.bf16.mxu0 %vm702_vm0, %v2426_v37 }
  0x8f   : > { %2312 = vmatprep.mubr.msk.bf16.mxu1 %vm702_vm0, %v2428_v38 }
  0x95   : > { %2249 = vmatmul.mubr.msk.bf16.gmra.mrb[36].mxu0 %vm702_vm0, %v2427_v39 }
  0x96   : > { %2313 = vmatmul.mubr.msk.bf16.gmra.mrb[36].mxu1 %vm702_vm0, %v2429_v40  ;;  %2252 = vmatprep.mubr.msk.bf16.mxu0 %vm702_vm0, %v2430_v41 }
  0x97   : > { %2316 = vmatprep.mubr.msk.bf16.mxu1 %vm702_vm0, %v2432_v42 }
  0x9d   : > { %2253 = vmatmul.mubr.msk.bf16.gmra.mrb[40].mxu0 %vm702_vm0, %v2431_v43 }
  0x9e   : > { %2317 = vmatmul.mubr.msk.bf16.gmra.mrb[40].mxu1 %vm702_vm0, %v2433_v44  ;;  %2256 = vmatprep.mubr.msk.bf16.mxu0 %vm702_vm0, %v2434_v45 }
  0x9f   : > { %2320 = vmatprep.mubr.msk.bf16.mxu1 %vm702_vm0, %v2436_v46 }
  0xa5   : > { %2257 = vmatmul.mubr.msk.bf16.gmra.mrb[44].mxu0 %vm702_vm0, %v2435_v47 }
  0xa6   : > { %2321 = vmatmul.mubr.msk.bf16.gmra.mrb[44].mxu1 %vm702_vm0, %v2437_v48  ;;  %2260 = vmatprep.mubr.msk.bf16.mxu0 %vm702_vm0, %v2438_v49 }
  0xa7   : > { %2324 = vmatprep.mubr.msk.bf16.mxu1 %vm702_vm0, %v2440_v50 }
  0xad   : > { %2261 = vmatmul.mubr.msk.bf16.gmra.mrb[48].mxu0 %vm702_vm0, %v2439_v51 }
  0xae   : > { %2325 = vmatmul.mubr.msk.bf16.gmra.mrb[48].mxu1 %vm702_vm0, %v2441_v52  ;;  %2264 = vmatprep.mubr.msk.bf16.mxu0 %vm702_vm0, %v2442_v53 }
  0xaf   : > { %2328 = vmatprep.mubr.msk.bf16.mxu1 %vm702_vm0, %v2444_v54 }
  0xb5   : > { %2265 = vmatmul.mubr.msk.bf16.gmra.mrb[52].mxu0 %vm702_vm0, %v2443_v55 }
  0xb6   : > { %2329 = vmatmul.mubr.msk.bf16.gmra.mrb[52].mxu1 %vm702_vm0, %v2445_v56  ;;  %2268 = vmatprep.mubr.msk.bf16.mxu0 %vm702_vm0, %v2446_v57 }
  0xb7   : > { %2332 = vmatprep.mubr.msk.bf16.mxu1 %vm702_vm0, %v2448_v58 }
  0xbd   : > { %2269 = vmatmul.mubr.msk.bf16.gmra.mrb[56].mxu0 %vm702_vm0, %v2447_v59 }
  0xbe   : > { %2333 = vmatmul.mubr.msk.bf16.gmra.mrb[56].mxu1 %vm702_vm0, %v2449_v60  ;;  %2272 = vmatprep.mubr.msk.bf16.mxu0 %vm702_vm0, %v2450_v61 }
  0xbf   : > { %2336 = vmatprep.mubr.msk.bf16.mxu1 %vm702_vm0, %v2452_v62 }
  0xc5   : > { %2273 = vmatmul.mubr.msk.bf16.gmra.mrb[60].mxu0 %vm702_vm0, %v2451_v63 }
  0xc6   : > { %2337 = vmatmul.mubr.msk.bf16.gmra.mrb[60].mxu1 %vm702_vm0, %v2453_v0 }
 0x120   : > { %v2214_v1 = vpop.f32.mrb[0].mxu0 }
 0x121   : > { %v2278_v2 = vpop.f32.mrb[0].mxu1  ;;  %v929_v3 = vpop.f32.mrb[1].mxu0  ;;  %v2832_v40 = vadd.f32 %v2214_v1, %v2817_v33 }
 0x122   : > { %v1185_v4 = vpop.f32.mrb[1].mxu1  ;;  %v2215_v5 = vpop.f32.mrb[2].mxu0  ;;  %v2835_v41 = vadd.f32 %v2817_v33, %v929_v3  ;;  %v2838_v42 = vadd.f32 %v2278_v2, %v2817_v33 }
 0x123   : > { %v2279_v6 = vpop.f32.mrb[2].mxu1  ;;  %v932_v7 = vpop.f32.mrb[3].mxu0  ;;  %v2841_v43 = vadd.f32 %v2817_v33, %v1185_v4  ;;  %v2848_v46 = vadd.f32 %v2215_v5, %v2817_v33 }
 0x124   : > { %v1188_v8 = vpop.f32.mrb[3].mxu1  ;;  %v2851_v47 = vadd.f32 %v2817_v33, %v932_v7  ;;  %v2854_v48 = vadd.f32 %v2279_v6, %v2817_v33 }
 0x125   : > { %v2857_v49 = vadd.f32 %v2817_v33, %v1188_v8 }
 0x128   : > { %v2218_v9 = vpop.f32.mrb[4].mxu0 }
 0x129   : > { %v2282_v10 = vpop.f32.mrb[4].mxu1  ;;  %v945_v11 = vpop.f32.mrb[5].mxu0  ;;  %v2860_v50 = vadd.f32 %v2218_v9, %v2817_v33 }
 0x12a   : > { %v1201_v12 = vpop.f32.mrb[5].mxu1  ;;  %v2219_v13 = vpop.f32.mrb[6].mxu0  ;;  %v2863_v51 = vadd.f32 %v2282_v10, %v2817_v33  ;;  %v2878_v62 = vadd.f32 %v2817_v33, %v945_v11 }
 0x12b   : > { %v2283_v14 = vpop.f32.mrb[6].mxu1  ;;  %v948_v15 = vpop.f32.mrb[7].mxu0  ;;  %v2881_v63 = vadd.f32 %v2219_v13, %v2817_v33  ;;  %v2884_v0 = vadd.f32 %v2817_v33, %v1201_v12 }
 0x12c   : > { %v1204_v16 = vpop.f32.mrb[7].mxu1  ;;  %v2887_v1 = vadd.f32 %v2283_v14, %v2817_v33  ;;  %v2896_v6 = vadd.f32 %v2817_v33, %v948_v15 }
 0x12d   : > { %v2899_v7 = vadd.f32 %v2817_v33, %v1204_v16 }
 0x130   : > { %v2222_v17 = vpop.f32.mrb[8].mxu0 }
 0x131   : > { %v2286_v18 = vpop.f32.mrb[8].mxu1  ;;  %v961_v19 = vpop.f32.mrb[9].mxu0  ;;  %v2906_v10 = vadd.f32 %v2222_v17, %v2817_v33 }
 0x132   : > { %v1217_v20 = vpop.f32.mrb[9].mxu1  ;;  %v2223_v21 = vpop.f32.mrb[10].mxu0  ;;  %v2909_v11 = vadd.f32 %v2817_v33, %v961_v19  ;;  %v2912_v12 = vadd.f32 %v2286_v18, %v2817_v33 }
 0x133   : > { %v2287_v22 = vpop.f32.mrb[10].mxu1  ;;  %v964_v23 = vpop.f32.mrb[11].mxu0  ;;  %v2915_v13 = vadd.f32 %v2817_v33, %v1217_v20  ;;  %v2922_v16 = vadd.f32 %v2223_v21, %v2817_v33 }
 0x134   : > { %v1220_v24 = vpop.f32.mrb[11].mxu1  ;;  %v2925_v5 = vadd.f32 %v2817_v33, %v964_v23  ;;  %v2928_v17 = vadd.f32 %v2287_v22, %v2817_v33 }
 0x135   : > { %v2931_v19 = vadd.f32 %v2817_v33, %v1220_v24 }
 0x138   : > { %v2801_v25 = vpop.f32.mrb[12].mxu0 }
 0x139   : > { %v2803_v26 = vpop.f32.mrb[12].mxu1  ;;  %v2805_v27 = vpop.f32.mrb[13].mxu0  ;;  %v2941_v23 = vadd.f32 %v2801_v25, %v2817_v33 }
 0x13a   : > { %v2807_v28 = vpop.f32.mrb[13].mxu1  ;;  %v2809_v29 = vpop.f32.mrb[14].mxu0  ;;  %v2945_v22 = vadd.f32 %v2803_v26, %v2817_v33  ;;  %v2957_v26 = vadd.f32 %v2817_v33, %v2805_v27 }
 0x13b   : > { %v2811_v30 = vpop.f32.mrb[14].mxu1  ;;  %v2813_v31 = vpop.f32.mrb[15].mxu0  ;;  %v2961_v20 = vadd.f32 %v2809_v29, %v2817_v33  ;;  %v2965_v59 = vadd.f32 %v2817_v33, %v2807_v28 }
 0x13c   : > { %v2815_v32 = vpop.f32.mrb[15].mxu1  ;;  %3431 = vst [vmem:[#allocation8_spill] sm:$0xff] %v2945_v22  ;;  %v2969_v58 = vadd.f32 %v2811_v30, %v2817_v33  ;;  %v2975_v27 = vadd.f32 %v2817_v33, %v2813_v31 }
 0x13d   : > { %v2979_v29 = vadd.f32 %v2817_v33, %v2815_v32 }
 0x13e   : > { %3432 = vst [vmem:[#allocation9_spill] sm:$0xff] %v2969_v58  ;;  %3433 = vst [vmem:[#allocation10_spill] sm:$0xff] %v2975_v27 }
 0x13f   : > { %3434 = vst [vmem:[#allocation11_spill] sm:$0xff] %v2979_v29 }
 0x140   : > { %v2819_v34 = vpop.f32.mrb[16].mxu0 }
 0x141   : > { %v2821_v35 = vpop.f32.mrb[16].mxu1  ;;  %v2823_v36 = vpop.f32.mrb[17].mxu0  ;;  %v2983_v30 = vadd.f32 %v2819_v34, %v2817_v33 }
 0x142   : > { %v2825_v37 = vpop.f32.mrb[17].mxu1  ;;  %v2827_v38 = vpop.f32.mrb[18].mxu0  ;;  %v2987_v56 = vadd.f32 %v2817_v33, %v2823_v36  ;;  %v2991_v4 = vadd.f32 %v2821_v35, %v2817_v33 }
 0x143   : > { %v2829_v39 = vpop.f32.mrb[18].mxu1  ;;  %v2843_v44 = vpop.f32.mrb[19].mxu0  ;;  %v2995_v31 = vadd.f32 %v2817_v33, %v2825_v37  ;;  %v2999_v54 = vadd.f32 %v2827_v38, %v2817_v33 }
 0x144   : > { %v2845_v45 = vpop.f32.mrb[19].mxu1  ;;  %v3003_v34 = vadd.f32 %v2817_v33, %v2843_v44  ;;  %v3007_v36 = vadd.f32 %v2829_v39, %v2817_v33 }
 0x145   : > { %3435 = vst [vmem:[#allocation12_spill] sm:$0xff] %v2995_v31  ;;  %v3011_v35 = vadd.f32 %v2817_v33, %v2845_v45 }
 0x146   : > { %3436 = vst [vmem:[#allocation13_spill] sm:$0xff] %v3003_v34  ;;  %3437 = vst [vmem:[#allocation14_spill] sm:$0xff] %v3007_v36 }
 0x147   : > { %3438 = vst [vmem:[#allocation15_spill] sm:$0xff] %v3011_v35 }
 0x148   : > { %v2873_v60 = vpop.f32.mrb[20].mxu0 }
 0x149   : > { %v2875_v61 = vpop.f32.mrb[20].mxu1  ;;  %v2889_v2 = vpop.f32.mrb[21].mxu0  ;;  %v3021_v39 = vadd.f32 %v2873_v60, %v2817_v33 }
 0x14a   : > { %v2891_v3 = vpop.f32.mrb[21].mxu1  ;;  %v2901_v8 = vpop.f32.mrb[22].mxu0  ;;  %v3025_v45 = vadd.f32 %v2875_v61, %v2817_v33  ;;  %v3037_v61 = vadd.f32 %v2817_v33, %v2889_v2 }
 0x14b   : > { %v2903_v9 = vpop.f32.mrb[22].mxu1  ;;  %v2917_v14 = vpop.f32.mrb[23].mxu0  ;;  %3439 = vst [vmem:[#allocation16_spill] sm:$0xff] %v3021_v39  ;;  %v3041_v53 = vadd.f32 %v2901_v8, %v2817_v33  ;;  %v3045_v38 = vadd.f32 %v2817_v33, %v2891_v3 }
 0x14c   : > { %v2919_v15 = vpop.f32.mrb[23].mxu1  ;;  %3440 = vst [vmem:[#allocation17_spill] sm:$0xff] %v3025_v45  ;;  %v3049_v44 = vadd.f32 %v2903_v9, %v2817_v33  ;;  %v3055_v2 = vadd.f32 %v2817_v33, %v2917_v14 }
 0x14d   : > { %v3059_v8 = vadd.f32 %v2817_v33, %v2919_v15 }
 0x14e   : > { %3441 = vst [vmem:[#allocation18_spill] sm:$0xff] %v3049_v44 }
 0x14f   : > { %3442 = vst [vmem:[#allocation19_spill] sm:$0xff] %v3059_v8 }
 0x150   : > { %v2238_v57 = vpop.f32.mrb[24].mxu0 }
 0x151   : > { %v2302_v55 = vpop.f32.mrb[24].mxu1  ;;  %v1025_v18 = vpop.f32.mrb[25].mxu0  ;;  %v3062_v35 = vadd.f32 %v2238_v57, %v2817_v33 }
 0x152   : > { %v1281_v25 = vpop.f32.mrb[25].mxu1  ;;  %v2239_v28 = vpop.f32.mrb[26].mxu0  ;;  %v3065_v9 = vadd.f32 %v2817_v33, %v1025_v18  ;;  %v3068_v22 = vadd.f32 %v2302_v55, %v2817_v33 }
 0x153   : > { %v2303_v24 = vpop.f32.mrb[26].mxu1  ;;  %v1028_v32 = vpop.f32.mrb[27].mxu0  ;;  %v3071_v52 = vadd.f32 %v2817_v33, %v1281_v25  ;;  %v3074_v39 = vadd.f32 %v2239_v28, %v2817_v33 }
 0x154   : > { %v1284_v21 = vpop.f32.mrb[27].mxu1  ;;  %3443 = vst [vmem:[#allocation20_spill] sm:$0xff] %v3065_v9  ;;  %3444 = vst [vmem:[#allocation21_spill] sm:$0xff] %v3068_v22  ;;  %v3077_v15 = vadd.f32 %v2817_v33, %v1028_v32  ;;  %v3080_v57 = vadd.f32 %v2303_v24, %v2817_v33 }
 0x155   : > { %3445 = vst [vmem:[#allocation22_spill] sm:$0xff] %v3071_v52  ;;  %3446 = vst [vmem:[#allocation23_spill] sm:$0xff] %v3074_v39  ;;  %v3083_v18 = vadd.f32 %v2817_v33, %v1284_v21 }
 0x156   : > { %3447 = vst [vmem:[#allocation24_spill] sm:$0xff] %v3077_v15  ;;  %3448 = vst [vmem:[#allocation25_spill] sm:$0xff] %v3080_v57 }
 0x157   : > { %3449 = vst [vmem:[#allocation26_spill] sm:$0xff] %v3083_v18 }
 0x158   : > { %v2242_v58 = vpop.f32.mrb[28].mxu0 }
 0x159   : > { %v2306_v27 = vpop.f32.mrb[28].mxu1  ;;  %v1041_v29 = vpop.f32.mrb[29].mxu0  ;;  %v3092_v32 = vadd.f32 %v2242_v58, %v2817_v33 }
 0x15a   : > { %v1297_v60 = vpop.f32.mrb[29].mxu1  ;;  %v2243_v3 = vpop.f32.mrb[30].mxu0  ;;  %v3095_v24 = vadd.f32 %v2306_v27, %v2817_v33  ;;  %v3106_v27 = vadd.f32 %v2817_v33, %v1041_v29 }
 0x15b   : > { %v2307_v37 = vpop.f32.mrb[30].mxu1  ;;  %v1044_v14 = vpop.f32.mrb[31].mxu0  ;;  %3450 = vst [vmem:[#allocation27_spill] sm:$0xff] %v3092_v32  ;;  %v3109_v21 = vadd.f32 %v2817_v33, %v1297_v60  ;;  %v3118_v60 = vadd.f32 %v2243_v3, %v2817_v33  ;;  %v3453_v3 = vmax.f32 %v2832_v40, 0.0 }
 0x15c   : > { %v1300_v45 = vpop.f32.mrb[31].mxu1  ;;  %3451 = vst [vmem:[#allocation28_spill] sm:$0xff] %v3095_v24 }
 0x160   : > { %v2246_v8 = vpop.f32.mrb[32].mxu0 }
 0x161   : > { %v2310_v44 = vpop.f32.mrb[32].mxu1  ;;  %v1066_v34 = vadd.f32 %v2246_v8, %v2817_v33  ;;  %v1057_v55 = vpop.f32.mrb[33].mxu0  ;;  %v3121_v8 = vadd.f32 %v2307_v37, %v2817_v33 }
 0x162   : > { %v1322_v25 = vadd.f32 %v2310_v44, %v2817_v33  ;;  %v1313_v36 = vpop.f32.mrb[33].mxu1  ;;  %v1058_v58 = vadd.f32 %v2817_v33, %v1057_v55  ;;  %v2247_v18 = vpop.f32.mrb[34].mxu0 }
 0x163   : > { %v1314_v29 = vadd.f32 %v2817_v33, %v1313_v36  ;;  %v2311_v15 = vpop.f32.mrb[34].mxu1  ;;  %3452 = vst [vmem:[#allocation29_spill] sm:$0xff] %v3121_v8  ;;  %v1474_v57 = vmax.f32 %v1066_v34, 0.0  ;;  %v1069_v44 = vadd.f32 %v2247_v18, %v2817_v33  ;;  %v1060_v52 = vpop.f32.mrb[35].mxu0  ;;  %v3454_v18 = vmax.f32 %v2835_v41, 0.0 }
 0x164   : > { %v1316_v28 = vpop.f32.mrb[35].mxu1  ;;  %v1472_v31 = vmax.f32 %v1058_v58, 0.0  ;;  %v1061_v55 = vadd.f32 %v2817_v33, %v1060_v52  ;;  %v1325_v24 = vadd.f32 %v2311_v15, %v2817_v33  ;;  %v1538_v37 = vmax.f32 %v1322_v25, 0.0 }
 0x165   : > { %v1317_v36 = vadd.f32 %v2817_v33, %v1316_v28  ;;  %v1570_v39 = vadd.f32 %v1474_v57, %v3453_v3  ;;  %v1475_v8 = vmax.f32 %v1069_v44, 0.0  ;;  %v1536_v9 = vmax.f32 %v1314_v29, 0.0 }
 0x166   : > { %v1568_v22 = vadd.f32 %v1472_v31, %v3454_v18  ;;  %v1473_v58 = vmax.f32 %v1061_v55, 0.0  ;;  %v3134_v52 = vadd.f32 %v2817_v33, %v1044_v14  ;;  %v3137_v15 = vadd.f32 %v2817_v33, %v1300_v45 }
 0x167   : > { %v3455_v28 = vmax.f32 %v2838_v42, 0.0  ;;  %v3456_v57 = vmax.f32 %v2848_v46, 0.0  ;;  %v3457_v44 = vmax.f32 %v2841_v43, 0.0  ;;  %v3458_v41 = vmax.f32 %v2851_v47, 0.0 }
 0x168   : > { %v1539_v29 = vmax.f32 %v1325_v24, 0.0  ;;  %v1537_v55 = vmax.f32 %v1317_v36, 0.0  ;;  %v2250_v14 = vpop.f32.mrb[36].mxu0  ;;  %v3459_v45 = vmax.f32 %v2854_v48, 0.0  ;;  %v3460_v47 = vmax.f32 %v2857_v49, 0.0 }
 0x169   : > { %v1602_v40 = vadd.f32 %v1570_v39, %v3455_v28  ;;  %v1571_v25 = vadd.f32 %v1475_v8, %v3456_v57  ;;  %v1600_v3 = vadd.f32 %v1568_v22, %v3457_v44  ;;  %v1569_v31 = vadd.f32 %v1473_v58, %v3458_v41  ;;  %v2314_v18 = vpop.f32.mrb[36].mxu1  ;;  %v1073_v39 = vpop.f32.mrb[37].mxu0 }
 0x16a   : > { %v1082_v42 = vadd.f32 %v2250_v14, %v2817_v33  ;;  %v1338_v46 = vadd.f32 %v2314_v18, %v2817_v33  ;;  %v1329_v8 = vpop.f32.mrb[37].mxu1  ;;  %v1074_v24 = vadd.f32 %v2817_v33, %v1073_v39  ;;  %v2251_v48 = vpop.f32.mrb[38].mxu0  ;;  %v3461_v14 = vmax.f32 %v2860_v50, 0.0 }
 0x16b   : > { %v1634_v34 = vadd.f32 %v1602_v40, %v1538_v37  ;;  %v1603_v32 = vadd.f32 %v1571_v25, %v3459_v45  ;;  %v1632_v43 = vadd.f32 %v1600_v3, %v1536_v9  ;;  %v1601_v22 = vadd.f32 %v1569_v31, %v3460_v47  ;;  %v2315_v37 = vpop.f32.mrb[38].mxu1  ;;  %v1076_v25 = vpop.f32.mrb[39].mxu0 }
 0x16c   : > { %v1330_v36 = vadd.f32 %v2817_v33, %v1329_v8  ;;  %v1478_v40 = vmax.f32 %v1082_v42, 0.0  ;;  %v1542_v57 = vmax.f32 %v1338_v46, 0.0  ;;  %v1332_v44 = vpop.f32.mrb[39].mxu1  ;;  %v1476_v3 = vmax.f32 %v1074_v24, 0.0 }
 0x16d   : > { %v2115_v58 = vpack.c.bf16 %v1634_v34, %v1634_v34  ;;  %v1635_v28 = vadd.f32 %v1603_v32, %v1539_v29  ;;  %v2113_v41 = vpack.c.bf16 %v1632_v43, %v1632_v43  ;;  %v1633_v9 = vadd.f32 %v1601_v22, %v1537_v55 }
 0x16e   : > { %v1085_v49 = vadd.f32 %v2251_v48, %v2817_v33  ;;  %v1574_v18 = vadd.f32 %v1478_v40, %v3461_v14  ;;  %v1540_v45 = vmax.f32 %v1330_v36, 0.0  ;;  %v1077_v32 = vadd.f32 %v2817_v33, %v1076_v25 }
 0x16f   : > { %1795 = vst.msk [vmem:[%s3155_s30 + $0x8] sm:$0xf] %vm1792_vm1, %v2115_v58  ;;  %v2116_v31 = vpack.c.bf16 %v1635_v28, %v1635_v28  ;;  %1793 = vst.msk [vmem:[%s3155_s30] sm:$0xf] %vm1792_vm1, %v2113_v41  ;;  %v2114_v34 = vpack.c.bf16 %v1633_v9, %v1633_v9  ;;  %v3462_v29 = vmax.f32 %v2878_v62, 0.0  ;;  %v1341_v39 = vadd.f32 %v2315_v37, %v2817_v33 }
 0x170   : > { %v1479_v55 = vmax.f32 %v1085_v49, 0.0  ;;  %v1471_v46 = vmax.f32 %v3118_v60, 0.0  ;;  %v3463_v8 = vmax.f32 %v2863_v51, 0.0  ;;  %v1477_v43 = vmax.f32 %v1077_v32, 0.0  ;;  %v2254_v58 = vpop.f32.mrb[40].mxu0 }
 0x171   : > { %v1572_v42 = vadd.f32 %v1476_v3, %v3462_v29  ;;  %1796 = vst.msk [vmem:[%s3155_s30 + $0xc] sm:$0xf] %vm1792_vm1, %v2116_v31  ;;  %v1333_v47 = vadd.f32 %v2817_v33, %v1332_v44  ;;  %v1469_v22 = vmax.f32 %v3134_v52, 0.0  ;;  %1794 = vst.msk [vmem:[%s3155_s30 + $0x4] sm:$0xf] %vm1792_vm1, %v2114_v34  ;;  %v3464_v62 = vmax.f32 %v2881_v63, 0.0 }
 0x172   : > { %v1606_v50 = vadd.f32 %v1574_v18, %v3463_v8  ;;  %v3465_v48 = vmax.f32 %v2884_v0, 0.0  ;;  %v1543_v37 = vmax.f32 %v1341_v39, 0.0  ;;  %v2318_v28 = vpop.f32.mrb[40].mxu1  ;;  %v3466_v51 = vmax.f32 %v2896_v6, 0.0  ;;  %v1089_v9 = vpop.f32.mrb[41].mxu0 }
 0x173   : > { %v1575_v24 = vadd.f32 %v1479_v55, %v3464_v62  ;;  %v1541_v41 = vmax.f32 %v1333_v47, 0.0  ;;  %v1098_v44 = vadd.f32 %v2254_v58, %v2817_v33  ;;  %v1345_v3 = vpop.f32.mrb[41].mxu1  ;;  %v3467_v31 = vmax.f32 %v2887_v1, 0.0  ;;  %v2255_v18 = vpop.f32.mrb[42].mxu0 }
 0x174   : > { %v1604_v36 = vadd.f32 %v1572_v42, %v3465_v48  ;;  %v1638_v40 = vadd.f32 %v1606_v50, %v1542_v57  ;;  %v1573_v25 = vadd.f32 %v1477_v43, %v3466_v51  ;;  %v1090_v0 = vadd.f32 %v2817_v33, %v1089_v9  ;;  %v2319_v32 = vpop.f32.mrb[42].mxu1  ;;  %v1092_v55 = vpop.f32.mrb[43].mxu0 }
 0x175   : > { %v1607_v63 = vadd.f32 %v1575_v24, %v3467_v31  ;;  %v1354_v14 = vadd.f32 %v2318_v28, %v2817_v33  ;;  %v3468_v6 = vmax.f32 %v2899_v7, 0.0  ;;  %v1482_v29 = vmax.f32 %v1098_v44, 0.0 }
 0x176   : > { %v1636_v49 = vadd.f32 %v1604_v36, %v1540_v45  ;;  %v2119_v57 = vpack.c.bf16 %v1638_v40, %v1638_v40  ;;  %v1101_v42 = vadd.f32 %v2255_v18, %v2817_v33  ;;  %v1348_v45 = vpop.f32.mrb[43].mxu1  ;;  %v1480_v8 = vmax.f32 %v1090_v0, 0.0 }
 0x177   : > { %v1605_v34 = vadd.f32 %v1573_v25, %v3468_v6  ;;  %v1639_v1 = vadd.f32 %v1607_v63, %v1543_v37  ;;  %v1546_v50 = vmax.f32 %v1354_v14, 0.0  ;;  %v3469_v47 = vmax.f32 %v2906_v10, 0.0 }
 0x178   : > { %v2117_v39 = vpack.c.bf16 %v1636_v49, %v1636_v49  ;;  %1799 = vst.msk [vmem:[%s3155_s30 + $0x18] sm:$0xf] %vm1792_vm1, %v2119_v57  ;;  %v1483_v24 = vmax.f32 %v1101_v42, 0.0  ;;  %v1346_v7 = vadd.f32 %v2817_v33, %v1345_v3  ;;  %v3470_v36 = vmax.f32 %v2909_v11, 0.0  ;;  %v2258_v63 = vpop.f32.mrb[44].mxu0 }
 0x179   : > { %v1637_v43 = vadd.f32 %v1605_v34, %v1541_v41  ;;  %v1578_v62 = vadd.f32 %v1482_v29, %v3469_v47  ;;  %v2120_v48 = vpack.c.bf16 %v1639_v1, %v1639_v1  ;;  %v1093_v37 = vadd.f32 %v2817_v33, %v1092_v55  ;;  %v2322_v0 = vpop.f32.mrb[44].mxu1 }
 0x17a   : > { %1797 = vst.msk [vmem:[%s3155_s30 + $0x10] sm:$0xf] %vm1792_vm1, %v2117_v39  ;;  %v1576_v58 = vadd.f32 %v1480_v8, %v3470_v36  ;;  %v1357_v28 = vadd.f32 %v2319_v32, %v2817_v33  ;;  %v3471_v51 = vmax.f32 %v2912_v12, 0.0  ;;  %v3472_v10 = vmax.f32 %v2922_v16, 0.0  ;;  %v1105_v32 = vpop.f32.mrb[45].mxu0  ;;  %v1361_v6 = vpop.f32.mrb[45].mxu1 }
 0x17b   : > { %v2118_v40 = vpack.c.bf16 %v1637_v43, %v1637_v43  ;;  %v1544_v44 = vmax.f32 %v1346_v7, 0.0  ;;  %1800 = vst.msk [vmem:[%s3155_s30 + $0x1c] sm:$0xf] %vm1792_vm1, %v2120_v48  ;;  %v3473_v9 = vmax.f32 %v2915_v13, 0.0  ;;  %v1481_v49 = vmax.f32 %v1093_v37, 0.0  ;;  %v2323_v39 = vpop.f32.mrb[46].mxu1 }
 0x17c   : > { %v1610_v25 = vadd.f32 %v1578_v62, %v3471_v51  ;;  %v1579_v41 = vadd.f32 %v1483_v24, %v3472_v10  ;;  %v1547_v11 = vmax.f32 %v1357_v28, 0.0  ;;  %v1349_v31 = vadd.f32 %v2817_v33, %v1348_v45  ;;  %v2259_v45 = vpop.f32.mrb[46].mxu0  ;;  %v1364_v47 = vpop.f32.mrb[47].mxu1 }
 0x17d   : > { %v1608_v3 = vadd.f32 %v1576_v58, %v3473_v9  ;;  %1798 = vst.msk [vmem:[%s3155_s30 + $0x14] sm:$0xf] %vm1792_vm1, %v2118_v40  ;;  %v3474_v12 = vmax.f32 %v2928_v17, 0.0  ;;  %v1114_v16 = vadd.f32 %v2258_v63, %v2817_v33  ;;  %v1370_v57 = vadd.f32 %v2322_v0, %v2817_v33  ;;  %v1108_v43 = vpop.f32.mrb[47].mxu0 }
 0x17e   : > { %v1642_v14 = vadd.f32 %v1610_v25, %v1546_v50  ;;  %v3475_v34 = vmax.f32 %v2925_v5, 0.0  ;;  %v1545_v42 = vmax.f32 %v1349_v31, 0.0  ;;  %v1106_v55 = vadd.f32 %v2817_v33, %v1105_v32 }
 0x17f   : > { %v1611_v18 = vadd.f32 %v1579_v41, %v3474_v12  ;;  %v1640_v13 = vadd.f32 %v1608_v3, %v1544_v44  ;;  %v1486_v8 = vmax.f32 %v1114_v16, 0.0  ;;  %v1550_v50 = vmax.f32 %v1370_v57, 0.0  ;;  %v3479_v44 = vld [vmem:[#allocation8_spill] sm:$0xff]  ;;  %v3483_v57 = vld [vmem:[#allocation10_spill] sm:$0xff] }
 0x180   : > { %v1577_v29 = vadd.f32 %v1481_v49, %v3475_v34  ;;  %v2123_v1 = vpack.c.bf16 %v1642_v14, %v1642_v14  ;;  %v3476_v24 = vmax.f32 %v2931_v19, 0.0  ;;  %v1484_v5 = vmax.f32 %v1106_v55, 0.0 }
 0x181   : > { %v1643_v17 = vadd.f32 %v1611_v18, %v1547_v11  ;;  %v2121_v62 = vpack.c.bf16 %v1640_v13, %v1640_v13  ;;  %v1117_v48 = vadd.f32 %v2259_v45, %v2817_v33  ;;  %v3477_v58 = vmax.f32 %v2941_v23, 0.0  ;;  %v2262_v18 = vpop.f32.mrb[48].mxu0  ;;  %v2326_v16 = vpop.f32.mrb[48].mxu1 }
 0x182   : > { %v1609_v7 = vadd.f32 %v1577_v29, %v3476_v24  ;;  %1803 = vst.msk [vmem:[%s3155_s30 + $0x28] sm:$0xf] %vm1792_vm1, %v2123_v1  ;;  %v1362_v28 = vadd.f32 %v2817_v33, %v1361_v6  ;;  %v1109_v40 = vadd.f32 %v2817_v33, %v1108_v43  ;;  %v3478_v25 = vmax.f32 %v2957_v26, 0.0  ;;  %v1377_v55 = vpop.f32.mrb[49].mxu1 }
 0x183   : > { %v2124_v36 = vpack.c.bf16 %v1643_v17, %v1643_v17  ;;  %v1582_v37 = vadd.f32 %v1486_v8, %v3477_v58  ;;  %1801 = vst.msk [vmem:[%s3155_s30 + $0x20] sm:$0xf] %vm1792_vm1, %v2121_v62  ;;  %v1487_v10 = vmax.f32 %v1117_v48, 0.0  ;;  %v1373_v41 = vadd.f32 %v2323_v39, %v2817_v33 }
 0x184   : > { %v1641_v51 = vadd.f32 %v1609_v7, %v1545_v42  ;;  %v1580_v19 = vadd.f32 %v1484_v5, %v3478_v25  ;;  %v3480_v9 = vmax.f32 %v3479_v44, 0.0  ;;  %v1548_v23 = vmax.f32 %v1362_v28, 0.0  ;;  %v1121_v42 = vpop.f32.mrb[49].mxu0 }
 0x185   : > { %1804 = vst.msk [vmem:[%s3155_s30 + $0x2c] sm:$0xf] %vm1792_vm1, %v2124_v36  ;;  %v1485_v49 = vmax.f32 %v1109_v40, 0.0  ;;  %v1365_v11 = vadd.f32 %v2817_v33, %v1364_v47  ;;  %v3481_v63 = vmax.f32 %v2961_v20, 0.0  ;;  %v3482_v26 = vmax.f32 %v2965_v59, 0.0  ;;  %v3485_v20 = vld [vmem:[#allocation9_spill] sm:$0xff] }
 0x186   : > { %v1614_v3 = vadd.f32 %v1582_v37, %v3480_v9  ;;  %v2122_v31 = vpack.c.bf16 %v1641_v51, %v1641_v51  ;;  %v1551_v12 = vmax.f32 %v1373_v41, 0.0  ;;  %v3484_v6 = vmax.f32 %v3483_v57, 0.0  ;;  %v2263_v8 = vpop.f32.mrb[50].mxu0  ;;  %v3487_v47 = vld [vmem:[#allocation11_spill] sm:$0xff] }
 0x187   : > { %v1583_v0 = vadd.f32 %v1487_v10, %v3481_v63  ;;  %v1612_v14 = vadd.f32 %v1580_v19, %v3482_v26  ;;  %v1549_v34 = vmax.f32 %v1365_v11, 0.0  ;;  %v1130_v29 = vadd.f32 %v2262_v18, %v2817_v33  ;;  %v1124_v48 = vpop.f32.mrb[51].mxu0 }
 0x188   : > { %v1646_v32 = vadd.f32 %v1614_v3, %v1550_v50  ;;  %v1581_v13 = vadd.f32 %v1485_v49, %v3484_v6  ;;  %1802 = vst.msk [vmem:[%s3155_s30 + $0x24] sm:$0xf] %vm1792_vm1, %v2122_v31  ;;  %v3486_v39 = vmax.f32 %v3485_v20, 0.0  ;;  %v1122_v1 = vadd.f32 %v2817_v33, %v1121_v42  ;;  %v2327_v50 = vpop.f32.mrb[50].mxu1  ;;  %v2266_v57 = vpop.f32.mrb[52].mxu0 }
 0x189   : > { %v1644_v45 = vadd.f32 %v1612_v14, %v1548_v23  ;;  %v1386_v17 = vadd.f32 %v2326_v16, %v2817_v33  ;;  %v3488_v62 = vmax.f32 %v3487_v47, 0.0  ;;  %v1490_v7 = vmax.f32 %v1130_v29, 0.0  ;;  %v1380_v36 = vpop.f32.mrb[51].mxu1  ;;  %v3493_v14 = vld [vmem:[#allocation12_spill] sm:$0xff]  ;;  %v1137_v42 = vpop.f32.mrb[53].mxu0 }
 0x18a   : > { %v1615_v59 = vadd.f32 %v1583_v0, %v3486_v39  ;;  %v2127_v43 = vpack.c.bf16 %v1646_v32, %v1646_v32  ;;  %v1133_v5 = vadd.f32 %v2263_v8, %v2817_v33  ;;  %v1488_v28 = vmax.f32 %v1122_v1, 0.0  ;;  %v2330_v6 = vpop.f32.mrb[52].mxu1  ;;  %v3497_v39 = vld [vmem:[#allocation13_spill] sm:$0xff] }
 0x18b   : > { %v1613_v24 = vadd.f32 %v1581_v13, %v3488_v62  ;;  %v2125_v58 = vpack.c.bf16 %v1644_v45, %v1644_v45  ;;  %v1554_v40 = vmax.f32 %v1386_v17, 0.0  ;;  %v3489_v25 = vmax.f32 %v2983_v30, 0.0  ;;  %v1393_v45 = vpop.f32.mrb[53].mxu1 }
 0x18c   : > { %v1647_v37 = vadd.f32 %v1615_v59, %v1551_v12  ;;  %1807 = vst.msk [vmem:[%s3155_s30 + $0x38] sm:$0xf] %vm1792_vm1, %v2127_v43  ;;  %v1491_v10 = vmax.f32 %v1133_v5, 0.0  ;;  %v1378_v41 = vadd.f32 %v2817_v33, %v1377_v55  ;;  %v3490_v9 = vmax.f32 %v2987_v56, 0.0  ;;  %v2331_v43 = vpop.f32.mrb[54].mxu1 }
 0x18d   : > { %v1645_v51 = vadd.f32 %v1613_v24, %v1549_v34  ;;  %v1586_v19 = vadd.f32 %v1490_v7, %v3489_v25  ;;  %1805 = vst.msk [vmem:[%s3155_s30 + $0x30] sm:$0xf] %vm1792_vm1, %v2125_v58  ;;  %v1125_v23 = vadd.f32 %v2817_v33, %v1124_v48  ;;  %v1389_v49 = vadd.f32 %v2327_v50, %v2817_v33  ;;  %v2267_v50 = vpop.f32.mrb[54].mxu0  ;;  %v1396_v48 = vpop.f32.mrb[55].mxu1  ;;  %v3499_v58 = vld [vmem:[#allocation15_spill] sm:$0xff] }
 0x18e   : > { %v2128_v44 = vpack.c.bf16 %v1647_v37, %v1647_v37  ;;  %v1584_v3 = vadd.f32 %v1488_v28, %v3490_v9  ;;  %v3491_v31 = vmax.f32 %v2991_v4, 0.0  ;;  %v3492_v30 = vmax.f32 %v2999_v54, 0.0  ;;  %v3495_v4 = vld [vmem:[#allocation14_spill] sm:$0xff]  ;;  %v1140_v5 = vpop.f32.mrb[55].mxu0 }
 0x18f   : > { %v2126_v11 = vpack.c.bf16 %v1645_v51, %v1645_v51  ;;  %v1552_v26 = vmax.f32 %v1378_v41, 0.0  ;;  %v3494_v12 = vmax.f32 %v3493_v14, 0.0  ;;  %v1489_v16 = vmax.f32 %v1125_v23, 0.0 }
 0x190   : > { %v1618_v63 = vadd.f32 %v1586_v19, %v3491_v31  ;;  %v1587_v0 = vadd.f32 %v1491_v10, %v3492_v30  ;;  %1808 = vst.msk [vmem:[%s3155_s30 + $0x3c] sm:$0xf] %vm1792_vm1, %v2128_v44  ;;  %v1555_v56 = vmax.f32 %v1389_v49, 0.0  ;;  %v1381_v32 = vadd.f32 %v2817_v33, %v1380_v36  ;;  %v3501_v19 = vld [vmem:[#allocation16_spill] sm:$0xff] }
 0x191   : > { %v1616_v18 = vadd.f32 %v1584_v3, %v3494_v12  ;;  %1806 = vst.msk [vmem:[%s3155_s30 + $0x34] sm:$0xf] %vm1792_vm1, %v2126_v11  ;;  %v3496_v34 = vmax.f32 %v3495_v4, 0.0  ;;  %v1146_v54 = vadd.f32 %v2266_v57, %v2817_v33  ;;  %v1402_v55 = vadd.f32 %v2330_v6, %v2817_v33  ;;  %v2270_v6 = vpop.f32.mrb[56].mxu0 }
 0x192   : > { %v1650_v13 = vadd.f32 %v1618_v63, %v1554_v40  ;;  %v3498_v59 = vmax.f32 %v3497_v39, 0.0  ;;  %v1553_v17 = vmax.f32 %v1381_v32, 0.0  ;;  %v1138_v8 = vadd.f32 %v2817_v33, %v1137_v42  ;;  %v3504_v63 = vld [vmem:[#allocation17_spill] sm:$0xff] }
 0x193   : > { %v1619_v29 = vadd.f32 %v1587_v0, %v3496_v34  ;;  %v1648_v20 = vadd.f32 %v1616_v18, %v1552_v26  ;;  %v1494_v24 = vmax.f32 %v1146_v54, 0.0  ;;  %v1558_v7 = vmax.f32 %v1402_v55, 0.0  ;;  %v1153_v55 = vpop.f32.mrb[57].mxu0 }
 0x194   : > { %v1585_v1 = vadd.f32 %v1489_v16, %v3498_v59  ;;  %v2131_v47 = vpack.c.bf16 %v1650_v13, %v1650_v13  ;;  %v3500_v37 = vmax.f32 %v3499_v58, 0.0  ;;  %v1492_v40 = vmax.f32 %v1138_v8, 0.0  ;;  %v2334_v13 = vpop.f32.mrb[56].mxu1 }
 0x195   : > { %v1651_v62 = vadd.f32 %v1619_v29, %v1555_v56  ;;  %v2129_v36 = vpack.c.bf16 %v1648_v20, %v1648_v20  ;;  %v1149_v51 = vadd.f32 %v2267_v50, %v2817_v33  ;;  %v3502_v10 = vmax.f32 %v3501_v19, 0.0  ;;  %v3511_v50 = vld [vmem:[#allocation19_spill] sm:$0xff] }
 0x196   : > { %v1617_v28 = vadd.f32 %v1585_v1, %v3500_v37  ;;  %1811 = vst.msk [vmem:[%s3155_s30 + $0x48] sm:$0xf] %vm1792_vm1, %v2131_v47  ;;  %v1394_v44 = vadd.f32 %v2817_v33, %v1393_v45  ;;  %v1141_v9 = vadd.f32 %v2817_v33, %v1140_v5  ;;  %v3503_v23 = vmax.f32 %v3037_v61, 0.0  ;;  %v1409_v45 = vpop.f32.mrb[57].mxu1 }
 0x197   : > { %v2132_v25 = vpack.c.bf16 %v1651_v62, %v1651_v62  ;;  %v1590_v41 = vadd.f32 %v1494_v24, %v3502_v10  ;;  %1809 = vst.msk [vmem:[%s3155_s30 + $0x40] sm:$0xf] %vm1792_vm1, %v2129_v36  ;;  %v1495_v11 = vmax.f32 %v1149_v51, 0.0  ;;  %v1405_v31 = vadd.f32 %v2331_v43, %v2817_v33  ;;  %v2335_v8 = vpop.f32.mrb[58].mxu1 }
 0x198   : > { %v1649_v3 = vadd.f32 %v1617_v28, %v1553_v17  ;;  %v1588_v49 = vadd.f32 %v1492_v40, %v3503_v23  ;;  %v3505_v30 = vmax.f32 %v3504_v63, 0.0  ;;  %v1556_v26 = vmax.f32 %v1394_v44, 0.0  ;;  %v2271_v17 = vpop.f32.mrb[58].mxu0  ;;  %v1412_v5 = vpop.f32.mrb[59].mxu1 }
 0x199   : > { %1812 = vst.msk [vmem:[%s3155_s30 + $0x4c] sm:$0xf] %vm1792_vm1, %v2132_v25  ;;  %v1493_v14 = vmax.f32 %v1141_v9, 0.0  ;;  %v1397_v12 = vadd.f32 %v2817_v33, %v1396_v48  ;;  %v3506_v16 = vmax.f32 %v3041_v53, 0.0  ;;  %v3507_v61 = vmax.f32 %v3045_v38, 0.0  ;;  %v3509_v53 = vld [vmem:[#allocation18_spill] sm:$0xff] }
 0x19a   : > { %v1622_v0 = vadd.f32 %v1590_v41, %v3505_v30  ;;  %v2130_v18 = vpack.c.bf16 %v1649_v3, %v1649_v3  ;;  %v1559_v57 = vmax.f32 %v1405_v31, 0.0  ;;  %v3508_v34 = vmax.f32 %v3055_v2, 0.0  ;;  %v3514_v41 = vld [vmem:[#allocation20_spill] sm:$0xff] }
 0x19b   : > { %v1591_v56 = vadd.f32 %v1495_v11, %v3506_v16  ;;  %v1620_v32 = vadd.f32 %v1588_v49, %v3507_v61  ;;  %v1557_v54 = vmax.f32 %v1397_v12, 0.0  ;;  %v1162_v42 = vadd.f32 %v2270_v6, %v2817_v33  ;;  %v3516_v11 = vld [vmem:[#allocation21_spill] sm:$0xff] }
 0x19c   : > { %v1654_v4 = vadd.f32 %v1622_v0, %v1558_v7  ;;  %v1589_v29 = vadd.f32 %v1493_v14, %v3508_v34  ;;  %1810 = vst.msk [vmem:[%s3155_s30 + $0x44] sm:$0xf] %vm1792_vm1, %v2130_v18  ;;  %v3510_v39 = vmax.f32 %v3509_v53, 0.0  ;;  %v1154_v59 = vadd.f32 %v2817_v33, %v1153_v55  ;;  %v1156_v7 = vpop.f32.mrb[59].mxu0  ;;  %v3520_v14 = vld [vmem:[#allocation22_spill] sm:$0xff] }
 0x19d   : > { %v1652_v20 = vadd.f32 %v1620_v32, %v1556_v26  ;;  %v1418_v1 = vadd.f32 %v2334_v13, %v2817_v33  ;;  %v3512_v43 = vmax.f32 %v3511_v50, 0.0  ;;  %v1498_v62 = vmax.f32 %v1162_v42, 0.0  ;;  %v2274_v32 = vpop.f32.mrb[60].mxu0  ;;  %v3522_v13 = vld [vmem:[#allocation25_spill] sm:$0xff] }
 0x19e   : > { %v1623_v38 = vadd.f32 %v1591_v56, %v3510_v39  ;;  %v2135_v2 = vpack.c.bf16 %v1654_v4, %v1654_v4  ;;  %v1165_v24 = vadd.f32 %v2271_v17, %v2817_v33  ;;  %v1496_v58 = vmax.f32 %v1154_v59, 0.0 }
 0x19f   : > { %v1621_v47 = vadd.f32 %v1589_v29, %v3512_v43  ;;  %v2133_v48 = vpack.c.bf16 %v1652_v20, %v1652_v20  ;;  %v1562_v37 = vmax.f32 %v1418_v1, 0.0  ;;  %v3513_v40 = vmax.f32 %v3062_v35, 0.0  ;;  %v3518_v35 = vld [vmem:[#allocation23_spill] sm:$0xff]  ;;  %v3524_v20 = vld [vmem:[#allocation24_spill] sm:$0xff] }
 0x1a0   : > { %v1655_v36 = vadd.f32 %v1623_v38, %v1559_v57  ;;  %1815 = vst.msk [vmem:[%s3155_s30 + $0x58] sm:$0xf] %vm1792_vm1, %v2135_v2  ;;  %v1499_v25 = vmax.f32 %v1165_v24, 0.0  ;;  %v1410_v19 = vadd.f32 %v2817_v33, %v1409_v45  ;;  %v3515_v44 = vmax.f32 %v3514_v41, 0.0  ;;  %v2338_v57 = vpop.f32.mrb[60].mxu1 }
 0x1a1   : > { %v1653_v28 = vadd.f32 %v1621_v47, %v1557_v54  ;;  %v1594_v51 = vadd.f32 %v1498_v62, %v3513_v40  ;;  %1813 = vst.msk [vmem:[%s3155_s30 + $0x50] sm:$0xf] %vm1792_vm1, %v2133_v48  ;;  %v1157_v3 = vadd.f32 %v2817_v33, %v1156_v7  ;;  %v1421_v23 = vadd.f32 %v2335_v8, %v2817_v33  ;;  %v1169_v54 = vpop.f32.mrb[61].mxu0  ;;  %v1425_v55 = vpop.f32.mrb[61].mxu1  ;;  %v3526_v7 = vld [vmem:[#allocation26_spill] sm:$0xff] }
 0x1a2   : > { %v2136_v10 = vpack.c.bf16 %v1655_v36, %v1655_v36  ;;  %v1592_v9 = vadd.f32 %v1496_v58, %v3515_v44  ;;  %v3517_v31 = vmax.f32 %v3516_v11, 0.0  ;;  %v3519_v30 = vmax.f32 %v3518_v35, 0.0  ;;  %v2275_v1 = vpop.f32.mrb[62].mxu0  ;;  %v2339_v17 = vpop.f32.mrb[62].mxu1 }
 0x1a3   : > { %v2134_v49 = vpack.c.bf16 %v1653_v28, %v1653_v28  ;;  %v1560_v26 = vmax.f32 %v1410_v19, 0.0  ;;  %v3521_v12 = vmax.f32 %v3520_v14, 0.0  ;;  %v1497_v16 = vmax.f32 %v1157_v3, 0.0  ;;  %v1172_v47 = vpop.f32.mrb[63].mxu0  ;;  %v1428_v62 = vpop.f32.mrb[63].mxu1  ;;  %v3528_v28 = vld [vmem:[#allocation27_spill] sm:$0xff] }
 0x1a4   : > { %v1626_v63 = vadd.f32 %v1594_v51, %v3517_v31  ;;  %v1595_v0 = vadd.f32 %v1499_v25, %v3519_v30  ;;  %1816 = vst.msk [vmem:[%s3155_s30 + $0x5c] sm:$0xf] %vm1792_vm1, %v2136_v10  ;;  %v1563_v56 = vmax.f32 %v1421_v23, 0.0  ;;  %v1413_v61 = vadd.f32 %v2817_v33, %v1412_v5  ;;  %v3531_v23 = vld [vmem:[#allocation28_spill] sm:$0xff]  ;;  %v3533_v30 = vld [vmem:[#allocation29_spill] sm:$0xff] }
 0x1a5   : > { %v1624_v18 = vadd.f32 %v1592_v9, %v3521_v12  ;;  %1814 = vst.msk [vmem:[%s3155_s30 + $0x54] sm:$0xf] %vm1792_vm1, %v2134_v49  ;;  %v3523_v4 = vmax.f32 %v3522_v13, 0.0  ;;  %v1178_v29 = vadd.f32 %v2274_v32, %v2817_v33  ;;  %v1434_v42 = vadd.f32 %v2338_v57, %v2817_v33 }
 0x1a6   : > { %v1658_v6 = vadd.f32 %v1626_v63, %v1562_v37  ;;  %v3525_v53 = vmax.f32 %v3524_v20, 0.0  ;;  %v1561_v38 = vmax.f32 %v1413_v61, 0.0  ;;  %v1170_v59 = vadd.f32 %v2817_v33, %v1169_v54 }
 0x1a7   : > { %v1627_v34 = vadd.f32 %v1595_v0, %v3523_v4  ;;  %v1656_v45 = vadd.f32 %v1624_v18, %v1560_v26  ;;  %v1502_v50 = vmax.f32 %v1178_v29, 0.0  ;;  %v1566_v43 = vmax.f32 %v1434_v42, 0.0 }
 0x1a8   : > { %v1593_v39 = vadd.f32 %v1497_v16, %v3525_v53  ;;  %v2139_v8 = vpack.c.bf16 %v1658_v6, %v1658_v6  ;;  %v3527_v5 = vmax.f32 %v3526_v7, 0.0  ;;  %v1500_v36 = vmax.f32 %v1170_v59, 0.0 }
 0x1a9   : > { %v1659_v2 = vadd.f32 %v1627_v34, %v1563_v56  ;;  %v2137_v24 = vpack.c.bf16 %v1656_v45, %v1656_v45  ;;  %v1181_v58 = vadd.f32 %v2275_v1, %v2817_v33  ;;  %v3529_v40 = vmax.f32 %v3528_v28, 0.0 }
 0x1aa   : > { %v1625_v48 = vadd.f32 %v1593_v39, %v3527_v5  ;;  %1819 = vst.msk [vmem:[%s3155_s30 + $0x68] sm:$0xf] %vm1792_vm1, %v2139_v8  ;;  %v1426_v25 = vadd.f32 %v2817_v33, %v1425_v55  ;;  %v1173_v19 = vadd.f32 %v2817_v33, %v1172_v47  ;;  %v3530_v41 = vmax.f32 %v3106_v27, 0.0 }
 0x1ab   : > { %v2140_v37 = vpack.c.bf16 %v1659_v2, %v1659_v2  ;;  %v1598_v51 = vadd.f32 %v1502_v50, %v3529_v40  ;;  %1817 = vst.msk [vmem:[%s3155_s30 + $0x60] sm:$0xf] %vm1792_vm1, %v2137_v24  ;;  %v1503_v9 = vmax.f32 %v1181_v58, 0.0  ;;  %v1437_v3 = vadd.f32 %v2339_v17, %v2817_v33 }
 0x1ac   : > { %v1657_v10 = vadd.f32 %v1625_v48, %v1561_v38  ;;  %v1596_v44 = vadd.f32 %v1500_v36, %v3530_v41  ;;  %v3532_v49 = vmax.f32 %v3531_v23, 0.0  ;;  %v1564_v31 = vmax.f32 %v1426_v25, 0.0 }
 0x1ad   : > { %1820 = vst.msk [vmem:[%s3155_s30 + $0x6c] sm:$0xf] %vm1792_vm1, %v2140_v37  ;;  %v1501_v63 = vmax.f32 %v1173_v19, 0.0  ;;  %v1429_v35 = vadd.f32 %v2817_v33, %v1428_v62  ;;  %v1535_v0 = vmax.f32 %v3533_v30, 0.0  ;;  %v1599_v27 = vadd.f32 %v1503_v9, %v1471_v46 }
 0x1ae   : > { %v1630_v11 = vadd.f32 %v1598_v51, %v3532_v49  ;;  %v2138_v26 = vpack.c.bf16 %v1657_v10, %v1657_v10  ;;  %v3534_v14 = vmax.f32 %v3109_v21, 0.0  ;;  %v1533_v18 = vmax.f32 %v3137_v15, 0.0 }
 0x1af   : > { %v1597_v56 = vadd.f32 %v1501_v63, %v1469_v22  ;;  %v1567_v61 = vmax.f32 %v1437_v3, 0.0  ;;  %v1631_v32 = vadd.f32 %v1599_v27, %v1535_v0  ;;  %v1565_v60 = vmax.f32 %v1429_v35, 0.0 }
 0x1b0   : > { %v1628_v12 = vadd.f32 %v1596_v44, %v3534_v14  ;;  %v1662_v16 = vadd.f32 %v1630_v11, %v1566_v43  ;;  %1818 = vst.msk [vmem:[%s3155_s30 + $0x64] sm:$0xf] %vm1792_vm1, %v2138_v26 }
 0x1b1   : > { %v1629_v46 = vadd.f32 %v1597_v56, %v1533_v18  ;;  %v1663_v21 = vadd.f32 %v1631_v32, %v1567_v61 }
 0x1b2   : > { %v1660_v33 = vadd.f32 %v1628_v12, %v1564_v31  ;;  %v2143_v57 = vpack.c.bf16 %v1662_v16, %v1662_v16 }
 0x1b3   : > { %v1661_v13 = vadd.f32 %v1629_v46, %v1565_v60  ;;  %v2144_v15 = vpack.c.bf16 %v1663_v21, %v1663_v21 }
 0x1b4   : > { %v2141_v6 = vpack.c.bf16 %v1660_v33, %v1660_v33  ;;  %1823 = vst.msk [vmem:[%s3155_s30 + $0x78] sm:$0xf] %vm1792_vm1, %v2143_v57 }
 0x1b5   : > { %v2142_v52 = vpack.c.bf16 %v1661_v13, %v1661_v13  ;;  %1824 = vst.msk [vmem:[%s3155_s30 + $0x7c] sm:$0xf] %vm1792_vm1, %v2144_v15 }
 0x1b6   : > { %1821 = vst.msk [vmem:[%s3155_s30 + $0x70] sm:$0xf] %vm1792_vm1, %v2141_v6 }
 0x1b7   : > { %1822 = vst.msk [vmem:[%s3155_s30 + $0x74] sm:$0xf] %vm1792_vm1, %v2142_v52 }
 0x1b8 PF: > { %s15_s14 = sadd.s32 1, %s2540_s14   ;;  %s3535_s12 = smov %s2536_s13 }
 0x1b9   : > { %p12_p6 = scmp.ge.s32.totalorder %s15_s14, 4   ;;  %s3536_s13 = smov %s3538_s16 }
 0x1bb   :  { %14 = sbr.rel (!%p12_p6) target bundleno = 3 (0x3), region = 71 }
 0x1c2   :  { %1855 = vsyncpa [#allocation3], 1 }
 0x1c3   :  { %1857 = vsyncpa [#allocation3 + $0x1], 1 }
 0x1c4   :  { %1858 = vsyncpa [#allocation5], 1 }

// kernel: lora_cnn_forward.5
= control target key start
LH: loop header
LB: loop body
LE: loop exit
PB: predicated region body
PF: predicated region fallthrough
CT: control target
= control target key end

     0   :  { %s1916_s12 = smov 0   ;;  %s1918_s13 = smov 0   ;;  %s2246_s0 = inlined_call_operand.vmem [shape: bf16[2,4,64,512], index: 0, kind: input, shape index: {}]   ;;  %s2247_s1 = inlined_call_operand.vmem [shape: bf16[512,64], index: 1, kind: input, shape index: {}]   ;;  %s2248_s2 = inlined_call_operand.vmem [shape: f32[1,64], index: 2, kind: input, shape index: {}]   ;;  %s2249_s3 = inlined_call_operand.vmem [shape: bf16[2,64,64], index: 3, kind: output, shape index: {}]  }
   0x1   :  { %s1920_s14 = smov 0  }
   0x2 LB: > { %s25_s15 = sadd.s32 1, %s1890_s13  ;;  %p1374_p0 = scmp.ge.s32.totalorder %s1894_s14, 1  ;;  %s1894_s14 = sphi %s1920_s14, %s13_s14   ;;  %s1890_s13 = sphi %s1918_s13, %s2251_s13   ;;  %s1886_s12 = sphi %s1916_s12, %s2250_s12  }
   0x3   : > { %p27_p1 = scmp.ge.s32.totalorder %s25_s15, 2  ;;  %p159_p2 = scmp.lt.s32.totalorder %s1894_s14, 3 }
   0x5   : > { %s2253_s15 = smov (%p27_p1, %s25_s15), 0  ;;  %p160_p3 = pnand %p1374_p0, %p159_p2 }
   0x6   : > { %v1744_v0 = vld [vmem:[%s2247_s1 + $0x40] sm:$0xff] (!%p160_p3)   ;;  %v1748_v4 = vld [vmem:[%s2247_s1 + $0x48] sm:$0xff] (!%p160_p3)   ;;  %v1752_v8 = vld [vmem:[%s2247_s1 + $0x50] sm:$0xff] (!%p160_p3)   ;;  %p193_p4 = scmp.lt.s32.totalorder (!%p160_p3), %s1886_s12, 1  ;;  %vm1271_vm0 = vcmask (!%p160_p3), 519168  }
   0x7   : > { %163 = sbr.rel (%p160_p3) target bundleno = 388 (0x184), region = 32  ;;  %v1745_v1 = vld [vmem:[%s2247_s1 + $0xc0] sm:$0xff] (!%p160_p3)   ;;  %1496 = vmatprep.subr.bf16.mxu0 (!%p160_p3), %v1744_v0  ;;  %v1749_v5 = vld [vmem:[%s2247_s1 + $0xc8] sm:$0xff] (!%p160_p3)   ;;  %v1753_v9 = vld [vmem:[%s2247_s1 + $0xd0] sm:$0xff] (!%p160_p3)  }
   0x8   : > { %v1746_v2 = vld [vmem:[%s2247_s1] sm:$0xff] (!%p160_p3)   ;;  %1608 = vmatprep.subr.bf16.mxu1 (!%p160_p3), %v1745_v1  ;;  %v1750_v6 = vld [vmem:[%s2247_s1 + $0x8] sm:$0xff] (!%p160_p3)   ;;  %v1754_v10 = vld [vmem:[%s2247_s1 + $0x10] sm:$0xff] (!%p160_p3)  }
   0x9   : > { %v1747_v3 = vld [vmem:[%s2247_s1 + $0x80] sm:$0xff] (!%p160_p3)   ;;  %1497 = vmatpush3.bf16.msra.mxu0 (!%p160_p3), %v1746_v2  ;;  %v1751_v7 = vld [vmem:[%s2247_s1 + $0x88] sm:$0xff] (!%p160_p3)   ;;  %v1755_v11 = vld [vmem:[%s2247_s1 + $0x90] sm:$0xff] (!%p160_p3)  }
   0xa   : > { %1609 = vmatpush3.bf16.msra.mxu1 (!%p160_p3), %v1747_v3  ;;  %1498 = vmatprep.subr.bf16.mxu0 (!%p160_p3), %v1748_v4  ;;  %v1756_v12 = vld [vmem:[%s2247_s1 + $0x58] sm:$0xff] (!%p160_p3)   ;;  %v1760_v16 = vld [vmem:[%s2247_s1 + $0x60] sm:$0xff] (!%p160_p3)   ;;  %v1764_v20 = vld [vmem:[%s2247_s1 + $0x68] sm:$0xff] (!%p160_p3)  }
   0xb   : > { %1610 = vmatprep.subr.bf16.mxu1 (!%p160_p3), %v1749_v5  ;;  %v1757_v13 = vld [vmem:[%s2247_s1 + $0xd8] sm:$0xff] (!%p160_p3)   ;;  %v1761_v17 = vld [vmem:[%s2247_s1 + $0xe0] sm:$0xff] (!%p160_p3)   ;;  %v1765_v21 = vld [vmem:[%s2247_s1 + $0xe8] sm:$0xff] (!%p160_p3)  }
   0xc   : > { %v1758_v14 = vld [vmem:[%s2247_s1 + $0x18] sm:$0xff] (!%p160_p3)   ;;  %v1762_v18 = vld [vmem:[%s2247_s1 + $0x20] sm:$0xff] (!%p160_p3)   ;;  %v1766_v22 = vld [vmem:[%s2247_s1 + $0x28] sm:$0xff] (!%p160_p3)  }
   0xd   : > { %1499 = vmatpush3.bf16.msra.mxu0 (!%p160_p3), %v1750_v6  ;;  %v1759_v15 = vld [vmem:[%s2247_s1 + $0x98] sm:$0xff] (!%p160_p3)   ;;  %v1763_v19 = vld [vmem:[%s2247_s1 + $0xa0] sm:$0xff] (!%p160_p3)   ;;  %v1767_v23 = vld [vmem:[%s2247_s1 + $0xa8] sm:$0xff] (!%p160_p3)  }
   0xe   : > { %1611 = vmatpush3.bf16.msra.mxu1 %v1751_v7  ;;  %1500 = vmatprep.subr.bf16.mxu0 %v1752_v8  ;;  %s2255_s12 = smov (!%p193_p4, %s1886_s12), 1  ;;  %v1768_v24 = vld [vmem:[%s2247_s1 + $0x70] sm:$0xff]   ;;  %v1772_v28 = vld [vmem:[%s2247_s1 + $0x78] sm:$0xff]  }
   0xf   : > { %1612 = vmatprep.subr.bf16.mxu1 %v1753_v9  ;;  %v1769_v25 = vld [vmem:[%s2247_s1 + $0xf0] sm:$0xff]   ;;  %s1486_s24 = sshll.u32 %s2255_s12, 9  ;;  %v1773_v29 = vld [vmem:[%s2247_s1 + $0xf8] sm:$0xff]   ;;  %s1487_s17 = sshll.u32 %s2255_s12, 5 }
  0x10   : > { %v1770_v26 = vld [vmem:[%s2247_s1 + $0x30] sm:$0xff]   ;;  %s2034_s6 = scalar_lea.vmem %s2246_s0, %s1486_s24  ;;  %v1774_v30 = vld [vmem:[%s2247_s1 + $0x38] sm:$0xff]   ;;  %s2206_s20 = scalar_lea.vmem %s2249_s3, %s1487_s17 }
  0x11   : > { %1501 = vmatpush3.bf16.msra.mxu0 %v1754_v10  ;;  %v1771_v27 = vld [vmem:[%s2247_s1 + $0xb0] sm:$0xff]   ;;  %v1775_v31 = vld [vmem:[%s2247_s1 + $0xb8] sm:$0xff]  }
  0x12   : > { %1613 = vmatpush3.bf16.msra.mxu1 %v1755_v11  ;;  %1502 = vmatprep.subr.bf16.mxu0 %v1756_v12  ;;  %v1776_v32 = vld [vmem:[%s2034_s6] ss:$16 sps:$4 sm:$0xff]   ;;  %v1778_v33 = vld [vmem:[%s2034_s6 + $0x4] ss:$16 sps:$4 sm:$0xff]   ;;  %v1779_v34 = vld [vmem:[%s2034_s6 + $0x8] ss:$16 sps:$4 sm:$0xff]  }
  0x13   : > { %1614 = vmatprep.subr.bf16.mxu1 %v1757_v13  ;;  %v1781_v35 = vld [vmem:[%s2034_s6 + $0xc] ss:$16 sps:$4 sm:$0xff]   ;;  %893 = vmatprep.mubr.bf16.mxu0 %v1778_v33  ;;  %v1782_v36 = vld [vmem:[%s2034_s6 + $0x24] ss:$16 sps:$4 sm:$0xff]   ;;  %v1786_v38 = vld [vmem:[%s2034_s6 + $0x20] ss:$16 sps:$4 sm:$0xff]  }
  0x14   : > { %1054 = vmatprep.mubr.bf16.mxu1 %v1781_v35  ;;  %v1784_v37 = vld [vmem:[%s2034_s6 + $0x2c] ss:$16 sps:$4 sm:$0xff]   ;;  %v1787_v39 = vld [vmem:[%s2034_s6 + $0x28] ss:$16 sps:$4 sm:$0xff]   ;;  %v1788_v40 = vld [vmem:[%s2034_s6 + $0x44] ss:$16 sps:$4 sm:$0xff]  }
  0x15   : > { %1503 = vmatpush3.bf16.msra.mxu0 %v1758_v14  ;;  %v1790_v41 = vld [vmem:[%s2034_s6 + $0x4c] ss:$16 sps:$4 sm:$0xff]   ;;  %v1792_v42 = vld [vmem:[%s2034_s6 + $0x40] ss:$16 sps:$4 sm:$0xff]   ;;  %v1793_v43 = vld [vmem:[%s2034_s6 + $0x48] ss:$16 sps:$4 sm:$0xff]  }
  0x16   : > { %1615 = vmatpush3.bf16.msra.mxu1 %v1759_v15  ;;  %1504 = vmatprep.subr.bf16.mxu0 %v1760_v16  ;;  %v1794_v44 = vld [vmem:[%s2034_s6 + $0x64] ss:$16 sps:$4 sm:$0xff]   ;;  %v1796_v45 = vld [vmem:[%s2034_s6 + $0x6c] ss:$16 sps:$4 sm:$0xff]   ;;  %v1798_v46 = vld [vmem:[%s2034_s6 + $0x60] ss:$16 sps:$4 sm:$0xff]  }
  0x17   : > { %1616 = vmatprep.subr.bf16.mxu1 %v1761_v17  ;;  %v1799_v47 = vld [vmem:[%s2034_s6 + $0x68] ss:$16 sps:$4 sm:$0xff]   ;;  %v1800_v48 = vld [vmem:[%s2034_s6 + $0x84] ss:$16 sps:$4 sm:$0xff]   ;;  %v1802_v49 = vld [vmem:[%s2034_s6 + $0x8c] ss:$16 sps:$4 sm:$0xff]  }
  0x18   : > { %v1804_v50 = vld [vmem:[%s2034_s6 + $0x80] ss:$16 sps:$4 sm:$0xff]   ;;  %v1805_v51 = vld [vmem:[%s2034_s6 + $0x88] ss:$16 sps:$4 sm:$0xff]   ;;  %v1806_v52 = vld [vmem:[%s2034_s6 + $0xa4] ss:$16 sps:$4 sm:$0xff]  }
  0x19   : > { %1505 = vmatpush3.bf16.msra.mxu0 %v1762_v18  ;;  %v1808_v53 = vld [vmem:[%s2034_s6 + $0xac] ss:$16 sps:$4 sm:$0xff]   ;;  %v1810_v54 = vld [vmem:[%s2034_s6 + $0xa0] ss:$16 sps:$4 sm:$0xff]   ;;  %v1811_v55 = vld [vmem:[%s2034_s6 + $0xa8] ss:$16 sps:$4 sm:$0xff]  }
  0x1a   : > { %1617 = vmatpush3.bf16.msra.mxu1 %v1763_v19  ;;  %1506 = vmatprep.subr.bf16.mxu0 %v1764_v20  ;;  %v1812_v56 = vld [vmem:[%s2034_s6 + $0xc4] ss:$16 sps:$4 sm:$0xff]   ;;  %v1814_v57 = vld [vmem:[%s2034_s6 + $0xcc] ss:$16 sps:$4 sm:$0xff]   ;;  %v1816_v58 = vld [vmem:[%s2034_s6 + $0xc0] ss:$16 sps:$4 sm:$0xff]  }
  0x1b   : > { %1618 = vmatprep.subr.bf16.mxu1 %v1765_v21  ;;  %v1817_v59 = vld [vmem:[%s2034_s6 + $0xc8] ss:$16 sps:$4 sm:$0xff]   ;;  %v1818_v60 = vld [vmem:[%s2034_s6 + $0xe4] ss:$16 sps:$4 sm:$0xff]   ;;  %v1820_v61 = vld [vmem:[%s2034_s6 + $0xec] ss:$16 sps:$4 sm:$0xff]  }
  0x1c   : > { %v1822_v62 = vld [vmem:[%s2034_s6 + $0xe0] ss:$16 sps:$4 sm:$0xff]   ;;  %v1823_v63 = vld [vmem:[%s2034_s6 + $0xe8] ss:$16 sps:$4 sm:$0xff]   ;;  %v1824_v0 = vld [vmem:[%s2034_s6 + $0x104] ss:$16 sps:$4 sm:$0xff]  }
  0x1d   : > { %1507 = vmatpush3.bf16.msra.mxu0 %v1766_v22  ;;  %v1826_v1 = vld [vmem:[%s2034_s6 + $0x10c] ss:$16 sps:$4 sm:$0xff]   ;;  %v1828_v2 = vld [vmem:[%s2034_s6 + $0x100] ss:$16 sps:$4 sm:$0xff]   ;;  %v1829_v3 = vld [vmem:[%s2034_s6 + $0x108] ss:$16 sps:$4 sm:$0xff]  }
  0x1e   : > { %1619 = vmatpush3.bf16.msra.mxu1 %v1767_v23  ;;  %1508 = vmatprep.subr.bf16.mxu0 %v1768_v24  ;;  %v1830_v4 = vld [vmem:[%s2034_s6 + $0x124] ss:$16 sps:$4 sm:$0xff]   ;;  %v1832_v5 = vld [vmem:[%s2034_s6 + $0x12c] ss:$16 sps:$4 sm:$0xff]   ;;  %v1834_v6 = vld [vmem:[%s2034_s6 + $0x120] ss:$16 sps:$4 sm:$0xff]  }
  0x1f   : > { %1620 = vmatprep.subr.bf16.mxu1 %v1769_v25  ;;  %v1835_v7 = vld [vmem:[%s2034_s6 + $0x128] ss:$16 sps:$4 sm:$0xff]   ;;  %v1836_v8 = vld [vmem:[%s2034_s6 + $0x144] ss:$16 sps:$4 sm:$0xff]   ;;  %v1838_v9 = vld [vmem:[%s2034_s6 + $0x14c] ss:$16 sps:$4 sm:$0xff]  }
  0x20   : > { %v1840_v10 = vld [vmem:[%s2034_s6 + $0x140] ss:$16 sps:$4 sm:$0xff]   ;;  %v1841_v11 = vld [vmem:[%s2034_s6 + $0x148] ss:$16 sps:$4 sm:$0xff]   ;;  %v1842_v12 = vld [vmem:[%s2034_s6 + $0x164] ss:$16 sps:$4 sm:$0xff]  }
  0x21   : > { %1509 = vmatpush3.bf16.msra.mxu0 %v1770_v26  ;;  %v1844_v13 = vld [vmem:[%s2034_s6 + $0x16c] ss:$16 sps:$4 sm:$0xff]   ;;  %v1846_v14 = vld [vmem:[%s2034_s6 + $0x160] ss:$16 sps:$4 sm:$0xff]   ;;  %v1847_v15 = vld [vmem:[%s2034_s6 + $0x168] ss:$16 sps:$4 sm:$0xff]  }
  0x22   : > { %1621 = vmatpush3.bf16.msra.mxu1 %v1771_v27  ;;  %1510 = vmatprep.subr.bf16.mxu0 %v1772_v28  ;;  %v1848_v16 = vld [vmem:[%s2034_s6 + $0x184] ss:$16 sps:$4 sm:$0xff]   ;;  %v1850_v17 = vld [vmem:[%s2034_s6 + $0x18c] ss:$16 sps:$4 sm:$0xff]   ;;  %v1852_v18 = vld [vmem:[%s2034_s6 + $0x180] ss:$16 sps:$4 sm:$0xff]  }
  0x23   : > { %1622 = vmatprep.subr.bf16.mxu1 %v1773_v29  ;;  %v1853_v19 = vld [vmem:[%s2034_s6 + $0x188] ss:$16 sps:$4 sm:$0xff]   ;;  %v1854_v20 = vld [vmem:[%s2034_s6 + $0x1a4] ss:$16 sps:$4 sm:$0xff]   ;;  %v1856_v21 = vld [vmem:[%s2034_s6 + $0x1ac] ss:$16 sps:$4 sm:$0xff]  }
  0x24   : > { %v1858_v22 = vld [vmem:[%s2034_s6 + $0x1a0] ss:$16 sps:$4 sm:$0xff]   ;;  %v1859_v23 = vld [vmem:[%s2034_s6 + $0x1a8] ss:$16 sps:$4 sm:$0xff]   ;;  %v1860_v24 = vld [vmem:[%s2034_s6 + $0x1c4] ss:$16 sps:$4 sm:$0xff]  }
  0x25   : > { %1511 = vmatpush3.bf16.msra.mxu0 %v1774_v30  ;;  %v1862_v25 = vld [vmem:[%s2034_s6 + $0x1cc] ss:$16 sps:$4 sm:$0xff]   ;;  %v1864_v26 = vld [vmem:[%s2034_s6 + $0x1c0] ss:$16 sps:$4 sm:$0xff]   ;;  %v1865_v27 = vld [vmem:[%s2034_s6 + $0x1c8] ss:$16 sps:$4 sm:$0xff]  }
  0x26   : > { %1623 = vmatpush3.bf16.msra.mxu1 %v1775_v31  ;;  %v1866_v28 = vld [vmem:[%s2034_s6 + $0x1e4] ss:$16 sps:$4 sm:$0xff]   ;;  %v1868_v29 = vld [vmem:[%s2034_s6 + $0x1ec] ss:$16 sps:$4 sm:$0xff]   ;;  %v1870_v30 = vld [vmem:[%s2034_s6 + $0x1e0] ss:$16 sps:$4 sm:$0xff]  }
  0x27   : > { %v1871_v31 = vld [vmem:[%s2034_s6 + $0x1e8] ss:$16 sps:$4 sm:$0xff]  }
  0x28   : > { %894 = vmatmul.mubr.bf16.vlgmr.msra.gmra.mrb[0].mxu0 %v1776_v32 }
  0x29   : > { %1055 = vmatmul.mubr.bf16.vlgmr.msra.gmra.mrb[0].mxu1 %v1779_v34  ;;  %901 = vmatprep.mubr.bf16.mxu0 %v1782_v36  ;;  %v2109_v34 = vld [vmem:[%s2248_s2] ss:$0 sm:$0xff] }
  0x2a   : > { %1062 = vmatprep.mubr.bf16.mxu1 %v1784_v37 }
  0x30   : > { %902 = vmatmul.mubr.bf16.gmra.mrb[4].mxu0 %v1786_v38 }
  0x31   : > { %1063 = vmatmul.mubr.bf16.gmra.mrb[4].mxu1 %v1787_v39  ;;  %909 = vmatprep.mubr.bf16.mxu0 %v1788_v40 }
  0x32   : > { %1070 = vmatprep.mubr.bf16.mxu1 %v1790_v41 }
  0x38   : > { %910 = vmatmul.mubr.bf16.gmra.mrb[8].mxu0 %v1792_v42 }
  0x39   : > { %1071 = vmatmul.mubr.bf16.gmra.mrb[8].mxu1 %v1793_v43  ;;  %917 = vmatprep.mubr.bf16.mxu0 %v1794_v44 }
  0x3a   : > { %1078 = vmatprep.mubr.bf16.mxu1 %v1796_v45 }
  0x40   : > { %918 = vmatmul.mubr.bf16.gmra.mrb[12].mxu0 %v1798_v46 }
  0x41   : > { %1079 = vmatmul.mubr.bf16.gmra.mrb[12].mxu1 %v1799_v47  ;;  %925 = vmatprep.mubr.bf16.mxu0 %v1800_v48 }
  0x42   : > { %1086 = vmatprep.mubr.bf16.mxu1 %v1802_v49 }
  0x48   : > { %926 = vmatmul.mubr.bf16.gmra.mrb[16].mxu0 %v1804_v50 }
  0x49   : > { %1087 = vmatmul.mubr.bf16.gmra.mrb[16].mxu1 %v1805_v51  ;;  %933 = vmatprep.mubr.bf16.mxu0 %v1806_v52 }
  0x4a   : > { %1094 = vmatprep.mubr.bf16.mxu1 %v1808_v53 }
  0x50   : > { %934 = vmatmul.mubr.bf16.gmra.mrb[20].mxu0 %v1810_v54 }
  0x51   : > { %1095 = vmatmul.mubr.bf16.gmra.mrb[20].mxu1 %v1811_v55  ;;  %941 = vmatprep.mubr.bf16.mxu0 %v1812_v56 }
  0x52   : > { %1102 = vmatprep.mubr.bf16.mxu1 %v1814_v57 }
  0x58   : > { %942 = vmatmul.mubr.bf16.gmra.mrb[24].mxu0 %v1816_v58 }
  0x59   : > { %1103 = vmatmul.mubr.bf16.gmra.mrb[24].mxu1 %v1817_v59  ;;  %949 = vmatprep.mubr.bf16.mxu0 %v1818_v60 }
  0x5a   : > { %1110 = vmatprep.mubr.bf16.mxu1 %v1820_v61 }
  0x60   : > { %950 = vmatmul.mubr.bf16.gmra.mrb[28].mxu0 %v1822_v62 }
  0x61   : > { %1111 = vmatmul.mubr.bf16.gmra.mrb[28].mxu1 %v1823_v63  ;;  %957 = vmatprep.mubr.bf16.mxu0 %v1824_v0 }
  0x62   : > { %1118 = vmatprep.mubr.bf16.mxu1 %v1826_v1 }
  0x68   : > { %958 = vmatmul.mubr.bf16.gmra.mrb[32].mxu0 %v1828_v2 }
  0x69   : > { %1119 = vmatmul.mubr.bf16.gmra.mrb[32].mxu1 %v1829_v3  ;;  %965 = vmatprep.mubr.bf16.mxu0 %v1830_v4 }
  0x6a   : > { %1126 = vmatprep.mubr.bf16.mxu1 %v1832_v5 }
  0x70   : > { %966 = vmatmul.mubr.bf16.gmra.mrb[36].mxu0 %v1834_v6 }
  0x71   : > { %1127 = vmatmul.mubr.bf16.gmra.mrb[36].mxu1 %v1835_v7  ;;  %973 = vmatprep.mubr.bf16.mxu0 %v1836_v8 }
  0x72   : > { %1134 = vmatprep.mubr.bf16.mxu1 %v1838_v9 }
  0x78   : > { %974 = vmatmul.mubr.bf16.gmra.mrb[40].mxu0 %v1840_v10 }
  0x79   : > { %1135 = vmatmul.mubr.bf16.gmra.mrb[40].mxu1 %v1841_v11  ;;  %981 = vmatprep.mubr.bf16.mxu0 %v1842_v12 }
  0x7a   : > { %1142 = vmatprep.mubr.bf16.mxu1 %v1844_v13 }
  0x80   : > { %982 = vmatmul.mubr.bf16.gmra.mrb[44].mxu0 %v1846_v14 }
  0x81   : > { %1143 = vmatmul.mubr.bf16.gmra.mrb[44].mxu1 %v1847_v15  ;;  %989 = vmatprep.mubr.bf16.mxu0 %v1848_v16 }
  0x82   : > { %1150 = vmatprep.mubr.bf16.mxu1 %v1850_v17 }
  0x88   : > { %990 = vmatmul.mubr.bf16.gmra.mrb[48].mxu0 %v1852_v18 }
  0x89   : > { %1151 = vmatmul.mubr.bf16.gmra.mrb[48].mxu1 %v1853_v19  ;;  %997 = vmatprep.mubr.bf16.mxu0 %v1854_v20 }
  0x8a   : > { %1158 = vmatprep.mubr.bf16.mxu1 %v1856_v21 }
  0x90   : > { %998 = vmatmul.mubr.bf16.gmra.mrb[52].mxu0 %v1858_v22 }
  0x91   : > { %1159 = vmatmul.mubr.bf16.gmra.mrb[52].mxu1 %v1859_v23  ;;  %1005 = vmatprep.mubr.bf16.mxu0 %v1860_v24 }
  0x92   : > { %1166 = vmatprep.mubr.bf16.mxu1 %v1862_v25 }
  0x98   : > { %1006 = vmatmul.mubr.bf16.gmra.mrb[56].mxu0 %v1864_v26 }
  0x99   : > { %1167 = vmatmul.mubr.bf16.gmra.mrb[56].mxu1 %v1865_v27  ;;  %1013 = vmatprep.mubr.bf16.mxu0 %v1866_v28 }
  0x9a   : > { %1174 = vmatprep.mubr.bf16.mxu1 %v1868_v29 }
  0xa0   : > { %1014 = vmatmul.mubr.bf16.gmra.mrb[60].mxu0 %v1870_v30 }
  0xa1   : > { %1175 = vmatmul.mubr.bf16.gmra.mrb[60].mxu1 %v1871_v31 }
  0xfb   : > { %v1512_v32 = vpop.f32.mrb[0].mxu0 }
  0xfc   : > { %v1624_v33 = vpop.f32.mrb[0].mxu1  ;;  %v1513_v35 = vpop.f32.mrb[1].mxu0 }
  0xfd   : > { %v1514_v36 = vadd.f32 %v1513_v35, %v1512_v32  ;;  %v1625_v37 = vpop.f32.mrb[1].mxu1  ;;  %v1515_v38 = vpop.f32.mrb[2].mxu0 }
  0xfe   : > { %v1626_v39 = vadd.f32 %v1625_v37, %v1624_v33  ;;  %v1627_v40 = vpop.f32.mrb[2].mxu1  ;;  %v1516_v41 = vpop.f32.mrb[3].mxu0 }
  0xff   : > { %v896_v42 = vadd.f32 %v1514_v36, %v2109_v34  ;;  %v1517_v43 = vadd.f32 %v1516_v41, %v1515_v38  ;;  %v1628_v44 = vpop.f32.mrb[3].mxu1 }
 0x100   : > { %v1629_v45 = vadd.f32 %v1628_v44, %v1627_v40 }
 0x101   : > { %v2112_v46 = vadd.f32 %v1626_v39, %v896_v42  ;;  %v899_v47 = vadd.f32 %v1517_v43, %v2109_v34 }
 0x103   : > { %v2115_v48 = vadd.f32 %v1629_v45, %v899_v47  ;;  %v1518_v49 = vpop.f32.mrb[4].mxu0 }
 0x104   : > { %v1630_v50 = vpop.f32.mrb[4].mxu1  ;;  %v1519_v51 = vpop.f32.mrb[5].mxu0 }
 0x105   : > { %v1520_v52 = vadd.f32 %v1519_v51, %v1518_v49  ;;  %v1631_v53 = vpop.f32.mrb[5].mxu1  ;;  %v1521_v54 = vpop.f32.mrb[6].mxu0  ;;  %v1183_v51 = vmax.f32 %v2112_v46, 0.0 }
 0x106   : > { %v1632_v55 = vadd.f32 %v1631_v53, %v1630_v50  ;;  %v1633_v56 = vpop.f32.mrb[6].mxu1  ;;  %v1522_v57 = vpop.f32.mrb[7].mxu0 }
 0x107   : > { %v904_v58 = vadd.f32 %v1520_v52, %v2109_v34  ;;  %v1523_v59 = vadd.f32 %v1522_v57, %v1521_v54  ;;  %v1634_v60 = vpop.f32.mrb[7].mxu1  ;;  %v1184_v57 = vmax.f32 %v2115_v48, 0.0 }
 0x108   : > { %v1635_v61 = vadd.f32 %v1634_v60, %v1633_v56 }
 0x109   : > { %v2118_v62 = vadd.f32 %v1632_v55, %v904_v58  ;;  %v907_v63 = vadd.f32 %v1523_v59, %v2109_v34 }
 0x10b   : > { %v2121_v0 = vadd.f32 %v1635_v61, %v907_v63  ;;  %v1524_v1 = vpop.f32.mrb[8].mxu0  ;;  %v1185_v48 = vmax.f32 %v2118_v62, 0.0 }
 0x10c   : > { %v1636_v2 = vpop.f32.mrb[8].mxu1  ;;  %v1525_v3 = vpop.f32.mrb[9].mxu0 }
 0x10d   : > { %v1526_v4 = vadd.f32 %v1525_v3, %v1524_v1  ;;  %v1637_v5 = vpop.f32.mrb[9].mxu1  ;;  %v1527_v6 = vpop.f32.mrb[10].mxu0 }
 0x10e   : > { %v1638_v7 = vadd.f32 %v1637_v5, %v1636_v2  ;;  %v1639_v8 = vpop.f32.mrb[10].mxu1  ;;  %v1528_v9 = vpop.f32.mrb[11].mxu0 }
 0x10f   : > { %v912_v10 = vadd.f32 %v1526_v4, %v2109_v34  ;;  %v1529_v11 = vadd.f32 %v1528_v9, %v1527_v6  ;;  %v1640_v12 = vpop.f32.mrb[11].mxu1 }
 0x110   : > { %v1641_v13 = vadd.f32 %v1640_v12, %v1639_v8 }
 0x111   : > { %v2124_v14 = vadd.f32 %v1638_v7, %v912_v10  ;;  %v915_v15 = vadd.f32 %v1529_v11, %v2109_v34 }
 0x113   : > { %v2127_v16 = vadd.f32 %v1641_v13, %v915_v15  ;;  %v1530_v17 = vpop.f32.mrb[12].mxu0 }
 0x114   : > { %v1642_v18 = vpop.f32.mrb[12].mxu1  ;;  %v1531_v19 = vpop.f32.mrb[13].mxu0 }
 0x115   : > { %v1532_v20 = vadd.f32 %v1531_v19, %v1530_v17  ;;  %v1643_v21 = vpop.f32.mrb[13].mxu1  ;;  %v1533_v22 = vpop.f32.mrb[14].mxu0  ;;  %v1186_v17 = vmax.f32 %v2121_v0, 0.0  ;;  %v1187_v0 = vmax.f32 %v2124_v14, 0.0 }
 0x116   : > { %v1644_v23 = vadd.f32 %v1643_v21, %v1642_v18  ;;  %v1645_v24 = vpop.f32.mrb[14].mxu1  ;;  %v1534_v25 = vpop.f32.mrb[15].mxu0 }
 0x117   : > { %v920_v26 = vadd.f32 %v1532_v20, %v2109_v34  ;;  %v1535_v27 = vadd.f32 %v1534_v25, %v1533_v22  ;;  %v1646_v28 = vpop.f32.mrb[15].mxu1 }
 0x118   : > { %v1647_v29 = vadd.f32 %v1646_v28, %v1645_v24 }
 0x119   : > { %v2130_v30 = vadd.f32 %v1644_v23, %v920_v26  ;;  %v923_v31 = vadd.f32 %v1535_v27, %v2109_v34 }
 0x11b   : > { %v2133_v32 = vadd.f32 %v1647_v29, %v923_v31  ;;  %v1536_v33 = vpop.f32.mrb[16].mxu0 }
 0x11c   : > { %v1648_v35 = vpop.f32.mrb[16].mxu1  ;;  %v1537_v36 = vpop.f32.mrb[17].mxu0 }
 0x11d   : > { %v1538_v37 = vadd.f32 %v1537_v36, %v1536_v33  ;;  %v1649_v38 = vpop.f32.mrb[17].mxu1  ;;  %v1539_v39 = vpop.f32.mrb[18].mxu0 }
 0x11e   : > { %v1650_v40 = vadd.f32 %v1649_v38, %v1648_v35  ;;  %v1651_v41 = vpop.f32.mrb[18].mxu1  ;;  %v1540_v42 = vpop.f32.mrb[19].mxu0 }
 0x11f   : > { %v928_v43 = vadd.f32 %v1538_v37, %v2109_v34  ;;  %v1541_v44 = vadd.f32 %v1540_v42, %v1539_v39  ;;  %v1652_v45 = vpop.f32.mrb[19].mxu1 }
 0x120   : > { %v1653_v47 = vadd.f32 %v1652_v45, %v1651_v41 }
 0x121   : > { %v1089_v49 = vadd.f32 %v1650_v40, %v928_v43  ;;  %v931_v50 = vadd.f32 %v1541_v44, %v2109_v34  ;;  %v1188_v40 = vmax.f32 %v2127_v16, 0.0  ;;  %v1189_v16 = vmax.f32 %v2130_v30, 0.0 }
 0x123   : > { %v1191_v52 = vmax.f32 %v1089_v49, 0.0  ;;  %v1092_v53 = vadd.f32 %v1653_v47, %v931_v50  ;;  %v1542_v54 = vpop.f32.mrb[20].mxu0 }
 0x124   : > { %v1654_v55 = vpop.f32.mrb[20].mxu1  ;;  %v1543_v56 = vpop.f32.mrb[21].mxu0 }
 0x125   : > { %v2139_v58 = vadd.f32 %v1191_v52, %v1183_v51  ;;  %v1192_v59 = vmax.f32 %v1092_v53, 0.0  ;;  %v1544_v60 = vadd.f32 %v1543_v56, %v1542_v54  ;;  %v1655_v61 = vpop.f32.mrb[21].mxu1  ;;  %v1545_v63 = vpop.f32.mrb[22].mxu0 }
 0x126   : > { %v1656_v1 = vadd.f32 %v1655_v61, %v1654_v55  ;;  %v1657_v2 = vpop.f32.mrb[22].mxu1  ;;  %v1546_v3 = vpop.f32.mrb[23].mxu0 }
 0x127   : > { %v2141_v4 = vadd.f32 %v1192_v59, %v1184_v57  ;;  %v936_v46 = vadd.f32 %v1544_v60, %v2109_v34  ;;  %v1547_v5 = vadd.f32 %v1546_v3, %v1545_v63  ;;  %v1658_v6 = vpop.f32.mrb[23].mxu1 }
 0x128   : > { %v1659_v7 = vadd.f32 %v1658_v6, %v1657_v2 }
 0x129   : > { %v1097_v8 = vadd.f32 %v1656_v1, %v936_v46  ;;  %v939_v9 = vadd.f32 %v1547_v5, %v2109_v34  ;;  %v1190_v1 = vmax.f32 %v2133_v32, 0.0 }
 0x12b   : > { %v1193_v10 = vmax.f32 %v1097_v8, 0.0  ;;  %v1100_v11 = vadd.f32 %v1659_v7, %v939_v9  ;;  %v1548_v12 = vpop.f32.mrb[24].mxu0 }
 0x12c   : > { %v1660_v13 = vpop.f32.mrb[24].mxu1  ;;  %v1549_v15 = vpop.f32.mrb[25].mxu0 }
 0x12d   : > { %v2147_v18 = vadd.f32 %v1193_v10, %v1185_v48  ;;  %v1194_v19 = vmax.f32 %v1100_v11, 0.0  ;;  %v1550_v20 = vadd.f32 %v1549_v15, %v1548_v12  ;;  %v1661_v21 = vpop.f32.mrb[25].mxu1  ;;  %v1551_v22 = vpop.f32.mrb[26].mxu0 }
 0x12e   : > { %v1662_v23 = vadd.f32 %v1661_v21, %v1660_v13  ;;  %v1663_v24 = vpop.f32.mrb[26].mxu1  ;;  %v1552_v25 = vpop.f32.mrb[27].mxu0 }
 0x12f   : > { %v2149_v26 = vadd.f32 %v1194_v19, %v1186_v17  ;;  %v944_v62 = vadd.f32 %v1550_v20, %v2109_v34  ;;  %v1553_v27 = vadd.f32 %v1552_v25, %v1551_v22  ;;  %v1664_v28 = vpop.f32.mrb[27].mxu1 }
 0x130   : > { %v1665_v29 = vadd.f32 %v1664_v28, %v1663_v24 }
 0x131   : > { %v1105_v31 = vadd.f32 %v1662_v23, %v944_v62  ;;  %v947_v33 = vadd.f32 %v1553_v27, %v2109_v34 }
 0x133   : > { %v1195_v35 = vmax.f32 %v1105_v31, 0.0  ;;  %v1108_v36 = vadd.f32 %v1665_v29, %v947_v33  ;;  %v1554_v37 = vpop.f32.mrb[28].mxu0 }
 0x134   : > { %v1666_v38 = vpop.f32.mrb[28].mxu1  ;;  %v1555_v39 = vpop.f32.mrb[29].mxu0 }
 0x135   : > { %v2155_v41 = vadd.f32 %v1195_v35, %v1187_v0  ;;  %v1196_v42 = vmax.f32 %v1108_v36, 0.0  ;;  %v1556_v43 = vadd.f32 %v1555_v39, %v1554_v37  ;;  %v1667_v44 = vpop.f32.mrb[29].mxu1  ;;  %v1557_v45 = vpop.f32.mrb[30].mxu0 }
 0x136   : > { %v1668_v47 = vadd.f32 %v1667_v44, %v1666_v38  ;;  %v1669_v49 = vpop.f32.mrb[30].mxu1  ;;  %v1558_v50 = vpop.f32.mrb[31].mxu0 }
 0x137   : > { %v2157_v51 = vadd.f32 %v1196_v42, %v1188_v40  ;;  %v952_v14 = vadd.f32 %v1556_v43, %v2109_v34  ;;  %v1559_v52 = vadd.f32 %v1558_v50, %v1557_v45  ;;  %v1670_v53 = vpop.f32.mrb[31].mxu1 }
 0x138   : > { %v1671_v54 = vadd.f32 %v1670_v53, %v1669_v49 }
 0x139   : > { %v1113_v55 = vadd.f32 %v1668_v47, %v952_v14  ;;  %v955_v56 = vadd.f32 %v1559_v52, %v2109_v34 }
 0x13b   : > { %v1197_v57 = vmax.f32 %v1113_v55, 0.0  ;;  %v1116_v59 = vadd.f32 %v1671_v54, %v955_v56  ;;  %v1560_v60 = vpop.f32.mrb[32].mxu0 }
 0x13c   : > { %v1672_v61 = vpop.f32.mrb[32].mxu1  ;;  %v1561_v63 = vpop.f32.mrb[33].mxu0 }
 0x13d   : > { %v2163_v2 = vadd.f32 %v1197_v57, %v1189_v16  ;;  %v1198_v3 = vmax.f32 %v1116_v59, 0.0  ;;  %v1562_v46 = vadd.f32 %v1561_v63, %v1560_v60  ;;  %v1673_v5 = vpop.f32.mrb[33].mxu1  ;;  %v1563_v6 = vpop.f32.mrb[34].mxu0 }
 0x13e   : > { %v1674_v7 = vadd.f32 %v1673_v5, %v1672_v61  ;;  %v1675_v8 = vpop.f32.mrb[34].mxu1  ;;  %v1564_v9 = vpop.f32.mrb[35].mxu0 }
 0x13f   : > { %v2165_v48 = vadd.f32 %v1198_v3, %v1190_v1  ;;  %v960_v30 = vadd.f32 %v1562_v46, %v2109_v34  ;;  %v1565_v10 = vadd.f32 %v1564_v9, %v1563_v6  ;;  %v1676_v11 = vpop.f32.mrb[35].mxu1 }
 0x140   : > { %v1677_v12 = vadd.f32 %v1676_v11, %v1675_v8 }
 0x141   : > { %v1121_v13 = vadd.f32 %v1674_v7, %v960_v30  ;;  %v963_v15 = vadd.f32 %v1565_v10, %v2109_v34 }
 0x143   : > { %v1199_v32 = vmax.f32 %v1121_v13, 0.0  ;;  %v1124_v17 = vadd.f32 %v1677_v12, %v963_v15  ;;  %v1566_v19 = vpop.f32.mrb[36].mxu0 }
 0x144   : > { %v1678_v20 = vpop.f32.mrb[36].mxu1  ;;  %v1567_v21 = vpop.f32.mrb[37].mxu0 }
 0x145   : > { %v2170_v22 = vadd.f32 %v2139_v58, %v1199_v32  ;;  %v1200_v23 = vmax.f32 %v1124_v17, 0.0  ;;  %v1568_v24 = vadd.f32 %v1567_v21, %v1566_v19  ;;  %v1679_v25 = vpop.f32.mrb[37].mxu1  ;;  %v1569_v62 = vpop.f32.mrb[38].mxu0 }
 0x146   : > { %v1680_v27 = vadd.f32 %v1679_v25, %v1678_v20  ;;  %v1681_v28 = vpop.f32.mrb[38].mxu1  ;;  %v1570_v29 = vpop.f32.mrb[39].mxu0 }
 0x147   : > { %v2173_v31 = vadd.f32 %v2141_v4, %v1200_v23  ;;  %v968_v33 = vadd.f32 %v1568_v24, %v2109_v34  ;;  %v1571_v0 = vadd.f32 %v1570_v29, %v1569_v62  ;;  %v1682_v35 = vpop.f32.mrb[39].mxu1 }
 0x148   : > { %v1683_v36 = vadd.f32 %v1682_v35, %v1681_v28 }
 0x149   : > { %v1129_v37 = vadd.f32 %v1680_v27, %v968_v33  ;;  %v971_v38 = vadd.f32 %v1571_v0, %v2109_v34 }
 0x14b   : > { %v1201_v58 = vmax.f32 %v1129_v37, 0.0  ;;  %v1132_v39 = vadd.f32 %v1683_v36, %v971_v38  ;;  %v1572_v40 = vpop.f32.mrb[40].mxu0 }
 0x14c   : > { %v1684_v42 = vpop.f32.mrb[40].mxu1  ;;  %v1573_v43 = vpop.f32.mrb[41].mxu0 }
 0x14d   : > { %v2178_v44 = vadd.f32 %v2147_v18, %v1201_v58  ;;  %v1202_v45 = vmax.f32 %v1132_v39, 0.0  ;;  %v1574_v47 = vadd.f32 %v1573_v43, %v1572_v40  ;;  %v1685_v4 = vpop.f32.mrb[41].mxu1  ;;  %v1575_v49 = vpop.f32.mrb[42].mxu0 }
 0x14e   : > { %v1686_v50 = vadd.f32 %v1685_v4, %v1684_v42  ;;  %v1687_v14 = vpop.f32.mrb[42].mxu1  ;;  %v1576_v52 = vpop.f32.mrb[43].mxu0 }
 0x14f   : > { %v2181_v53 = vadd.f32 %v2149_v26, %v1202_v45  ;;  %v976_v54 = vadd.f32 %v1574_v47, %v2109_v34  ;;  %v1577_v55 = vadd.f32 %v1576_v52, %v1575_v49  ;;  %v1688_v56 = vpop.f32.mrb[43].mxu1 }
 0x150   : > { %v1689_v16 = vadd.f32 %v1688_v56, %v1687_v14 }
 0x151   : > { %v1137_v57 = vadd.f32 %v1686_v50, %v976_v54  ;;  %v979_v59 = vadd.f32 %v1577_v55, %v2109_v34 }
 0x153   : > { %v1203_v18 = vmax.f32 %v1137_v57, 0.0  ;;  %v1140_v60 = vadd.f32 %v1689_v16, %v979_v59  ;;  %v1578_v61 = vpop.f32.mrb[44].mxu0 }
 0x154   : > { %v1690_v63 = vpop.f32.mrb[44].mxu1  ;;  %v1579_v1 = vpop.f32.mrb[45].mxu0 }
 0x155   : > { %v2186_v3 = vadd.f32 %v2155_v41, %v1203_v18  ;;  %v1204_v46 = vmax.f32 %v1140_v60, 0.0  ;;  %v1580_v5 = vadd.f32 %v1579_v1, %v1578_v61  ;;  %v1691_v26 = vpop.f32.mrb[45].mxu1  ;;  %v1581_v6 = vpop.f32.mrb[46].mxu0 }
 0x156   : > { %v1692_v7 = vadd.f32 %v1691_v26, %v1690_v63  ;;  %v1693_v8 = vpop.f32.mrb[46].mxu1  ;;  %v1582_v9 = vpop.f32.mrb[47].mxu0 }
 0x157   : > { %v2189_v30 = vadd.f32 %v2157_v51, %v1204_v46  ;;  %v984_v10 = vadd.f32 %v1580_v5, %v2109_v34  ;;  %v1583_v11 = vadd.f32 %v1582_v9, %v1581_v6  ;;  %v1694_v12 = vpop.f32.mrb[47].mxu1 }
 0x158   : > { %v1695_v13 = vadd.f32 %v1694_v12, %v1693_v8 }
 0x159   : > { %v1145_v15 = vadd.f32 %v1692_v7, %v984_v10  ;;  %v987_v32 = vadd.f32 %v1583_v11, %v2109_v34 }
 0x15b   : > { %v1205_v41 = vmax.f32 %v1145_v15, 0.0  ;;  %v1148_v17 = vadd.f32 %v1695_v13, %v987_v32  ;;  %v1584_v19 = vpop.f32.mrb[48].mxu0 }
 0x15c   : > { %v1696_v20 = vpop.f32.mrb[48].mxu1  ;;  %v1585_v21 = vpop.f32.mrb[49].mxu0 }
 0x15d   : > { %v2194_v23 = vadd.f32 %v2163_v2, %v1205_v41  ;;  %v1206_v24 = vmax.f32 %v1148_v17, 0.0  ;;  %v1586_v51 = vadd.f32 %v1585_v21, %v1584_v19  ;;  %v1697_v25 = vpop.f32.mrb[49].mxu1  ;;  %v1587_v62 = vpop.f32.mrb[50].mxu0 }
 0x15e   : > { %v1698_v27 = vadd.f32 %v1697_v25, %v1696_v20  ;;  %v1699_v28 = vpop.f32.mrb[50].mxu1  ;;  %v1588_v29 = vpop.f32.mrb[51].mxu0 }
 0x15f   : > { %v2197_v33 = vadd.f32 %v2165_v48, %v1206_v24  ;;  %v992_v0 = vadd.f32 %v1586_v51, %v2109_v34  ;;  %v1589_v35 = vadd.f32 %v1588_v29, %v1587_v62  ;;  %v1700_v36 = vpop.f32.mrb[51].mxu1 }
 0x160   : > { %v1701_v37 = vadd.f32 %v1700_v36, %v1699_v28 }
 0x161   : > { %v1153_v38 = vadd.f32 %v1698_v27, %v992_v0  ;;  %v995_v58 = vadd.f32 %v1589_v35, %v2109_v34 }
 0x163   : > { %v1207_v2 = vmax.f32 %v1153_v38, 0.0  ;;  %v1156_v39 = vadd.f32 %v1701_v37, %v995_v58  ;;  %v1590_v40 = vpop.f32.mrb[52].mxu0 }
 0x164   : > { %v1702_v42 = vpop.f32.mrb[52].mxu1  ;;  %v1591_v43 = vpop.f32.mrb[53].mxu0 }
 0x165   : > { %v1231_v45 = vadd.f32 %v2170_v22, %v1207_v2  ;;  %v1208_v47 = vmax.f32 %v1156_v39, 0.0  ;;  %v1592_v4 = vadd.f32 %v1591_v43, %v1590_v40  ;;  %v1703_v48 = vpop.f32.mrb[53].mxu1  ;;  %v1593_v49 = vpop.f32.mrb[54].mxu0 }
 0x166   : > { %v1704_v50 = vadd.f32 %v1703_v48, %v1702_v42  ;;  %v1705_v14 = vpop.f32.mrb[54].mxu1  ;;  %v1594_v52 = vpop.f32.mrb[55].mxu0 }
 0x167   : > { %v1488_v54 = vpack.c.bf16 %v1231_v45, %v1231_v45  ;;  %v1232_v55 = vadd.f32 %v2173_v31, %v1208_v47  ;;  %v1000_v22 = vadd.f32 %v1592_v4, %v2109_v34  ;;  %v1595_v56 = vadd.f32 %v1594_v52, %v1593_v49  ;;  %v1706_v16 = vpop.f32.mrb[55].mxu1 }
 0x168   : > { %v1707_v57 = vadd.f32 %v1706_v16, %v1705_v14 }
 0x169   : > { %1272 = vst.msk [vmem:[%s2206_s20] sm:$0xf] %vm1271_vm0, %v1488_v54  ;;  %v1489_v59 = vpack.c.bf16 %v1232_v55, %v1232_v55  ;;  %v1161_v18 = vadd.f32 %v1704_v50, %v1000_v22  ;;  %v1003_v60 = vadd.f32 %v1595_v56, %v2109_v34 }
 0x16b   : > { %1273 = vst.msk [vmem:[%s2206_s20 + $0x4] sm:$0xf] %vm1271_vm0, %v1489_v59  ;;  %v1209_v61 = vmax.f32 %v1161_v18, 0.0  ;;  %v1164_v63 = vadd.f32 %v1707_v57, %v1003_v60  ;;  %v1596_v1 = vpop.f32.mrb[56].mxu0 }
 0x16c   : > { %v1708_v46 = vpop.f32.mrb[56].mxu1  ;;  %v1597_v5 = vpop.f32.mrb[57].mxu0 }
 0x16d   : > { %v1233_v31 = vadd.f32 %v2178_v44, %v1209_v61  ;;  %v1210_v26 = vmax.f32 %v1164_v63, 0.0  ;;  %v1598_v6 = vadd.f32 %v1597_v5, %v1596_v1  ;;  %v1709_v7 = vpop.f32.mrb[57].mxu1  ;;  %v1599_v8 = vpop.f32.mrb[58].mxu0 }
 0x16e   : > { %v1710_v9 = vadd.f32 %v1709_v7, %v1708_v46  ;;  %v1711_v10 = vpop.f32.mrb[58].mxu1  ;;  %v1600_v11 = vpop.f32.mrb[59].mxu0 }
 0x16f   : > { %v1490_v12 = vpack.c.bf16 %v1233_v31, %v1233_v31  ;;  %v1234_v13 = vadd.f32 %v2181_v53, %v1210_v26  ;;  %v1008_v15 = vadd.f32 %v1598_v6, %v2109_v34  ;;  %v1601_v32 = vadd.f32 %v1600_v11, %v1599_v8  ;;  %v1712_v41 = vpop.f32.mrb[59].mxu1 }
 0x170   : > { %v1713_v17 = vadd.f32 %v1712_v41, %v1711_v10 }
 0x171   : > { %1274 = vst.msk [vmem:[%s2206_s20 + $0x8] sm:$0xf] %vm1271_vm0, %v1490_v12  ;;  %v1491_v19 = vpack.c.bf16 %v1234_v13, %v1234_v13  ;;  %v1169_v44 = vadd.f32 %v1710_v9, %v1008_v15  ;;  %v1011_v20 = vadd.f32 %v1601_v32, %v2109_v34 }
 0x173   : > { %1275 = vst.msk [vmem:[%s2206_s20 + $0xc] sm:$0xf] %vm1271_vm0, %v1491_v19  ;;  %v1211_v21 = vmax.f32 %v1169_v44, 0.0  ;;  %v1172_v24 = vadd.f32 %v1713_v17, %v1011_v20  ;;  %v1602_v51 = vpop.f32.mrb[60].mxu0 }
 0x174   : > { %v1714_v25 = vpop.f32.mrb[60].mxu1  ;;  %v1603_v62 = vpop.f32.mrb[61].mxu0 }
 0x175   : > { %v1235_v53 = vadd.f32 %v2186_v3, %v1211_v21  ;;  %v1212_v27 = vmax.f32 %v1172_v24, 0.0  ;;  %v1604_v28 = vadd.f32 %v1603_v62, %v1602_v51  ;;  %v1715_v29 = vpop.f32.mrb[61].mxu1  ;;  %v1605_v0 = vpop.f32.mrb[62].mxu0 }
 0x176   : > { %v1716_v35 = vadd.f32 %v1715_v29, %v1714_v25  ;;  %v1717_v36 = vpop.f32.mrb[62].mxu1  ;;  %v1606_v37 = vpop.f32.mrb[63].mxu0 }
 0x177   : > { %v1492_v38 = vpack.c.bf16 %v1235_v53, %v1235_v53  ;;  %v1236_v58 = vadd.f32 %v2189_v30, %v1212_v27  ;;  %v1016_v2 = vadd.f32 %v1604_v28, %v2109_v34  ;;  %v1607_v39 = vadd.f32 %v1606_v37, %v1605_v0  ;;  %v1718_v40 = vpop.f32.mrb[63].mxu1 }
 0x178   : > { %v1719_v42 = vadd.f32 %v1718_v40, %v1717_v36 }
 0x179   : > { %1276 = vst.msk [vmem:[%s2206_s20 + $0x10] sm:$0xf] %vm1271_vm0, %v1492_v38  ;;  %v1493_v3 = vpack.c.bf16 %v1236_v58, %v1236_v58  ;;  %v1177_v43 = vadd.f32 %v1716_v35, %v1016_v2  ;;  %v1019_v45 = vadd.f32 %v1607_v39, %v2109_v34 }
 0x17b   : > { %1277 = vst.msk [vmem:[%s2206_s20 + $0x14] sm:$0xf] %vm1271_vm0, %v1493_v3  ;;  %v1213_v47 = vmax.f32 %v1177_v43, 0.0  ;;  %v1180_v4 = vadd.f32 %v1719_v42, %v1019_v45 }
 0x17d   : > { %v1237_v48 = vadd.f32 %v2194_v23, %v1213_v47  ;;  %v1214_v30 = vmax.f32 %v1180_v4, 0.0 }
 0x17f   : > { %v1494_v49 = vpack.c.bf16 %v1237_v48, %v1237_v48  ;;  %v1238_v50 = vadd.f32 %v2197_v33, %v1214_v30 }
 0x181   : > { %1278 = vst.msk [vmem:[%s2206_s20 + $0x18] sm:$0xf] %vm1271_vm0, %v1494_v49  ;;  %v1495_v14 = vpack.c.bf16 %v1238_v50, %v1238_v50 }
 0x183   : > { %1279 = vst.msk [vmem:[%s2206_s20 + $0x1c] sm:$0xf] %vm1271_vm0, %v1495_v14 }
 0x184 PF: > { %s13_s14 = sadd.s32 1, %s1894_s14   ;;  %s2250_s12 = smov %s1890_s13 }
 0x185   : > { %p10_p5 = scmp.ge.s32.totalorder %s13_s14, 4   ;;  %s2251_s13 = smov %s2253_s15 }
 0x187   :  { %12 = sbr.rel (!%p10_p5) target bundleno = 2 (0x2), region = 62 }

// kernel: lora_cnn_forward.7
= control target key start
LH: loop header
LB: loop body
LE: loop exit
PB: predicated region body
PF: predicated region fallthrough
CT: control target
= control target key end

     0   :  { %v89_v38 = vlaneseq  ;;  %v970_v39 = vmov 1966171168   ;;  %s1268_s0 = inlined_call_operand.vmem [shape: bf16[2,512], index: 0, kind: input, shape index: {}]   ;;  %s1269_s1 = inlined_call_operand.vmem [shape: bf16[512,256], index: 1, kind: input, shape index: {}]   ;;  %s1270_s2 = inlined_call_operand.vmem [shape: f32[1,256], index: 2, kind: input, shape index: {}]   ;;  %s1271_s3 = inlined_call_operand.vmem [shape: bf16[256,128], index: 3, kind: input, shape index: {}]   ;;  %s1272_s4 = inlined_call_operand.vmem [shape: f32[1,128], index: 4, kind: input, shape index: {}]   ;;  %s1273_s5 = inlined_call_operand.hbm [shape: f32[2,128], index: 5, kind: output, shape index: {}]  }
   0x1   :  { %v834_v0 = vld [vmem:[%s1269_s1 + $0x4] ss:$8 sps:$4 sm:$0xff]   ;;  %v838_v2 = vld [vmem:[%s1269_s1] ss:$8 sps:$4 sm:$0xff]   ;;  %v840_v4 = vld [vmem:[%s1269_s1 + $0x14] ss:$8 sps:$4 sm:$0xff]   ;;  %v109_v40 = vunpack.c.l.s4 %v970_v39 }
   0x2   :  { %v836_v1 = vld [vmem:[%s1269_s1 + $0x104] ss:$8 sps:$4 sm:$0xff]   ;;  %448 = vmatprep.subr.bf16.mxu1 %v834_v0  ;;  %v839_v3 = vld [vmem:[%s1269_s1 + $0x100] ss:$8 sps:$4 sm:$0xff]   ;;  %v842_v5 = vld [vmem:[%s1269_s1 + $0x114] ss:$8 sps:$4 sm:$0xff]  }
   0x3   :  { %489 = vmatprep.subr.bf16.mxu0 %v836_v1  ;;  %449 = vmatpush1.bf16.msra.mxu1 %v838_v2  ;;  %v844_v6 = vld [vmem:[%s1269_s1 + $0x10] ss:$8 sps:$4 sm:$0xff]   ;;  %v846_v8 = vld [vmem:[%s1269_s1 + $0x24] ss:$8 sps:$4 sm:$0xff]   ;;  %v850_v10 = vld [vmem:[%s1269_s1 + $0x20] ss:$8 sps:$4 sm:$0xff]   ;;  %v110_v46 = vunpack.c.0.s8 %v109_v40 }
   0x4   :  { %490 = vmatpush1.bf16.msra.mxu0 %v839_v3  ;;  %450 = vmatprep.subr.bf16.mxu1 %v840_v4  ;;  %v845_v7 = vld [vmem:[%s1269_s1 + $0x110] ss:$8 sps:$4 sm:$0xff]   ;;  %v848_v9 = vld [vmem:[%s1269_s1 + $0x124] ss:$8 sps:$4 sm:$0xff]   ;;  %v851_v11 = vld [vmem:[%s1269_s1 + $0x120] ss:$8 sps:$4 sm:$0xff]  }
   0x5   :  { %491 = vmatprep.subr.bf16.mxu0 %v842_v5  ;;  %v852_v12 = vld [vmem:[%s1269_s1 + $0x34] ss:$8 sps:$4 sm:$0xff]   ;;  %v856_v14 = vld [vmem:[%s1269_s1 + $0x30] ss:$8 sps:$4 sm:$0xff]   ;;  %v858_v16 = vld [vmem:[%s1269_s1 + $0x44] ss:$8 sps:$4 sm:$0xff]  }
   0x6   :  { %v854_v13 = vld [vmem:[%s1269_s1 + $0x134] ss:$8 sps:$4 sm:$0xff]   ;;  %v857_v15 = vld [vmem:[%s1269_s1 + $0x130] ss:$8 sps:$4 sm:$0xff]   ;;  %v860_v17 = vld [vmem:[%s1269_s1 + $0x144] ss:$8 sps:$4 sm:$0xff]  }
   0x7   :  { %451 = vmatpush1.bf16.msra.mxu1 %v844_v6  ;;  %v862_v18 = vld [vmem:[%s1269_s1 + $0x40] ss:$8 sps:$4 sm:$0xff]   ;;  %v864_v20 = vld [vmem:[%s1269_s1 + $0x54] ss:$8 sps:$4 sm:$0xff]   ;;  %v868_v22 = vld [vmem:[%s1269_s1 + $0x50] ss:$8 sps:$4 sm:$0xff]  }
   0x8   :  { %492 = vmatpush1.bf16.msra.mxu0 %v845_v7  ;;  %452 = vmatprep.subr.bf16.mxu1 %v846_v8  ;;  %v863_v19 = vld [vmem:[%s1269_s1 + $0x140] ss:$8 sps:$4 sm:$0xff]   ;;  %v866_v21 = vld [vmem:[%s1269_s1 + $0x154] ss:$8 sps:$4 sm:$0xff]   ;;  %v869_v23 = vld [vmem:[%s1269_s1 + $0x150] ss:$8 sps:$4 sm:$0xff]  }
   0x9   :  { %493 = vmatprep.subr.bf16.mxu0 %v848_v9  ;;  %v870_v24 = vld [vmem:[%s1269_s1 + $0x64] ss:$8 sps:$4 sm:$0xff]   ;;  %v874_v26 = vld [vmem:[%s1269_s1 + $0x60] ss:$8 sps:$4 sm:$0xff]   ;;  %v876_v28 = vld [vmem:[%s1269_s1 + $0x74] ss:$8 sps:$4 sm:$0xff]  }
   0xa   :  { %v872_v25 = vld [vmem:[%s1269_s1 + $0x164] ss:$8 sps:$4 sm:$0xff]   ;;  %v875_v27 = vld [vmem:[%s1269_s1 + $0x160] ss:$8 sps:$4 sm:$0xff]   ;;  %v878_v29 = vld [vmem:[%s1269_s1 + $0x174] ss:$8 sps:$4 sm:$0xff]  }
   0xb   :  { %453 = vmatpush1.bf16.msra.mxu1 %v850_v10  ;;  %v880_v30 = vld [vmem:[%s1269_s1 + $0x70] ss:$8 sps:$4 sm:$0xff]   ;;  %v882_v32 = vld [vmem:[%s1269_s1 + $0x84] ss:$8 sps:$4 sm:$0xff]   ;;  %v886_v34 = vld [vmem:[%s1269_s1 + $0x80] ss:$8 sps:$4 sm:$0xff]  }
   0xc   :  { %494 = vmatpush1.bf16.msra.mxu0 %v851_v11  ;;  %454 = vmatprep.subr.bf16.mxu1 %v852_v12  ;;  %v881_v31 = vld [vmem:[%s1269_s1 + $0x170] ss:$8 sps:$4 sm:$0xff]   ;;  %v884_v33 = vld [vmem:[%s1269_s1 + $0x184] ss:$8 sps:$4 sm:$0xff]   ;;  %v887_v35 = vld [vmem:[%s1269_s1 + $0x180] ss:$8 sps:$4 sm:$0xff]  }
   0xd   :  { %495 = vmatprep.subr.bf16.mxu0 %v854_v13  ;;  %v888_v36 = vld [vmem:[%s1269_s1 + $0x94] ss:$8 sps:$4 sm:$0xff]   ;;  %v892_v41 = vld [vmem:[%s1269_s1 + $0x90] ss:$8 sps:$4 sm:$0xff]   ;;  %v894_v43 = vld [vmem:[%s1269_s1 + $0xa4] ss:$8 sps:$4 sm:$0xff]  }
   0xe   :  { %v890_v37 = vld [vmem:[%s1269_s1 + $0x194] ss:$8 sps:$4 sm:$0xff]   ;;  %v893_v42 = vld [vmem:[%s1269_s1 + $0x190] ss:$8 sps:$4 sm:$0xff]   ;;  %v896_v44 = vld [vmem:[%s1269_s1 + $0x1a4] ss:$8 sps:$4 sm:$0xff]  }
   0xf   :  { %455 = vmatpush1.bf16.msra.mxu1 %v856_v14  ;;  %v1128_v45 = vshrl.u32 %v89_v38, 7  ;;  %v898_v47 = vld [vmem:[%s1269_s1 + $0xa0] ss:$8 sps:$4 sm:$0xff]   ;;  %v900_v49 = vld [vmem:[%s1269_s1 + $0xb4] ss:$8 sps:$4 sm:$0xff]  }
  0x10   :  { %496 = vmatpush1.bf16.msra.mxu0 %v857_v15  ;;  %456 = vmatprep.subr.bf16.mxu1 %v858_v16  ;;  %v899_v48 = vld [vmem:[%s1269_s1 + $0x1a0] ss:$8 sps:$4 sm:$0xff]   ;;  %v902_v50 = vld [vmem:[%s1269_s1 + $0x1b4] ss:$8 sps:$4 sm:$0xff]   ;;  %v904_v51 = vld [vmem:[%s1269_s1 + $0xb0] ss:$8 sps:$4 sm:$0xff]  }
  0x11   :  { %497 = vmatprep.subr.bf16.mxu0 %v860_v17  ;;  %v905_v52 = vld [vmem:[%s1269_s1 + $0x1b0] ss:$8 sps:$4 sm:$0xff]   ;;  %v113_v53 = vsub.s32 %v110_v46, %v1128_v45  ;;  %v724_v54 = vld.sshfl [vmem:[%s1268_s0] sm:$0x33 pattern:$0x75316420] }
  0x12   :  { %v906_v55 = vld [vmem:[%s1269_s1 + $0xc4] ss:$8 sps:$4 sm:$0xff]   ;;  %v107_v56 = vcombine.high %v724_v54, %v724_v54  ;;  %v910_v58 = vld [vmem:[%s1269_s1 + $0xc0] ss:$8 sps:$4 sm:$0xff]   ;;  %v912_v61 = vld [vmem:[%s1269_s1 + $0xd4] ss:$8 sps:$4 sm:$0xff]  }
  0x13   :  { %457 = vmatpush1.bf16.msra.mxu1 %v862_v18  ;;  %v908_v57 = vld [vmem:[%s1269_s1 + $0x1c4] ss:$8 sps:$4 sm:$0xff]   ;;  %v911_v60 = vld [vmem:[%s1269_s1 + $0x1c0] ss:$8 sps:$4 sm:$0xff]   ;;  %v914_v63 = vld [vmem:[%s1269_s1 + $0x1d4] ss:$8 sps:$4 sm:$0xff]  }
  0x14   :  { %498 = vmatpush1.bf16.msra.mxu0 %v863_v19  ;;  %458 = vmatprep.subr.bf16.mxu1 %v864_v20  ;;  %v121_v59 = vrot.slane %v107_v56, %v113_v53  ;;  %v916_v0 = vld [vmem:[%s1269_s1 + $0xd0] ss:$8 sps:$4 sm:$0xff]   ;;  %v918_v2 = vld [vmem:[%s1269_s1 + $0xe4] ss:$8 sps:$4 sm:$0xff]   ;;  %v922_v4 = vld [vmem:[%s1269_s1 + $0xe0] ss:$8 sps:$4 sm:$0xff]  }
  0x15   :  { %499 = vmatprep.subr.bf16.mxu0 %v866_v21  ;;  %v917_v1 = vld [vmem:[%s1269_s1 + $0x1d0] ss:$8 sps:$4 sm:$0xff]   ;;  %v920_v3 = vld [vmem:[%s1269_s1 + $0x1e4] ss:$8 sps:$4 sm:$0xff]   ;;  %v923_v5 = vld [vmem:[%s1269_s1 + $0x1e0] ss:$8 sps:$4 sm:$0xff]  }
  0x16   :  { %v123_v62 = vcombine.high %v121_v59, %v121_v59  ;;  %480 = vmatprep.mubr.bf16.mxu1 %v121_v59  ;;  %v924_v6 = vld [vmem:[%s1269_s1 + $0xf4] ss:$8 sps:$4 sm:$0xff]  }
  0x17   :  { %459 = vmatpush1.bf16.msra.mxu1 %v868_v22  ;;  %v926_v7 = vld [vmem:[%s1269_s1 + $0x1f4] ss:$8 sps:$4 sm:$0xff]  }
  0x18   :  { %500 = vmatpush1.bf16.msra.mxu0 %v869_v23  ;;  %460 = vmatprep.subr.bf16.mxu1 %v870_v24 }
  0x19   :  { %501 = vmatprep.subr.bf16.mxu0 %v872_v25  ;;  %521 = vmatprep.mubr.bf16.mxu0 %v123_v62 }
  0x1b   :  { %461 = vmatpush1.bf16.msra.mxu1 %v874_v26 }
  0x1c   :  { %502 = vmatpush1.bf16.msra.mxu0 %v875_v27  ;;  %462 = vmatprep.subr.bf16.mxu1 %v876_v28 }
  0x1d   :  { %503 = vmatprep.subr.bf16.mxu0 %v878_v29 }
  0x1f   :  { %463 = vmatpush1.bf16.msra.mxu1 %v880_v30 }
  0x20   :  { %504 = vmatpush1.bf16.msra.mxu0 %v881_v31  ;;  %464 = vmatprep.subr.bf16.mxu1 %v882_v32 }
  0x21   :  { %505 = vmatprep.subr.bf16.mxu0 %v884_v33 }
  0x23   :  { %465 = vmatpush1.bf16.msra.mxu1 %v886_v34 }
  0x24   :  { %506 = vmatpush1.bf16.msra.mxu0 %v887_v35  ;;  %466 = vmatprep.subr.bf16.mxu1 %v888_v36 }
  0x25   :  { %507 = vmatprep.subr.bf16.mxu0 %v890_v37 }
  0x27   :  { %467 = vmatpush1.bf16.msra.mxu1 %v892_v41 }
  0x28   :  { %508 = vmatpush1.bf16.msra.mxu0 %v893_v42  ;;  %468 = vmatprep.subr.bf16.mxu1 %v894_v43 }
  0x29   :  { %509 = vmatprep.subr.bf16.mxu0 %v896_v44 }
  0x2b   :  { %469 = vmatpush1.bf16.msra.mxu1 %v898_v47 }
  0x2c   :  { %510 = vmatpush1.bf16.msra.mxu0 %v899_v48  ;;  %470 = vmatprep.subr.bf16.mxu1 %v900_v49 }
  0x2d   :  { %511 = vmatprep.subr.bf16.mxu0 %v902_v50 }
  0x2f   :  { %471 = vmatpush1.bf16.msra.mxu1 %v904_v51 }
  0x30   :  { %512 = vmatpush1.bf16.msra.mxu0 %v905_v52  ;;  %472 = vmatprep.subr.bf16.mxu1 %v906_v55 }
  0x31   :  { %513 = vmatprep.subr.bf16.mxu0 %v908_v57 }
  0x33   :  { %473 = vmatpush1.bf16.msra.mxu1 %v910_v58 }
  0x34   :  { %514 = vmatpush1.bf16.msra.mxu0 %v911_v60  ;;  %474 = vmatprep.subr.bf16.mxu1 %v912_v61 }
  0x35   :  { %515 = vmatprep.subr.bf16.mxu0 %v914_v63 }
  0x37   :  { %475 = vmatpush1.bf16.msra.mxu1 %v916_v0 }
  0x38   :  { %516 = vmatpush1.bf16.msra.mxu0 %v917_v1  ;;  %476 = vmatprep.subr.bf16.mxu1 %v918_v2 }
  0x39   :  { %517 = vmatprep.subr.bf16.mxu0 %v920_v3 }
  0x3a   :  { %10 = vsyncpa [#allocation3], 0  ;;  %v114_v8 = vrot.slane %v724_v54, %v113_v53  ;;  %v928_v9 = vld [vmem:[%s1269_s1 + $0xf0] ss:$8 sps:$4 sm:$0xff]   ;;  %v930_v11 = vld [vmem:[%s1271_s3 + $0x40] sm:$0xff]   ;;  %v91_v28 = vsub.s32 0, %v1128_v45 }
  0x3b   :  { %477 = vmatpush1.bf16.msra.mxu1 %v922_v4  ;;  %v929_v10 = vld [vmem:[%s1269_s1 + $0x1f0] ss:$8 sps:$4 sm:$0xff]   ;;  %v931_v13 = vld [vmem:[%s1271_s3] sm:$0xff]   ;;  %v932_v14 = vld [vmem:[%s1271_s3 + $0x48] sm:$0xff]   ;;  %v95_v30 = vsub.s32 1, %v1128_v45  ;;  %s971_s27 = smov [#allocation2]  }
  0x3c   :  { %518 = vmatpush1.bf16.msra.mxu0 %v923_v5  ;;  %478 = vmatprep.subr.bf16.mxu1 %v924_v6  ;;  %v122_v12 = vcombine.high %v114_v8, %v114_v8  ;;  %v933_v15 = vld [vmem:[%s1271_s3 + $0x8] sm:$0xff]   ;;  %v934_v16 = vld [vmem:[%s1271_s3 + $0x50] sm:$0xff]   ;;  %v936_v18 = vld [vmem:[%s1271_s3 + $0x58] sm:$0xff]   ;;  %s716_s28 = sshll.u32 %s971_s27, 4  ;;  %s717_s28 = int_to_ptr.vmem [resolvable:$true] %s716_s28 }
  0x3d   :  { %519 = vmatprep.subr.bf16.mxu0 %v926_v7  ;;  %v935_v17 = vld [vmem:[%s1271_s3 + $0x10] sm:$0xff]   ;;  %v937_v19 = vld [vmem:[%s1271_s3 + $0x18] sm:$0xff]   ;;  %v938_v20 = vld [vmem:[%s1271_s3 + $0x60] sm:$0xff]   ;;  %s946_s29 = scalar_lea.vmem %s717_s28, 32  ;;  %p951_p1 = scmp.lt.s32.totalorder %s717_s28, %s717_s28 }
  0x3e   :  { %v939_v21 = vld [vmem:[%s1271_s3 + $0x20] sm:$0xff]   ;;  %v940_v22 = vld [vmem:[%s1271_s3 + $0x68] sm:$0xff]   ;;  %v942_v24 = vld [vmem:[%s1271_s3 + $0x70] sm:$0xff]   ;;  %p947_p0 = scmp.ne.s32.totalorder %s717_s28, %s946_s29  ;;  %p952_p2 = scmp.lt.s32.totalorder %s946_s29, %s946_s29 }
  0x3f   :  { %479 = vmatpush1.bf16.msra.mxu1 %v928_v9  ;;  %v941_v23 = vld [vmem:[%s1271_s3 + $0x28] sm:$0xff]   ;;  %v943_v25 = vld [vmem:[%s1271_s3 + $0x30] sm:$0xff]   ;;  %v944_v26 = vld [vmem:[%s1271_s3 + $0x78] sm:$0xff]  }
  0x40   :  { %520 = vmatpush1.bf16.msra.mxu0 %v929_v10  ;;  %806 = vmatprep.subr.bf16.mxu1 %v930_v11  ;;  %v945_v27 = vld [vmem:[%s1271_s3 + $0x38] sm:$0xff]   ;;  %v87_v29 = vld [vmem:[%s1270_s2] sm:$0x3]  ;;  %p953_p3 = por %p952_p2, %p951_p1 }
  0x41   :  { %v92_v31 = vrot.slane %v87_v29, %v91_v28  ;;  %v96_v32 = vrot.slane %v87_v29, %v95_v30  ;;  %v789_v51 = vld [vmem:[%s1272_s4] ss:$0 sm:$0xff] }
  0x42   :  { %481 = vmatmul.mubr.bf16.vlgmr.msra.gmra.mrb[0].mxu1 %v114_v8  ;;  %p954_p4 = pnand %p953_p3, %p947_p0 }
  0x43   :  { %522 = vmatmul.mubr.bf16.vlgmr.msra.gmra.mrb[0].mxu0 %v122_v12  ;;  %807 = vmatpush3.bf16.msra.mxu1 %v931_v13 }
  0x44   :  { %808 = vmatprep.subr.bf16.mxu1 %v932_v14 }
  0x47   :  { %809 = vmatpush3.bf16.msra.mxu1 %v933_v15 }
  0x48   :  { %810 = vmatprep.subr.bf16.mxu1 %v934_v16 }
  0x4b   :  { %811 = vmatpush3.bf16.msra.mxu1 %v935_v17 }
  0x4c   :  { %812 = vmatprep.subr.bf16.mxu1 %v936_v18 }
  0x4f   :  { %813 = vmatpush3.bf16.msra.mxu1 %v937_v19 }
  0x50   :  { %814 = vmatprep.subr.bf16.mxu1 %v938_v20 }
  0x53   :  { %815 = vmatpush3.bf16.msra.mxu1 %v939_v21 }
  0x54   :  { %816 = vmatprep.subr.bf16.mxu1 %v940_v22 }
  0x57   :  { %817 = vmatpush3.bf16.msra.mxu1 %v941_v23 }
  0x58   :  { %818 = vmatprep.subr.bf16.mxu1 %v942_v24 }
  0x5b   :  { %819 = vmatpush3.bf16.msra.mxu1 %v943_v25 }
  0x5c   :  { %820 = vmatprep.subr.bf16.mxu1 %v944_v26 }
  0x5f   :  { %821 = vmatpush3.bf16.msra.mxu1 %v945_v27 }
 0x115   :  { %v482_v33 = vpop.f32.mrb[0].mxu1 }
 0x116   :  { %v523_v34 = vpop.f32.mrb[0].mxu0  ;;  %v483_v35 = vadd.f32 %v482_v33, %v92_v31  ;;  %v484_v36 = vpop.f32.mrb[1].mxu1 }
 0x117   :  { %v525_v37 = vpop.f32.mrb[1].mxu0  ;;  %v485_v38 = vadd.f32 %v484_v36, %v96_v32  ;;  %v486_v39 = vpop.f32.mrb[2].mxu1 }
 0x118   :  { %v527_v40 = vpop.f32.mrb[2].mxu0  ;;  %v524_v41 = vadd.f32 %v523_v34, %v483_v35  ;;  %v487_v42 = vpop.f32.mrb[3].mxu1 }
 0x119   :  { %v528_v43 = vpop.f32.mrb[3].mxu0  ;;  %v526_v44 = vadd.f32 %v525_v37, %v485_v38 }
 0x11a   :  { %v530_v46 = vmax.f32 %v524_v41, 0.0 }
 0x11b   :  { %v531_v47 = vmax.f32 %v526_v44, 0.0 }
 0x11c   :  { %v532_v49 = vpack.c.bf16 %v530_v46, %v530_v46 }
 0x11d   :  { %v533_v48 = vpack.c.bf16 %v531_v47, %v531_v47 }
 0x11f   :  { %701 = vmatprep.mubr.bf16.mxu1 %v533_v48 }
 0x120   :  { %702 = vmatmul.mubr.bf16.vlgmr.msra.gmra.mrb[4].mxu1 %v532_v49 }
 0x1f3   :  { %v822_v45 = vpop.f32.mrb[4].mxu1 }
 0x1f4   :  { %v823_v50 = vpop.f32.mrb[5].mxu1 }
 0x1f5   :  { %v824_v52 = vadd.f32 %v823_v50, %v822_v45  ;;  %v825_v53 = vpop.f32.mrb[6].mxu1 }
 0x1f6   :  { %v826_v54 = vpop.f32.mrb[7].mxu1 }
 0x1f7   :  { %v704_v55 = vadd.f32 %v824_v52, %v789_v51 }
 0x1f9   :  { %709 = vst [vmem:[#allocation2] sm:$0x3] %v704_v55 }
 0x1fa   :  { %957 = shalt.err (!%p954_p4)
}
 0x1fb   :  { %s958_s7 = scalar_lea.hbm %s1273_s5, 32 }
 0x1fc   :  { %p959_p5 = scmp.ne.s32.totalorder %s1273_s5, %s958_s7  ;;  %p962_p6 = scmp.lt.u32.totalorder %s958_s7, %s1273_s5 }
 0x1fe   :  { %p964_p7 = pnand %p962_p6, %p959_p5 }
 0x200   :  { %967 = shalt.err (!%p964_p7)
}
 0x201   :  { %719 = dma.vmem_to_hbm [thread:$0]  %s717_s28, 32, %s1273_s5, [#allocation3]  }
 0x202   :  { %968 = dma.done.wait [#allocation3], 32  }
 0x203   :  { %969 = vsyncadd [#allocation3], 4294967264 }
 0x204   :  { %723 = vsyncpa [#allocation3], 1 }

// kernel: lora_cnn_forward.6
= control target key start
LH: loop header
LB: loop body
LE: loop exit
PB: predicated region body
PF: predicated region fallthrough
CT: control target
= control target key end

     0   :  { %s9996_s12 = smov 0   ;;  %s9998_s13 = smov 0   ;;  %s11795_s0 = inlined_call_operand.vmem [shape: bf16[2,4096], index: 0, kind: input, shape index: {}]   ;;  %s11796_s1 = inlined_call_operand.vmem [shape: bf16[4096,512], index: 1, kind: input, shape index: {}]   ;;  %s11797_s2 = inlined_call_operand.vmem [shape: f32[1,512], index: 2, kind: input, shape index: {}]   ;;  %s11798_s3 = inlined_call_operand.vmem [shape: bf16[2,512], index: 3, kind: output, shape index: {}]  }
   0x1   :  { %s10000_s14 = smov 0   ;;  %s10002_s15 = smov 0  }
   0x2   :  { %s10004_s16 = smov 0  }
   0x3 LB: > { %s25_s17 = sadd.s32 1, %s9967_s15  ;;  %p67_p1 = scmp.ne.s32.totalorder %s9959_s13, %s9955_s12  ;;  %s9971_s16 = sphi %s10004_s16, %s13_s16   ;;  %s9967_s15 = sphi %s10002_s15, %s11802_s15   ;;  %s9963_s14 = sphi %s10000_s14, %s11801_s14   ;;  %s9959_s13 = sphi %s9998_s13, %s11800_s13   ;;  %s9955_s12 = sphi %s9996_s12, %s11799_s12  }
   0x4   : > { %p27_p0 = scmp.ge.s32.totalorder %s25_s17, 2  ;;  %p68_p2 = scmp.eq.s32.totalorder %s9971_s16, 0 }
   0x5   : > { %s60_s19 = sadd.s32 1, %s9959_s13  ;;  %p8535_p5 = scmp.ge.s32.totalorder %s9971_s16, 2 }
   0x6   : > { %s11804_s17 = smov (%p27_p0, %s25_s17), 0  ;;  %p69_p3 = por %p68_p2, %p67_p1 }
   0x7   : > { %s56_s18 = ssub.s32 %s9967_s15, %s11804_s17  ;;  %153 = sbr.rel (%p8535_p5) target bundleno = 274 (0x112), region = 20 }
   0x8   : > { %p58_p4 = scmp.eq.s32.totalorder %s56_s18, 0 }
   0xa   : > { %s10031_s20 = scalar_select %p58_p4, %s9959_s13, %s60_s19  }
   0xe   : > { %156 = sbr.rel (!%p69_p3) target bundleno = 274 (0x112), region = 24  ;;  %s158_s21 = sand.u32 (%p69_p3), 1, %s9959_s13  }
   0xf   : > { %s9059_s22 = sshll.u32 (%p69_p3), %s9967_s15, 3  ;;  %s8536_s23 = sshll.u32 (%p69_p3), %s158_s21, 12 }
  0x10   : > { %s10039_s26 = scalar_lea.vmem (%p69_p3), %s11796_s1, %s9059_s22  ;;  %s10044_s27 = scalar_lea.vmem (%p69_p3), [#allocation3], %s8536_s23 }
  0x11   : > { %v1219_v0 = vld [vmem:[%s10039_s26] sm:$0xff] (%p69_p3)  ;;  %v1221_v1 = vld [vmem:[%s10039_s26 + $0x10] sm:$0xff] (%p69_p3) }
  0x12   : > { %v1223_v2 = vld [vmem:[%s10039_s26 + $0x20] sm:$0xff] (%p69_p3)  ;;  %1220 = vst [vmem:[%s10044_s27] sm:$0xff] (%p69_p3), %v1219_v0  ;;  %1222 = vst [vmem:[%s10044_s27 + $0x8] sm:$0xff] (%p69_p3), %v1221_v1  ;;  %v1225_v3 = vld [vmem:[%s10039_s26 + $0x30] sm:$0xff] (%p69_p3) }
  0x13   : > { %1224 = vst [vmem:[%s10044_s27 + $0x10] sm:$0xff] (%p69_p3), %v1223_v2  ;;  %v1227_v4 = vld [vmem:[%s10039_s26 + $0x40] sm:$0xff] (%p69_p3)  ;;  %v1229_v5 = vld [vmem:[%s10039_s26 + $0x50] sm:$0xff] (%p69_p3)  ;;  %1226 = vst [vmem:[%s10044_s27 + $0x18] sm:$0xff] (%p69_p3), %v1225_v3 }
  0x14   : > { %1228 = vst [vmem:[%s10044_s27 + $0x20] sm:$0xff] (%p69_p3), %v1227_v4  ;;  %1230 = vst [vmem:[%s10044_s27 + $0x28] sm:$0xff] (%p69_p3), %v1229_v5  ;;  %v1231_v6 = vld [vmem:[%s10039_s26 + $0x60] sm:$0xff] (%p69_p3)  ;;  %v1233_v7 = vld [vmem:[%s10039_s26 + $0x70] sm:$0xff] (%p69_p3) }
  0x15   : > { %v1235_v8 = vld [vmem:[%s10039_s26 + $0x80] sm:$0xff]  ;;  %1232 = vst [vmem:[%s10044_s27 + $0x30] sm:$0xff] %v1231_v6  ;;  %1234 = vst [vmem:[%s10044_s27 + $0x38] sm:$0xff] %v1233_v7  ;;  %v1237_v9 = vld [vmem:[%s10039_s26 + $0x90] sm:$0xff] }
  0x16   : > { %1236 = vst [vmem:[%s10044_s27 + $0x40] sm:$0xff] %v1235_v8  ;;  %v1239_v10 = vld [vmem:[%s10039_s26 + $0xa0] sm:$0xff]  ;;  %v1241_v11 = vld [vmem:[%s10039_s26 + $0xb0] sm:$0xff]  ;;  %1238 = vst [vmem:[%s10044_s27 + $0x48] sm:$0xff] %v1237_v9 }
  0x17   : > { %1240 = vst [vmem:[%s10044_s27 + $0x50] sm:$0xff] %v1239_v10  ;;  %1242 = vst [vmem:[%s10044_s27 + $0x58] sm:$0xff] %v1241_v11  ;;  %v1243_v12 = vld [vmem:[%s10039_s26 + $0xc0] sm:$0xff]  ;;  %v1245_v13 = vld [vmem:[%s10039_s26 + $0xd0] sm:$0xff] }
  0x18   : > { %v1247_v14 = vld [vmem:[%s10039_s26 + $0xe0] sm:$0xff]  ;;  %1244 = vst [vmem:[%s10044_s27 + $0x60] sm:$0xff] %v1243_v12  ;;  %1246 = vst [vmem:[%s10044_s27 + $0x68] sm:$0xff] %v1245_v13  ;;  %v1249_v15 = vld [vmem:[%s10039_s26 + $0xf0] sm:$0xff] }
  0x19   : > { %1248 = vst [vmem:[%s10044_s27 + $0x70] sm:$0xff] %v1247_v14  ;;  %v1251_v16 = vld [vmem:[%s10039_s26 + $0x100] sm:$0xff]  ;;  %v1253_v17 = vld [vmem:[%s10039_s26 + $0x110] sm:$0xff]  ;;  %1250 = vst [vmem:[%s10044_s27 + $0x78] sm:$0xff] %v1249_v15 }
  0x1a   : > { %1252 = vst [vmem:[%s10044_s27 + $0x80] sm:$0xff] %v1251_v16  ;;  %1254 = vst [vmem:[%s10044_s27 + $0x88] sm:$0xff] %v1253_v17  ;;  %v1255_v18 = vld [vmem:[%s10039_s26 + $0x120] sm:$0xff]  ;;  %v1257_v19 = vld [vmem:[%s10039_s26 + $0x130] sm:$0xff] }
  0x1b   : > { %v1259_v20 = vld [vmem:[%s10039_s26 + $0x140] sm:$0xff]  ;;  %1256 = vst [vmem:[%s10044_s27 + $0x90] sm:$0xff] %v1255_v18  ;;  %1258 = vst [vmem:[%s10044_s27 + $0x98] sm:$0xff] %v1257_v19  ;;  %v1261_v21 = vld [vmem:[%s10039_s26 + $0x150] sm:$0xff] }
  0x1c   : > { %1260 = vst [vmem:[%s10044_s27 + $0xa0] sm:$0xff] %v1259_v20  ;;  %v1263_v22 = vld [vmem:[%s10039_s26 + $0x160] sm:$0xff]  ;;  %v1265_v23 = vld [vmem:[%s10039_s26 + $0x170] sm:$0xff]  ;;  %1262 = vst [vmem:[%s10044_s27 + $0xa8] sm:$0xff] %v1261_v21 }
  0x1d   : > { %1264 = vst [vmem:[%s10044_s27 + $0xb0] sm:$0xff] %v1263_v22  ;;  %1266 = vst [vmem:[%s10044_s27 + $0xb8] sm:$0xff] %v1265_v23  ;;  %v1267_v24 = vld [vmem:[%s10039_s26 + $0x180] sm:$0xff]  ;;  %v1269_v25 = vld [vmem:[%s10039_s26 + $0x190] sm:$0xff] }
  0x1e   : > { %v1271_v26 = vld [vmem:[%s10039_s26 + $0x1a0] sm:$0xff]  ;;  %1268 = vst [vmem:[%s10044_s27 + $0xc0] sm:$0xff] %v1267_v24  ;;  %1270 = vst [vmem:[%s10044_s27 + $0xc8] sm:$0xff] %v1269_v25  ;;  %v1273_v27 = vld [vmem:[%s10039_s26 + $0x1b0] sm:$0xff] }
  0x1f   : > { %1272 = vst [vmem:[%s10044_s27 + $0xd0] sm:$0xff] %v1271_v26  ;;  %v1275_v28 = vld [vmem:[%s10039_s26 + $0x1c0] sm:$0xff]  ;;  %v1277_v29 = vld [vmem:[%s10039_s26 + $0x1d0] sm:$0xff]  ;;  %1274 = vst [vmem:[%s10044_s27 + $0xd8] sm:$0xff] %v1273_v27 }
  0x20   : > { %1276 = vst [vmem:[%s10044_s27 + $0xe0] sm:$0xff] %v1275_v28  ;;  %1278 = vst [vmem:[%s10044_s27 + $0xe8] sm:$0xff] %v1277_v29  ;;  %v1279_v30 = vld [vmem:[%s10039_s26 + $0x1e0] sm:$0xff]  ;;  %v1281_v31 = vld [vmem:[%s10039_s26 + $0x1f0] sm:$0xff] }
  0x21   : > { %v1283_v32 = vld [vmem:[%s10039_s26 + $0x200] sm:$0xff]  ;;  %1280 = vst [vmem:[%s10044_s27 + $0xf0] sm:$0xff] %v1279_v30  ;;  %1282 = vst [vmem:[%s10044_s27 + $0xf8] sm:$0xff] %v1281_v31  ;;  %v1285_v33 = vld [vmem:[%s10039_s26 + $0x210] sm:$0xff] }
  0x22   : > { %1284 = vst [vmem:[%s10044_s27 + $0x100] sm:$0xff] %v1283_v32  ;;  %v1287_v34 = vld [vmem:[%s10039_s26 + $0x220] sm:$0xff]  ;;  %v1289_v35 = vld [vmem:[%s10039_s26 + $0x230] sm:$0xff]  ;;  %1286 = vst [vmem:[%s10044_s27 + $0x108] sm:$0xff] %v1285_v33 }
  0x23   : > { %1288 = vst [vmem:[%s10044_s27 + $0x110] sm:$0xff] %v1287_v34  ;;  %1290 = vst [vmem:[%s10044_s27 + $0x118] sm:$0xff] %v1289_v35  ;;  %v1291_v36 = vld [vmem:[%s10039_s26 + $0x240] sm:$0xff]  ;;  %v1293_v37 = vld [vmem:[%s10039_s26 + $0x250] sm:$0xff] }
  0x24   : > { %v1295_v38 = vld [vmem:[%s10039_s26 + $0x260] sm:$0xff]  ;;  %1292 = vst [vmem:[%s10044_s27 + $0x120] sm:$0xff] %v1291_v36  ;;  %1294 = vst [vmem:[%s10044_s27 + $0x128] sm:$0xff] %v1293_v37  ;;  %v1297_v39 = vld [vmem:[%s10039_s26 + $0x270] sm:$0xff] }
  0x25   : > { %1296 = vst [vmem:[%s10044_s27 + $0x130] sm:$0xff] %v1295_v38  ;;  %v1299_v40 = vld [vmem:[%s10039_s26 + $0x280] sm:$0xff]  ;;  %v1301_v41 = vld [vmem:[%s10039_s26 + $0x290] sm:$0xff]  ;;  %1298 = vst [vmem:[%s10044_s27 + $0x138] sm:$0xff] %v1297_v39 }
  0x26   : > { %1300 = vst [vmem:[%s10044_s27 + $0x140] sm:$0xff] %v1299_v40  ;;  %1302 = vst [vmem:[%s10044_s27 + $0x148] sm:$0xff] %v1301_v41  ;;  %v1303_v42 = vld [vmem:[%s10039_s26 + $0x2a0] sm:$0xff]  ;;  %v1305_v43 = vld [vmem:[%s10039_s26 + $0x2b0] sm:$0xff] }
  0x27   : > { %v1307_v44 = vld [vmem:[%s10039_s26 + $0x2c0] sm:$0xff]  ;;  %1304 = vst [vmem:[%s10044_s27 + $0x150] sm:$0xff] %v1303_v42  ;;  %1306 = vst [vmem:[%s10044_s27 + $0x158] sm:$0xff] %v1305_v43  ;;  %v1309_v45 = vld [vmem:[%s10039_s26 + $0x2d0] sm:$0xff] }
  0x28   : > { %1308 = vst [vmem:[%s10044_s27 + $0x160] sm:$0xff] %v1307_v44  ;;  %v1311_v46 = vld [vmem:[%s10039_s26 + $0x2e0] sm:$0xff]  ;;  %v1313_v47 = vld [vmem:[%s10039_s26 + $0x2f0] sm:$0xff]  ;;  %1310 = vst [vmem:[%s10044_s27 + $0x168] sm:$0xff] %v1309_v45 }
  0x29   : > { %1312 = vst [vmem:[%s10044_s27 + $0x170] sm:$0xff] %v1311_v46  ;;  %1314 = vst [vmem:[%s10044_s27 + $0x178] sm:$0xff] %v1313_v47  ;;  %v1315_v48 = vld [vmem:[%s10039_s26 + $0x300] sm:$0xff]  ;;  %v1317_v49 = vld [vmem:[%s10039_s26 + $0x310] sm:$0xff] }
  0x2a   : > { %v1319_v50 = vld [vmem:[%s10039_s26 + $0x320] sm:$0xff]  ;;  %1316 = vst [vmem:[%s10044_s27 + $0x180] sm:$0xff] %v1315_v48  ;;  %1318 = vst [vmem:[%s10044_s27 + $0x188] sm:$0xff] %v1317_v49  ;;  %v1321_v51 = vld [vmem:[%s10039_s26 + $0x330] sm:$0xff] }
  0x2b   : > { %1320 = vst [vmem:[%s10044_s27 + $0x190] sm:$0xff] %v1319_v50  ;;  %v1323_v52 = vld [vmem:[%s10039_s26 + $0x340] sm:$0xff]  ;;  %v1325_v53 = vld [vmem:[%s10039_s26 + $0x350] sm:$0xff]  ;;  %1322 = vst [vmem:[%s10044_s27 + $0x198] sm:$0xff] %v1321_v51 }
  0x2c   : > { %1324 = vst [vmem:[%s10044_s27 + $0x1a0] sm:$0xff] %v1323_v52  ;;  %1326 = vst [vmem:[%s10044_s27 + $0x1a8] sm:$0xff] %v1325_v53  ;;  %v1327_v54 = vld [vmem:[%s10039_s26 + $0x360] sm:$0xff]  ;;  %v1329_v55 = vld [vmem:[%s10039_s26 + $0x370] sm:$0xff] }
  0x2d   : > { %v1331_v56 = vld [vmem:[%s10039_s26 + $0x380] sm:$0xff]  ;;  %1328 = vst [vmem:[%s10044_s27 + $0x1b0] sm:$0xff] %v1327_v54  ;;  %1330 = vst [vmem:[%s10044_s27 + $0x1b8] sm:$0xff] %v1329_v55  ;;  %v1333_v57 = vld [vmem:[%s10039_s26 + $0x390] sm:$0xff] }
  0x2e   : > { %1332 = vst [vmem:[%s10044_s27 + $0x1c0] sm:$0xff] %v1331_v56  ;;  %v1335_v58 = vld [vmem:[%s10039_s26 + $0x3a0] sm:$0xff]  ;;  %v1337_v59 = vld [vmem:[%s10039_s26 + $0x3b0] sm:$0xff]  ;;  %1334 = vst [vmem:[%s10044_s27 + $0x1c8] sm:$0xff] %v1333_v57 }
  0x2f   : > { %1336 = vst [vmem:[%s10044_s27 + $0x1d0] sm:$0xff] %v1335_v58  ;;  %1338 = vst [vmem:[%s10044_s27 + $0x1d8] sm:$0xff] %v1337_v59  ;;  %v1339_v60 = vld [vmem:[%s10039_s26 + $0x3c0] sm:$0xff]  ;;  %v1341_v61 = vld [vmem:[%s10039_s26 + $0x3d0] sm:$0xff] }
  0x30   : > { %v1343_v62 = vld [vmem:[%s10039_s26 + $0x3e0] sm:$0xff]  ;;  %1340 = vst [vmem:[%s10044_s27 + $0x1e0] sm:$0xff] %v1339_v60  ;;  %1342 = vst [vmem:[%s10044_s27 + $0x1e8] sm:$0xff] %v1341_v61  ;;  %v1345_v63 = vld [vmem:[%s10039_s26 + $0x3f0] sm:$0xff] }
  0x31   : > { %1344 = vst [vmem:[%s10044_s27 + $0x1f0] sm:$0xff] %v1343_v62  ;;  %v1347_v0 = vld [vmem:[%s10039_s26 + $0x400] sm:$0xff]  ;;  %v1349_v1 = vld [vmem:[%s10039_s26 + $0x410] sm:$0xff]  ;;  %1346 = vst [vmem:[%s10044_s27 + $0x1f8] sm:$0xff] %v1345_v63 }
  0x32   : > { %1348 = vst [vmem:[%s10044_s27 + $0x200] sm:$0xff] %v1347_v0  ;;  %1350 = vst [vmem:[%s10044_s27 + $0x208] sm:$0xff] %v1349_v1  ;;  %v1351_v2 = vld [vmem:[%s10039_s26 + $0x420] sm:$0xff]  ;;  %v1353_v3 = vld [vmem:[%s10039_s26 + $0x430] sm:$0xff] }
  0x33   : > { %v1355_v4 = vld [vmem:[%s10039_s26 + $0x440] sm:$0xff]  ;;  %1352 = vst [vmem:[%s10044_s27 + $0x210] sm:$0xff] %v1351_v2  ;;  %1354 = vst [vmem:[%s10044_s27 + $0x218] sm:$0xff] %v1353_v3  ;;  %v1357_v5 = vld [vmem:[%s10039_s26 + $0x450] sm:$0xff] }
  0x34   : > { %1356 = vst [vmem:[%s10044_s27 + $0x220] sm:$0xff] %v1355_v4  ;;  %v1359_v6 = vld [vmem:[%s10039_s26 + $0x460] sm:$0xff]  ;;  %v1361_v7 = vld [vmem:[%s10039_s26 + $0x470] sm:$0xff]  ;;  %1358 = vst [vmem:[%s10044_s27 + $0x228] sm:$0xff] %v1357_v5 }
  0x35   : > { %1360 = vst [vmem:[%s10044_s27 + $0x230] sm:$0xff] %v1359_v6  ;;  %1362 = vst [vmem:[%s10044_s27 + $0x238] sm:$0xff] %v1361_v7  ;;  %v1363_v8 = vld [vmem:[%s10039_s26 + $0x480] sm:$0xff]  ;;  %v1365_v9 = vld [vmem:[%s10039_s26 + $0x490] sm:$0xff] }
  0x36   : > { %v1367_v10 = vld [vmem:[%s10039_s26 + $0x4a0] sm:$0xff]  ;;  %1364 = vst [vmem:[%s10044_s27 + $0x240] sm:$0xff] %v1363_v8  ;;  %1366 = vst [vmem:[%s10044_s27 + $0x248] sm:$0xff] %v1365_v9  ;;  %v1369_v11 = vld [vmem:[%s10039_s26 + $0x4b0] sm:$0xff] }
  0x37   : > { %1368 = vst [vmem:[%s10044_s27 + $0x250] sm:$0xff] %v1367_v10  ;;  %v1371_v12 = vld [vmem:[%s10039_s26 + $0x4c0] sm:$0xff]  ;;  %v1373_v13 = vld [vmem:[%s10039_s26 + $0x4d0] sm:$0xff]  ;;  %1370 = vst [vmem:[%s10044_s27 + $0x258] sm:$0xff] %v1369_v11 }
  0x38   : > { %1372 = vst [vmem:[%s10044_s27 + $0x260] sm:$0xff] %v1371_v12  ;;  %1374 = vst [vmem:[%s10044_s27 + $0x268] sm:$0xff] %v1373_v13  ;;  %v1375_v14 = vld [vmem:[%s10039_s26 + $0x4e0] sm:$0xff]  ;;  %v1377_v15 = vld [vmem:[%s10039_s26 + $0x4f0] sm:$0xff] }
  0x39   : > { %v1379_v16 = vld [vmem:[%s10039_s26 + $0x500] sm:$0xff]  ;;  %1376 = vst [vmem:[%s10044_s27 + $0x270] sm:$0xff] %v1375_v14  ;;  %1378 = vst [vmem:[%s10044_s27 + $0x278] sm:$0xff] %v1377_v15  ;;  %v1381_v17 = vld [vmem:[%s10039_s26 + $0x510] sm:$0xff] }
  0x3a   : > { %1380 = vst [vmem:[%s10044_s27 + $0x280] sm:$0xff] %v1379_v16  ;;  %v1383_v18 = vld [vmem:[%s10039_s26 + $0x520] sm:$0xff]  ;;  %v1385_v19 = vld [vmem:[%s10039_s26 + $0x530] sm:$0xff]  ;;  %1382 = vst [vmem:[%s10044_s27 + $0x288] sm:$0xff] %v1381_v17 }
  0x3b   : > { %1384 = vst [vmem:[%s10044_s27 + $0x290] sm:$0xff] %v1383_v18  ;;  %1386 = vst [vmem:[%s10044_s27 + $0x298] sm:$0xff] %v1385_v19  ;;  %v1387_v20 = vld [vmem:[%s10039_s26 + $0x540] sm:$0xff]  ;;  %v1389_v21 = vld [vmem:[%s10039_s26 + $0x550] sm:$0xff] }
  0x3c   : > { %v1391_v22 = vld [vmem:[%s10039_s26 + $0x560] sm:$0xff]  ;;  %1388 = vst [vmem:[%s10044_s27 + $0x2a0] sm:$0xff] %v1387_v20  ;;  %1390 = vst [vmem:[%s10044_s27 + $0x2a8] sm:$0xff] %v1389_v21  ;;  %v1393_v23 = vld [vmem:[%s10039_s26 + $0x570] sm:$0xff] }
  0x3d   : > { %1392 = vst [vmem:[%s10044_s27 + $0x2b0] sm:$0xff] %v1391_v22  ;;  %v1395_v24 = vld [vmem:[%s10039_s26 + $0x580] sm:$0xff]  ;;  %v1397_v25 = vld [vmem:[%s10039_s26 + $0x590] sm:$0xff]  ;;  %1394 = vst [vmem:[%s10044_s27 + $0x2b8] sm:$0xff] %v1393_v23 }
  0x3e   : > { %1396 = vst [vmem:[%s10044_s27 + $0x2c0] sm:$0xff] %v1395_v24  ;;  %1398 = vst [vmem:[%s10044_s27 + $0x2c8] sm:$0xff] %v1397_v25  ;;  %v1399_v26 = vld [vmem:[%s10039_s26 + $0x5a0] sm:$0xff]  ;;  %v1401_v27 = vld [vmem:[%s10039_s26 + $0x5b0] sm:$0xff] }
  0x3f   : > { %v1403_v28 = vld [vmem:[%s10039_s26 + $0x5c0] sm:$0xff]  ;;  %1400 = vst [vmem:[%s10044_s27 + $0x2d0] sm:$0xff] %v1399_v26  ;;  %1402 = vst [vmem:[%s10044_s27 + $0x2d8] sm:$0xff] %v1401_v27  ;;  %v1405_v29 = vld [vmem:[%s10039_s26 + $0x5d0] sm:$0xff] }
  0x40   : > { %1404 = vst [vmem:[%s10044_s27 + $0x2e0] sm:$0xff] %v1403_v28  ;;  %v1407_v30 = vld [vmem:[%s10039_s26 + $0x5e0] sm:$0xff]  ;;  %v1409_v31 = vld [vmem:[%s10039_s26 + $0x5f0] sm:$0xff]  ;;  %1406 = vst [vmem:[%s10044_s27 + $0x2e8] sm:$0xff] %v1405_v29 }
  0x41   : > { %1408 = vst [vmem:[%s10044_s27 + $0x2f0] sm:$0xff] %v1407_v30  ;;  %1410 = vst [vmem:[%s10044_s27 + $0x2f8] sm:$0xff] %v1409_v31  ;;  %v1411_v32 = vld [vmem:[%s10039_s26 + $0x600] sm:$0xff]  ;;  %v1413_v33 = vld [vmem:[%s10039_s26 + $0x610] sm:$0xff] }
  0x42   : > { %v1415_v34 = vld [vmem:[%s10039_s26 + $0x620] sm:$0xff]  ;;  %1412 = vst [vmem:[%s10044_s27 + $0x300] sm:$0xff] %v1411_v32  ;;  %1414 = vst [vmem:[%s10044_s27 + $0x308] sm:$0xff] %v1413_v33  ;;  %v1417_v35 = vld [vmem:[%s10039_s26 + $0x630] sm:$0xff] }
  0x43   : > { %1416 = vst [vmem:[%s10044_s27 + $0x310] sm:$0xff] %v1415_v34  ;;  %v1419_v36 = vld [vmem:[%s10039_s26 + $0x640] sm:$0xff]  ;;  %v1421_v37 = vld [vmem:[%s10039_s26 + $0x650] sm:$0xff]  ;;  %1418 = vst [vmem:[%s10044_s27 + $0x318] sm:$0xff] %v1417_v35 }
  0x44   : > { %1420 = vst [vmem:[%s10044_s27 + $0x320] sm:$0xff] %v1419_v36  ;;  %1422 = vst [vmem:[%s10044_s27 + $0x328] sm:$0xff] %v1421_v37  ;;  %v1423_v38 = vld [vmem:[%s10039_s26 + $0x660] sm:$0xff]  ;;  %v1425_v39 = vld [vmem:[%s10039_s26 + $0x670] sm:$0xff] }
  0x45   : > { %v1427_v40 = vld [vmem:[%s10039_s26 + $0x680] sm:$0xff]  ;;  %1424 = vst [vmem:[%s10044_s27 + $0x330] sm:$0xff] %v1423_v38  ;;  %1426 = vst [vmem:[%s10044_s27 + $0x338] sm:$0xff] %v1425_v39  ;;  %v1429_v41 = vld [vmem:[%s10039_s26 + $0x690] sm:$0xff] }
  0x46   : > { %1428 = vst [vmem:[%s10044_s27 + $0x340] sm:$0xff] %v1427_v40  ;;  %v1431_v42 = vld [vmem:[%s10039_s26 + $0x6a0] sm:$0xff]  ;;  %v1433_v43 = vld [vmem:[%s10039_s26 + $0x6b0] sm:$0xff]  ;;  %1430 = vst [vmem:[%s10044_s27 + $0x348] sm:$0xff] %v1429_v41 }
  0x47   : > { %1432 = vst [vmem:[%s10044_s27 + $0x350] sm:$0xff] %v1431_v42  ;;  %1434 = vst [vmem:[%s10044_s27 + $0x358] sm:$0xff] %v1433_v43  ;;  %v1435_v44 = vld [vmem:[%s10039_s26 + $0x6c0] sm:$0xff]  ;;  %v1437_v45 = vld [vmem:[%s10039_s26 + $0x6d0] sm:$0xff] }
  0x48   : > { %v1439_v46 = vld [vmem:[%s10039_s26 + $0x6e0] sm:$0xff]  ;;  %1436 = vst [vmem:[%s10044_s27 + $0x360] sm:$0xff] %v1435_v44  ;;  %1438 = vst [vmem:[%s10044_s27 + $0x368] sm:$0xff] %v1437_v45  ;;  %v1441_v47 = vld [vmem:[%s10039_s26 + $0x6f0] sm:$0xff] }
  0x49   : > { %1440 = vst [vmem:[%s10044_s27 + $0x370] sm:$0xff] %v1439_v46  ;;  %v1443_v48 = vld [vmem:[%s10039_s26 + $0x700] sm:$0xff]  ;;  %v1445_v49 = vld [vmem:[%s10039_s26 + $0x710] sm:$0xff]  ;;  %1442 = vst [vmem:[%s10044_s27 + $0x378] sm:$0xff] %v1441_v47 }
  0x4a   : > { %1444 = vst [vmem:[%s10044_s27 + $0x380] sm:$0xff] %v1443_v48  ;;  %1446 = vst [vmem:[%s10044_s27 + $0x388] sm:$0xff] %v1445_v49  ;;  %v1447_v50 = vld [vmem:[%s10039_s26 + $0x720] sm:$0xff]  ;;  %v1449_v51 = vld [vmem:[%s10039_s26 + $0x730] sm:$0xff] }
  0x4b   : > { %v1451_v52 = vld [vmem:[%s10039_s26 + $0x740] sm:$0xff]  ;;  %1448 = vst [vmem:[%s10044_s27 + $0x390] sm:$0xff] %v1447_v50  ;;  %1450 = vst [vmem:[%s10044_s27 + $0x398] sm:$0xff] %v1449_v51  ;;  %v1453_v53 = vld [vmem:[%s10039_s26 + $0x750] sm:$0xff] }
  0x4c   : > { %1452 = vst [vmem:[%s10044_s27 + $0x3a0] sm:$0xff] %v1451_v52  ;;  %v1455_v54 = vld [vmem:[%s10039_s26 + $0x760] sm:$0xff]  ;;  %v1457_v55 = vld [vmem:[%s10039_s26 + $0x770] sm:$0xff]  ;;  %1454 = vst [vmem:[%s10044_s27 + $0x3a8] sm:$0xff] %v1453_v53 }
  0x4d   : > { %1456 = vst [vmem:[%s10044_s27 + $0x3b0] sm:$0xff] %v1455_v54  ;;  %1458 = vst [vmem:[%s10044_s27 + $0x3b8] sm:$0xff] %v1457_v55  ;;  %v1459_v56 = vld [vmem:[%s10039_s26 + $0x780] sm:$0xff]  ;;  %v1461_v57 = vld [vmem:[%s10039_s26 + $0x790] sm:$0xff] }
  0x4e   : > { %v1463_v58 = vld [vmem:[%s10039_s26 + $0x7a0] sm:$0xff]  ;;  %1460 = vst [vmem:[%s10044_s27 + $0x3c0] sm:$0xff] %v1459_v56  ;;  %1462 = vst [vmem:[%s10044_s27 + $0x3c8] sm:$0xff] %v1461_v57  ;;  %v1465_v59 = vld [vmem:[%s10039_s26 + $0x7b0] sm:$0xff] }
  0x4f   : > { %1464 = vst [vmem:[%s10044_s27 + $0x3d0] sm:$0xff] %v1463_v58  ;;  %v1467_v60 = vld [vmem:[%s10039_s26 + $0x7c0] sm:$0xff]  ;;  %v1469_v61 = vld [vmem:[%s10039_s26 + $0x7d0] sm:$0xff]  ;;  %1466 = vst [vmem:[%s10044_s27 + $0x3d8] sm:$0xff] %v1465_v59 }
  0x50   : > { %1468 = vst [vmem:[%s10044_s27 + $0x3e0] sm:$0xff] %v1467_v60  ;;  %1470 = vst [vmem:[%s10044_s27 + $0x3e8] sm:$0xff] %v1469_v61  ;;  %v1471_v62 = vld [vmem:[%s10039_s26 + $0x7e0] sm:$0xff]  ;;  %v1473_v63 = vld [vmem:[%s10039_s26 + $0x7f0] sm:$0xff] }
  0x51   : > { %v1475_v0 = vld [vmem:[%s10039_s26 + $0x800] sm:$0xff]  ;;  %1472 = vst [vmem:[%s10044_s27 + $0x3f0] sm:$0xff] %v1471_v62  ;;  %1474 = vst [vmem:[%s10044_s27 + $0x3f8] sm:$0xff] %v1473_v63  ;;  %v1477_v1 = vld [vmem:[%s10039_s26 + $0x810] sm:$0xff] }
  0x52   : > { %1476 = vst [vmem:[%s10044_s27 + $0x400] sm:$0xff] %v1475_v0  ;;  %v1479_v2 = vld [vmem:[%s10039_s26 + $0x820] sm:$0xff]  ;;  %v1481_v3 = vld [vmem:[%s10039_s26 + $0x830] sm:$0xff]  ;;  %1478 = vst [vmem:[%s10044_s27 + $0x408] sm:$0xff] %v1477_v1 }
  0x53   : > { %1480 = vst [vmem:[%s10044_s27 + $0x410] sm:$0xff] %v1479_v2  ;;  %1482 = vst [vmem:[%s10044_s27 + $0x418] sm:$0xff] %v1481_v3  ;;  %v1483_v4 = vld [vmem:[%s10039_s26 + $0x840] sm:$0xff]  ;;  %v1485_v5 = vld [vmem:[%s10039_s26 + $0x850] sm:$0xff] }
  0x54   : > { %v1487_v6 = vld [vmem:[%s10039_s26 + $0x860] sm:$0xff]  ;;  %1484 = vst [vmem:[%s10044_s27 + $0x420] sm:$0xff] %v1483_v4  ;;  %1486 = vst [vmem:[%s10044_s27 + $0x428] sm:$0xff] %v1485_v5  ;;  %v1489_v7 = vld [vmem:[%s10039_s26 + $0x870] sm:$0xff] }
  0x55   : > { %1488 = vst [vmem:[%s10044_s27 + $0x430] sm:$0xff] %v1487_v6  ;;  %v1491_v8 = vld [vmem:[%s10039_s26 + $0x880] sm:$0xff]  ;;  %v1493_v9 = vld [vmem:[%s10039_s26 + $0x890] sm:$0xff]  ;;  %1490 = vst [vmem:[%s10044_s27 + $0x438] sm:$0xff] %v1489_v7 }
  0x56   : > { %1492 = vst [vmem:[%s10044_s27 + $0x440] sm:$0xff] %v1491_v8  ;;  %1494 = vst [vmem:[%s10044_s27 + $0x448] sm:$0xff] %v1493_v9  ;;  %v1495_v10 = vld [vmem:[%s10039_s26 + $0x8a0] sm:$0xff]  ;;  %v1497_v11 = vld [vmem:[%s10039_s26 + $0x8b0] sm:$0xff] }
  0x57   : > { %v1499_v12 = vld [vmem:[%s10039_s26 + $0x8c0] sm:$0xff]  ;;  %1496 = vst [vmem:[%s10044_s27 + $0x450] sm:$0xff] %v1495_v10  ;;  %1498 = vst [vmem:[%s10044_s27 + $0x458] sm:$0xff] %v1497_v11  ;;  %v1501_v13 = vld [vmem:[%s10039_s26 + $0x8d0] sm:$0xff] }
  0x58   : > { %1500 = vst [vmem:[%s10044_s27 + $0x460] sm:$0xff] %v1499_v12  ;;  %v1503_v14 = vld [vmem:[%s10039_s26 + $0x8e0] sm:$0xff]  ;;  %v1505_v15 = vld [vmem:[%s10039_s26 + $0x8f0] sm:$0xff]  ;;  %1502 = vst [vmem:[%s10044_s27 + $0x468] sm:$0xff] %v1501_v13 }
  0x59   : > { %1504 = vst [vmem:[%s10044_s27 + $0x470] sm:$0xff] %v1503_v14  ;;  %1506 = vst [vmem:[%s10044_s27 + $0x478] sm:$0xff] %v1505_v15  ;;  %v1507_v16 = vld [vmem:[%s10039_s26 + $0x900] sm:$0xff]  ;;  %v1509_v17 = vld [vmem:[%s10039_s26 + $0x910] sm:$0xff] }
  0x5a   : > { %v1511_v18 = vld [vmem:[%s10039_s26 + $0x920] sm:$0xff]  ;;  %1508 = vst [vmem:[%s10044_s27 + $0x480] sm:$0xff] %v1507_v16  ;;  %1510 = vst [vmem:[%s10044_s27 + $0x488] sm:$0xff] %v1509_v17  ;;  %v1513_v19 = vld [vmem:[%s10039_s26 + $0x930] sm:$0xff] }
  0x5b   : > { %1512 = vst [vmem:[%s10044_s27 + $0x490] sm:$0xff] %v1511_v18  ;;  %v1515_v20 = vld [vmem:[%s10039_s26 + $0x940] sm:$0xff]  ;;  %v1517_v21 = vld [vmem:[%s10039_s26 + $0x950] sm:$0xff]  ;;  %1514 = vst [vmem:[%s10044_s27 + $0x498] sm:$0xff] %v1513_v19 }
  0x5c   : > { %1516 = vst [vmem:[%s10044_s27 + $0x4a0] sm:$0xff] %v1515_v20  ;;  %1518 = vst [vmem:[%s10044_s27 + $0x4a8] sm:$0xff] %v1517_v21  ;;  %v1519_v22 = vld [vmem:[%s10039_s26 + $0x960] sm:$0xff]  ;;  %v1521_v23 = vld [vmem:[%s10039_s26 + $0x970] sm:$0xff] }
  0x5d   : > { %v1523_v24 = vld [vmem:[%s10039_s26 + $0x980] sm:$0xff]  ;;  %1520 = vst [vmem:[%s10044_s27 + $0x4b0] sm:$0xff] %v1519_v22  ;;  %1522 = vst [vmem:[%s10044_s27 + $0x4b8] sm:$0xff] %v1521_v23  ;;  %v1525_v25 = vld [vmem:[%s10039_s26 + $0x990] sm:$0xff] }
  0x5e   : > { %1524 = vst [vmem:[%s10044_s27 + $0x4c0] sm:$0xff] %v1523_v24  ;;  %v1527_v26 = vld [vmem:[%s10039_s26 + $0x9a0] sm:$0xff]  ;;  %v1529_v27 = vld [vmem:[%s10039_s26 + $0x9b0] sm:$0xff]  ;;  %1526 = vst [vmem:[%s10044_s27 + $0x4c8] sm:$0xff] %v1525_v25 }
  0x5f   : > { %1528 = vst [vmem:[%s10044_s27 + $0x4d0] sm:$0xff] %v1527_v26  ;;  %1530 = vst [vmem:[%s10044_s27 + $0x4d8] sm:$0xff] %v1529_v27  ;;  %v1531_v28 = vld [vmem:[%s10039_s26 + $0x9c0] sm:$0xff]  ;;  %v1533_v29 = vld [vmem:[%s10039_s26 + $0x9d0] sm:$0xff] }
  0x60   : > { %v1535_v30 = vld [vmem:[%s10039_s26 + $0x9e0] sm:$0xff]  ;;  %1532 = vst [vmem:[%s10044_s27 + $0x4e0] sm:$0xff] %v1531_v28  ;;  %1534 = vst [vmem:[%s10044_s27 + $0x4e8] sm:$0xff] %v1533_v29  ;;  %v1537_v31 = vld [vmem:[%s10039_s26 + $0x9f0] sm:$0xff] }
  0x61   : > { %1536 = vst [vmem:[%s10044_s27 + $0x4f0] sm:$0xff] %v1535_v30  ;;  %v1539_v32 = vld [vmem:[%s10039_s26 + $0xa00] sm:$0xff]  ;;  %v1541_v33 = vld [vmem:[%s10039_s26 + $0xa10] sm:$0xff]  ;;  %1538 = vst [vmem:[%s10044_s27 + $0x4f8] sm:$0xff] %v1537_v31 }
  0x62   : > { %1540 = vst [vmem:[%s10044_s27 + $0x500] sm:$0xff] %v1539_v32  ;;  %1542 = vst [vmem:[%s10044_s27 + $0x508] sm:$0xff] %v1541_v33  ;;  %v1543_v34 = vld [vmem:[%s10039_s26 + $0xa20] sm:$0xff]  ;;  %v1545_v35 = vld [vmem:[%s10039_s26 + $0xa30] sm:$0xff] }
  0x63   : > { %v1547_v36 = vld [vmem:[%s10039_s26 + $0xa40] sm:$0xff]  ;;  %1544 = vst [vmem:[%s10044_s27 + $0x510] sm:$0xff] %v1543_v34  ;;  %1546 = vst [vmem:[%s10044_s27 + $0x518] sm:$0xff] %v1545_v35  ;;  %v1549_v37 = vld [vmem:[%s10039_s26 + $0xa50] sm:$0xff] }
  0x64   : > { %1548 = vst [vmem:[%s10044_s27 + $0x520] sm:$0xff] %v1547_v36  ;;  %v1551_v38 = vld [vmem:[%s10039_s26 + $0xa60] sm:$0xff]  ;;  %v1553_v39 = vld [vmem:[%s10039_s26 + $0xa70] sm:$0xff]  ;;  %1550 = vst [vmem:[%s10044_s27 + $0x528] sm:$0xff] %v1549_v37 }
  0x65   : > { %1552 = vst [vmem:[%s10044_s27 + $0x530] sm:$0xff] %v1551_v38  ;;  %1554 = vst [vmem:[%s10044_s27 + $0x538] sm:$0xff] %v1553_v39  ;;  %v1555_v40 = vld [vmem:[%s10039_s26 + $0xa80] sm:$0xff]  ;;  %v1557_v41 = vld [vmem:[%s10039_s26 + $0xa90] sm:$0xff] }
  0x66   : > { %v1559_v42 = vld [vmem:[%s10039_s26 + $0xaa0] sm:$0xff]  ;;  %1556 = vst [vmem:[%s10044_s27 + $0x540] sm:$0xff] %v1555_v40  ;;  %1558 = vst [vmem:[%s10044_s27 + $0x548] sm:$0xff] %v1557_v41  ;;  %v1561_v43 = vld [vmem:[%s10039_s26 + $0xab0] sm:$0xff] }
  0x67   : > { %1560 = vst [vmem:[%s10044_s27 + $0x550] sm:$0xff] %v1559_v42  ;;  %v1563_v44 = vld [vmem:[%s10039_s26 + $0xac0] sm:$0xff]  ;;  %v1565_v45 = vld [vmem:[%s10039_s26 + $0xad0] sm:$0xff]  ;;  %1562 = vst [vmem:[%s10044_s27 + $0x558] sm:$0xff] %v1561_v43 }
  0x68   : > { %1564 = vst [vmem:[%s10044_s27 + $0x560] sm:$0xff] %v1563_v44  ;;  %1566 = vst [vmem:[%s10044_s27 + $0x568] sm:$0xff] %v1565_v45  ;;  %v1567_v46 = vld [vmem:[%s10039_s26 + $0xae0] sm:$0xff]  ;;  %v1569_v47 = vld [vmem:[%s10039_s26 + $0xaf0] sm:$0xff] }
  0x69   : > { %v1571_v48 = vld [vmem:[%s10039_s26 + $0xb00] sm:$0xff]  ;;  %1568 = vst [vmem:[%s10044_s27 + $0x570] sm:$0xff] %v1567_v46  ;;  %1570 = vst [vmem:[%s10044_s27 + $0x578] sm:$0xff] %v1569_v47  ;;  %v1573_v49 = vld [vmem:[%s10039_s26 + $0xb10] sm:$0xff] }
  0x6a   : > { %1572 = vst [vmem:[%s10044_s27 + $0x580] sm:$0xff] %v1571_v48  ;;  %v1575_v50 = vld [vmem:[%s10039_s26 + $0xb20] sm:$0xff]  ;;  %v1577_v51 = vld [vmem:[%s10039_s26 + $0xb30] sm:$0xff]  ;;  %1574 = vst [vmem:[%s10044_s27 + $0x588] sm:$0xff] %v1573_v49 }
  0x6b   : > { %1576 = vst [vmem:[%s10044_s27 + $0x590] sm:$0xff] %v1575_v50  ;;  %1578 = vst [vmem:[%s10044_s27 + $0x598] sm:$0xff] %v1577_v51  ;;  %v1579_v52 = vld [vmem:[%s10039_s26 + $0xb40] sm:$0xff]  ;;  %v1581_v53 = vld [vmem:[%s10039_s26 + $0xb50] sm:$0xff] }
  0x6c   : > { %v1583_v54 = vld [vmem:[%s10039_s26 + $0xb60] sm:$0xff]  ;;  %1580 = vst [vmem:[%s10044_s27 + $0x5a0] sm:$0xff] %v1579_v52  ;;  %1582 = vst [vmem:[%s10044_s27 + $0x5a8] sm:$0xff] %v1581_v53  ;;  %v1585_v55 = vld [vmem:[%s10039_s26 + $0xb70] sm:$0xff] }
  0x6d   : > { %1584 = vst [vmem:[%s10044_s27 + $0x5b0] sm:$0xff] %v1583_v54  ;;  %v1587_v56 = vld [vmem:[%s10039_s26 + $0xb80] sm:$0xff]  ;;  %v1589_v57 = vld [vmem:[%s10039_s26 + $0xb90] sm:$0xff]  ;;  %1586 = vst [vmem:[%s10044_s27 + $0x5b8] sm:$0xff] %v1585_v55 }
  0x6e   : > { %1588 = vst [vmem:[%s10044_s27 + $0x5c0] sm:$0xff] %v1587_v56  ;;  %1590 = vst [vmem:[%s10044_s27 + $0x5c8] sm:$0xff] %v1589_v57  ;;  %v1591_v58 = vld [vmem:[%s10039_s26 + $0xba0] sm:$0xff]  ;;  %v1593_v59 = vld [vmem:[%s10039_s26 + $0xbb0] sm:$0xff] }
  0x6f   : > { %v1595_v60 = vld [vmem:[%s10039_s26 + $0xbc0] sm:$0xff]  ;;  %1592 = vst [vmem:[%s10044_s27 + $0x5d0] sm:$0xff] %v1591_v58  ;;  %1594 = vst [vmem:[%s10044_s27 + $0x5d8] sm:$0xff] %v1593_v59  ;;  %v1597_v61 = vld [vmem:[%s10039_s26 + $0xbd0] sm:$0xff] }
  0x70   : > { %1596 = vst [vmem:[%s10044_s27 + $0x5e0] sm:$0xff] %v1595_v60  ;;  %v1599_v62 = vld [vmem:[%s10039_s26 + $0xbe0] sm:$0xff]  ;;  %v1601_v63 = vld [vmem:[%s10039_s26 + $0xbf0] sm:$0xff]  ;;  %1598 = vst [vmem:[%s10044_s27 + $0x5e8] sm:$0xff] %v1597_v61 }
  0x71   : > { %1600 = vst [vmem:[%s10044_s27 + $0x5f0] sm:$0xff] %v1599_v62  ;;  %1602 = vst [vmem:[%s10044_s27 + $0x5f8] sm:$0xff] %v1601_v63  ;;  %v1603_v0 = vld [vmem:[%s10039_s26 + $0xc00] sm:$0xff]  ;;  %v1605_v1 = vld [vmem:[%s10039_s26 + $0xc10] sm:$0xff] }
  0x72   : > { %v1607_v2 = vld [vmem:[%s10039_s26 + $0xc20] sm:$0xff]  ;;  %1604 = vst [vmem:[%s10044_s27 + $0x600] sm:$0xff] %v1603_v0  ;;  %1606 = vst [vmem:[%s10044_s27 + $0x608] sm:$0xff] %v1605_v1  ;;  %v1609_v3 = vld [vmem:[%s10039_s26 + $0xc30] sm:$0xff] }
  0x73   : > { %1608 = vst [vmem:[%s10044_s27 + $0x610] sm:$0xff] %v1607_v2  ;;  %v1611_v4 = vld [vmem:[%s10039_s26 + $0xc40] sm:$0xff]  ;;  %v1613_v5 = vld [vmem:[%s10039_s26 + $0xc50] sm:$0xff]  ;;  %1610 = vst [vmem:[%s10044_s27 + $0x618] sm:$0xff] %v1609_v3 }
  0x74   : > { %1612 = vst [vmem:[%s10044_s27 + $0x620] sm:$0xff] %v1611_v4  ;;  %1614 = vst [vmem:[%s10044_s27 + $0x628] sm:$0xff] %v1613_v5  ;;  %v1615_v6 = vld [vmem:[%s10039_s26 + $0xc60] sm:$0xff]  ;;  %v1617_v7 = vld [vmem:[%s10039_s26 + $0xc70] sm:$0xff] }
  0x75   : > { %v1619_v8 = vld [vmem:[%s10039_s26 + $0xc80] sm:$0xff]  ;;  %1616 = vst [vmem:[%s10044_s27 + $0x630] sm:$0xff] %v1615_v6  ;;  %1618 = vst [vmem:[%s10044_s27 + $0x638] sm:$0xff] %v1617_v7  ;;  %v1621_v9 = vld [vmem:[%s10039_s26 + $0xc90] sm:$0xff] }
  0x76   : > { %1620 = vst [vmem:[%s10044_s27 + $0x640] sm:$0xff] %v1619_v8  ;;  %v1623_v10 = vld [vmem:[%s10039_s26 + $0xca0] sm:$0xff]  ;;  %v1625_v11 = vld [vmem:[%s10039_s26 + $0xcb0] sm:$0xff]  ;;  %1622 = vst [vmem:[%s10044_s27 + $0x648] sm:$0xff] %v1621_v9 }
  0x77   : > { %1624 = vst [vmem:[%s10044_s27 + $0x650] sm:$0xff] %v1623_v10  ;;  %1626 = vst [vmem:[%s10044_s27 + $0x658] sm:$0xff] %v1625_v11  ;;  %v1627_v12 = vld [vmem:[%s10039_s26 + $0xcc0] sm:$0xff]  ;;  %v1629_v13 = vld [vmem:[%s10039_s26 + $0xcd0] sm:$0xff] }
  0x78   : > { %v1631_v14 = vld [vmem:[%s10039_s26 + $0xce0] sm:$0xff]  ;;  %1628 = vst [vmem:[%s10044_s27 + $0x660] sm:$0xff] %v1627_v12  ;;  %1630 = vst [vmem:[%s10044_s27 + $0x668] sm:$0xff] %v1629_v13  ;;  %v1633_v15 = vld [vmem:[%s10039_s26 + $0xcf0] sm:$0xff] }
  0x79   : > { %1632 = vst [vmem:[%s10044_s27 + $0x670] sm:$0xff] %v1631_v14  ;;  %v1635_v16 = vld [vmem:[%s10039_s26 + $0xd00] sm:$0xff]  ;;  %v1637_v17 = vld [vmem:[%s10039_s26 + $0xd10] sm:$0xff]  ;;  %1634 = vst [vmem:[%s10044_s27 + $0x678] sm:$0xff] %v1633_v15 }
  0x7a   : > { %1636 = vst [vmem:[%s10044_s27 + $0x680] sm:$0xff] %v1635_v16  ;;  %1638 = vst [vmem:[%s10044_s27 + $0x688] sm:$0xff] %v1637_v17  ;;  %v1639_v18 = vld [vmem:[%s10039_s26 + $0xd20] sm:$0xff]  ;;  %v1641_v19 = vld [vmem:[%s10039_s26 + $0xd30] sm:$0xff] }
  0x7b   : > { %v1643_v20 = vld [vmem:[%s10039_s26 + $0xd40] sm:$0xff]  ;;  %1640 = vst [vmem:[%s10044_s27 + $0x690] sm:$0xff] %v1639_v18  ;;  %1642 = vst [vmem:[%s10044_s27 + $0x698] sm:$0xff] %v1641_v19  ;;  %v1645_v21 = vld [vmem:[%s10039_s26 + $0xd50] sm:$0xff] }
  0x7c   : > { %1644 = vst [vmem:[%s10044_s27 + $0x6a0] sm:$0xff] %v1643_v20  ;;  %v1647_v22 = vld [vmem:[%s10039_s26 + $0xd60] sm:$0xff]  ;;  %v1649_v23 = vld [vmem:[%s10039_s26 + $0xd70] sm:$0xff]  ;;  %1646 = vst [vmem:[%s10044_s27 + $0x6a8] sm:$0xff] %v1645_v21 }
  0x7d   : > { %1648 = vst [vmem:[%s10044_s27 + $0x6b0] sm:$0xff] %v1647_v22  ;;  %1650 = vst [vmem:[%s10044_s27 + $0x6b8] sm:$0xff] %v1649_v23  ;;  %v1651_v24 = vld [vmem:[%s10039_s26 + $0xd80] sm:$0xff]  ;;  %v1653_v25 = vld [vmem:[%s10039_s26 + $0xd90] sm:$0xff] }
  0x7e   : > { %v1655_v26 = vld [vmem:[%s10039_s26 + $0xda0] sm:$0xff]  ;;  %1652 = vst [vmem:[%s10044_s27 + $0x6c0] sm:$0xff] %v1651_v24  ;;  %1654 = vst [vmem:[%s10044_s27 + $0x6c8] sm:$0xff] %v1653_v25  ;;  %v1657_v27 = vld [vmem:[%s10039_s26 + $0xdb0] sm:$0xff] }
  0x7f   : > { %1656 = vst [vmem:[%s10044_s27 + $0x6d0] sm:$0xff] %v1655_v26  ;;  %v1659_v28 = vld [vmem:[%s10039_s26 + $0xdc0] sm:$0xff]  ;;  %v1661_v29 = vld [vmem:[%s10039_s26 + $0xdd0] sm:$0xff]  ;;  %1658 = vst [vmem:[%s10044_s27 + $0x6d8] sm:$0xff] %v1657_v27 }
  0x80   : > { %1660 = vst [vmem:[%s10044_s27 + $0x6e0] sm:$0xff] %v1659_v28  ;;  %1662 = vst [vmem:[%s10044_s27 + $0x6e8] sm:$0xff] %v1661_v29  ;;  %v1663_v30 = vld [vmem:[%s10039_s26 + $0xde0] sm:$0xff]  ;;  %v1665_v31 = vld [vmem:[%s10039_s26 + $0xdf0] sm:$0xff] }
  0x81   : > { %v1667_v32 = vld [vmem:[%s10039_s26 + $0xe00] sm:$0xff]  ;;  %1664 = vst [vmem:[%s10044_s27 + $0x6f0] sm:$0xff] %v1663_v30  ;;  %1666 = vst [vmem:[%s10044_s27 + $0x6f8] sm:$0xff] %v1665_v31  ;;  %v1669_v33 = vld [vmem:[%s10039_s26 + $0xe10] sm:$0xff] }
  0x82   : > { %1668 = vst [vmem:[%s10044_s27 + $0x700] sm:$0xff] %v1667_v32  ;;  %v1671_v34 = vld [vmem:[%s10039_s26 + $0xe20] sm:$0xff]  ;;  %v1673_v35 = vld [vmem:[%s10039_s26 + $0xe30] sm:$0xff]  ;;  %1670 = vst [vmem:[%s10044_s27 + $0x708] sm:$0xff] %v1669_v33 }
  0x83   : > { %1672 = vst [vmem:[%s10044_s27 + $0x710] sm:$0xff] %v1671_v34  ;;  %1674 = vst [vmem:[%s10044_s27 + $0x718] sm:$0xff] %v1673_v35  ;;  %v1675_v36 = vld [vmem:[%s10039_s26 + $0xe40] sm:$0xff]  ;;  %v1677_v37 = vld [vmem:[%s10039_s26 + $0xe50] sm:$0xff] }
  0x84   : > { %v1679_v38 = vld [vmem:[%s10039_s26 + $0xe60] sm:$0xff]  ;;  %1676 = vst [vmem:[%s10044_s27 + $0x720] sm:$0xff] %v1675_v36  ;;  %1678 = vst [vmem:[%s10044_s27 + $0x728] sm:$0xff] %v1677_v37  ;;  %v1681_v39 = vld [vmem:[%s10039_s26 + $0xe70] sm:$0xff] }
  0x85   : > { %1680 = vst [vmem:[%s10044_s27 + $0x730] sm:$0xff] %v1679_v38  ;;  %v1683_v40 = vld [vmem:[%s10039_s26 + $0xe80] sm:$0xff]  ;;  %v1685_v41 = vld [vmem:[%s10039_s26 + $0xe90] sm:$0xff]  ;;  %1682 = vst [vmem:[%s10044_s27 + $0x738] sm:$0xff] %v1681_v39 }
  0x86   : > { %1684 = vst [vmem:[%s10044_s27 + $0x740] sm:$0xff] %v1683_v40  ;;  %1686 = vst [vmem:[%s10044_s27 + $0x748] sm:$0xff] %v1685_v41  ;;  %v1687_v42 = vld [vmem:[%s10039_s26 + $0xea0] sm:$0xff]  ;;  %v1689_v43 = vld [vmem:[%s10039_s26 + $0xeb0] sm:$0xff] }
  0x87   : > { %v1691_v44 = vld [vmem:[%s10039_s26 + $0xec0] sm:$0xff]  ;;  %1688 = vst [vmem:[%s10044_s27 + $0x750] sm:$0xff] %v1687_v42  ;;  %1690 = vst [vmem:[%s10044_s27 + $0x758] sm:$0xff] %v1689_v43  ;;  %v1693_v45 = vld [vmem:[%s10039_s26 + $0xed0] sm:$0xff] }
  0x88   : > { %1692 = vst [vmem:[%s10044_s27 + $0x760] sm:$0xff] %v1691_v44  ;;  %v1695_v46 = vld [vmem:[%s10039_s26 + $0xee0] sm:$0xff]  ;;  %v1697_v47 = vld [vmem:[%s10039_s26 + $0xef0] sm:$0xff]  ;;  %1694 = vst [vmem:[%s10044_s27 + $0x768] sm:$0xff] %v1693_v45 }
  0x89   : > { %1696 = vst [vmem:[%s10044_s27 + $0x770] sm:$0xff] %v1695_v46  ;;  %1698 = vst [vmem:[%s10044_s27 + $0x778] sm:$0xff] %v1697_v47  ;;  %v1699_v48 = vld [vmem:[%s10039_s26 + $0xf00] sm:$0xff]  ;;  %v1701_v49 = vld [vmem:[%s10039_s26 + $0xf10] sm:$0xff] }
  0x8a   : > { %v1703_v50 = vld [vmem:[%s10039_s26 + $0xf20] sm:$0xff]  ;;  %1700 = vst [vmem:[%s10044_s27 + $0x780] sm:$0xff] %v1699_v48  ;;  %1702 = vst [vmem:[%s10044_s27 + $0x788] sm:$0xff] %v1701_v49  ;;  %v1705_v51 = vld [vmem:[%s10039_s26 + $0xf30] sm:$0xff] }
  0x8b   : > { %1704 = vst [vmem:[%s10044_s27 + $0x790] sm:$0xff] %v1703_v50  ;;  %v1707_v52 = vld [vmem:[%s10039_s26 + $0xf40] sm:$0xff]  ;;  %v1709_v53 = vld [vmem:[%s10039_s26 + $0xf50] sm:$0xff]  ;;  %1706 = vst [vmem:[%s10044_s27 + $0x798] sm:$0xff] %v1705_v51 }
  0x8c   : > { %1708 = vst [vmem:[%s10044_s27 + $0x7a0] sm:$0xff] %v1707_v52  ;;  %1710 = vst [vmem:[%s10044_s27 + $0x7a8] sm:$0xff] %v1709_v53  ;;  %v1711_v54 = vld [vmem:[%s10039_s26 + $0xf60] sm:$0xff]  ;;  %v1713_v55 = vld [vmem:[%s10039_s26 + $0xf70] sm:$0xff] }
  0x8d   : > { %v1715_v56 = vld [vmem:[%s10039_s26 + $0xf80] sm:$0xff]  ;;  %1712 = vst [vmem:[%s10044_s27 + $0x7b0] sm:$0xff] %v1711_v54  ;;  %1714 = vst [vmem:[%s10044_s27 + $0x7b8] sm:$0xff] %v1713_v55  ;;  %v1717_v57 = vld [vmem:[%s10039_s26 + $0xf90] sm:$0xff] }
  0x8e   : > { %1716 = vst [vmem:[%s10044_s27 + $0x7c0] sm:$0xff] %v1715_v56  ;;  %v1719_v58 = vld [vmem:[%s10039_s26 + $0xfa0] sm:$0xff]  ;;  %v1721_v59 = vld [vmem:[%s10039_s26 + $0xfb0] sm:$0xff]  ;;  %1718 = vst [vmem:[%s10044_s27 + $0x7c8] sm:$0xff] %v1717_v57 }
  0x8f   : > { %1720 = vst [vmem:[%s10044_s27 + $0x7d0] sm:$0xff] %v1719_v58  ;;  %1722 = vst [vmem:[%s10044_s27 + $0x7d8] sm:$0xff] %v1721_v59  ;;  %v1723_v60 = vld [vmem:[%s10039_s26 + $0xfc0] sm:$0xff]  ;;  %v1725_v61 = vld [vmem:[%s10039_s26 + $0xfd0] sm:$0xff] }
  0x90   : > { %v1727_v62 = vld [vmem:[%s10039_s26 + $0xfe0] sm:$0xff]  ;;  %1724 = vst [vmem:[%s10044_s27 + $0x7e0] sm:$0xff] %v1723_v60  ;;  %1726 = vst [vmem:[%s10044_s27 + $0x7e8] sm:$0xff] %v1725_v61  ;;  %v1729_v63 = vld [vmem:[%s10039_s26 + $0xff0] sm:$0xff] }
  0x91   : > { %1728 = vst [vmem:[%s10044_s27 + $0x7f0] sm:$0xff] %v1727_v62  ;;  %v1731_v0 = vld [vmem:[%s10039_s26 + $0x1000] sm:$0xff]  ;;  %v1733_v1 = vld [vmem:[%s10039_s26 + $0x1010] sm:$0xff]  ;;  %1730 = vst [vmem:[%s10044_s27 + $0x7f8] sm:$0xff] %v1729_v63 }
  0x92   : > { %1732 = vst [vmem:[%s10044_s27 + $0x800] sm:$0xff] %v1731_v0  ;;  %1734 = vst [vmem:[%s10044_s27 + $0x808] sm:$0xff] %v1733_v1  ;;  %v1735_v2 = vld [vmem:[%s10039_s26 + $0x1020] sm:$0xff]  ;;  %v1737_v3 = vld [vmem:[%s10039_s26 + $0x1030] sm:$0xff] }
  0x93   : > { %v1739_v4 = vld [vmem:[%s10039_s26 + $0x1040] sm:$0xff]  ;;  %1736 = vst [vmem:[%s10044_s27 + $0x810] sm:$0xff] %v1735_v2  ;;  %1738 = vst [vmem:[%s10044_s27 + $0x818] sm:$0xff] %v1737_v3  ;;  %v1741_v5 = vld [vmem:[%s10039_s26 + $0x1050] sm:$0xff] }
  0x94   : > { %1740 = vst [vmem:[%s10044_s27 + $0x820] sm:$0xff] %v1739_v4  ;;  %v1743_v6 = vld [vmem:[%s10039_s26 + $0x1060] sm:$0xff]  ;;  %v1745_v7 = vld [vmem:[%s10039_s26 + $0x1070] sm:$0xff]  ;;  %1742 = vst [vmem:[%s10044_s27 + $0x828] sm:$0xff] %v1741_v5 }
  0x95   : > { %1744 = vst [vmem:[%s10044_s27 + $0x830] sm:$0xff] %v1743_v6  ;;  %1746 = vst [vmem:[%s10044_s27 + $0x838] sm:$0xff] %v1745_v7  ;;  %v1747_v8 = vld [vmem:[%s10039_s26 + $0x1080] sm:$0xff]  ;;  %v1749_v9 = vld [vmem:[%s10039_s26 + $0x1090] sm:$0xff] }
  0x96   : > { %v1751_v10 = vld [vmem:[%s10039_s26 + $0x10a0] sm:$0xff]  ;;  %1748 = vst [vmem:[%s10044_s27 + $0x840] sm:$0xff] %v1747_v8  ;;  %1750 = vst [vmem:[%s10044_s27 + $0x848] sm:$0xff] %v1749_v9  ;;  %v1753_v11 = vld [vmem:[%s10039_s26 + $0x10b0] sm:$0xff] }
  0x97   : > { %1752 = vst [vmem:[%s10044_s27 + $0x850] sm:$0xff] %v1751_v10  ;;  %v1755_v12 = vld [vmem:[%s10039_s26 + $0x10c0] sm:$0xff]  ;;  %v1757_v13 = vld [vmem:[%s10039_s26 + $0x10d0] sm:$0xff]  ;;  %1754 = vst [vmem:[%s10044_s27 + $0x858] sm:$0xff] %v1753_v11 }
  0x98   : > { %1756 = vst [vmem:[%s10044_s27 + $0x860] sm:$0xff] %v1755_v12  ;;  %1758 = vst [vmem:[%s10044_s27 + $0x868] sm:$0xff] %v1757_v13  ;;  %v1759_v14 = vld [vmem:[%s10039_s26 + $0x10e0] sm:$0xff]  ;;  %v1761_v15 = vld [vmem:[%s10039_s26 + $0x10f0] sm:$0xff] }
  0x99   : > { %v1763_v16 = vld [vmem:[%s10039_s26 + $0x1100] sm:$0xff]  ;;  %1760 = vst [vmem:[%s10044_s27 + $0x870] sm:$0xff] %v1759_v14  ;;  %1762 = vst [vmem:[%s10044_s27 + $0x878] sm:$0xff] %v1761_v15  ;;  %v1765_v17 = vld [vmem:[%s10039_s26 + $0x1110] sm:$0xff] }
  0x9a   : > { %1764 = vst [vmem:[%s10044_s27 + $0x880] sm:$0xff] %v1763_v16  ;;  %v1767_v18 = vld [vmem:[%s10039_s26 + $0x1120] sm:$0xff]  ;;  %v1769_v19 = vld [vmem:[%s10039_s26 + $0x1130] sm:$0xff]  ;;  %1766 = vst [vmem:[%s10044_s27 + $0x888] sm:$0xff] %v1765_v17 }
  0x9b   : > { %1768 = vst [vmem:[%s10044_s27 + $0x890] sm:$0xff] %v1767_v18  ;;  %1770 = vst [vmem:[%s10044_s27 + $0x898] sm:$0xff] %v1769_v19  ;;  %v1771_v20 = vld [vmem:[%s10039_s26 + $0x1140] sm:$0xff]  ;;  %v1773_v21 = vld [vmem:[%s10039_s26 + $0x1150] sm:$0xff] }
  0x9c   : > { %v1775_v22 = vld [vmem:[%s10039_s26 + $0x1160] sm:$0xff]  ;;  %1772 = vst [vmem:[%s10044_s27 + $0x8a0] sm:$0xff] %v1771_v20  ;;  %1774 = vst [vmem:[%s10044_s27 + $0x8a8] sm:$0xff] %v1773_v21  ;;  %v1777_v23 = vld [vmem:[%s10039_s26 + $0x1170] sm:$0xff] }
  0x9d   : > { %1776 = vst [vmem:[%s10044_s27 + $0x8b0] sm:$0xff] %v1775_v22  ;;  %v1779_v24 = vld [vmem:[%s10039_s26 + $0x1180] sm:$0xff]  ;;  %v1781_v25 = vld [vmem:[%s10039_s26 + $0x1190] sm:$0xff]  ;;  %1778 = vst [vmem:[%s10044_s27 + $0x8b8] sm:$0xff] %v1777_v23 }
  0x9e   : > { %1780 = vst [vmem:[%s10044_s27 + $0x8c0] sm:$0xff] %v1779_v24  ;;  %1782 = vst [vmem:[%s10044_s27 + $0x8c8] sm:$0xff] %v1781_v25  ;;  %v1783_v26 = vld [vmem:[%s10039_s26 + $0x11a0] sm:$0xff]  ;;  %v1785_v27 = vld [vmem:[%s10039_s26 + $0x11b0] sm:$0xff] }
  0x9f   : > { %v1787_v28 = vld [vmem:[%s10039_s26 + $0x11c0] sm:$0xff]  ;;  %1784 = vst [vmem:[%s10044_s27 + $0x8d0] sm:$0xff] %v1783_v26  ;;  %1786 = vst [vmem:[%s10044_s27 + $0x8d8] sm:$0xff] %v1785_v27  ;;  %v1789_v29 = vld [vmem:[%s10039_s26 + $0x11d0] sm:$0xff] }
  0xa0   : > { %1788 = vst [vmem:[%s10044_s27 + $0x8e0] sm:$0xff] %v1787_v28  ;;  %v1791_v30 = vld [vmem:[%s10039_s26 + $0x11e0] sm:$0xff]  ;;  %v1793_v31 = vld [vmem:[%s10039_s26 + $0x11f0] sm:$0xff]  ;;  %1790 = vst [vmem:[%s10044_s27 + $0x8e8] sm:$0xff] %v1789_v29 }
  0xa1   : > { %1792 = vst [vmem:[%s10044_s27 + $0x8f0] sm:$0xff] %v1791_v30  ;;  %1794 = vst [vmem:[%s10044_s27 + $0x8f8] sm:$0xff] %v1793_v31  ;;  %v1795_v32 = vld [vmem:[%s10039_s26 + $0x1200] sm:$0xff]  ;;  %v1797_v33 = vld [vmem:[%s10039_s26 + $0x1210] sm:$0xff] }
  0xa2   : > { %v1799_v34 = vld [vmem:[%s10039_s26 + $0x1220] sm:$0xff]  ;;  %1796 = vst [vmem:[%s10044_s27 + $0x900] sm:$0xff] %v1795_v32  ;;  %1798 = vst [vmem:[%s10044_s27 + $0x908] sm:$0xff] %v1797_v33  ;;  %v1801_v35 = vld [vmem:[%s10039_s26 + $0x1230] sm:$0xff] }
  0xa3   : > { %1800 = vst [vmem:[%s10044_s27 + $0x910] sm:$0xff] %v1799_v34  ;;  %v1803_v36 = vld [vmem:[%s10039_s26 + $0x1240] sm:$0xff]  ;;  %v1805_v37 = vld [vmem:[%s10039_s26 + $0x1250] sm:$0xff]  ;;  %1802 = vst [vmem:[%s10044_s27 + $0x918] sm:$0xff] %v1801_v35 }
  0xa4   : > { %1804 = vst [vmem:[%s10044_s27 + $0x920] sm:$0xff] %v1803_v36  ;;  %1806 = vst [vmem:[%s10044_s27 + $0x928] sm:$0xff] %v1805_v37  ;;  %v1807_v38 = vld [vmem:[%s10039_s26 + $0x1260] sm:$0xff]  ;;  %v1809_v39 = vld [vmem:[%s10039_s26 + $0x1270] sm:$0xff] }
  0xa5   : > { %v1811_v40 = vld [vmem:[%s10039_s26 + $0x1280] sm:$0xff]  ;;  %1808 = vst [vmem:[%s10044_s27 + $0x930] sm:$0xff] %v1807_v38  ;;  %1810 = vst [vmem:[%s10044_s27 + $0x938] sm:$0xff] %v1809_v39  ;;  %v1813_v41 = vld [vmem:[%s10039_s26 + $0x1290] sm:$0xff] }
  0xa6   : > { %1812 = vst [vmem:[%s10044_s27 + $0x940] sm:$0xff] %v1811_v40  ;;  %v1815_v42 = vld [vmem:[%s10039_s26 + $0x12a0] sm:$0xff]  ;;  %v1817_v43 = vld [vmem:[%s10039_s26 + $0x12b0] sm:$0xff]  ;;  %1814 = vst [vmem:[%s10044_s27 + $0x948] sm:$0xff] %v1813_v41 }
  0xa7   : > { %1816 = vst [vmem:[%s10044_s27 + $0x950] sm:$0xff] %v1815_v42  ;;  %1818 = vst [vmem:[%s10044_s27 + $0x958] sm:$0xff] %v1817_v43  ;;  %v1819_v44 = vld [vmem:[%s10039_s26 + $0x12c0] sm:$0xff]  ;;  %v1821_v45 = vld [vmem:[%s10039_s26 + $0x12d0] sm:$0xff] }
  0xa8   : > { %v1823_v46 = vld [vmem:[%s10039_s26 + $0x12e0] sm:$0xff]  ;;  %1820 = vst [vmem:[%s10044_s27 + $0x960] sm:$0xff] %v1819_v44  ;;  %1822 = vst [vmem:[%s10044_s27 + $0x968] sm:$0xff] %v1821_v45  ;;  %v1825_v47 = vld [vmem:[%s10039_s26 + $0x12f0] sm:$0xff] }
  0xa9   : > { %1824 = vst [vmem:[%s10044_s27 + $0x970] sm:$0xff] %v1823_v46  ;;  %v1827_v48 = vld [vmem:[%s10039_s26 + $0x1300] sm:$0xff]  ;;  %v1829_v49 = vld [vmem:[%s10039_s26 + $0x1310] sm:$0xff]  ;;  %1826 = vst [vmem:[%s10044_s27 + $0x978] sm:$0xff] %v1825_v47 }
  0xaa   : > { %1828 = vst [vmem:[%s10044_s27 + $0x980] sm:$0xff] %v1827_v48  ;;  %1830 = vst [vmem:[%s10044_s27 + $0x988] sm:$0xff] %v1829_v49  ;;  %v1831_v50 = vld [vmem:[%s10039_s26 + $0x1320] sm:$0xff]  ;;  %v1833_v51 = vld [vmem:[%s10039_s26 + $0x1330] sm:$0xff] }
  0xab   : > { %v1835_v52 = vld [vmem:[%s10039_s26 + $0x1340] sm:$0xff]  ;;  %1832 = vst [vmem:[%s10044_s27 + $0x990] sm:$0xff] %v1831_v50  ;;  %1834 = vst [vmem:[%s10044_s27 + $0x998] sm:$0xff] %v1833_v51  ;;  %v1837_v53 = vld [vmem:[%s10039_s26 + $0x1350] sm:$0xff] }
  0xac   : > { %1836 = vst [vmem:[%s10044_s27 + $0x9a0] sm:$0xff] %v1835_v52  ;;  %v1839_v54 = vld [vmem:[%s10039_s26 + $0x1360] sm:$0xff]  ;;  %v1841_v55 = vld [vmem:[%s10039_s26 + $0x1370] sm:$0xff]  ;;  %1838 = vst [vmem:[%s10044_s27 + $0x9a8] sm:$0xff] %v1837_v53 }
  0xad   : > { %1840 = vst [vmem:[%s10044_s27 + $0x9b0] sm:$0xff] %v1839_v54  ;;  %1842 = vst [vmem:[%s10044_s27 + $0x9b8] sm:$0xff] %v1841_v55  ;;  %v1843_v56 = vld [vmem:[%s10039_s26 + $0x1380] sm:$0xff]  ;;  %v1845_v57 = vld [vmem:[%s10039_s26 + $0x1390] sm:$0xff] }
  0xae   : > { %v1847_v58 = vld [vmem:[%s10039_s26 + $0x13a0] sm:$0xff]  ;;  %1844 = vst [vmem:[%s10044_s27 + $0x9c0] sm:$0xff] %v1843_v56  ;;  %1846 = vst [vmem:[%s10044_s27 + $0x9c8] sm:$0xff] %v1845_v57  ;;  %v1849_v59 = vld [vmem:[%s10039_s26 + $0x13b0] sm:$0xff] }
  0xaf   : > { %1848 = vst [vmem:[%s10044_s27 + $0x9d0] sm:$0xff] %v1847_v58  ;;  %v1851_v60 = vld [vmem:[%s10039_s26 + $0x13c0] sm:$0xff]  ;;  %v1853_v61 = vld [vmem:[%s10039_s26 + $0x13d0] sm:$0xff]  ;;  %1850 = vst [vmem:[%s10044_s27 + $0x9d8] sm:$0xff] %v1849_v59 }
  0xb0   : > { %1852 = vst [vmem:[%s10044_s27 + $0x9e0] sm:$0xff] %v1851_v60  ;;  %1854 = vst [vmem:[%s10044_s27 + $0x9e8] sm:$0xff] %v1853_v61  ;;  %v1855_v62 = vld [vmem:[%s10039_s26 + $0x13e0] sm:$0xff]  ;;  %v1857_v63 = vld [vmem:[%s10039_s26 + $0x13f0] sm:$0xff] }
  0xb1   : > { %v1859_v0 = vld [vmem:[%s10039_s26 + $0x1400] sm:$0xff]  ;;  %1856 = vst [vmem:[%s10044_s27 + $0x9f0] sm:$0xff] %v1855_v62  ;;  %1858 = vst [vmem:[%s10044_s27 + $0x9f8] sm:$0xff] %v1857_v63  ;;  %v1861_v1 = vld [vmem:[%s10039_s26 + $0x1410] sm:$0xff] }
  0xb2   : > { %1860 = vst [vmem:[%s10044_s27 + $0xa00] sm:$0xff] %v1859_v0  ;;  %v1863_v2 = vld [vmem:[%s10039_s26 + $0x1420] sm:$0xff]  ;;  %v1865_v3 = vld [vmem:[%s10039_s26 + $0x1430] sm:$0xff]  ;;  %1862 = vst [vmem:[%s10044_s27 + $0xa08] sm:$0xff] %v1861_v1 }
  0xb3   : > { %1864 = vst [vmem:[%s10044_s27 + $0xa10] sm:$0xff] %v1863_v2  ;;  %1866 = vst [vmem:[%s10044_s27 + $0xa18] sm:$0xff] %v1865_v3  ;;  %v1867_v4 = vld [vmem:[%s10039_s26 + $0x1440] sm:$0xff]  ;;  %v1869_v5 = vld [vmem:[%s10039_s26 + $0x1450] sm:$0xff] }
  0xb4   : > { %v1871_v6 = vld [vmem:[%s10039_s26 + $0x1460] sm:$0xff]  ;;  %1868 = vst [vmem:[%s10044_s27 + $0xa20] sm:$0xff] %v1867_v4  ;;  %1870 = vst [vmem:[%s10044_s27 + $0xa28] sm:$0xff] %v1869_v5  ;;  %v1873_v7 = vld [vmem:[%s10039_s26 + $0x1470] sm:$0xff] }
  0xb5   : > { %1872 = vst [vmem:[%s10044_s27 + $0xa30] sm:$0xff] %v1871_v6  ;;  %v1875_v8 = vld [vmem:[%s10039_s26 + $0x1480] sm:$0xff]  ;;  %v1877_v9 = vld [vmem:[%s10039_s26 + $0x1490] sm:$0xff]  ;;  %1874 = vst [vmem:[%s10044_s27 + $0xa38] sm:$0xff] %v1873_v7 }
  0xb6   : > { %1876 = vst [vmem:[%s10044_s27 + $0xa40] sm:$0xff] %v1875_v8  ;;  %1878 = vst [vmem:[%s10044_s27 + $0xa48] sm:$0xff] %v1877_v9  ;;  %v1879_v10 = vld [vmem:[%s10039_s26 + $0x14a0] sm:$0xff]  ;;  %v1881_v11 = vld [vmem:[%s10039_s26 + $0x14b0] sm:$0xff] }
  0xb7   : > { %v1883_v12 = vld [vmem:[%s10039_s26 + $0x14c0] sm:$0xff]  ;;  %1880 = vst [vmem:[%s10044_s27 + $0xa50] sm:$0xff] %v1879_v10  ;;  %1882 = vst [vmem:[%s10044_s27 + $0xa58] sm:$0xff] %v1881_v11  ;;  %v1885_v13 = vld [vmem:[%s10039_s26 + $0x14d0] sm:$0xff] }
  0xb8   : > { %1884 = vst [vmem:[%s10044_s27 + $0xa60] sm:$0xff] %v1883_v12  ;;  %v1887_v14 = vld [vmem:[%s10039_s26 + $0x14e0] sm:$0xff]  ;;  %v1889_v15 = vld [vmem:[%s10039_s26 + $0x14f0] sm:$0xff]  ;;  %1886 = vst [vmem:[%s10044_s27 + $0xa68] sm:$0xff] %v1885_v13 }
  0xb9   : > { %1888 = vst [vmem:[%s10044_s27 + $0xa70] sm:$0xff] %v1887_v14  ;;  %1890 = vst [vmem:[%s10044_s27 + $0xa78] sm:$0xff] %v1889_v15  ;;  %v1891_v16 = vld [vmem:[%s10039_s26 + $0x1500] sm:$0xff]  ;;  %v1893_v17 = vld [vmem:[%s10039_s26 + $0x1510] sm:$0xff] }
  0xba   : > { %v1895_v18 = vld [vmem:[%s10039_s26 + $0x1520] sm:$0xff]  ;;  %1892 = vst [vmem:[%s10044_s27 + $0xa80] sm:$0xff] %v1891_v16  ;;  %1894 = vst [vmem:[%s10044_s27 + $0xa88] sm:$0xff] %v1893_v17  ;;  %v1897_v19 = vld [vmem:[%s10039_s26 + $0x1530] sm:$0xff] }
  0xbb   : > { %1896 = vst [vmem:[%s10044_s27 + $0xa90] sm:$0xff] %v1895_v18  ;;  %v1899_v20 = vld [vmem:[%s10039_s26 + $0x1540] sm:$0xff]  ;;  %v1901_v21 = vld [vmem:[%s10039_s26 + $0x1550] sm:$0xff]  ;;  %1898 = vst [vmem:[%s10044_s27 + $0xa98] sm:$0xff] %v1897_v19 }
  0xbc   : > { %1900 = vst [vmem:[%s10044_s27 + $0xaa0] sm:$0xff] %v1899_v20  ;;  %1902 = vst [vmem:[%s10044_s27 + $0xaa8] sm:$0xff] %v1901_v21  ;;  %v1903_v22 = vld [vmem:[%s10039_s26 + $0x1560] sm:$0xff]  ;;  %v1905_v23 = vld [vmem:[%s10039_s26 + $0x1570] sm:$0xff] }
  0xbd   : > { %v1907_v24 = vld [vmem:[%s10039_s26 + $0x1580] sm:$0xff]  ;;  %1904 = vst [vmem:[%s10044_s27 + $0xab0] sm:$0xff] %v1903_v22  ;;  %1906 = vst [vmem:[%s10044_s27 + $0xab8] sm:$0xff] %v1905_v23  ;;  %v1909_v25 = vld [vmem:[%s10039_s26 + $0x1590] sm:$0xff] }
  0xbe   : > { %1908 = vst [vmem:[%s10044_s27 + $0xac0] sm:$0xff] %v1907_v24  ;;  %v1911_v26 = vld [vmem:[%s10039_s26 + $0x15a0] sm:$0xff]  ;;  %v1913_v27 = vld [vmem:[%s10039_s26 + $0x15b0] sm:$0xff]  ;;  %1910 = vst [vmem:[%s10044_s27 + $0xac8] sm:$0xff] %v1909_v25 }
  0xbf   : > { %1912 = vst [vmem:[%s10044_s27 + $0xad0] sm:$0xff] %v1911_v26  ;;  %1914 = vst [vmem:[%s10044_s27 + $0xad8] sm:$0xff] %v1913_v27  ;;  %v1915_v28 = vld [vmem:[%s10039_s26 + $0x15c0] sm:$0xff]  ;;  %v1917_v29 = vld [vmem:[%s10039_s26 + $0x15d0] sm:$0xff] }
  0xc0   : > { %v1919_v30 = vld [vmem:[%s10039_s26 + $0x15e0] sm:$0xff]  ;;  %1916 = vst [vmem:[%s10044_s27 + $0xae0] sm:$0xff] %v1915_v28  ;;  %1918 = vst [vmem:[%s10044_s27 + $0xae8] sm:$0xff] %v1917_v29  ;;  %v1921_v31 = vld [vmem:[%s10039_s26 + $0x15f0] sm:$0xff] }
  0xc1   : > { %1920 = vst [vmem:[%s10044_s27 + $0xaf0] sm:$0xff] %v1919_v30  ;;  %v1923_v32 = vld [vmem:[%s10039_s26 + $0x1600] sm:$0xff]  ;;  %v1925_v33 = vld [vmem:[%s10039_s26 + $0x1610] sm:$0xff]  ;;  %1922 = vst [vmem:[%s10044_s27 + $0xaf8] sm:$0xff] %v1921_v31 }
  0xc2   : > { %1924 = vst [vmem:[%s10044_s27 + $0xb00] sm:$0xff] %v1923_v32  ;;  %1926 = vst [vmem:[%s10044_s27 + $0xb08] sm:$0xff] %v1925_v33  ;;  %v1927_v34 = vld [vmem:[%s10039_s26 + $0x1620] sm:$0xff]  ;;  %v1929_v35 = vld [vmem:[%s10039_s26 + $0x1630] sm:$0xff] }
  0xc3   : > { %v1931_v36 = vld [vmem:[%s10039_s26 + $0x1640] sm:$0xff]  ;;  %1928 = vst [vmem:[%s10044_s27 + $0xb10] sm:$0xff] %v1927_v34  ;;  %1930 = vst [vmem:[%s10044_s27 + $0xb18] sm:$0xff] %v1929_v35  ;;  %v1933_v37 = vld [vmem:[%s10039_s26 + $0x1650] sm:$0xff] }
  0xc4   : > { %1932 = vst [vmem:[%s10044_s27 + $0xb20] sm:$0xff] %v1931_v36  ;;  %v1935_v38 = vld [vmem:[%s10039_s26 + $0x1660] sm:$0xff]  ;;  %v1937_v39 = vld [vmem:[%s10039_s26 + $0x1670] sm:$0xff]  ;;  %1934 = vst [vmem:[%s10044_s27 + $0xb28] sm:$0xff] %v1933_v37 }
  0xc5   : > { %1936 = vst [vmem:[%s10044_s27 + $0xb30] sm:$0xff] %v1935_v38  ;;  %1938 = vst [vmem:[%s10044_s27 + $0xb38] sm:$0xff] %v1937_v39  ;;  %v1939_v40 = vld [vmem:[%s10039_s26 + $0x1680] sm:$0xff]  ;;  %v1941_v41 = vld [vmem:[%s10039_s26 + $0x1690] sm:$0xff] }
  0xc6   : > { %v1943_v42 = vld [vmem:[%s10039_s26 + $0x16a0] sm:$0xff]  ;;  %1940 = vst [vmem:[%s10044_s27 + $0xb40] sm:$0xff] %v1939_v40  ;;  %1942 = vst [vmem:[%s10044_s27 + $0xb48] sm:$0xff] %v1941_v41  ;;  %v1945_v43 = vld [vmem:[%s10039_s26 + $0x16b0] sm:$0xff] }
  0xc7   : > { %1944 = vst [vmem:[%s10044_s27 + $0xb50] sm:$0xff] %v1943_v42  ;;  %v1947_v44 = vld [vmem:[%s10039_s26 + $0x16c0] sm:$0xff]  ;;  %v1949_v45 = vld [vmem:[%s10039_s26 + $0x16d0] sm:$0xff]  ;;  %1946 = vst [vmem:[%s10044_s27 + $0xb58] sm:$0xff] %v1945_v43 }
  0xc8   : > { %1948 = vst [vmem:[%s10044_s27 + $0xb60] sm:$0xff] %v1947_v44  ;;  %1950 = vst [vmem:[%s10044_s27 + $0xb68] sm:$0xff] %v1949_v45  ;;  %v1951_v46 = vld [vmem:[%s10039_s26 + $0x16e0] sm:$0xff]  ;;  %v1953_v47 = vld [vmem:[%s10039_s26 + $0x16f0] sm:$0xff] }
  0xc9   : > { %v1955_v48 = vld [vmem:[%s10039_s26 + $0x1700] sm:$0xff]  ;;  %1952 = vst [vmem:[%s10044_s27 + $0xb70] sm:$0xff] %v1951_v46  ;;  %1954 = vst [vmem:[%s10044_s27 + $0xb78] sm:$0xff] %v1953_v47  ;;  %v1957_v49 = vld [vmem:[%s10039_s26 + $0x1710] sm:$0xff] }
  0xca   : > { %1956 = vst [vmem:[%s10044_s27 + $0xb80] sm:$0xff] %v1955_v48  ;;  %v1959_v50 = vld [vmem:[%s10039_s26 + $0x1720] sm:$0xff]  ;;  %v1961_v51 = vld [vmem:[%s10039_s26 + $0x1730] sm:$0xff]  ;;  %1958 = vst [vmem:[%s10044_s27 + $0xb88] sm:$0xff] %v1957_v49 }
  0xcb   : > { %1960 = vst [vmem:[%s10044_s27 + $0xb90] sm:$0xff] %v1959_v50  ;;  %1962 = vst [vmem:[%s10044_s27 + $0xb98] sm:$0xff] %v1961_v51  ;;  %v1963_v52 = vld [vmem:[%s10039_s26 + $0x1740] sm:$0xff]  ;;  %v1965_v53 = vld [vmem:[%s10039_s26 + $0x1750] sm:$0xff] }
  0xcc   : > { %v1967_v54 = vld [vmem:[%s10039_s26 + $0x1760] sm:$0xff]  ;;  %1964 = vst [vmem:[%s10044_s27 + $0xba0] sm:$0xff] %v1963_v52  ;;  %1966 = vst [vmem:[%s10044_s27 + $0xba8] sm:$0xff] %v1965_v53  ;;  %v1969_v55 = vld [vmem:[%s10039_s26 + $0x1770] sm:$0xff] }
  0xcd   : > { %1968 = vst [vmem:[%s10044_s27 + $0xbb0] sm:$0xff] %v1967_v54  ;;  %v1971_v56 = vld [vmem:[%s10039_s26 + $0x1780] sm:$0xff]  ;;  %v1973_v57 = vld [vmem:[%s10039_s26 + $0x1790] sm:$0xff]  ;;  %1970 = vst [vmem:[%s10044_s27 + $0xbb8] sm:$0xff] %v1969_v55 }
  0xce   : > { %1972 = vst [vmem:[%s10044_s27 + $0xbc0] sm:$0xff] %v1971_v56  ;;  %1974 = vst [vmem:[%s10044_s27 + $0xbc8] sm:$0xff] %v1973_v57  ;;  %v1975_v58 = vld [vmem:[%s10039_s26 + $0x17a0] sm:$0xff]  ;;  %v1977_v59 = vld [vmem:[%s10039_s26 + $0x17b0] sm:$0xff] }
  0xcf   : > { %v1979_v60 = vld [vmem:[%s10039_s26 + $0x17c0] sm:$0xff]  ;;  %1976 = vst [vmem:[%s10044_s27 + $0xbd0] sm:$0xff] %v1975_v58  ;;  %1978 = vst [vmem:[%s10044_s27 + $0xbd8] sm:$0xff] %v1977_v59  ;;  %v1981_v61 = vld [vmem:[%s10039_s26 + $0x17d0] sm:$0xff] }
  0xd0   : > { %1980 = vst [vmem:[%s10044_s27 + $0xbe0] sm:$0xff] %v1979_v60  ;;  %v1983_v62 = vld [vmem:[%s10039_s26 + $0x17e0] sm:$0xff]  ;;  %v1985_v63 = vld [vmem:[%s10039_s26 + $0x17f0] sm:$0xff]  ;;  %1982 = vst [vmem:[%s10044_s27 + $0xbe8] sm:$0xff] %v1981_v61 }
  0xd1   : > { %1984 = vst [vmem:[%s10044_s27 + $0xbf0] sm:$0xff] %v1983_v62  ;;  %1986 = vst [vmem:[%s10044_s27 + $0xbf8] sm:$0xff] %v1985_v63  ;;  %v1987_v0 = vld [vmem:[%s10039_s26 + $0x1800] sm:$0xff]  ;;  %v1989_v1 = vld [vmem:[%s10039_s26 + $0x1810] sm:$0xff] }
  0xd2   : > { %v1991_v2 = vld [vmem:[%s10039_s26 + $0x1820] sm:$0xff]  ;;  %1988 = vst [vmem:[%s10044_s27 + $0xc00] sm:$0xff] %v1987_v0  ;;  %1990 = vst [vmem:[%s10044_s27 + $0xc08] sm:$0xff] %v1989_v1  ;;  %v1993_v3 = vld [vmem:[%s10039_s26 + $0x1830] sm:$0xff] }
  0xd3   : > { %1992 = vst [vmem:[%s10044_s27 + $0xc10] sm:$0xff] %v1991_v2  ;;  %v1995_v4 = vld [vmem:[%s10039_s26 + $0x1840] sm:$0xff]  ;;  %v1997_v5 = vld [vmem:[%s10039_s26 + $0x1850] sm:$0xff]  ;;  %1994 = vst [vmem:[%s10044_s27 + $0xc18] sm:$0xff] %v1993_v3 }
  0xd4   : > { %1996 = vst [vmem:[%s10044_s27 + $0xc20] sm:$0xff] %v1995_v4  ;;  %1998 = vst [vmem:[%s10044_s27 + $0xc28] sm:$0xff] %v1997_v5  ;;  %v1999_v6 = vld [vmem:[%s10039_s26 + $0x1860] sm:$0xff]  ;;  %v2001_v7 = vld [vmem:[%s10039_s26 + $0x1870] sm:$0xff] }
  0xd5   : > { %v2003_v8 = vld [vmem:[%s10039_s26 + $0x1880] sm:$0xff]  ;;  %2000 = vst [vmem:[%s10044_s27 + $0xc30] sm:$0xff] %v1999_v6  ;;  %2002 = vst [vmem:[%s10044_s27 + $0xc38] sm:$0xff] %v2001_v7  ;;  %v2005_v9 = vld [vmem:[%s10039_s26 + $0x1890] sm:$0xff] }
  0xd6   : > { %2004 = vst [vmem:[%s10044_s27 + $0xc40] sm:$0xff] %v2003_v8  ;;  %v2007_v10 = vld [vmem:[%s10039_s26 + $0x18a0] sm:$0xff]  ;;  %v2009_v11 = vld [vmem:[%s10039_s26 + $0x18b0] sm:$0xff]  ;;  %2006 = vst [vmem:[%s10044_s27 + $0xc48] sm:$0xff] %v2005_v9 }
  0xd7   : > { %2008 = vst [vmem:[%s10044_s27 + $0xc50] sm:$0xff] %v2007_v10  ;;  %2010 = vst [vmem:[%s10044_s27 + $0xc58] sm:$0xff] %v2009_v11  ;;  %v2011_v12 = vld [vmem:[%s10039_s26 + $0x18c0] sm:$0xff]  ;;  %v2013_v13 = vld [vmem:[%s10039_s26 + $0x18d0] sm:$0xff] }
  0xd8   : > { %v2015_v14 = vld [vmem:[%s10039_s26 + $0x18e0] sm:$0xff]  ;;  %2012 = vst [vmem:[%s10044_s27 + $0xc60] sm:$0xff] %v2011_v12  ;;  %2014 = vst [vmem:[%s10044_s27 + $0xc68] sm:$0xff] %v2013_v13  ;;  %v2017_v15 = vld [vmem:[%s10039_s26 + $0x18f0] sm:$0xff] }
  0xd9   : > { %2016 = vst [vmem:[%s10044_s27 + $0xc70] sm:$0xff] %v2015_v14  ;;  %v2019_v16 = vld [vmem:[%s10039_s26 + $0x1900] sm:$0xff]  ;;  %v2021_v17 = vld [vmem:[%s10039_s26 + $0x1910] sm:$0xff]  ;;  %2018 = vst [vmem:[%s10044_s27 + $0xc78] sm:$0xff] %v2017_v15 }
  0xda   : > { %2020 = vst [vmem:[%s10044_s27 + $0xc80] sm:$0xff] %v2019_v16  ;;  %2022 = vst [vmem:[%s10044_s27 + $0xc88] sm:$0xff] %v2021_v17  ;;  %v2023_v18 = vld [vmem:[%s10039_s26 + $0x1920] sm:$0xff]  ;;  %v2025_v19 = vld [vmem:[%s10039_s26 + $0x1930] sm:$0xff] }
  0xdb   : > { %v2027_v20 = vld [vmem:[%s10039_s26 + $0x1940] sm:$0xff]  ;;  %2024 = vst [vmem:[%s10044_s27 + $0xc90] sm:$0xff] %v2023_v18  ;;  %2026 = vst [vmem:[%s10044_s27 + $0xc98] sm:$0xff] %v2025_v19  ;;  %v2029_v21 = vld [vmem:[%s10039_s26 + $0x1950] sm:$0xff] }
  0xdc   : > { %2028 = vst [vmem:[%s10044_s27 + $0xca0] sm:$0xff] %v2027_v20  ;;  %v2031_v22 = vld [vmem:[%s10039_s26 + $0x1960] sm:$0xff]  ;;  %v2033_v23 = vld [vmem:[%s10039_s26 + $0x1970] sm:$0xff]  ;;  %2030 = vst [vmem:[%s10044_s27 + $0xca8] sm:$0xff] %v2029_v21 }
  0xdd   : > { %2032 = vst [vmem:[%s10044_s27 + $0xcb0] sm:$0xff] %v2031_v22  ;;  %2034 = vst [vmem:[%s10044_s27 + $0xcb8] sm:$0xff] %v2033_v23  ;;  %v2035_v24 = vld [vmem:[%s10039_s26 + $0x1980] sm:$0xff]  ;;  %v2037_v25 = vld [vmem:[%s10039_s26 + $0x1990] sm:$0xff] }
  0xde   : > { %v2039_v26 = vld [vmem:[%s10039_s26 + $0x19a0] sm:$0xff]  ;;  %2036 = vst [vmem:[%s10044_s27 + $0xcc0] sm:$0xff] %v2035_v24  ;;  %2038 = vst [vmem:[%s10044_s27 + $0xcc8] sm:$0xff] %v2037_v25  ;;  %v2041_v27 = vld [vmem:[%s10039_s26 + $0x19b0] sm:$0xff] }
  0xdf   : > { %2040 = vst [vmem:[%s10044_s27 + $0xcd0] sm:$0xff] %v2039_v26  ;;  %v2043_v28 = vld [vmem:[%s10039_s26 + $0x19c0] sm:$0xff]  ;;  %v2045_v29 = vld [vmem:[%s10039_s26 + $0x19d0] sm:$0xff]  ;;  %2042 = vst [vmem:[%s10044_s27 + $0xcd8] sm:$0xff] %v2041_v27 }
  0xe0   : > { %2044 = vst [vmem:[%s10044_s27 + $0xce0] sm:$0xff] %v2043_v28  ;;  %2046 = vst [vmem:[%s10044_s27 + $0xce8] sm:$0xff] %v2045_v29  ;;  %v2047_v30 = vld [vmem:[%s10039_s26 + $0x19e0] sm:$0xff]  ;;  %v2049_v31 = vld [vmem:[%s10039_s26 + $0x19f0] sm:$0xff] }
  0xe1   : > { %v2051_v32 = vld [vmem:[%s10039_s26 + $0x1a00] sm:$0xff]  ;;  %2048 = vst [vmem:[%s10044_s27 + $0xcf0] sm:$0xff] %v2047_v30  ;;  %2050 = vst [vmem:[%s10044_s27 + $0xcf8] sm:$0xff] %v2049_v31  ;;  %v2053_v33 = vld [vmem:[%s10039_s26 + $0x1a10] sm:$0xff] }
  0xe2   : > { %2052 = vst [vmem:[%s10044_s27 + $0xd00] sm:$0xff] %v2051_v32  ;;  %v2055_v34 = vld [vmem:[%s10039_s26 + $0x1a20] sm:$0xff]  ;;  %v2057_v35 = vld [vmem:[%s10039_s26 + $0x1a30] sm:$0xff]  ;;  %2054 = vst [vmem:[%s10044_s27 + $0xd08] sm:$0xff] %v2053_v33 }
  0xe3   : > { %2056 = vst [vmem:[%s10044_s27 + $0xd10] sm:$0xff] %v2055_v34  ;;  %2058 = vst [vmem:[%s10044_s27 + $0xd18] sm:$0xff] %v2057_v35  ;;  %v2059_v36 = vld [vmem:[%s10039_s26 + $0x1a40] sm:$0xff]  ;;  %v2061_v37 = vld [vmem:[%s10039_s26 + $0x1a50] sm:$0xff] }
  0xe4   : > { %v2063_v38 = vld [vmem:[%s10039_s26 + $0x1a60] sm:$0xff]  ;;  %2060 = vst [vmem:[%s10044_s27 + $0xd20] sm:$0xff] %v2059_v36  ;;  %2062 = vst [vmem:[%s10044_s27 + $0xd28] sm:$0xff] %v2061_v37  ;;  %v2065_v39 = vld [vmem:[%s10039_s26 + $0x1a70] sm:$0xff] }
  0xe5   : > { %2064 = vst [vmem:[%s10044_s27 + $0xd30] sm:$0xff] %v2063_v38  ;;  %v2067_v40 = vld [vmem:[%s10039_s26 + $0x1a80] sm:$0xff]  ;;  %v2069_v41 = vld [vmem:[%s10039_s26 + $0x1a90] sm:$0xff]  ;;  %2066 = vst [vmem:[%s10044_s27 + $0xd38] sm:$0xff] %v2065_v39 }
  0xe6   : > { %2068 = vst [vmem:[%s10044_s27 + $0xd40] sm:$0xff] %v2067_v40  ;;  %2070 = vst [vmem:[%s10044_s27 + $0xd48] sm:$0xff] %v2069_v41  ;;  %v2071_v42 = vld [vmem:[%s10039_s26 + $0x1aa0] sm:$0xff]  ;;  %v2073_v43 = vld [vmem:[%s10039_s26 + $0x1ab0] sm:$0xff] }
  0xe7   : > { %v2075_v44 = vld [vmem:[%s10039_s26 + $0x1ac0] sm:$0xff]  ;;  %2072 = vst [vmem:[%s10044_s27 + $0xd50] sm:$0xff] %v2071_v42  ;;  %2074 = vst [vmem:[%s10044_s27 + $0xd58] sm:$0xff] %v2073_v43  ;;  %v2077_v45 = vld [vmem:[%s10039_s26 + $0x1ad0] sm:$0xff] }
  0xe8   : > { %2076 = vst [vmem:[%s10044_s27 + $0xd60] sm:$0xff] %v2075_v44  ;;  %v2079_v46 = vld [vmem:[%s10039_s26 + $0x1ae0] sm:$0xff]  ;;  %v2081_v47 = vld [vmem:[%s10039_s26 + $0x1af0] sm:$0xff]  ;;  %2078 = vst [vmem:[%s10044_s27 + $0xd68] sm:$0xff] %v2077_v45 }
  0xe9   : > { %2080 = vst [vmem:[%s10044_s27 + $0xd70] sm:$0xff] %v2079_v46  ;;  %2082 = vst [vmem:[%s10044_s27 + $0xd78] sm:$0xff] %v2081_v47  ;;  %v2083_v48 = vld [vmem:[%s10039_s26 + $0x1b00] sm:$0xff]  ;;  %v2085_v49 = vld [vmem:[%s10039_s26 + $0x1b10] sm:$0xff] }
  0xea   : > { %v2087_v50 = vld [vmem:[%s10039_s26 + $0x1b20] sm:$0xff]  ;;  %2084 = vst [vmem:[%s10044_s27 + $0xd80] sm:$0xff] %v2083_v48  ;;  %2086 = vst [vmem:[%s10044_s27 + $0xd88] sm:$0xff] %v2085_v49  ;;  %v2089_v51 = vld [vmem:[%s10039_s26 + $0x1b30] sm:$0xff] }
  0xeb   : > { %2088 = vst [vmem:[%s10044_s27 + $0xd90] sm:$0xff] %v2087_v50  ;;  %v2091_v52 = vld [vmem:[%s10039_s26 + $0x1b40] sm:$0xff]  ;;  %v2093_v53 = vld [vmem:[%s10039_s26 + $0x1b50] sm:$0xff]  ;;  %2090 = vst [vmem:[%s10044_s27 + $0xd98] sm:$0xff] %v2089_v51 }
  0xec   : > { %2092 = vst [vmem:[%s10044_s27 + $0xda0] sm:$0xff] %v2091_v52  ;;  %2094 = vst [vmem:[%s10044_s27 + $0xda8] sm:$0xff] %v2093_v53  ;;  %v2095_v54 = vld [vmem:[%s10039_s26 + $0x1b60] sm:$0xff]  ;;  %v2097_v55 = vld [vmem:[%s10039_s26 + $0x1b70] sm:$0xff] }
  0xed   : > { %v2099_v56 = vld [vmem:[%s10039_s26 + $0x1b80] sm:$0xff]  ;;  %2096 = vst [vmem:[%s10044_s27 + $0xdb0] sm:$0xff] %v2095_v54  ;;  %2098 = vst [vmem:[%s10044_s27 + $0xdb8] sm:$0xff] %v2097_v55  ;;  %v2101_v57 = vld [vmem:[%s10039_s26 + $0x1b90] sm:$0xff] }
  0xee   : > { %2100 = vst [vmem:[%s10044_s27 + $0xdc0] sm:$0xff] %v2099_v56  ;;  %v2103_v58 = vld [vmem:[%s10039_s26 + $0x1ba0] sm:$0xff]  ;;  %v2105_v59 = vld [vmem:[%s10039_s26 + $0x1bb0] sm:$0xff]  ;;  %2102 = vst [vmem:[%s10044_s27 + $0xdc8] sm:$0xff] %v2101_v57 }
  0xef   : > { %2104 = vst [vmem:[%s10044_s27 + $0xdd0] sm:$0xff] %v2103_v58  ;;  %2106 = vst [vmem:[%s10044_s27 + $0xdd8] sm:$0xff] %v2105_v59  ;;  %v2107_v60 = vld [vmem:[%s10039_s26 + $0x1bc0] sm:$0xff]  ;;  %v2109_v61 = vld [vmem:[%s10039_s26 + $0x1bd0] sm:$0xff] }
  0xf0   : > { %v2111_v62 = vld [vmem:[%s10039_s26 + $0x1be0] sm:$0xff]  ;;  %2108 = vst [vmem:[%s10044_s27 + $0xde0] sm:$0xff] %v2107_v60  ;;  %2110 = vst [vmem:[%s10044_s27 + $0xde8] sm:$0xff] %v2109_v61  ;;  %v2113_v63 = vld [vmem:[%s10039_s26 + $0x1bf0] sm:$0xff] }
  0xf1   : > { %2112 = vst [vmem:[%s10044_s27 + $0xdf0] sm:$0xff] %v2111_v62  ;;  %v2115_v0 = vld [vmem:[%s10039_s26 + $0x1c00] sm:$0xff]  ;;  %v2117_v1 = vld [vmem:[%s10039_s26 + $0x1c10] sm:$0xff]  ;;  %2114 = vst [vmem:[%s10044_s27 + $0xdf8] sm:$0xff] %v2113_v63 }
  0xf2   : > { %2116 = vst [vmem:[%s10044_s27 + $0xe00] sm:$0xff] %v2115_v0  ;;  %2118 = vst [vmem:[%s10044_s27 + $0xe08] sm:$0xff] %v2117_v1  ;;  %v2119_v2 = vld [vmem:[%s10039_s26 + $0x1c20] sm:$0xff]  ;;  %v2121_v3 = vld [vmem:[%s10039_s26 + $0x1c30] sm:$0xff] }
  0xf3   : > { %v2123_v4 = vld [vmem:[%s10039_s26 + $0x1c40] sm:$0xff]  ;;  %2120 = vst [vmem:[%s10044_s27 + $0xe10] sm:$0xff] %v2119_v2  ;;  %2122 = vst [vmem:[%s10044_s27 + $0xe18] sm:$0xff] %v2121_v3  ;;  %v2125_v5 = vld [vmem:[%s10039_s26 + $0x1c50] sm:$0xff] }
  0xf4   : > { %2124 = vst [vmem:[%s10044_s27 + $0xe20] sm:$0xff] %v2123_v4  ;;  %v2127_v6 = vld [vmem:[%s10039_s26 + $0x1c60] sm:$0xff]  ;;  %v2129_v7 = vld [vmem:[%s10039_s26 + $0x1c70] sm:$0xff]  ;;  %2126 = vst [vmem:[%s10044_s27 + $0xe28] sm:$0xff] %v2125_v5 }
  0xf5   : > { %2128 = vst [vmem:[%s10044_s27 + $0xe30] sm:$0xff] %v2127_v6  ;;  %2130 = vst [vmem:[%s10044_s27 + $0xe38] sm:$0xff] %v2129_v7  ;;  %v2131_v8 = vld [vmem:[%s10039_s26 + $0x1c80] sm:$0xff]  ;;  %v2133_v9 = vld [vmem:[%s10039_s26 + $0x1c90] sm:$0xff] }
  0xf6   : > { %v2135_v10 = vld [vmem:[%s10039_s26 + $0x1ca0] sm:$0xff]  ;;  %2132 = vst [vmem:[%s10044_s27 + $0xe40] sm:$0xff] %v2131_v8  ;;  %2134 = vst [vmem:[%s10044_s27 + $0xe48] sm:$0xff] %v2133_v9  ;;  %v2137_v11 = vld [vmem:[%s10039_s26 + $0x1cb0] sm:$0xff] }
  0xf7   : > { %2136 = vst [vmem:[%s10044_s27 + $0xe50] sm:$0xff] %v2135_v10  ;;  %v2139_v12 = vld [vmem:[%s10039_s26 + $0x1cc0] sm:$0xff]  ;;  %v2141_v13 = vld [vmem:[%s10039_s26 + $0x1cd0] sm:$0xff]  ;;  %2138 = vst [vmem:[%s10044_s27 + $0xe58] sm:$0xff] %v2137_v11 }
  0xf8   : > { %2140 = vst [vmem:[%s10044_s27 + $0xe60] sm:$0xff] %v2139_v12  ;;  %2142 = vst [vmem:[%s10044_s27 + $0xe68] sm:$0xff] %v2141_v13  ;;  %v2143_v14 = vld [vmem:[%s10039_s26 + $0x1ce0] sm:$0xff]  ;;  %v2145_v15 = vld [vmem:[%s10039_s26 + $0x1cf0] sm:$0xff] }
  0xf9   : > { %v2147_v16 = vld [vmem:[%s10039_s26 + $0x1d00] sm:$0xff]  ;;  %2144 = vst [vmem:[%s10044_s27 + $0xe70] sm:$0xff] %v2143_v14  ;;  %2146 = vst [vmem:[%s10044_s27 + $0xe78] sm:$0xff] %v2145_v15  ;;  %v2149_v17 = vld [vmem:[%s10039_s26 + $0x1d10] sm:$0xff] }
  0xfa   : > { %2148 = vst [vmem:[%s10044_s27 + $0xe80] sm:$0xff] %v2147_v16  ;;  %v2151_v18 = vld [vmem:[%s10039_s26 + $0x1d20] sm:$0xff]  ;;  %v2153_v19 = vld [vmem:[%s10039_s26 + $0x1d30] sm:$0xff]  ;;  %2150 = vst [vmem:[%s10044_s27 + $0xe88] sm:$0xff] %v2149_v17 }
  0xfb   : > { %2152 = vst [vmem:[%s10044_s27 + $0xe90] sm:$0xff] %v2151_v18  ;;  %2154 = vst [vmem:[%s10044_s27 + $0xe98] sm:$0xff] %v2153_v19  ;;  %v2155_v20 = vld [vmem:[%s10039_s26 + $0x1d40] sm:$0xff]  ;;  %v2157_v21 = vld [vmem:[%s10039_s26 + $0x1d50] sm:$0xff] }
  0xfc   : > { %v2159_v22 = vld [vmem:[%s10039_s26 + $0x1d60] sm:$0xff]  ;;  %2156 = vst [vmem:[%s10044_s27 + $0xea0] sm:$0xff] %v2155_v20  ;;  %2158 = vst [vmem:[%s10044_s27 + $0xea8] sm:$0xff] %v2157_v21  ;;  %v2161_v23 = vld [vmem:[%s10039_s26 + $0x1d70] sm:$0xff] }
  0xfd   : > { %2160 = vst [vmem:[%s10044_s27 + $0xeb0] sm:$0xff] %v2159_v22  ;;  %v2163_v24 = vld [vmem:[%s10039_s26 + $0x1d80] sm:$0xff]  ;;  %v2165_v25 = vld [vmem:[%s10039_s26 + $0x1d90] sm:$0xff]  ;;  %2162 = vst [vmem:[%s10044_s27 + $0xeb8] sm:$0xff] %v2161_v23 }
  0xfe   : > { %2164 = vst [vmem:[%s10044_s27 + $0xec0] sm:$0xff] %v2163_v24  ;;  %2166 = vst [vmem:[%s10044_s27 + $0xec8] sm:$0xff] %v2165_v25  ;;  %v2167_v26 = vld [vmem:[%s10039_s26 + $0x1da0] sm:$0xff]  ;;  %v2169_v27 = vld [vmem:[%s10039_s26 + $0x1db0] sm:$0xff] }
  0xff   : > { %v2171_v28 = vld [vmem:[%s10039_s26 + $0x1dc0] sm:$0xff]  ;;  %2168 = vst [vmem:[%s10044_s27 + $0xed0] sm:$0xff] %v2167_v26  ;;  %2170 = vst [vmem:[%s10044_s27 + $0xed8] sm:$0xff] %v2169_v27  ;;  %v2173_v29 = vld [vmem:[%s10039_s26 + $0x1dd0] sm:$0xff] }
 0x100   : > { %2172 = vst [vmem:[%s10044_s27 + $0xee0] sm:$0xff] %v2171_v28  ;;  %v2175_v30 = vld [vmem:[%s10039_s26 + $0x1de0] sm:$0xff]  ;;  %v2177_v31 = vld [vmem:[%s10039_s26 + $0x1df0] sm:$0xff]  ;;  %2174 = vst [vmem:[%s10044_s27 + $0xee8] sm:$0xff] %v2173_v29 }
 0x101   : > { %2176 = vst [vmem:[%s10044_s27 + $0xef0] sm:$0xff] %v2175_v30  ;;  %2178 = vst [vmem:[%s10044_s27 + $0xef8] sm:$0xff] %v2177_v31  ;;  %v2179_v32 = vld [vmem:[%s10039_s26 + $0x1e00] sm:$0xff]  ;;  %v2181_v33 = vld [vmem:[%s10039_s26 + $0x1e10] sm:$0xff] }
 0x102   : > { %v2183_v34 = vld [vmem:[%s10039_s26 + $0x1e20] sm:$0xff]  ;;  %2180 = vst [vmem:[%s10044_s27 + $0xf00] sm:$0xff] %v2179_v32  ;;  %2182 = vst [vmem:[%s10044_s27 + $0xf08] sm:$0xff] %v2181_v33  ;;  %v2185_v35 = vld [vmem:[%s10039_s26 + $0x1e30] sm:$0xff] }
 0x103   : > { %2184 = vst [vmem:[%s10044_s27 + $0xf10] sm:$0xff] %v2183_v34  ;;  %v2187_v36 = vld [vmem:[%s10039_s26 + $0x1e40] sm:$0xff]  ;;  %v2189_v37 = vld [vmem:[%s10039_s26 + $0x1e50] sm:$0xff]  ;;  %2186 = vst [vmem:[%s10044_s27 + $0xf18] sm:$0xff] %v2185_v35 }
 0x104   : > { %2188 = vst [vmem:[%s10044_s27 + $0xf20] sm:$0xff] %v2187_v36  ;;  %2190 = vst [vmem:[%s10044_s27 + $0xf28] sm:$0xff] %v2189_v37  ;;  %v2191_v38 = vld [vmem:[%s10039_s26 + $0x1e60] sm:$0xff]  ;;  %v2193_v39 = vld [vmem:[%s10039_s26 + $0x1e70] sm:$0xff] }
 0x105   : > { %v2195_v40 = vld [vmem:[%s10039_s26 + $0x1e80] sm:$0xff]  ;;  %2192 = vst [vmem:[%s10044_s27 + $0xf30] sm:$0xff] %v2191_v38  ;;  %2194 = vst [vmem:[%s10044_s27 + $0xf38] sm:$0xff] %v2193_v39  ;;  %v2197_v41 = vld [vmem:[%s10039_s26 + $0x1e90] sm:$0xff] }
 0x106   : > { %2196 = vst [vmem:[%s10044_s27 + $0xf40] sm:$0xff] %v2195_v40  ;;  %v2199_v42 = vld [vmem:[%s10039_s26 + $0x1ea0] sm:$0xff]  ;;  %v2201_v43 = vld [vmem:[%s10039_s26 + $0x1eb0] sm:$0xff]  ;;  %2198 = vst [vmem:[%s10044_s27 + $0xf48] sm:$0xff] %v2197_v41 }
 0x107   : > { %2200 = vst [vmem:[%s10044_s27 + $0xf50] sm:$0xff] %v2199_v42  ;;  %2202 = vst [vmem:[%s10044_s27 + $0xf58] sm:$0xff] %v2201_v43  ;;  %v2203_v44 = vld [vmem:[%s10039_s26 + $0x1ec0] sm:$0xff]  ;;  %v2205_v45 = vld [vmem:[%s10039_s26 + $0x1ed0] sm:$0xff] }
 0x108   : > { %v2207_v46 = vld [vmem:[%s10039_s26 + $0x1ee0] sm:$0xff]  ;;  %2204 = vst [vmem:[%s10044_s27 + $0xf60] sm:$0xff] %v2203_v44  ;;  %2206 = vst [vmem:[%s10044_s27 + $0xf68] sm:$0xff] %v2205_v45  ;;  %v2209_v47 = vld [vmem:[%s10039_s26 + $0x1ef0] sm:$0xff] }
 0x109   : > { %2208 = vst [vmem:[%s10044_s27 + $0xf70] sm:$0xff] %v2207_v46  ;;  %v2211_v48 = vld [vmem:[%s10039_s26 + $0x1f00] sm:$0xff]  ;;  %v2213_v49 = vld [vmem:[%s10039_s26 + $0x1f10] sm:$0xff]  ;;  %2210 = vst [vmem:[%s10044_s27 + $0xf78] sm:$0xff] %v2209_v47 }
 0x10a   : > { %2212 = vst [vmem:[%s10044_s27 + $0xf80] sm:$0xff] %v2211_v48  ;;  %2214 = vst [vmem:[%s10044_s27 + $0xf88] sm:$0xff] %v2213_v49  ;;  %v2215_v50 = vld [vmem:[%s10039_s26 + $0x1f20] sm:$0xff]  ;;  %v2217_v51 = vld [vmem:[%s10039_s26 + $0x1f30] sm:$0xff] }
 0x10b   : > { %v2219_v52 = vld [vmem:[%s10039_s26 + $0x1f40] sm:$0xff]  ;;  %2216 = vst [vmem:[%s10044_s27 + $0xf90] sm:$0xff] %v2215_v50  ;;  %2218 = vst [vmem:[%s10044_s27 + $0xf98] sm:$0xff] %v2217_v51  ;;  %v2221_v53 = vld [vmem:[%s10039_s26 + $0x1f50] sm:$0xff] }
 0x10c   : > { %2220 = vst [vmem:[%s10044_s27 + $0xfa0] sm:$0xff] %v2219_v52  ;;  %v2223_v54 = vld [vmem:[%s10039_s26 + $0x1f60] sm:$0xff]  ;;  %v2225_v55 = vld [vmem:[%s10039_s26 + $0x1f70] sm:$0xff]  ;;  %2222 = vst [vmem:[%s10044_s27 + $0xfa8] sm:$0xff] %v2221_v53 }
 0x10d   : > { %2224 = vst [vmem:[%s10044_s27 + $0xfb0] sm:$0xff] %v2223_v54  ;;  %2226 = vst [vmem:[%s10044_s27 + $0xfb8] sm:$0xff] %v2225_v55  ;;  %v2227_v56 = vld [vmem:[%s10039_s26 + $0x1f80] sm:$0xff]  ;;  %v2229_v57 = vld [vmem:[%s10039_s26 + $0x1f90] sm:$0xff] }
 0x10e   : > { %v2231_v58 = vld [vmem:[%s10039_s26 + $0x1fa0] sm:$0xff]  ;;  %2228 = vst [vmem:[%s10044_s27 + $0xfc0] sm:$0xff] %v2227_v56  ;;  %2230 = vst [vmem:[%s10044_s27 + $0xfc8] sm:$0xff] %v2229_v57  ;;  %v2233_v59 = vld [vmem:[%s10039_s26 + $0x1fb0] sm:$0xff] }
 0x10f   : > { %2232 = vst [vmem:[%s10044_s27 + $0xfd0] sm:$0xff] %v2231_v58  ;;  %v2235_v60 = vld [vmem:[%s10039_s26 + $0x1fc0] sm:$0xff]  ;;  %v2237_v61 = vld [vmem:[%s10039_s26 + $0x1fd0] sm:$0xff]  ;;  %2234 = vst [vmem:[%s10044_s27 + $0xfd8] sm:$0xff] %v2233_v59 }
 0x110   : > { %2236 = vst [vmem:[%s10044_s27 + $0xfe0] sm:$0xff] %v2235_v60  ;;  %2238 = vst [vmem:[%s10044_s27 + $0xfe8] sm:$0xff] %v2237_v61  ;;  %v2239_v62 = vld [vmem:[%s10039_s26 + $0x1fe0] sm:$0xff]  ;;  %v2241_v63 = vld [vmem:[%s10039_s26 + $0x1ff0] sm:$0xff] }
 0x111   : > { %2240 = vst [vmem:[%s10044_s27 + $0xff0] sm:$0xff] %v2239_v62  ;;  %2242 = vst [vmem:[%s10044_s27 + $0xff8] sm:$0xff] %v2241_v63 }
 0x112 PF: > { %p8539_p6 = scmp.ge.s32.totalorder %s9971_s16, 1  ;;  %p4339_p7 = scmp.lt.s32.totalorder %s9971_s16, 3 }
 0x114   : > { %p4340_p8 = pnand %p8539_p6, %p4339_p7 }
 0x115   : > { %s4346_s28 = sand.u32 (!%p4340_p8), 1, %s9955_s12   ;;  %v4923_v0 = vlaneseq (!%p4340_p8)  ;;  %v9973_v1 = vmov (!%p4340_p8), 1966171168   ;;  %v11073_v3 = vld [vmem:[%s11795_s0] sm:$0xff] (!%p4340_p8)  ;;  %v11080_v5 = vld [vmem:[%s11795_s0 + $0x10] sm:$0xff] (!%p4340_p8)  ;;  %s8541_s12 = sshll.u32 (!%p4340_p8), %s9963_s14, 1 }
 0x116   : > { %4343 = sbr.rel (%p4340_p8) target bundleno = 1036 (0x40c), region = 80  ;;  %s8540_s29 = sshll.u32 (!%p4340_p8), %s4346_s28, 12  ;;  %v4921_v2 = vunpack.c.l.s4 (!%p4340_p8), %v9973_v1 }
 0x117   : > { %v11075_v4 = vshrl.u32 (!%p4340_p8), %v4923_v0, 7  ;;  %s11082_s7 = scalar_lea.vmem (!%p4340_p8), [#allocation3], %s8540_s29  ;;  %p4384_p9 = scmp.lt.s32.totalorder (!%p4340_p8), %s8541_s12, 3 }
 0x118   : > { %v9161_v6 = vld [vmem:[%s11082_s7 + $0x4] ss:$8 sps:$4 sm:$0xff] (!%p4340_p8)   ;;  %v4922_v7 = vunpack.c.0.s8 (!%p4340_p8), %v4921_v2  ;;  %v9165_v9 = vld [vmem:[%s11082_s7] ss:$8 sps:$4 sm:$0xff] (!%p4340_p8)   ;;  %v9167_v12 = vld [vmem:[%s11082_s7 + $0x14] ss:$8 sps:$4 sm:$0xff] (!%p4340_p8)  }
 0x119   : > { %v9163_v8 = vld [vmem:[%s11082_s7 + $0x804] ss:$8 sps:$4 sm:$0xff] (!%p4340_p8)   ;;  %7707 = vmatprep.subr.bf16.mxu1 (!%p4340_p8), %v9161_v6  ;;  %v9166_v10 = vld [vmem:[%s11082_s7 + $0x800] ss:$8 sps:$4 sm:$0xff] (!%p4340_p8)   ;;  %v9169_v13 = vld [vmem:[%s11082_s7 + $0x814] ss:$8 sps:$4 sm:$0xff] (!%p4340_p8)  }
 0x11a   : > { %v11089_v11 = vsub.s32 (!%p4340_p8), %v4922_v7, %v11075_v4  ;;  %8035 = vmatprep.subr.bf16.mxu0 (!%p4340_p8), %v9163_v8  ;;  %7708 = vmatpush1.bf16.msra.mxu1 (!%p4340_p8), %v9165_v9  ;;  %v9171_v14 = vld [vmem:[%s11082_s7 + $0x10] ss:$8 sps:$4 sm:$0xff] (!%p4340_p8)   ;;  %v9173_v18 = vld [vmem:[%s11082_s7 + $0x24] ss:$8 sps:$4 sm:$0xff] (!%p4340_p8)   ;;  %v9177_v22 = vld [vmem:[%s11082_s7 + $0x20] ss:$8 sps:$4 sm:$0xff] (!%p4340_p8)  }
 0x11b   : > { %8036 = vmatpush1.bf16.msra.mxu0 (!%p4340_p8), %v9166_v10  ;;  %7709 = vmatprep.subr.bf16.mxu1 (!%p4340_p8), %v9167_v12  ;;  %v9172_v17 = vld [vmem:[%s11082_s7 + $0x810] ss:$8 sps:$4 sm:$0xff] (!%p4340_p8)   ;;  %v9175_v21 = vld [vmem:[%s11082_s7 + $0x824] ss:$8 sps:$4 sm:$0xff] (!%p4340_p8)   ;;  %v9178_v23 = vld [vmem:[%s11082_s7 + $0x820] ss:$8 sps:$4 sm:$0xff] (!%p4340_p8)  }
 0x11c   : > { %v11096_v15 = vrot.slane (!%p4340_p8), %v11073_v3, %v11089_v11  ;;  %v11100_v16 = vrot.slane (!%p4340_p8), %v11080_v5, %v11089_v11  ;;  %8037 = vmatprep.subr.bf16.mxu0 (!%p4340_p8), %v9169_v13  ;;  %v9179_v24 = vld [vmem:[%s11082_s7 + $0x34] ss:$8 sps:$4 sm:$0xff] (!%p4340_p8)   ;;  %v9183_v28 = vld [vmem:[%s11082_s7 + $0x30] ss:$8 sps:$4 sm:$0xff] (!%p4340_p8)   ;;  %v9185_v30 = vld [vmem:[%s11082_s7 + $0x44] ss:$8 sps:$4 sm:$0xff] (!%p4340_p8)  }
 0x11d   : > { %v9181_v27 = vld [vmem:[%s11082_s7 + $0x834] ss:$8 sps:$4 sm:$0xff]   ;;  %v9184_v29 = vld [vmem:[%s11082_s7 + $0x830] ss:$8 sps:$4 sm:$0xff]   ;;  %v9187_v31 = vld [vmem:[%s11082_s7 + $0x844] ss:$8 sps:$4 sm:$0xff]  }
 0x11e   : > { %v4934_v19 = vcombine.high %v11096_v15, %v11096_v15  ;;  %v5032_v20 = vcombine.high %v11100_v16, %v11100_v16  ;;  %7710 = vmatpush1.bf16.msra.mxu1 %v9171_v14  ;;  %v9189_v32 = vld [vmem:[%s11082_s7 + $0x40] ss:$8 sps:$4 sm:$0xff]   ;;  %v9191_v34 = vld [vmem:[%s11082_s7 + $0x54] ss:$8 sps:$4 sm:$0xff]   ;;  %v9195_v36 = vld [vmem:[%s11082_s7 + $0x50] ss:$8 sps:$4 sm:$0xff]  }
 0x11f   : > { %8038 = vmatpush1.bf16.msra.mxu0 %v9172_v17  ;;  %7711 = vmatprep.subr.bf16.mxu1 %v9173_v18  ;;  %v9190_v33 = vld [vmem:[%s11082_s7 + $0x840] ss:$8 sps:$4 sm:$0xff]   ;;  %v9193_v35 = vld [vmem:[%s11082_s7 + $0x854] ss:$8 sps:$4 sm:$0xff]   ;;  %v9196_v37 = vld [vmem:[%s11082_s7 + $0x850] ss:$8 sps:$4 sm:$0xff]  }
 0x120   : > { %v11113_v25 = vrot.slane %v4934_v19, %v11089_v11  ;;  %v11116_v26 = vrot.slane %v5032_v20, %v11089_v11  ;;  %8039 = vmatprep.subr.bf16.mxu0 %v9175_v21  ;;  %v9197_v38 = vld [vmem:[%s11082_s7 + $0x64] ss:$8 sps:$4 sm:$0xff]   ;;  %v9201_v40 = vld [vmem:[%s11082_s7 + $0x60] ss:$8 sps:$4 sm:$0xff]   ;;  %v9203_v42 = vld [vmem:[%s11082_s7 + $0x74] ss:$8 sps:$4 sm:$0xff]  }
 0x121   : > { %v9199_v39 = vld [vmem:[%s11082_s7 + $0x864] ss:$8 sps:$4 sm:$0xff]   ;;  %v9202_v41 = vld [vmem:[%s11082_s7 + $0x860] ss:$8 sps:$4 sm:$0xff]   ;;  %v9205_v43 = vld [vmem:[%s11082_s7 + $0x874] ss:$8 sps:$4 sm:$0xff]  }
 0x122   : > { %7739 = vmatprep.mubr.bf16.mxu1 %v11113_v25  ;;  %8067 = vmatprep.mubr.bf16.mxu0 %v11116_v26  ;;  %v9207_v44 = vld [vmem:[%s11082_s7 + $0x70] ss:$8 sps:$4 sm:$0xff]   ;;  %v9209_v46 = vld [vmem:[%s11082_s7 + $0x84] ss:$8 sps:$4 sm:$0xff]   ;;  %v9213_v48 = vld [vmem:[%s11082_s7 + $0x80] ss:$8 sps:$4 sm:$0xff]  }
 0x123   : > { %7712 = vmatpush1.bf16.msra.mxu1 %v9177_v22  ;;  %8040 = vmatpush1.bf16.msra.mxu0 %v9178_v23  ;;  %v9208_v45 = vld [vmem:[%s11082_s7 + $0x870] ss:$8 sps:$4 sm:$0xff]   ;;  %v9211_v47 = vld [vmem:[%s11082_s7 + $0x884] ss:$8 sps:$4 sm:$0xff]   ;;  %v9214_v49 = vld [vmem:[%s11082_s7 + $0x880] ss:$8 sps:$4 sm:$0xff]  }
 0x124   : > { %7713 = vmatprep.subr.bf16.mxu1 %v9179_v24  ;;  %8041 = vmatprep.subr.bf16.mxu0 %v9181_v27  ;;  %v9215_v50 = vld [vmem:[%s11082_s7 + $0x94] ss:$8 sps:$4 sm:$0xff]   ;;  %v9219_v52 = vld [vmem:[%s11082_s7 + $0x90] ss:$8 sps:$4 sm:$0xff]   ;;  %v9221_v54 = vld [vmem:[%s11082_s7 + $0xa4] ss:$8 sps:$4 sm:$0xff]   ;;  %v11177_v24 = vrot.slane %v11096_v15, %v11089_v11  ;;  %v11181_v27 = vrot.slane %v11100_v16, %v11089_v11  ;;  %v5064_v15 = vcombine.high %v11116_v26, %v11116_v26 }
 0x125   : > { %v9217_v51 = vld [vmem:[%s11082_s7 + $0x894] ss:$8 sps:$4 sm:$0xff]   ;;  %v9220_v53 = vld [vmem:[%s11082_s7 + $0x890] ss:$8 sps:$4 sm:$0xff]   ;;  %v9223_v55 = vld [vmem:[%s11082_s7 + $0x8a4] ss:$8 sps:$4 sm:$0xff]  }
 0x126   : > { %v9225_v56 = vld [vmem:[%s11082_s7 + $0xa0] ss:$8 sps:$4 sm:$0xff]   ;;  %v9227_v58 = vld [vmem:[%s11082_s7 + $0xb4] ss:$8 sps:$4 sm:$0xff]   ;;  %v9231_v60 = vld [vmem:[%s11082_s7 + $0xb0] ss:$8 sps:$4 sm:$0xff]  }
 0x127   : > { %7714 = vmatpush1.bf16.msra.mxu1 %v9183_v28  ;;  %8042 = vmatpush1.bf16.msra.mxu0 %v9184_v29  ;;  %v9226_v57 = vld [vmem:[%s11082_s7 + $0x8a0] ss:$8 sps:$4 sm:$0xff]   ;;  %v9229_v59 = vld [vmem:[%s11082_s7 + $0x8b4] ss:$8 sps:$4 sm:$0xff]   ;;  %v9232_v61 = vld [vmem:[%s11082_s7 + $0x8b0] ss:$8 sps:$4 sm:$0xff]  }
 0x128   : > { %7715 = vmatprep.subr.bf16.mxu1 %v9185_v30  ;;  %8043 = vmatprep.subr.bf16.mxu0 %v9187_v31  ;;  %v9233_v62 = vld [vmem:[%s11082_s7 + $0xc4] ss:$8 sps:$4 sm:$0xff]   ;;  %v9237_v0 = vld [vmem:[%s11082_s7 + $0xc0] ss:$8 sps:$4 sm:$0xff]   ;;  %v9239_v2 = vld [vmem:[%s11082_s7 + $0xd4] ss:$8 sps:$4 sm:$0xff]   ;;  %v4966_v30 = vcombine.high %v11113_v25, %v11113_v25 }
 0x129   : > { %v9235_v63 = vld [vmem:[%s11082_s7 + $0x8c4] ss:$8 sps:$4 sm:$0xff]   ;;  %v9238_v1 = vld [vmem:[%s11082_s7 + $0x8c0] ss:$8 sps:$4 sm:$0xff]   ;;  %v9241_v6 = vld [vmem:[%s11082_s7 + $0x8d4] ss:$8 sps:$4 sm:$0xff]  }
 0x12a   : > { %v9243_v7 = vld [vmem:[%s11082_s7 + $0xd0] ss:$8 sps:$4 sm:$0xff]   ;;  %v9245_v9 = vld [vmem:[%s11082_s7 + $0xe4] ss:$8 sps:$4 sm:$0xff]   ;;  %v9249_v12 = vld [vmem:[%s11082_s7 + $0xe0] ss:$8 sps:$4 sm:$0xff]  }
 0x12b   : > { %7716 = vmatpush1.bf16.msra.mxu1 %v9189_v32  ;;  %8044 = vmatpush1.bf16.msra.mxu0 %v9190_v33  ;;  %v9244_v8 = vld [vmem:[%s11082_s7 + $0x8d0] ss:$8 sps:$4 sm:$0xff]   ;;  %v9247_v10 = vld [vmem:[%s11082_s7 + $0x8e4] ss:$8 sps:$4 sm:$0xff]   ;;  %v9250_v13 = vld [vmem:[%s11082_s7 + $0x8e0] ss:$8 sps:$4 sm:$0xff]  }
 0x12c   : > { %7717 = vmatprep.subr.bf16.mxu1 %v9191_v34  ;;  %8045 = vmatprep.subr.bf16.mxu0 %v9193_v35  ;;  %v9251_v14 = vld [vmem:[%s11082_s7 + $0xf4] ss:$8 sps:$4 sm:$0xff]   ;;  %v9255_v18 = vld [vmem:[%s11082_s7 + $0xf0] ss:$8 sps:$4 sm:$0xff]   ;;  %v9260_v20 = vld [vmem:[%s11082_s7 + $0x104] ss:$8 sps:$4 sm:$0xff]  }
 0x12d   : > { %v9253_v17 = vld [vmem:[%s11082_s7 + $0x8f4] ss:$8 sps:$4 sm:$0xff]   ;;  %v9256_v19 = vld [vmem:[%s11082_s7 + $0x8f0] ss:$8 sps:$4 sm:$0xff]   ;;  %v9264_v21 = vld [vmem:[%s11082_s7 + $0x904] ss:$8 sps:$4 sm:$0xff]  }
 0x12e   : > { %v9258_v22 = vld [vmem:[%s11082_s7 + $0x100] ss:$8 sps:$4 sm:$0xff]   ;;  %v9267_v28 = vld [vmem:[%s11082_s7 + $0x114] ss:$8 sps:$4 sm:$0xff]   ;;  %v9265_v16 = vld [vmem:[%s11082_s7 + $0x110] ss:$8 sps:$4 sm:$0xff]  }
 0x12f   : > { %7718 = vmatpush1.bf16.msra.mxu1 %v9195_v36  ;;  %8046 = vmatpush1.bf16.msra.mxu0 %v9196_v37  ;;  %v9262_v23 = vld [vmem:[%s11082_s7 + $0x900] ss:$8 sps:$4 sm:$0xff]   ;;  %v9270_v29 = vld [vmem:[%s11082_s7 + $0x914] ss:$8 sps:$4 sm:$0xff]   ;;  %v9268_v31 = vld [vmem:[%s11082_s7 + $0x910] ss:$8 sps:$4 sm:$0xff]  }
 0x130   : > { %7719 = vmatprep.subr.bf16.mxu1 %v9197_v38  ;;  %8047 = vmatprep.subr.bf16.mxu0 %v9199_v39  ;;  %v9273_v32 = vld [vmem:[%s11082_s7 + $0x124] ss:$8 sps:$4 sm:$0xff]   ;;  %v9271_v26 = vld [vmem:[%s11082_s7 + $0x120] ss:$8 sps:$4 sm:$0xff]   ;;  %v9279_v34 = vld [vmem:[%s11082_s7 + $0x134] ss:$8 sps:$4 sm:$0xff]  }
 0x131   : > { %v9276_v25 = vld [vmem:[%s11082_s7 + $0x924] ss:$8 sps:$4 sm:$0xff]   ;;  %v9274_v33 = vld [vmem:[%s11082_s7 + $0x920] ss:$8 sps:$4 sm:$0xff]   ;;  %v9282_v35 = vld [vmem:[%s11082_s7 + $0x934] ss:$8 sps:$4 sm:$0xff]  }
 0x132   : > { %v9277_v36 = vld [vmem:[%s11082_s7 + $0x130] ss:$8 sps:$4 sm:$0xff]   ;;  %v9285_v38 = vld [vmem:[%s11082_s7 + $0x144] ss:$8 sps:$4 sm:$0xff]   ;;  %s11806_s12 = smov (!%p4384_p9, %s8541_s12), 3 }
 0x133   : > { %7720 = vmatpush1.bf16.msra.mxu1 %v9201_v40  ;;  %8048 = vmatpush1.bf16.msra.mxu0 %v9202_v41  ;;  %v9280_v37 = vld [vmem:[%s11082_s7 + $0x930] ss:$8 sps:$4 sm:$0xff]   ;;  %v9288_v39 = vld [vmem:[%s11082_s7 + $0x944] ss:$8 sps:$4 sm:$0xff]   ;;  %v9283_v40 = vld [vmem:[%s11082_s7 + $0x140] ss:$8 sps:$4 sm:$0xff]   ;;  %s4386_s21 = scalar_lea.vmem %s11797_s2, %s11806_s12  ;;  %s4391_s23 = scalar_lea.vmem %s11798_s3, %s11806_s12 }
 0x134   : > { %7721 = vmatprep.subr.bf16.mxu1 %v9203_v42  ;;  %8049 = vmatprep.subr.bf16.mxu0 %v9205_v43  ;;  %v9286_v41 = vld [vmem:[%s11082_s7 + $0x940] ss:$8 sps:$4 sm:$0xff]   ;;  %v9291_v42 = vld [vmem:[%s11082_s7 + $0x154] ss:$8 sps:$4 sm:$0xff]  }
 0x135   : > { %v9294_v43 = vld [vmem:[%s11082_s7 + $0x954] ss:$8 sps:$4 sm:$0xff]  }
 0x137   : > { %7722 = vmatpush1.bf16.msra.mxu1 %v9207_v44  ;;  %8050 = vmatpush1.bf16.msra.mxu0 %v9208_v45  ;;  %v9289_v44 = vld [vmem:[%s11082_s7 + $0x150] ss:$8 sps:$4 sm:$0xff]  }
 0x138   : > { %7723 = vmatprep.subr.bf16.mxu1 %v9209_v46  ;;  %8051 = vmatprep.subr.bf16.mxu0 %v9211_v47  ;;  %v9292_v45 = vld [vmem:[%s11082_s7 + $0x950] ss:$8 sps:$4 sm:$0xff]   ;;  %v9297_v46 = vld [vmem:[%s11082_s7 + $0x164] ss:$8 sps:$4 sm:$0xff]  }
 0x139   : > { %v9300_v47 = vld [vmem:[%s11082_s7 + $0x964] ss:$8 sps:$4 sm:$0xff]  }
 0x13b   : > { %7724 = vmatpush1.bf16.msra.mxu1 %v9213_v48  ;;  %8052 = vmatpush1.bf16.msra.mxu0 %v9214_v49  ;;  %v9295_v48 = vld [vmem:[%s11082_s7 + $0x160] ss:$8 sps:$4 sm:$0xff]  }
 0x13c   : > { %7725 = vmatprep.subr.bf16.mxu1 %v9215_v50  ;;  %8053 = vmatprep.subr.bf16.mxu0 %v9217_v51  ;;  %v9298_v49 = vld [vmem:[%s11082_s7 + $0x960] ss:$8 sps:$4 sm:$0xff]   ;;  %v9303_v50 = vld [vmem:[%s11082_s7 + $0x174] ss:$8 sps:$4 sm:$0xff]  }
 0x13d   : > { %v9306_v51 = vld [vmem:[%s11082_s7 + $0x974] ss:$8 sps:$4 sm:$0xff]  }
 0x13f   : > { %7726 = vmatpush1.bf16.msra.mxu1 %v9219_v52  ;;  %8054 = vmatpush1.bf16.msra.mxu0 %v9220_v53  ;;  %v9301_v52 = vld [vmem:[%s11082_s7 + $0x170] ss:$8 sps:$4 sm:$0xff]  }
 0x140   : > { %7727 = vmatprep.subr.bf16.mxu1 %v9221_v54  ;;  %8055 = vmatprep.subr.bf16.mxu0 %v9223_v55  ;;  %v9304_v53 = vld [vmem:[%s11082_s7 + $0x970] ss:$8 sps:$4 sm:$0xff]   ;;  %v9309_v54 = vld [vmem:[%s11082_s7 + $0x184] ss:$8 sps:$4 sm:$0xff]  }
 0x141   : > { %v9312_v55 = vld [vmem:[%s11082_s7 + $0x984] ss:$8 sps:$4 sm:$0xff]  }
 0x143   : > { %7728 = vmatpush1.bf16.msra.mxu1 %v9225_v56  ;;  %8056 = vmatpush1.bf16.msra.mxu0 %v9226_v57  ;;  %v9307_v56 = vld [vmem:[%s11082_s7 + $0x180] ss:$8 sps:$4 sm:$0xff]  }
 0x144   : > { %7729 = vmatprep.subr.bf16.mxu1 %v9227_v58  ;;  %8057 = vmatprep.subr.bf16.mxu0 %v9229_v59  ;;  %v9310_v57 = vld [vmem:[%s11082_s7 + $0x980] ss:$8 sps:$4 sm:$0xff]   ;;  %v9315_v58 = vld [vmem:[%s11082_s7 + $0x194] ss:$8 sps:$4 sm:$0xff]  }
 0x145   : > { %v9318_v59 = vld [vmem:[%s11082_s7 + $0x994] ss:$8 sps:$4 sm:$0xff]  }
 0x147   : > { %7730 = vmatpush1.bf16.msra.mxu1 %v9231_v60  ;;  %8058 = vmatpush1.bf16.msra.mxu0 %v9232_v61  ;;  %v9313_v60 = vld [vmem:[%s11082_s7 + $0x190] ss:$8 sps:$4 sm:$0xff]  }
 0x148   : > { %7731 = vmatprep.subr.bf16.mxu1 %v9233_v62  ;;  %8059 = vmatprep.subr.bf16.mxu0 %v9235_v63  ;;  %v9316_v61 = vld [vmem:[%s11082_s7 + $0x990] ss:$8 sps:$4 sm:$0xff]   ;;  %v9321_v62 = vld [vmem:[%s11082_s7 + $0x1a4] ss:$8 sps:$4 sm:$0xff]  }
 0x149   : > { %v9324_v63 = vld [vmem:[%s11082_s7 + $0x9a4] ss:$8 sps:$4 sm:$0xff]  }
 0x14b   : > { %7732 = vmatpush1.bf16.msra.mxu1 %v9237_v0  ;;  %8060 = vmatpush1.bf16.msra.mxu0 %v9238_v1  ;;  %v9319_v0 = vld [vmem:[%s11082_s7 + $0x1a0] ss:$8 sps:$4 sm:$0xff]  }
 0x14c   : > { %7733 = vmatprep.subr.bf16.mxu1 %v9239_v2  ;;  %8061 = vmatprep.subr.bf16.mxu0 %v9241_v6  ;;  %v9322_v1 = vld [vmem:[%s11082_s7 + $0x9a0] ss:$8 sps:$4 sm:$0xff]   ;;  %v9327_v2 = vld [vmem:[%s11082_s7 + $0x1b4] ss:$8 sps:$4 sm:$0xff]  }
 0x14d   : > { %v9330_v6 = vld [vmem:[%s11082_s7 + $0x9b4] ss:$8 sps:$4 sm:$0xff]  }
 0x14f   : > { %7734 = vmatpush1.bf16.msra.mxu1 %v9243_v7  ;;  %8062 = vmatpush1.bf16.msra.mxu0 %v9244_v8  ;;  %v9325_v7 = vld [vmem:[%s11082_s7 + $0x1b0] ss:$8 sps:$4 sm:$0xff]  }
 0x150   : > { %7735 = vmatprep.subr.bf16.mxu1 %v9245_v9  ;;  %8063 = vmatprep.subr.bf16.mxu0 %v9247_v10  ;;  %v9328_v8 = vld [vmem:[%s11082_s7 + $0x9b0] ss:$8 sps:$4 sm:$0xff]   ;;  %v9333_v9 = vld [vmem:[%s11082_s7 + $0x1c4] ss:$8 sps:$4 sm:$0xff]  }
 0x151   : > { %v9336_v10 = vld [vmem:[%s11082_s7 + $0x9c4] ss:$8 sps:$4 sm:$0xff]  }
 0x153   : > { %7736 = vmatpush1.bf16.msra.mxu1 %v9249_v12  ;;  %8064 = vmatpush1.bf16.msra.mxu0 %v9250_v13  ;;  %v9331_v12 = vld [vmem:[%s11082_s7 + $0x1c0] ss:$8 sps:$4 sm:$0xff]  }
 0x154   : > { %7737 = vmatprep.subr.bf16.mxu1 %v9251_v14  ;;  %8065 = vmatprep.subr.bf16.mxu0 %v9253_v17  ;;  %v9334_v13 = vld [vmem:[%s11082_s7 + $0x9c0] ss:$8 sps:$4 sm:$0xff]   ;;  %v9339_v14 = vld [vmem:[%s11082_s7 + $0x1d4] ss:$8 sps:$4 sm:$0xff]  }
 0x155   : > { %v9342_v17 = vld [vmem:[%s11082_s7 + $0x9d4] ss:$8 sps:$4 sm:$0xff]  }
 0x157   : > { %7738 = vmatpush1.bf16.msra.mxu1 %v9255_v18  ;;  %8066 = vmatpush1.bf16.msra.mxu0 %v9256_v19  ;;  %v9337_v18 = vld [vmem:[%s11082_s7 + $0x1d0] ss:$8 sps:$4 sm:$0xff]  }
 0x158   : > { %7748 = vmatprep.subr.bf16.mxu1 %v9260_v20  ;;  %8076 = vmatprep.subr.bf16.mxu0 %v9264_v21  ;;  %v9340_v19 = vld [vmem:[%s11082_s7 + $0x9d0] ss:$8 sps:$4 sm:$0xff]   ;;  %v9345_v20 = vld [vmem:[%s11082_s7 + $0x1e4] ss:$8 sps:$4 sm:$0xff]  }
 0x159   : > { %v9348_v21 = vld [vmem:[%s11082_s7 + $0x9e4] ss:$8 sps:$4 sm:$0xff]  }
 0x15a   : > { %7740 = vmatmul.mubr.bf16.vlgmr.msra.gmra.mrb[0].mxu1 %v11177_v24  ;;  %8068 = vmatmul.mubr.bf16.vlgmr.msra.gmra.mrb[0].mxu0 %v11181_v27 }
 0x15b   : > { %7749 = vmatpush1.bf16.msra.mxu1 %v9258_v22  ;;  %8077 = vmatpush1.bf16.msra.mxu0 %v9262_v23  ;;  %v4919_v22 = vcombine.high %v11073_v3, %v11073_v3  ;;  %v5017_v23 = vcombine.high %v11080_v5, %v11080_v5  ;;  %v9352_v5 = vld [vmem:[%s11082_s7 + $0x9f0] ss:$8 sps:$4 sm:$0xff]  }
 0x15c   : > { %7750 = vmatprep.subr.bf16.mxu1 %v9267_v28  ;;  %8078 = vmatprep.subr.bf16.mxu0 %v9270_v29  ;;  %v9343_v28 = vld [vmem:[%s11082_s7 + $0x1e0] ss:$8 sps:$4 sm:$0xff]  }
 0x15d   : > { %7780 = vmatprep.mubr.bf16.mxu1 %v4966_v30  ;;  %8108 = vmatprep.mubr.bf16.mxu0 %v5064_v15  ;;  %v9346_v29 = vld [vmem:[%s11082_s7 + $0x9e0] ss:$8 sps:$4 sm:$0xff]   ;;  %v9351_v30 = vld [vmem:[%s11082_s7 + $0x1f4] ss:$8 sps:$4 sm:$0xff]   ;;  %v11255_v3 = vrot.slane %v5017_v23, %v11089_v11  ;;  %v9424_v23 = vld [vmem:[%s11082_s7 + $0xab0] ss:$8 sps:$4 sm:$0xff]  }
 0x15e   : > { %v9354_v15 = vld [vmem:[%s11082_s7 + $0x9f4] ss:$8 sps:$4 sm:$0xff]  }
 0x15f   : > { %7751 = vmatpush1.bf16.msra.mxu1 %v9265_v16  ;;  %8079 = vmatpush1.bf16.msra.mxu0 %v9268_v31  ;;  %v11252_v16 = vrot.slane %v4919_v22, %v11089_v11  ;;  %v9349_v31 = vld [vmem:[%s11082_s7 + $0x1f0] ss:$8 sps:$4 sm:$0xff]  }
 0x160   : > { %7752 = vmatprep.subr.bf16.mxu1 %v9273_v32  ;;  %8080 = vmatprep.subr.bf16.mxu0 %v9276_v25  ;;  %v9357_v32 = vld [vmem:[%s11082_s7 + $0x204] ss:$8 sps:$4 sm:$0xff]   ;;  %v9421_v22 = vld [vmem:[%s11082_s7 + $0x2b0] ss:$8 sps:$4 sm:$0xff]  }
 0x161   : > { %v9360_v25 = vld [vmem:[%s11082_s7 + $0xa04] ss:$8 sps:$4 sm:$0xff]  }
 0x163   : > { %7753 = vmatpush1.bf16.msra.mxu1 %v9271_v26  ;;  %8081 = vmatpush1.bf16.msra.mxu0 %v9274_v33  ;;  %v4935_v26 = vcombine.high %v11252_v16, %v11252_v16  ;;  %v5033_v33 = vcombine.high %v11255_v3, %v11255_v3 }
 0x164   : > { %7754 = vmatprep.subr.bf16.mxu1 %v9279_v34  ;;  %8082 = vmatprep.subr.bf16.mxu0 %v9282_v35  ;;  %v4964_v34 = vcombine.high %v11177_v24, %v11177_v24  ;;  %v5062_v35 = vcombine.high %v11181_v27, %v11181_v27  ;;  %v9361_v27 = vld [vmem:[%s11082_s7 + $0x210] ss:$8 sps:$4 sm:$0xff]  }
 0x165   : > { %v11277_v24 = vrot.slane %v5033_v33, %v11089_v11  ;;  %v9444_v33 = vld [vmem:[%s11082_s7 + $0xae4] ss:$8 sps:$4 sm:$0xff]  }
 0x167   : > { %7755 = vmatpush1.bf16.msra.mxu1 %v9277_v36  ;;  %8083 = vmatpush1.bf16.msra.mxu0 %v9280_v37  ;;  %v9355_v36 = vld [vmem:[%s11082_s7 + $0x200] ss:$8 sps:$4 sm:$0xff]  }
 0x168   : > { %7756 = vmatprep.subr.bf16.mxu1 %v9285_v38  ;;  %8084 = vmatprep.subr.bf16.mxu0 %v9288_v39  ;;  %v9358_v37 = vld [vmem:[%s11082_s7 + $0xa00] ss:$8 sps:$4 sm:$0xff]   ;;  %v9363_v38 = vld [vmem:[%s11082_s7 + $0x214] ss:$8 sps:$4 sm:$0xff]  }
 0x169   : > { %v9366_v39 = vld [vmem:[%s11082_s7 + $0xa14] ss:$8 sps:$4 sm:$0xff]  }
 0x16b   : > { %7757 = vmatpush1.bf16.msra.mxu1 %v9283_v40  ;;  %8085 = vmatpush1.bf16.msra.mxu0 %v9286_v41  ;;  %v11274_v40 = vrot.slane %v4935_v26, %v11089_v11  ;;  %v9364_v41 = vld [vmem:[%s11082_s7 + $0xa10] ss:$8 sps:$4 sm:$0xff]   ;;  %v9441_v26 = vld [vmem:[%s11082_s7 + $0x2e4] ss:$8 sps:$4 sm:$0xff]  }
 0x16c   : > { %7758 = vmatprep.subr.bf16.mxu1 %v9291_v42  ;;  %8086 = vmatprep.subr.bf16.mxu0 %v9294_v43  ;;  %v9369_v42 = vld [vmem:[%s11082_s7 + $0x224] ss:$8 sps:$4 sm:$0xff]  }
 0x16d   : > { %v9372_v43 = vld [vmem:[%s11082_s7 + $0xa24] ss:$8 sps:$4 sm:$0xff]  }
 0x16f   : > { %7759 = vmatpush1.bf16.msra.mxu1 %v9289_v44  ;;  %8087 = vmatpush1.bf16.msra.mxu0 %v9292_v45  ;;  %v9367_v44 = vld [vmem:[%s11082_s7 + $0x220] ss:$8 sps:$4 sm:$0xff]  }
 0x170   : > { %7760 = vmatprep.subr.bf16.mxu1 %v9297_v46  ;;  %8088 = vmatprep.subr.bf16.mxu0 %v9300_v47  ;;  %v9370_v45 = vld [vmem:[%s11082_s7 + $0xa20] ss:$8 sps:$4 sm:$0xff]   ;;  %v9375_v46 = vld [vmem:[%s11082_s7 + $0x234] ss:$8 sps:$4 sm:$0xff]  }
 0x171   : > { %v9378_v47 = vld [vmem:[%s11082_s7 + $0xa34] ss:$8 sps:$4 sm:$0xff]  }
 0x173   : > { %7761 = vmatpush1.bf16.msra.mxu1 %v9295_v48  ;;  %8089 = vmatpush1.bf16.msra.mxu0 %v9298_v49  ;;  %v9373_v48 = vld [vmem:[%s11082_s7 + $0x230] ss:$8 sps:$4 sm:$0xff]  }
 0x174   : > { %7762 = vmatprep.subr.bf16.mxu1 %v9303_v50  ;;  %8090 = vmatprep.subr.bf16.mxu0 %v9306_v51  ;;  %v9376_v49 = vld [vmem:[%s11082_s7 + $0xa30] ss:$8 sps:$4 sm:$0xff]   ;;  %v9381_v50 = vld [vmem:[%s11082_s7 + $0x244] ss:$8 sps:$4 sm:$0xff]  }
 0x175   : > { %v9384_v51 = vld [vmem:[%s11082_s7 + $0xa44] ss:$8 sps:$4 sm:$0xff]  }
 0x177   : > { %7763 = vmatpush1.bf16.msra.mxu1 %v9301_v52  ;;  %8091 = vmatpush1.bf16.msra.mxu0 %v9304_v53  ;;  %v9379_v52 = vld [vmem:[%s11082_s7 + $0x240] ss:$8 sps:$4 sm:$0xff]  }
 0x178   : > { %7764 = vmatprep.subr.bf16.mxu1 %v9309_v54  ;;  %8092 = vmatprep.subr.bf16.mxu0 %v9312_v55  ;;  %v9382_v53 = vld [vmem:[%s11082_s7 + $0xa40] ss:$8 sps:$4 sm:$0xff]   ;;  %v9387_v54 = vld [vmem:[%s11082_s7 + $0x254] ss:$8 sps:$4 sm:$0xff]  }
 0x179   : > { %v9390_v55 = vld [vmem:[%s11082_s7 + $0xa54] ss:$8 sps:$4 sm:$0xff]  }
 0x17b   : > { %7765 = vmatpush1.bf16.msra.mxu1 %v9307_v56  ;;  %8093 = vmatpush1.bf16.msra.mxu0 %v9310_v57  ;;  %v9385_v56 = vld [vmem:[%s11082_s7 + $0x250] ss:$8 sps:$4 sm:$0xff]  }
 0x17c   : > { %7766 = vmatprep.subr.bf16.mxu1 %v9315_v58  ;;  %8094 = vmatprep.subr.bf16.mxu0 %v9318_v59  ;;  %v9388_v57 = vld [vmem:[%s11082_s7 + $0xa50] ss:$8 sps:$4 sm:$0xff]   ;;  %v9393_v58 = vld [vmem:[%s11082_s7 + $0x264] ss:$8 sps:$4 sm:$0xff]  }
 0x17d   : > { %v9396_v59 = vld [vmem:[%s11082_s7 + $0xa64] ss:$8 sps:$4 sm:$0xff]  }
 0x17f   : > { %7767 = vmatpush1.bf16.msra.mxu1 %v9313_v60  ;;  %8095 = vmatpush1.bf16.msra.mxu0 %v9316_v61  ;;  %v9391_v60 = vld [vmem:[%s11082_s7 + $0x260] ss:$8 sps:$4 sm:$0xff]  }
 0x180   : > { %7768 = vmatprep.subr.bf16.mxu1 %v9321_v62  ;;  %8096 = vmatprep.subr.bf16.mxu0 %v9324_v63  ;;  %v9394_v61 = vld [vmem:[%s11082_s7 + $0xa60] ss:$8 sps:$4 sm:$0xff]   ;;  %v9399_v62 = vld [vmem:[%s11082_s7 + $0x274] ss:$8 sps:$4 sm:$0xff]  }
 0x181   : > { %v9402_v63 = vld [vmem:[%s11082_s7 + $0xa74] ss:$8 sps:$4 sm:$0xff]  }
 0x183   : > { %7769 = vmatpush1.bf16.msra.mxu1 %v9319_v0  ;;  %8097 = vmatpush1.bf16.msra.mxu0 %v9322_v1  ;;  %v9397_v0 = vld [vmem:[%s11082_s7 + $0x270] ss:$8 sps:$4 sm:$0xff]  }
 0x184   : > { %7770 = vmatprep.subr.bf16.mxu1 %v9327_v2  ;;  %8098 = vmatprep.subr.bf16.mxu0 %v9330_v6  ;;  %v9400_v1 = vld [vmem:[%s11082_s7 + $0xa70] ss:$8 sps:$4 sm:$0xff]   ;;  %v9405_v2 = vld [vmem:[%s11082_s7 + $0x284] ss:$8 sps:$4 sm:$0xff]  }
 0x185   : > { %v9408_v6 = vld [vmem:[%s11082_s7 + $0xa84] ss:$8 sps:$4 sm:$0xff]  }
 0x187   : > { %7771 = vmatpush1.bf16.msra.mxu1 %v9325_v7  ;;  %8099 = vmatpush1.bf16.msra.mxu0 %v9328_v8  ;;  %v9403_v7 = vld [vmem:[%s11082_s7 + $0x280] ss:$8 sps:$4 sm:$0xff]  }
 0x188   : > { %7772 = vmatprep.subr.bf16.mxu1 %v9333_v9  ;;  %8100 = vmatprep.subr.bf16.mxu0 %v9336_v10  ;;  %v9406_v8 = vld [vmem:[%s11082_s7 + $0xa80] ss:$8 sps:$4 sm:$0xff]   ;;  %v9411_v9 = vld [vmem:[%s11082_s7 + $0x294] ss:$8 sps:$4 sm:$0xff]  }
 0x189   : > { %v9414_v10 = vld [vmem:[%s11082_s7 + $0xa94] ss:$8 sps:$4 sm:$0xff]  }
 0x18b   : > { %7773 = vmatpush1.bf16.msra.mxu1 %v9331_v12  ;;  %8101 = vmatpush1.bf16.msra.mxu0 %v9334_v13  ;;  %v9409_v12 = vld [vmem:[%s11082_s7 + $0x290] ss:$8 sps:$4 sm:$0xff]  }
 0x18c   : > { %7774 = vmatprep.subr.bf16.mxu1 %v9339_v14  ;;  %8102 = vmatprep.subr.bf16.mxu0 %v9342_v17  ;;  %v9412_v13 = vld [vmem:[%s11082_s7 + $0xa90] ss:$8 sps:$4 sm:$0xff]   ;;  %v9417_v14 = vld [vmem:[%s11082_s7 + $0x2a4] ss:$8 sps:$4 sm:$0xff]  }
 0x18d   : > { %v9420_v17 = vld [vmem:[%s11082_s7 + $0xaa4] ss:$8 sps:$4 sm:$0xff]  }
 0x18f   : > { %7775 = vmatpush1.bf16.msra.mxu1 %v9337_v18  ;;  %8103 = vmatpush1.bf16.msra.mxu0 %v9340_v19  ;;  %v9415_v18 = vld [vmem:[%s11082_s7 + $0x2a0] ss:$8 sps:$4 sm:$0xff]  }
 0x190   : > { %7776 = vmatprep.subr.bf16.mxu1 %v9345_v20  ;;  %8104 = vmatprep.subr.bf16.mxu0 %v9348_v21  ;;  %v9418_v19 = vld [vmem:[%s11082_s7 + $0xaa0] ss:$8 sps:$4 sm:$0xff]   ;;  %v9423_v20 = vld [vmem:[%s11082_s7 + $0x2b4] ss:$8 sps:$4 sm:$0xff]  }
 0x191   : > { %v9426_v21 = vld [vmem:[%s11082_s7 + $0xab4] ss:$8 sps:$4 sm:$0xff]  }
 0x193   : > { %7777 = vmatpush1.bf16.msra.mxu1 %v9343_v28  ;;  %8105 = vmatpush1.bf16.msra.mxu0 %v9346_v29  ;;  %v9429_v28 = vld [vmem:[%s11082_s7 + $0x2c4] ss:$8 sps:$4 sm:$0xff]  }
 0x194   : > { %7778 = vmatprep.subr.bf16.mxu1 %v9351_v30  ;;  %8106 = vmatprep.subr.bf16.mxu0 %v9354_v15  ;;  %v9432_v29 = vld [vmem:[%s11082_s7 + $0xac4] ss:$8 sps:$4 sm:$0xff]   ;;  %v9427_v30 = vld [vmem:[%s11082_s7 + $0x2c0] ss:$8 sps:$4 sm:$0xff]  }
 0x195   : > { %v9430_v15 = vld [vmem:[%s11082_s7 + $0xac0] ss:$8 sps:$4 sm:$0xff]  }
 0x197   : > { %7779 = vmatpush1.bf16.msra.mxu1 %v9349_v31  ;;  %8107 = vmatpush1.bf16.msra.mxu0 %v9352_v5  ;;  %v9435_v31 = vld [vmem:[%s11082_s7 + $0x2d4] ss:$8 sps:$4 sm:$0xff]  }
 0x198   : > { %7789 = vmatprep.subr.bf16.mxu1 %v9357_v32  ;;  %8117 = vmatprep.subr.bf16.mxu0 %v9360_v25  ;;  %v9438_v5 = vld [vmem:[%s11082_s7 + $0xad4] ss:$8 sps:$4 sm:$0xff]   ;;  %v9433_v32 = vld [vmem:[%s11082_s7 + $0x2d0] ss:$8 sps:$4 sm:$0xff]  }
 0x199   : > { %v9436_v25 = vld [vmem:[%s11082_s7 + $0xad0] ss:$8 sps:$4 sm:$0xff]  }
 0x19a   : > { %7781 = vmatmul.mubr.bf16.vlgmr.msra.gmra.mrb[0].mxu1 %v4964_v34  ;;  %8109 = vmatmul.mubr.bf16.vlgmr.msra.gmra.mrb[0].mxu0 %v5062_v35  ;;  %v9439_v34 = vld [vmem:[%s11082_s7 + $0x2e0] ss:$8 sps:$4 sm:$0xff]  }
 0x19b   : > { %7790 = vmatpush1.bf16.msra.mxu1 %v9355_v36  ;;  %8118 = vmatpush1.bf16.msra.mxu0 %v9358_v37  ;;  %v9442_v35 = vld [vmem:[%s11082_s7 + $0xae0] ss:$8 sps:$4 sm:$0xff]   ;;  %v9447_v36 = vld [vmem:[%s11082_s7 + $0x2f4] ss:$8 sps:$4 sm:$0xff]  }
 0x19c   : > { %7791 = vmatprep.subr.bf16.mxu1 %v9363_v38  ;;  %8119 = vmatprep.subr.bf16.mxu0 %v9366_v39  ;;  %v9450_v37 = vld [vmem:[%s11082_s7 + $0xaf4] ss:$8 sps:$4 sm:$0xff]   ;;  %v9445_v38 = vld [vmem:[%s11082_s7 + $0x2f0] ss:$8 sps:$4 sm:$0xff]  }
 0x19d   : > { %7821 = vmatprep.mubr.bf16.mxu1 %v11274_v40  ;;  %8149 = vmatprep.mubr.bf16.mxu0 %v11277_v24  ;;  %v9448_v39 = vld [vmem:[%s11082_s7 + $0xaf0] ss:$8 sps:$4 sm:$0xff]  }
 0x19f   : > { %7792 = vmatpush1.bf16.msra.mxu1 %v9361_v27  ;;  %8120 = vmatpush1.bf16.msra.mxu0 %v9364_v41  ;;  %v9453_v27 = vld [vmem:[%s11082_s7 + $0x304] ss:$8 sps:$4 sm:$0xff]  }
 0x1a0   : > { %7793 = vmatprep.subr.bf16.mxu1 %v9369_v42  ;;  %8121 = vmatprep.subr.bf16.mxu0 %v9372_v43  ;;  %v9456_v41 = vld [vmem:[%s11082_s7 + $0xb04] ss:$8 sps:$4 sm:$0xff]   ;;  %v9451_v42 = vld [vmem:[%s11082_s7 + $0x300] ss:$8 sps:$4 sm:$0xff]  }
 0x1a1   : > { %v9454_v43 = vld [vmem:[%s11082_s7 + $0xb00] ss:$8 sps:$4 sm:$0xff]  }
 0x1a3   : > { %7794 = vmatpush1.bf16.msra.mxu1 %v9367_v44  ;;  %8122 = vmatpush1.bf16.msra.mxu0 %v9370_v45  ;;  %v11345_v44 = vrot.slane %v11252_v16, %v11089_v11  ;;  %v11349_v45 = vrot.slane %v11255_v3, %v11089_v11  ;;  %v5065_v16 = vcombine.high %v11277_v24, %v11277_v24  ;;  %v9457_v3 = vld [vmem:[%s11082_s7 + $0x310] ss:$8 sps:$4 sm:$0xff]   ;;  %v9463_v24 = vld [vmem:[%s11082_s7 + $0x320] ss:$8 sps:$4 sm:$0xff]  }
 0x1a4   : > { %7795 = vmatprep.subr.bf16.mxu1 %v9375_v46  ;;  %8123 = vmatprep.subr.bf16.mxu0 %v9378_v47  ;;  %v9459_v46 = vld [vmem:[%s11082_s7 + $0x314] ss:$8 sps:$4 sm:$0xff]  }
 0x1a5   : > { %v9462_v47 = vld [vmem:[%s11082_s7 + $0xb14] ss:$8 sps:$4 sm:$0xff]  }
 0x1a7   : > { %7796 = vmatpush1.bf16.msra.mxu1 %v9373_v48  ;;  %8124 = vmatpush1.bf16.msra.mxu0 %v9376_v49  ;;  %v4967_v48 = vcombine.high %v11274_v40, %v11274_v40  ;;  %v9460_v49 = vld [vmem:[%s11082_s7 + $0xb10] ss:$8 sps:$4 sm:$0xff]   ;;  %v9468_v40 = vld [vmem:[%s11082_s7 + $0xb24] ss:$8 sps:$4 sm:$0xff]  }
 0x1a8   : > { %7797 = vmatprep.subr.bf16.mxu1 %v9381_v50  ;;  %8125 = vmatprep.subr.bf16.mxu0 %v9384_v51  ;;  %v9465_v50 = vld [vmem:[%s11082_s7 + $0x324] ss:$8 sps:$4 sm:$0xff]   ;;  %v9466_v51 = vld [vmem:[%s11082_s7 + $0xb20] ss:$8 sps:$4 sm:$0xff]  }
 0x1ab   : > { %7798 = vmatpush1.bf16.msra.mxu1 %v9379_v52  ;;  %8126 = vmatpush1.bf16.msra.mxu0 %v9382_v53  ;;  %v9471_v52 = vld [vmem:[%s11082_s7 + $0x334] ss:$8 sps:$4 sm:$0xff]  }
 0x1ac   : > { %7799 = vmatprep.subr.bf16.mxu1 %v9387_v54  ;;  %8127 = vmatprep.subr.bf16.mxu0 %v9390_v55  ;;  %v9474_v53 = vld [vmem:[%s11082_s7 + $0xb34] ss:$8 sps:$4 sm:$0xff]   ;;  %v9469_v54 = vld [vmem:[%s11082_s7 + $0x330] ss:$8 sps:$4 sm:$0xff]  }
 0x1ad   : > { %v9472_v55 = vld [vmem:[%s11082_s7 + $0xb30] ss:$8 sps:$4 sm:$0xff]  }
 0x1af   : > { %7800 = vmatpush1.bf16.msra.mxu1 %v9385_v56  ;;  %8128 = vmatpush1.bf16.msra.mxu0 %v9388_v57  ;;  %v9477_v56 = vld [vmem:[%s11082_s7 + $0x344] ss:$8 sps:$4 sm:$0xff]  }
 0x1b0   : > { %7801 = vmatprep.subr.bf16.mxu1 %v9393_v58  ;;  %8129 = vmatprep.subr.bf16.mxu0 %v9396_v59  ;;  %v9480_v57 = vld [vmem:[%s11082_s7 + $0xb44] ss:$8 sps:$4 sm:$0xff]   ;;  %v9475_v58 = vld [vmem:[%s11082_s7 + $0x340] ss:$8 sps:$4 sm:$0xff]  }
 0x1b1   : > { %v9478_v59 = vld [vmem:[%s11082_s7 + $0xb40] ss:$8 sps:$4 sm:$0xff]  }
 0x1b3   : > { %7802 = vmatpush1.bf16.msra.mxu1 %v9391_v60  ;;  %8130 = vmatpush1.bf16.msra.mxu0 %v9394_v61  ;;  %v9483_v60 = vld [vmem:[%s11082_s7 + $0x354] ss:$8 sps:$4 sm:$0xff]  }
 0x1b4   : > { %7803 = vmatprep.subr.bf16.mxu1 %v9399_v62  ;;  %8131 = vmatprep.subr.bf16.mxu0 %v9402_v63  ;;  %v9486_v61 = vld [vmem:[%s11082_s7 + $0xb54] ss:$8 sps:$4 sm:$0xff]   ;;  %v9481_v62 = vld [vmem:[%s11082_s7 + $0x350] ss:$8 sps:$4 sm:$0xff]  }
 0x1b5   : > { %v9484_v63 = vld [vmem:[%s11082_s7 + $0xb50] ss:$8 sps:$4 sm:$0xff]  }
 0x1b7   : > { %7804 = vmatpush1.bf16.msra.mxu1 %v9397_v0  ;;  %8132 = vmatpush1.bf16.msra.mxu0 %v9400_v1  ;;  %v9489_v0 = vld [vmem:[%s11082_s7 + $0x364] ss:$8 sps:$4 sm:$0xff]  }
 0x1b8   : > { %7805 = vmatprep.subr.bf16.mxu1 %v9405_v2  ;;  %8133 = vmatprep.subr.bf16.mxu0 %v9408_v6  ;;  %v9492_v1 = vld [vmem:[%s11082_s7 + $0xb64] ss:$8 sps:$4 sm:$0xff]   ;;  %v9487_v2 = vld [vmem:[%s11082_s7 + $0x360] ss:$8 sps:$4 sm:$0xff]  }
 0x1b9   : > { %v9490_v6 = vld [vmem:[%s11082_s7 + $0xb60] ss:$8 sps:$4 sm:$0xff]  }
 0x1bb   : > { %7806 = vmatpush1.bf16.msra.mxu1 %v9403_v7  ;;  %8134 = vmatpush1.bf16.msra.mxu0 %v9406_v8  ;;  %v9495_v7 = vld [vmem:[%s11082_s7 + $0x374] ss:$8 sps:$4 sm:$0xff]  }
 0x1bc   : > { %7807 = vmatprep.subr.bf16.mxu1 %v9411_v9  ;;  %8135 = vmatprep.subr.bf16.mxu0 %v9414_v10  ;;  %v9498_v8 = vld [vmem:[%s11082_s7 + $0xb74] ss:$8 sps:$4 sm:$0xff]   ;;  %v9493_v9 = vld [vmem:[%s11082_s7 + $0x370] ss:$8 sps:$4 sm:$0xff]  }
 0x1bd   : > { %v9496_v10 = vld [vmem:[%s11082_s7 + $0xb70] ss:$8 sps:$4 sm:$0xff]  }
 0x1bf   : > { %7808 = vmatpush1.bf16.msra.mxu1 %v9409_v12  ;;  %8136 = vmatpush1.bf16.msra.mxu0 %v9412_v13  ;;  %v9501_v12 = vld [vmem:[%s11082_s7 + $0x384] ss:$8 sps:$4 sm:$0xff]  }
 0x1c0   : > { %7809 = vmatprep.subr.bf16.mxu1 %v9417_v14  ;;  %8137 = vmatprep.subr.bf16.mxu0 %v9420_v17  ;;  %v9504_v13 = vld [vmem:[%s11082_s7 + $0xb84] ss:$8 sps:$4 sm:$0xff]   ;;  %v9499_v14 = vld [vmem:[%s11082_s7 + $0x380] ss:$8 sps:$4 sm:$0xff]  }
 0x1c1   : > { %v9502_v17 = vld [vmem:[%s11082_s7 + $0xb80] ss:$8 sps:$4 sm:$0xff]  }
 0x1c3   : > { %7810 = vmatpush1.bf16.msra.mxu1 %v9415_v18  ;;  %8138 = vmatpush1.bf16.msra.mxu0 %v9418_v19  ;;  %v9507_v18 = vld [vmem:[%s11082_s7 + $0x394] ss:$8 sps:$4 sm:$0xff]  }
 0x1c4   : > { %7811 = vmatprep.subr.bf16.mxu1 %v9423_v20  ;;  %8139 = vmatprep.subr.bf16.mxu0 %v9426_v21  ;;  %v9510_v19 = vld [vmem:[%s11082_s7 + $0xb94] ss:$8 sps:$4 sm:$0xff]   ;;  %v9505_v20 = vld [vmem:[%s11082_s7 + $0x390] ss:$8 sps:$4 sm:$0xff]  }
 0x1c5   : > { %v9508_v21 = vld [vmem:[%s11082_s7 + $0xb90] ss:$8 sps:$4 sm:$0xff]  }
 0x1c7   : > { %7812 = vmatpush1.bf16.msra.mxu1 %v9421_v22  ;;  %8140 = vmatpush1.bf16.msra.mxu0 %v9424_v23  ;;  %v9513_v22 = vld [vmem:[%s11082_s7 + $0x3a4] ss:$8 sps:$4 sm:$0xff]  }
 0x1c8   : > { %7813 = vmatprep.subr.bf16.mxu1 %v9429_v28  ;;  %8141 = vmatprep.subr.bf16.mxu0 %v9432_v29  ;;  %v9516_v23 = vld [vmem:[%s11082_s7 + $0xba4] ss:$8 sps:$4 sm:$0xff]   ;;  %v9511_v28 = vld [vmem:[%s11082_s7 + $0x3a0] ss:$8 sps:$4 sm:$0xff]  }
 0x1c9   : > { %v9514_v29 = vld [vmem:[%s11082_s7 + $0xba0] ss:$8 sps:$4 sm:$0xff]  }
 0x1cb   : > { %7814 = vmatpush1.bf16.msra.mxu1 %v9427_v30  ;;  %8142 = vmatpush1.bf16.msra.mxu0 %v9430_v15  ;;  %v9519_v30 = vld [vmem:[%s11082_s7 + $0x3b4] ss:$8 sps:$4 sm:$0xff]  }
 0x1cc   : > { %7815 = vmatprep.subr.bf16.mxu1 %v9435_v31  ;;  %8143 = vmatprep.subr.bf16.mxu0 %v9438_v5  ;;  %v9522_v15 = vld [vmem:[%s11082_s7 + $0xbb4] ss:$8 sps:$4 sm:$0xff]   ;;  %v9517_v31 = vld [vmem:[%s11082_s7 + $0x3b0] ss:$8 sps:$4 sm:$0xff]  }
 0x1cd   : > { %v9520_v5 = vld [vmem:[%s11082_s7 + $0xbb0] ss:$8 sps:$4 sm:$0xff]  }
 0x1cf   : > { %7816 = vmatpush1.bf16.msra.mxu1 %v9433_v32  ;;  %8144 = vmatpush1.bf16.msra.mxu0 %v9436_v25  ;;  %v9525_v32 = vld [vmem:[%s11082_s7 + $0x3c4] ss:$8 sps:$4 sm:$0xff]  }
 0x1d0   : > { %7817 = vmatprep.subr.bf16.mxu1 %v9441_v26  ;;  %8145 = vmatprep.subr.bf16.mxu0 %v9444_v33  ;;  %v9528_v25 = vld [vmem:[%s11082_s7 + $0xbc4] ss:$8 sps:$4 sm:$0xff]   ;;  %v9523_v26 = vld [vmem:[%s11082_s7 + $0x3c0] ss:$8 sps:$4 sm:$0xff]  }
 0x1d1   : > { %v9526_v33 = vld [vmem:[%s11082_s7 + $0xbc0] ss:$8 sps:$4 sm:$0xff]  }
 0x1d3   : > { %7818 = vmatpush1.bf16.msra.mxu1 %v9439_v34  ;;  %8146 = vmatpush1.bf16.msra.mxu0 %v9442_v35  ;;  %v9531_v34 = vld [vmem:[%s11082_s7 + $0x3d4] ss:$8 sps:$4 sm:$0xff]  }
 0x1d4   : > { %7819 = vmatprep.subr.bf16.mxu1 %v9447_v36  ;;  %8147 = vmatprep.subr.bf16.mxu0 %v9450_v37  ;;  %v9534_v35 = vld [vmem:[%s11082_s7 + $0xbd4] ss:$8 sps:$4 sm:$0xff]   ;;  %v9529_v36 = vld [vmem:[%s11082_s7 + $0x3d0] ss:$8 sps:$4 sm:$0xff]  }
 0x1d5   : > { %v9532_v37 = vld [vmem:[%s11082_s7 + $0xbd0] ss:$8 sps:$4 sm:$0xff]  }
 0x1d7   : > { %7820 = vmatpush1.bf16.msra.mxu1 %v9445_v38  ;;  %8148 = vmatpush1.bf16.msra.mxu0 %v9448_v39  ;;  %v9537_v38 = vld [vmem:[%s11082_s7 + $0x3e4] ss:$8 sps:$4 sm:$0xff]  }
 0x1d8   : > { %7830 = vmatprep.subr.bf16.mxu1 %v9453_v27  ;;  %8158 = vmatprep.subr.bf16.mxu0 %v9456_v41  ;;  %v9540_v39 = vld [vmem:[%s11082_s7 + $0xbe4] ss:$8 sps:$4 sm:$0xff]   ;;  %v11419_v41 = vld [vmem:[%s11795_s0 + $0x18] sm:$0xff] }
 0x1d9   : > { %v11414_v27 = vld [vmem:[%s11795_s0 + $0x8] sm:$0xff] }
 0x1da   : > { %7822 = vmatmul.mubr.bf16.vlgmr.msra.gmra.mrb[0].mxu1 %v11345_v44  ;;  %8150 = vmatmul.mubr.bf16.vlgmr.msra.gmra.mrb[0].mxu0 %v11349_v45 }
 0x1db   : > { %7831 = vmatpush1.bf16.msra.mxu1 %v9451_v42  ;;  %8159 = vmatpush1.bf16.msra.mxu0 %v9454_v43  ;;  %v9535_v42 = vld [vmem:[%s11082_s7 + $0x3e0] ss:$8 sps:$4 sm:$0xff]  }
 0x1dc   : > { %7832 = vmatprep.subr.bf16.mxu1 %v9459_v46  ;;  %8160 = vmatprep.subr.bf16.mxu0 %v9462_v47  ;;  %v9538_v43 = vld [vmem:[%s11082_s7 + $0xbe0] ss:$8 sps:$4 sm:$0xff]   ;;  %v9543_v46 = vld [vmem:[%s11082_s7 + $0x3f4] ss:$8 sps:$4 sm:$0xff]  }
 0x1dd   : > { %7862 = vmatprep.mubr.bf16.mxu1 %v4967_v48  ;;  %8190 = vmatprep.mubr.bf16.mxu0 %v5065_v16  ;;  %v9546_v47 = vld [vmem:[%s11082_s7 + $0xbf4] ss:$8 sps:$4 sm:$0xff]   ;;  %v11427_v48 = vrot.slane %v11414_v27, %v11089_v11  ;;  %v11431_v16 = vrot.slane %v11419_v41, %v11089_v11 }
 0x1df   : > { %7833 = vmatpush1.bf16.msra.mxu1 %v9457_v3  ;;  %8161 = vmatpush1.bf16.msra.mxu0 %v9460_v49  ;;  %v9541_v3 = vld [vmem:[%s11082_s7 + $0x3f0] ss:$8 sps:$4 sm:$0xff]  }
 0x1e0   : > { %7834 = vmatprep.subr.bf16.mxu1 %v9465_v50  ;;  %8162 = vmatprep.subr.bf16.mxu0 %v9468_v40  ;;  %v9544_v49 = vld [vmem:[%s11082_s7 + $0xbf0] ss:$8 sps:$4 sm:$0xff]   ;;  %v9549_v50 = vld [vmem:[%s11082_s7 + $0x404] ss:$8 sps:$4 sm:$0xff]  }
 0x1e1   : > { %v9552_v40 = vld [vmem:[%s11082_s7 + $0xc04] ss:$8 sps:$4 sm:$0xff]  }
 0x1e3   : > { %7835 = vmatpush1.bf16.msra.mxu1 %v9463_v24  ;;  %8163 = vmatpush1.bf16.msra.mxu0 %v9466_v51  ;;  %v4983_v24 = vcombine.high %v11427_v48, %v11427_v48  ;;  %v5081_v51 = vcombine.high %v11431_v16, %v11431_v16 }
 0x1e4   : > { %7836 = vmatprep.subr.bf16.mxu1 %v9471_v52  ;;  %8164 = vmatprep.subr.bf16.mxu0 %v9474_v53  ;;  %v4965_v52 = vcombine.high %v11345_v44, %v11345_v44  ;;  %v5063_v53 = vcombine.high %v11349_v45, %v11349_v45  ;;  %v9553_v45 = vld [vmem:[%s11082_s7 + $0x410] ss:$8 sps:$4 sm:$0xff]  }
 0x1e5   : > { %v11453_v44 = vrot.slane %v5081_v51, %v11089_v11  ;;  %v9628_v51 = vld [vmem:[%s11082_s7 + $0xcd0] ss:$8 sps:$4 sm:$0xff]  }
 0x1e7   : > { %7837 = vmatpush1.bf16.msra.mxu1 %v9469_v54  ;;  %8165 = vmatpush1.bf16.msra.mxu0 %v9472_v55  ;;  %v9547_v54 = vld [vmem:[%s11082_s7 + $0x400] ss:$8 sps:$4 sm:$0xff]  }
 0x1e8   : > { %7838 = vmatprep.subr.bf16.mxu1 %v9477_v56  ;;  %8166 = vmatprep.subr.bf16.mxu0 %v9480_v57  ;;  %v9550_v55 = vld [vmem:[%s11082_s7 + $0xc00] ss:$8 sps:$4 sm:$0xff]   ;;  %v9555_v56 = vld [vmem:[%s11082_s7 + $0x414] ss:$8 sps:$4 sm:$0xff]  }
 0x1e9   : > { %v9558_v57 = vld [vmem:[%s11082_s7 + $0xc14] ss:$8 sps:$4 sm:$0xff]  }
 0x1eb   : > { %7839 = vmatpush1.bf16.msra.mxu1 %v9475_v58  ;;  %8167 = vmatpush1.bf16.msra.mxu0 %v9478_v59  ;;  %v11450_v58 = vrot.slane %v4983_v24, %v11089_v11  ;;  %v9556_v59 = vld [vmem:[%s11082_s7 + $0xc10] ss:$8 sps:$4 sm:$0xff]  }
 0x1ec   : > { %7840 = vmatprep.subr.bf16.mxu1 %v9483_v60  ;;  %8168 = vmatprep.subr.bf16.mxu0 %v9486_v61  ;;  %v9561_v60 = vld [vmem:[%s11082_s7 + $0x424] ss:$8 sps:$4 sm:$0xff]   ;;  %v9625_v24 = vld [vmem:[%s11082_s7 + $0x4d0] ss:$8 sps:$4 sm:$0xff]  }
 0x1ed   : > { %v9564_v61 = vld [vmem:[%s11082_s7 + $0xc24] ss:$8 sps:$4 sm:$0xff]  }
 0x1ef   : > { %7841 = vmatpush1.bf16.msra.mxu1 %v9481_v62  ;;  %8169 = vmatpush1.bf16.msra.mxu0 %v9484_v63  ;;  %v9559_v62 = vld [vmem:[%s11082_s7 + $0x420] ss:$8 sps:$4 sm:$0xff]  }
 0x1f0   : > { %7842 = vmatprep.subr.bf16.mxu1 %v9489_v0  ;;  %8170 = vmatprep.subr.bf16.mxu0 %v9492_v1  ;;  %v9562_v63 = vld [vmem:[%s11082_s7 + $0xc20] ss:$8 sps:$4 sm:$0xff]   ;;  %v9567_v0 = vld [vmem:[%s11082_s7 + $0x434] ss:$8 sps:$4 sm:$0xff]  }
 0x1f1   : > { %v9570_v1 = vld [vmem:[%s11082_s7 + $0xc34] ss:$8 sps:$4 sm:$0xff]  }
 0x1f3   : > { %7843 = vmatpush1.bf16.msra.mxu1 %v9487_v2  ;;  %8171 = vmatpush1.bf16.msra.mxu0 %v9490_v6  ;;  %v9565_v2 = vld [vmem:[%s11082_s7 + $0x430] ss:$8 sps:$4 sm:$0xff]  }
 0x1f4   : > { %7844 = vmatprep.subr.bf16.mxu1 %v9495_v7  ;;  %8172 = vmatprep.subr.bf16.mxu0 %v9498_v8  ;;  %v9568_v6 = vld [vmem:[%s11082_s7 + $0xc30] ss:$8 sps:$4 sm:$0xff]   ;;  %v9573_v7 = vld [vmem:[%s11082_s7 + $0x444] ss:$8 sps:$4 sm:$0xff]  }
 0x1f5   : > { %v9576_v8 = vld [vmem:[%s11082_s7 + $0xc44] ss:$8 sps:$4 sm:$0xff]  }
 0x1f7   : > { %7845 = vmatpush1.bf16.msra.mxu1 %v9493_v9  ;;  %8173 = vmatpush1.bf16.msra.mxu0 %v9496_v10  ;;  %v9571_v9 = vld [vmem:[%s11082_s7 + $0x440] ss:$8 sps:$4 sm:$0xff]  }
 0x1f8   : > { %7846 = vmatprep.subr.bf16.mxu1 %v9501_v12  ;;  %8174 = vmatprep.subr.bf16.mxu0 %v9504_v13  ;;  %v9574_v10 = vld [vmem:[%s11082_s7 + $0xc40] ss:$8 sps:$4 sm:$0xff]   ;;  %v9579_v12 = vld [vmem:[%s11082_s7 + $0x454] ss:$8 sps:$4 sm:$0xff]  }
 0x1f9   : > { %v9582_v13 = vld [vmem:[%s11082_s7 + $0xc54] ss:$8 sps:$4 sm:$0xff]  }
 0x1fb   : > { %7847 = vmatpush1.bf16.msra.mxu1 %v9499_v14  ;;  %8175 = vmatpush1.bf16.msra.mxu0 %v9502_v17  ;;  %v9577_v14 = vld [vmem:[%s11082_s7 + $0x450] ss:$8 sps:$4 sm:$0xff]  }
 0x1fc   : > { %7848 = vmatprep.subr.bf16.mxu1 %v9507_v18  ;;  %8176 = vmatprep.subr.bf16.mxu0 %v9510_v19  ;;  %v9580_v17 = vld [vmem:[%s11082_s7 + $0xc50] ss:$8 sps:$4 sm:$0xff]   ;;  %v9585_v18 = vld [vmem:[%s11082_s7 + $0x464] ss:$8 sps:$4 sm:$0xff]  }
 0x1fd   : > { %v9588_v19 = vld [vmem:[%s11082_s7 + $0xc64] ss:$8 sps:$4 sm:$0xff]  }
 0x1ff   : > { %7849 = vmatpush1.bf16.msra.mxu1 %v9505_v20  ;;  %8177 = vmatpush1.bf16.msra.mxu0 %v9508_v21  ;;  %v9583_v20 = vld [vmem:[%s11082_s7 + $0x460] ss:$8 sps:$4 sm:$0xff]  }
 0x200   : > { %7850 = vmatprep.subr.bf16.mxu1 %v9513_v22  ;;  %8178 = vmatprep.subr.bf16.mxu0 %v9516_v23  ;;  %v9586_v21 = vld [vmem:[%s11082_s7 + $0xc60] ss:$8 sps:$4 sm:$0xff]   ;;  %v9591_v22 = vld [vmem:[%s11082_s7 + $0x474] ss:$8 sps:$4 sm:$0xff]  }
 0x201   : > { %v9594_v23 = vld [vmem:[%s11082_s7 + $0xc74] ss:$8 sps:$4 sm:$0xff]  }
 0x203   : > { %7851 = vmatpush1.bf16.msra.mxu1 %v9511_v28  ;;  %8179 = vmatpush1.bf16.msra.mxu0 %v9514_v29  ;;  %v9589_v28 = vld [vmem:[%s11082_s7 + $0x470] ss:$8 sps:$4 sm:$0xff]  }
 0x204   : > { %7852 = vmatprep.subr.bf16.mxu1 %v9519_v30  ;;  %8180 = vmatprep.subr.bf16.mxu0 %v9522_v15  ;;  %v9592_v29 = vld [vmem:[%s11082_s7 + $0xc70] ss:$8 sps:$4 sm:$0xff]   ;;  %v9597_v30 = vld [vmem:[%s11082_s7 + $0x484] ss:$8 sps:$4 sm:$0xff]  }
 0x205   : > { %v9600_v15 = vld [vmem:[%s11082_s7 + $0xc84] ss:$8 sps:$4 sm:$0xff]  }
 0x207   : > { %7853 = vmatpush1.bf16.msra.mxu1 %v9517_v31  ;;  %8181 = vmatpush1.bf16.msra.mxu0 %v9520_v5  ;;  %v9595_v31 = vld [vmem:[%s11082_s7 + $0x480] ss:$8 sps:$4 sm:$0xff]  }
 0x208   : > { %7854 = vmatprep.subr.bf16.mxu1 %v9525_v32  ;;  %8182 = vmatprep.subr.bf16.mxu0 %v9528_v25  ;;  %v9598_v5 = vld [vmem:[%s11082_s7 + $0xc80] ss:$8 sps:$4 sm:$0xff]   ;;  %v9603_v32 = vld [vmem:[%s11082_s7 + $0x494] ss:$8 sps:$4 sm:$0xff]  }
 0x209   : > { %v9606_v25 = vld [vmem:[%s11082_s7 + $0xc94] ss:$8 sps:$4 sm:$0xff]  }
 0x20b   : > { %7855 = vmatpush1.bf16.msra.mxu1 %v9523_v26  ;;  %8183 = vmatpush1.bf16.msra.mxu0 %v9526_v33  ;;  %v9601_v26 = vld [vmem:[%s11082_s7 + $0x490] ss:$8 sps:$4 sm:$0xff]  }
 0x20c   : > { %7856 = vmatprep.subr.bf16.mxu1 %v9531_v34  ;;  %8184 = vmatprep.subr.bf16.mxu0 %v9534_v35  ;;  %v9604_v33 = vld [vmem:[%s11082_s7 + $0xc90] ss:$8 sps:$4 sm:$0xff]   ;;  %v9609_v34 = vld [vmem:[%s11082_s7 + $0x4a4] ss:$8 sps:$4 sm:$0xff]  }
 0x20d   : > { %v9612_v35 = vld [vmem:[%s11082_s7 + $0xca4] ss:$8 sps:$4 sm:$0xff]  }
 0x20f   : > { %7857 = vmatpush1.bf16.msra.mxu1 %v9529_v36  ;;  %8185 = vmatpush1.bf16.msra.mxu0 %v9532_v37  ;;  %v9607_v36 = vld [vmem:[%s11082_s7 + $0x4a0] ss:$8 sps:$4 sm:$0xff]  }
 0x210   : > { %7858 = vmatprep.subr.bf16.mxu1 %v9537_v38  ;;  %8186 = vmatprep.subr.bf16.mxu0 %v9540_v39  ;;  %v9610_v37 = vld [vmem:[%s11082_s7 + $0xca0] ss:$8 sps:$4 sm:$0xff]   ;;  %v9615_v38 = vld [vmem:[%s11082_s7 + $0x4b4] ss:$8 sps:$4 sm:$0xff]  }
 0x211   : > { %v9618_v39 = vld [vmem:[%s11082_s7 + $0xcb4] ss:$8 sps:$4 sm:$0xff]  }
 0x213   : > { %7859 = vmatpush1.bf16.msra.mxu1 %v9535_v42  ;;  %8187 = vmatpush1.bf16.msra.mxu0 %v9538_v43  ;;  %v9613_v42 = vld [vmem:[%s11082_s7 + $0x4b0] ss:$8 sps:$4 sm:$0xff]  }
 0x214   : > { %7860 = vmatprep.subr.bf16.mxu1 %v9543_v46  ;;  %8188 = vmatprep.subr.bf16.mxu0 %v9546_v47  ;;  %v9616_v43 = vld [vmem:[%s11082_s7 + $0xcb0] ss:$8 sps:$4 sm:$0xff]   ;;  %v9621_v46 = vld [vmem:[%s11082_s7 + $0x4c4] ss:$8 sps:$4 sm:$0xff]  }
 0x215   : > { %v9624_v47 = vld [vmem:[%s11082_s7 + $0xcc4] ss:$8 sps:$4 sm:$0xff]  }
 0x217   : > { %7861 = vmatpush1.bf16.msra.mxu1 %v9541_v3  ;;  %8189 = vmatpush1.bf16.msra.mxu0 %v9544_v49  ;;  %v9619_v3 = vld [vmem:[%s11082_s7 + $0x4c0] ss:$8 sps:$4 sm:$0xff]  }
 0x218   : > { %7871 = vmatprep.subr.bf16.mxu1 %v9549_v50  ;;  %8199 = vmatprep.subr.bf16.mxu0 %v9552_v40  ;;  %v9622_v49 = vld [vmem:[%s11082_s7 + $0xcc0] ss:$8 sps:$4 sm:$0xff]   ;;  %v9627_v50 = vld [vmem:[%s11082_s7 + $0x4d4] ss:$8 sps:$4 sm:$0xff]  }
 0x219   : > { %v9630_v40 = vld [vmem:[%s11082_s7 + $0xcd4] ss:$8 sps:$4 sm:$0xff]  }
 0x21a   : > { %7863 = vmatmul.mubr.bf16.vlgmr.msra.gmra.mrb[0].mxu1 %v4965_v52  ;;  %8191 = vmatmul.mubr.bf16.vlgmr.msra.gmra.mrb[0].mxu0 %v5063_v53  ;;  %v9633_v52 = vld [vmem:[%s11082_s7 + $0x4e4] ss:$8 sps:$4 sm:$0xff]  }
 0x21b   : > { %7872 = vmatpush1.bf16.msra.mxu1 %v9547_v54  ;;  %8200 = vmatpush1.bf16.msra.mxu0 %v9550_v55  ;;  %v9636_v53 = vld [vmem:[%s11082_s7 + $0xce4] ss:$8 sps:$4 sm:$0xff]   ;;  %v9631_v54 = vld [vmem:[%s11082_s7 + $0x4e0] ss:$8 sps:$4 sm:$0xff]  }
 0x21c   : > { %7873 = vmatprep.subr.bf16.mxu1 %v9555_v56  ;;  %8201 = vmatprep.subr.bf16.mxu0 %v9558_v57  ;;  %v9634_v55 = vld [vmem:[%s11082_s7 + $0xce0] ss:$8 sps:$4 sm:$0xff]   ;;  %v9639_v56 = vld [vmem:[%s11082_s7 + $0x4f4] ss:$8 sps:$4 sm:$0xff]  }
 0x21d   : > { %7903 = vmatprep.mubr.bf16.mxu1 %v11450_v58  ;;  %8231 = vmatprep.mubr.bf16.mxu0 %v11453_v44  ;;  %v9642_v57 = vld [vmem:[%s11082_s7 + $0xcf4] ss:$8 sps:$4 sm:$0xff]  }
 0x21f   : > { %7874 = vmatpush1.bf16.msra.mxu1 %v9553_v45  ;;  %8202 = vmatpush1.bf16.msra.mxu0 %v9556_v59  ;;  %v9637_v45 = vld [vmem:[%s11082_s7 + $0x4f0] ss:$8 sps:$4 sm:$0xff]  }
 0x220   : > { %7875 = vmatprep.subr.bf16.mxu1 %v9561_v60  ;;  %8203 = vmatprep.subr.bf16.mxu0 %v9564_v61  ;;  %v9640_v59 = vld [vmem:[%s11082_s7 + $0xcf0] ss:$8 sps:$4 sm:$0xff]   ;;  %v9645_v60 = vld [vmem:[%s11082_s7 + $0x504] ss:$8 sps:$4 sm:$0xff]  }
 0x221   : > { %v9648_v61 = vld [vmem:[%s11082_s7 + $0xd04] ss:$8 sps:$4 sm:$0xff]  }
 0x223   : > { %7876 = vmatpush1.bf16.msra.mxu1 %v9559_v62  ;;  %8204 = vmatpush1.bf16.msra.mxu0 %v9562_v63  ;;  %v11519_v62 = vrot.slane %v11427_v48, %v11089_v11  ;;  %v11523_v63 = vrot.slane %v11431_v16, %v11089_v11  ;;  %v5015_v48 = vcombine.high %v11450_v58, %v11450_v58  ;;  %v9649_v16 = vld [vmem:[%s11082_s7 + $0x510] ss:$8 sps:$4 sm:$0xff]   ;;  %v9657_v58 = vld [vmem:[%s11082_s7 + $0x524] ss:$8 sps:$4 sm:$0xff]  }
 0x224   : > { %7877 = vmatprep.subr.bf16.mxu1 %v9567_v0  ;;  %8205 = vmatprep.subr.bf16.mxu0 %v9570_v1  ;;  %v9643_v0 = vld [vmem:[%s11082_s7 + $0x500] ss:$8 sps:$4 sm:$0xff]  }
 0x225   : > { %v9646_v1 = vld [vmem:[%s11082_s7 + $0xd00] ss:$8 sps:$4 sm:$0xff]  }
 0x227   : > { %7878 = vmatpush1.bf16.msra.mxu1 %v9565_v2  ;;  %8206 = vmatpush1.bf16.msra.mxu0 %v9568_v6  ;;  %v9651_v2 = vld [vmem:[%s11082_s7 + $0x514] ss:$8 sps:$4 sm:$0xff]  }
 0x228   : > { %7879 = vmatprep.subr.bf16.mxu1 %v9573_v7  ;;  %8207 = vmatprep.subr.bf16.mxu0 %v9576_v8  ;;  %v9654_v6 = vld [vmem:[%s11082_s7 + $0xd14] ss:$8 sps:$4 sm:$0xff]   ;;  %v5113_v7 = vcombine.high %v11453_v44, %v11453_v44  ;;  %v9652_v8 = vld [vmem:[%s11082_s7 + $0xd10] ss:$8 sps:$4 sm:$0xff]   ;;  %v9655_v44 = vld [vmem:[%s11082_s7 + $0x520] ss:$8 sps:$4 sm:$0xff]  }
 0x22b   : > { %7880 = vmatpush1.bf16.msra.mxu1 %v9571_v9  ;;  %8208 = vmatpush1.bf16.msra.mxu0 %v9574_v10  ;;  %v9660_v9 = vld [vmem:[%s11082_s7 + $0xd24] ss:$8 sps:$4 sm:$0xff]   ;;  %v9658_v10 = vld [vmem:[%s11082_s7 + $0xd20] ss:$8 sps:$4 sm:$0xff]  }
 0x22c   : > { %7881 = vmatprep.subr.bf16.mxu1 %v9579_v12  ;;  %8209 = vmatprep.subr.bf16.mxu0 %v9582_v13  ;;  %v9663_v12 = vld [vmem:[%s11082_s7 + $0x534] ss:$8 sps:$4 sm:$0xff]  }
 0x22d   : > { %v9666_v13 = vld [vmem:[%s11082_s7 + $0xd34] ss:$8 sps:$4 sm:$0xff]  }
 0x22f   : > { %7882 = vmatpush1.bf16.msra.mxu1 %v9577_v14  ;;  %8210 = vmatpush1.bf16.msra.mxu0 %v9580_v17  ;;  %v9661_v14 = vld [vmem:[%s11082_s7 + $0x530] ss:$8 sps:$4 sm:$0xff]  }
 0x230   : > { %7883 = vmatprep.subr.bf16.mxu1 %v9585_v18  ;;  %8211 = vmatprep.subr.bf16.mxu0 %v9588_v19  ;;  %v9664_v17 = vld [vmem:[%s11082_s7 + $0xd30] ss:$8 sps:$4 sm:$0xff]   ;;  %v9669_v18 = vld [vmem:[%s11082_s7 + $0x544] ss:$8 sps:$4 sm:$0xff]  }
 0x231   : > { %v9672_v19 = vld [vmem:[%s11082_s7 + $0xd44] ss:$8 sps:$4 sm:$0xff]  }
 0x233   : > { %7884 = vmatpush1.bf16.msra.mxu1 %v9583_v20  ;;  %8212 = vmatpush1.bf16.msra.mxu0 %v9586_v21  ;;  %v9667_v20 = vld [vmem:[%s11082_s7 + $0x540] ss:$8 sps:$4 sm:$0xff]  }
 0x234   : > { %7885 = vmatprep.subr.bf16.mxu1 %v9591_v22  ;;  %8213 = vmatprep.subr.bf16.mxu0 %v9594_v23  ;;  %v9670_v21 = vld [vmem:[%s11082_s7 + $0xd40] ss:$8 sps:$4 sm:$0xff]   ;;  %v9675_v22 = vld [vmem:[%s11082_s7 + $0x554] ss:$8 sps:$4 sm:$0xff]  }
 0x235   : > { %v9678_v23 = vld [vmem:[%s11082_s7 + $0xd54] ss:$8 sps:$4 sm:$0xff]  }
 0x237   : > { %7886 = vmatpush1.bf16.msra.mxu1 %v9589_v28  ;;  %8214 = vmatpush1.bf16.msra.mxu0 %v9592_v29  ;;  %v9673_v28 = vld [vmem:[%s11082_s7 + $0x550] ss:$8 sps:$4 sm:$0xff]  }
 0x238   : > { %7887 = vmatprep.subr.bf16.mxu1 %v9597_v30  ;;  %8215 = vmatprep.subr.bf16.mxu0 %v9600_v15  ;;  %v9676_v29 = vld [vmem:[%s11082_s7 + $0xd50] ss:$8 sps:$4 sm:$0xff]   ;;  %v9681_v30 = vld [vmem:[%s11082_s7 + $0x564] ss:$8 sps:$4 sm:$0xff]  }
 0x239   : > { %v9684_v15 = vld [vmem:[%s11082_s7 + $0xd64] ss:$8 sps:$4 sm:$0xff]  }
 0x23b   : > { %7888 = vmatpush1.bf16.msra.mxu1 %v9595_v31  ;;  %8216 = vmatpush1.bf16.msra.mxu0 %v9598_v5  ;;  %v9679_v31 = vld [vmem:[%s11082_s7 + $0x560] ss:$8 sps:$4 sm:$0xff]  }
 0x23c   : > { %7889 = vmatprep.subr.bf16.mxu1 %v9603_v32  ;;  %8217 = vmatprep.subr.bf16.mxu0 %v9606_v25  ;;  %v9682_v5 = vld [vmem:[%s11082_s7 + $0xd60] ss:$8 sps:$4 sm:$0xff]   ;;  %v9687_v32 = vld [vmem:[%s11082_s7 + $0x574] ss:$8 sps:$4 sm:$0xff]  }
 0x23d   : > { %v9690_v25 = vld [vmem:[%s11082_s7 + $0xd74] ss:$8 sps:$4 sm:$0xff]  }
 0x23f   : > { %7890 = vmatpush1.bf16.msra.mxu1 %v9601_v26  ;;  %8218 = vmatpush1.bf16.msra.mxu0 %v9604_v33  ;;  %v9685_v26 = vld [vmem:[%s11082_s7 + $0x570] ss:$8 sps:$4 sm:$0xff]  }
 0x240   : > { %7891 = vmatprep.subr.bf16.mxu1 %v9609_v34  ;;  %8219 = vmatprep.subr.bf16.mxu0 %v9612_v35  ;;  %v9688_v33 = vld [vmem:[%s11082_s7 + $0xd70] ss:$8 sps:$4 sm:$0xff]   ;;  %v9693_v34 = vld [vmem:[%s11082_s7 + $0x584] ss:$8 sps:$4 sm:$0xff]  }
 0x241   : > { %v9696_v35 = vld [vmem:[%s11082_s7 + $0xd84] ss:$8 sps:$4 sm:$0xff]  }
 0x243   : > { %7892 = vmatpush1.bf16.msra.mxu1 %v9607_v36  ;;  %8220 = vmatpush1.bf16.msra.mxu0 %v9610_v37  ;;  %v9691_v36 = vld [vmem:[%s11082_s7 + $0x580] ss:$8 sps:$4 sm:$0xff]  }
 0x244   : > { %7893 = vmatprep.subr.bf16.mxu1 %v9615_v38  ;;  %8221 = vmatprep.subr.bf16.mxu0 %v9618_v39  ;;  %v9694_v37 = vld [vmem:[%s11082_s7 + $0xd80] ss:$8 sps:$4 sm:$0xff]   ;;  %v9699_v38 = vld [vmem:[%s11082_s7 + $0x594] ss:$8 sps:$4 sm:$0xff]  }
 0x245   : > { %v9702_v39 = vld [vmem:[%s11082_s7 + $0xd94] ss:$8 sps:$4 sm:$0xff]  }
 0x247   : > { %7894 = vmatpush1.bf16.msra.mxu1 %v9613_v42  ;;  %8222 = vmatpush1.bf16.msra.mxu0 %v9616_v43  ;;  %v9697_v42 = vld [vmem:[%s11082_s7 + $0x590] ss:$8 sps:$4 sm:$0xff]  }
 0x248   : > { %7895 = vmatprep.subr.bf16.mxu1 %v9621_v46  ;;  %8223 = vmatprep.subr.bf16.mxu0 %v9624_v47  ;;  %v9700_v43 = vld [vmem:[%s11082_s7 + $0xd90] ss:$8 sps:$4 sm:$0xff]   ;;  %v9705_v46 = vld [vmem:[%s11082_s7 + $0x5a4] ss:$8 sps:$4 sm:$0xff]  }
 0x249   : > { %v9708_v47 = vld [vmem:[%s11082_s7 + $0xda4] ss:$8 sps:$4 sm:$0xff]  }
 0x24b   : > { %7896 = vmatpush1.bf16.msra.mxu1 %v9619_v3  ;;  %8224 = vmatpush1.bf16.msra.mxu0 %v9622_v49  ;;  %v9703_v3 = vld [vmem:[%s11082_s7 + $0x5a0] ss:$8 sps:$4 sm:$0xff]  }
 0x24c   : > { %7897 = vmatprep.subr.bf16.mxu1 %v9627_v50  ;;  %8225 = vmatprep.subr.bf16.mxu0 %v9630_v40  ;;  %v9706_v49 = vld [vmem:[%s11082_s7 + $0xda0] ss:$8 sps:$4 sm:$0xff]   ;;  %v9711_v50 = vld [vmem:[%s11082_s7 + $0x5b4] ss:$8 sps:$4 sm:$0xff]  }
 0x24d   : > { %v9714_v40 = vld [vmem:[%s11082_s7 + $0xdb4] ss:$8 sps:$4 sm:$0xff]  }
 0x24f   : > { %7898 = vmatpush1.bf16.msra.mxu1 %v9625_v24  ;;  %8226 = vmatpush1.bf16.msra.mxu0 %v9628_v51  ;;  %v9709_v24 = vld [vmem:[%s11082_s7 + $0x5b0] ss:$8 sps:$4 sm:$0xff]  }
 0x250   : > { %7899 = vmatprep.subr.bf16.mxu1 %v9633_v52  ;;  %8227 = vmatprep.subr.bf16.mxu0 %v9636_v53  ;;  %v9712_v51 = vld [vmem:[%s11082_s7 + $0xdb0] ss:$8 sps:$4 sm:$0xff]   ;;  %v9717_v52 = vld [vmem:[%s11082_s7 + $0x5c4] ss:$8 sps:$4 sm:$0xff]  }
 0x251   : > { %v9720_v53 = vld [vmem:[%s11082_s7 + $0xdc4] ss:$8 sps:$4 sm:$0xff]  }
 0x253   : > { %7900 = vmatpush1.bf16.msra.mxu1 %v9631_v54  ;;  %8228 = vmatpush1.bf16.msra.mxu0 %v9634_v55  ;;  %v9715_v54 = vld [vmem:[%s11082_s7 + $0x5c0] ss:$8 sps:$4 sm:$0xff]  }
 0x254   : > { %7901 = vmatprep.subr.bf16.mxu1 %v9639_v56  ;;  %8229 = vmatprep.subr.bf16.mxu0 %v9642_v57  ;;  %v9718_v55 = vld [vmem:[%s11082_s7 + $0xdc0] ss:$8 sps:$4 sm:$0xff]   ;;  %v9723_v56 = vld [vmem:[%s11082_s7 + $0x5d4] ss:$8 sps:$4 sm:$0xff]  }
 0x255   : > { %v9726_v57 = vld [vmem:[%s11082_s7 + $0xdd4] ss:$8 sps:$4 sm:$0xff]  }
 0x257   : > { %7902 = vmatpush1.bf16.msra.mxu1 %v9637_v45  ;;  %8230 = vmatpush1.bf16.msra.mxu0 %v9640_v59  ;;  %v9721_v45 = vld [vmem:[%s11082_s7 + $0x5d0] ss:$8 sps:$4 sm:$0xff]  }
 0x258   : > { %7912 = vmatprep.subr.bf16.mxu1 %v9645_v60  ;;  %8240 = vmatprep.subr.bf16.mxu0 %v9648_v61  ;;  %v9724_v59 = vld [vmem:[%s11082_s7 + $0xdd0] ss:$8 sps:$4 sm:$0xff]   ;;  %v9729_v60 = vld [vmem:[%s11082_s7 + $0x5e4] ss:$8 sps:$4 sm:$0xff]  }
 0x259   : > { %v9732_v61 = vld [vmem:[%s11082_s7 + $0xde4] ss:$8 sps:$4 sm:$0xff]  }
 0x25a   : > { %7904 = vmatmul.mubr.bf16.vlgmr.msra.gmra.mrb[0].mxu1 %v11519_v62  ;;  %8232 = vmatmul.mubr.bf16.vlgmr.msra.gmra.mrb[0].mxu0 %v11523_v63 }
 0x25b   : > { %7913 = vmatpush1.bf16.msra.mxu1 %v9643_v0  ;;  %8241 = vmatpush1.bf16.msra.mxu0 %v9646_v1  ;;  %v4968_v0 = vcombine.high %v11414_v27, %v11414_v27  ;;  %v5066_v1 = vcombine.high %v11419_v41, %v11419_v41  ;;  %v9733_v27 = vld [vmem:[%s11082_s7 + $0x5f0] ss:$8 sps:$4 sm:$0xff]  }
 0x25c   : > { %7914 = vmatprep.subr.bf16.mxu1 %v9651_v2  ;;  %8242 = vmatprep.subr.bf16.mxu0 %v9654_v6  ;;  %v9727_v2 = vld [vmem:[%s11082_s7 + $0x5e0] ss:$8 sps:$4 sm:$0xff]   ;;  %v9736_v41 = vld [vmem:[%s11082_s7 + $0xdf0] ss:$8 sps:$4 sm:$0xff]  }
 0x25d   : > { %7944 = vmatprep.mubr.bf16.mxu1 %v5015_v48  ;;  %8272 = vmatprep.mubr.bf16.mxu0 %v5113_v7  ;;  %v9730_v6 = vld [vmem:[%s11082_s7 + $0xde0] ss:$8 sps:$4 sm:$0xff]   ;;  %v9735_v48 = vld [vmem:[%s11082_s7 + $0x5f4] ss:$8 sps:$4 sm:$0xff]  }
 0x25e   : > { %v9738_v7 = vld [vmem:[%s11082_s7 + $0xdf4] ss:$8 sps:$4 sm:$0xff]  }
 0x25f   : > { %7915 = vmatpush1.bf16.msra.mxu1 %v9649_v16  ;;  %8243 = vmatpush1.bf16.msra.mxu0 %v9652_v8  ;;  %v11596_v16 = vrot.slane %v4968_v0, %v11089_v11  ;;  %v11599_v8 = vrot.slane %v5066_v1, %v11089_v11  ;;  %v9805_v0 = vld [vmem:[%s11082_s7 + $0x6b0] ss:$8 sps:$4 sm:$0xff]  }
 0x260   : > { %7916 = vmatprep.subr.bf16.mxu1 %v9657_v58  ;;  %8244 = vmatprep.subr.bf16.mxu0 %v9660_v9  ;;  %v9741_v58 = vld [vmem:[%s11082_s7 + $0x604] ss:$8 sps:$4 sm:$0xff]   ;;  %v9808_v1 = vld [vmem:[%s11082_s7 + $0xeb0] ss:$8 sps:$4 sm:$0xff]  }
 0x261   : > { %v9744_v9 = vld [vmem:[%s11082_s7 + $0xe04] ss:$8 sps:$4 sm:$0xff]  }
 0x263   : > { %7917 = vmatpush1.bf16.msra.mxu1 %v9655_v44  ;;  %8245 = vmatpush1.bf16.msra.mxu0 %v9658_v10  ;;  %v4984_v44 = vcombine.high %v11596_v16, %v11596_v16  ;;  %v5082_v10 = vcombine.high %v11599_v8, %v11599_v8 }
 0x264   : > { %7918 = vmatprep.subr.bf16.mxu1 %v9663_v12  ;;  %8246 = vmatprep.subr.bf16.mxu0 %v9666_v13  ;;  %v5013_v12 = vcombine.high %v11519_v62, %v11519_v62  ;;  %v5111_v13 = vcombine.high %v11523_v63, %v11523_v63  ;;  %v9745_v63 = vld [vmem:[%s11082_s7 + $0x610] ss:$8 sps:$4 sm:$0xff]  }
 0x265   : > { %v11621_v62 = vrot.slane %v5082_v10, %v11089_v11  ;;  %v9828_v10 = vld [vmem:[%s11082_s7 + $0xee4] ss:$8 sps:$4 sm:$0xff]  }
 0x267   : > { %7919 = vmatpush1.bf16.msra.mxu1 %v9661_v14  ;;  %8247 = vmatpush1.bf16.msra.mxu0 %v9664_v17  ;;  %v9739_v14 = vld [vmem:[%s11082_s7 + $0x600] ss:$8 sps:$4 sm:$0xff]  }
 0x268   : > { %7920 = vmatprep.subr.bf16.mxu1 %v9669_v18  ;;  %8248 = vmatprep.subr.bf16.mxu0 %v9672_v19  ;;  %v9742_v17 = vld [vmem:[%s11082_s7 + $0xe00] ss:$8 sps:$4 sm:$0xff]   ;;  %v9747_v18 = vld [vmem:[%s11082_s7 + $0x614] ss:$8 sps:$4 sm:$0xff]  }
 0x269   : > { %v9750_v19 = vld [vmem:[%s11082_s7 + $0xe14] ss:$8 sps:$4 sm:$0xff]  }
 0x26b   : > { %7921 = vmatpush1.bf16.msra.mxu1 %v9667_v20  ;;  %8249 = vmatpush1.bf16.msra.mxu0 %v9670_v21  ;;  %v11618_v20 = vrot.slane %v4984_v44, %v11089_v11  ;;  %v9748_v21 = vld [vmem:[%s11082_s7 + $0xe10] ss:$8 sps:$4 sm:$0xff]   ;;  %v9825_v44 = vld [vmem:[%s11082_s7 + $0x6e4] ss:$8 sps:$4 sm:$0xff]  }
 0x26c   : > { %7922 = vmatprep.subr.bf16.mxu1 %v9675_v22  ;;  %8250 = vmatprep.subr.bf16.mxu0 %v9678_v23  ;;  %v9753_v22 = vld [vmem:[%s11082_s7 + $0x624] ss:$8 sps:$4 sm:$0xff]  }
 0x26d   : > { %v9756_v23 = vld [vmem:[%s11082_s7 + $0xe24] ss:$8 sps:$4 sm:$0xff]  }
 0x26f   : > { %7923 = vmatpush1.bf16.msra.mxu1 %v9673_v28  ;;  %8251 = vmatpush1.bf16.msra.mxu0 %v9676_v29  ;;  %v9751_v28 = vld [vmem:[%s11082_s7 + $0x620] ss:$8 sps:$4 sm:$0xff]  }
 0x270   : > { %7924 = vmatprep.subr.bf16.mxu1 %v9681_v30  ;;  %8252 = vmatprep.subr.bf16.mxu0 %v9684_v15  ;;  %v9754_v29 = vld [vmem:[%s11082_s7 + $0xe20] ss:$8 sps:$4 sm:$0xff]   ;;  %v9759_v30 = vld [vmem:[%s11082_s7 + $0x634] ss:$8 sps:$4 sm:$0xff]  }
 0x271   : > { %v9762_v15 = vld [vmem:[%s11082_s7 + $0xe34] ss:$8 sps:$4 sm:$0xff]  }
 0x273   : > { %7925 = vmatpush1.bf16.msra.mxu1 %v9679_v31  ;;  %8253 = vmatpush1.bf16.msra.mxu0 %v9682_v5  ;;  %v9757_v31 = vld [vmem:[%s11082_s7 + $0x630] ss:$8 sps:$4 sm:$0xff]  }
 0x274   : > { %7926 = vmatprep.subr.bf16.mxu1 %v9687_v32  ;;  %8254 = vmatprep.subr.bf16.mxu0 %v9690_v25  ;;  %v9760_v5 = vld [vmem:[%s11082_s7 + $0xe30] ss:$8 sps:$4 sm:$0xff]   ;;  %v9765_v32 = vld [vmem:[%s11082_s7 + $0x644] ss:$8 sps:$4 sm:$0xff]  }
 0x275   : > { %v9768_v25 = vld [vmem:[%s11082_s7 + $0xe44] ss:$8 sps:$4 sm:$0xff]  }
 0x277   : > { %7927 = vmatpush1.bf16.msra.mxu1 %v9685_v26  ;;  %8255 = vmatpush1.bf16.msra.mxu0 %v9688_v33  ;;  %v9763_v26 = vld [vmem:[%s11082_s7 + $0x640] ss:$8 sps:$4 sm:$0xff]  }
 0x278   : > { %7928 = vmatprep.subr.bf16.mxu1 %v9693_v34  ;;  %8256 = vmatprep.subr.bf16.mxu0 %v9696_v35  ;;  %v9766_v33 = vld [vmem:[%s11082_s7 + $0xe40] ss:$8 sps:$4 sm:$0xff]   ;;  %v9771_v34 = vld [vmem:[%s11082_s7 + $0x654] ss:$8 sps:$4 sm:$0xff]  }
 0x279   : > { %v9774_v35 = vld [vmem:[%s11082_s7 + $0xe54] ss:$8 sps:$4 sm:$0xff]  }
 0x27b   : > { %7929 = vmatpush1.bf16.msra.mxu1 %v9691_v36  ;;  %8257 = vmatpush1.bf16.msra.mxu0 %v9694_v37  ;;  %v9769_v36 = vld [vmem:[%s11082_s7 + $0x650] ss:$8 sps:$4 sm:$0xff]  }
 0x27c   : > { %7930 = vmatprep.subr.bf16.mxu1 %v9699_v38  ;;  %8258 = vmatprep.subr.bf16.mxu0 %v9702_v39  ;;  %v9772_v37 = vld [vmem:[%s11082_s7 + $0xe50] ss:$8 sps:$4 sm:$0xff]   ;;  %v9777_v38 = vld [vmem:[%s11082_s7 + $0x664] ss:$8 sps:$4 sm:$0xff]  }
 0x27d   : > { %v9780_v39 = vld [vmem:[%s11082_s7 + $0xe64] ss:$8 sps:$4 sm:$0xff]  }
 0x27f   : > { %7931 = vmatpush1.bf16.msra.mxu1 %v9697_v42  ;;  %8259 = vmatpush1.bf16.msra.mxu0 %v9700_v43  ;;  %v9775_v42 = vld [vmem:[%s11082_s7 + $0x660] ss:$8 sps:$4 sm:$0xff]  }
 0x280   : > { %7932 = vmatprep.subr.bf16.mxu1 %v9705_v46  ;;  %8260 = vmatprep.subr.bf16.mxu0 %v9708_v47  ;;  %v9778_v43 = vld [vmem:[%s11082_s7 + $0xe60] ss:$8 sps:$4 sm:$0xff]   ;;  %v9783_v46 = vld [vmem:[%s11082_s7 + $0x674] ss:$8 sps:$4 sm:$0xff]  }
 0x281   : > { %v9786_v47 = vld [vmem:[%s11082_s7 + $0xe74] ss:$8 sps:$4 sm:$0xff]  }
 0x283   : > { %7933 = vmatpush1.bf16.msra.mxu1 %v9703_v3  ;;  %8261 = vmatpush1.bf16.msra.mxu0 %v9706_v49  ;;  %v9781_v3 = vld [vmem:[%s11082_s7 + $0x670] ss:$8 sps:$4 sm:$0xff]  }
 0x284   : > { %7934 = vmatprep.subr.bf16.mxu1 %v9711_v50  ;;  %8262 = vmatprep.subr.bf16.mxu0 %v9714_v40  ;;  %v9784_v49 = vld [vmem:[%s11082_s7 + $0xe70] ss:$8 sps:$4 sm:$0xff]   ;;  %v9789_v50 = vld [vmem:[%s11082_s7 + $0x684] ss:$8 sps:$4 sm:$0xff]  }
 0x285   : > { %v9792_v40 = vld [vmem:[%s11082_s7 + $0xe84] ss:$8 sps:$4 sm:$0xff]  }
 0x287   : > { %7935 = vmatpush1.bf16.msra.mxu1 %v9709_v24  ;;  %8263 = vmatpush1.bf16.msra.mxu0 %v9712_v51  ;;  %v9787_v24 = vld [vmem:[%s11082_s7 + $0x680] ss:$8 sps:$4 sm:$0xff]  }
 0x288   : > { %7936 = vmatprep.subr.bf16.mxu1 %v9717_v52  ;;  %8264 = vmatprep.subr.bf16.mxu0 %v9720_v53  ;;  %v9790_v51 = vld [vmem:[%s11082_s7 + $0xe80] ss:$8 sps:$4 sm:$0xff]   ;;  %v9795_v52 = vld [vmem:[%s11082_s7 + $0x694] ss:$8 sps:$4 sm:$0xff]  }
 0x289   : > { %v9798_v53 = vld [vmem:[%s11082_s7 + $0xe94] ss:$8 sps:$4 sm:$0xff]  }
 0x28b   : > { %7937 = vmatpush1.bf16.msra.mxu1 %v9715_v54  ;;  %8265 = vmatpush1.bf16.msra.mxu0 %v9718_v55  ;;  %v9793_v54 = vld [vmem:[%s11082_s7 + $0x690] ss:$8 sps:$4 sm:$0xff]  }
 0x28c   : > { %7938 = vmatprep.subr.bf16.mxu1 %v9723_v56  ;;  %8266 = vmatprep.subr.bf16.mxu0 %v9726_v57  ;;  %v9796_v55 = vld [vmem:[%s11082_s7 + $0xe90] ss:$8 sps:$4 sm:$0xff]   ;;  %v9801_v56 = vld [vmem:[%s11082_s7 + $0x6a4] ss:$8 sps:$4 sm:$0xff]  }
 0x28d   : > { %v9804_v57 = vld [vmem:[%s11082_s7 + $0xea4] ss:$8 sps:$4 sm:$0xff]  }
 0x28f   : > { %7939 = vmatpush1.bf16.msra.mxu1 %v9721_v45  ;;  %8267 = vmatpush1.bf16.msra.mxu0 %v9724_v59  ;;  %v9799_v45 = vld [vmem:[%s11082_s7 + $0x6a0] ss:$8 sps:$4 sm:$0xff]  }
 0x290   : > { %7940 = vmatprep.subr.bf16.mxu1 %v9729_v60  ;;  %8268 = vmatprep.subr.bf16.mxu0 %v9732_v61  ;;  %v9802_v59 = vld [vmem:[%s11082_s7 + $0xea0] ss:$8 sps:$4 sm:$0xff]   ;;  %v9807_v60 = vld [vmem:[%s11082_s7 + $0x6b4] ss:$8 sps:$4 sm:$0xff]  }
 0x291   : > { %v9810_v61 = vld [vmem:[%s11082_s7 + $0xeb4] ss:$8 sps:$4 sm:$0xff]  }
 0x293   : > { %7941 = vmatpush1.bf16.msra.mxu1 %v9727_v2  ;;  %8269 = vmatpush1.bf16.msra.mxu0 %v9730_v6  ;;  %v9813_v2 = vld [vmem:[%s11082_s7 + $0x6c4] ss:$8 sps:$4 sm:$0xff]  }
 0x294   : > { %7942 = vmatprep.subr.bf16.mxu1 %v9735_v48  ;;  %8270 = vmatprep.subr.bf16.mxu0 %v9738_v7  ;;  %v9816_v6 = vld [vmem:[%s11082_s7 + $0xec4] ss:$8 sps:$4 sm:$0xff]   ;;  %v9811_v48 = vld [vmem:[%s11082_s7 + $0x6c0] ss:$8 sps:$4 sm:$0xff]  }
 0x295   : > { %v9814_v7 = vld [vmem:[%s11082_s7 + $0xec0] ss:$8 sps:$4 sm:$0xff]  }
 0x297   : > { %7943 = vmatpush1.bf16.msra.mxu1 %v9733_v27  ;;  %8271 = vmatpush1.bf16.msra.mxu0 %v9736_v41  ;;  %v9819_v27 = vld [vmem:[%s11082_s7 + $0x6d4] ss:$8 sps:$4 sm:$0xff]  }
 0x298   : > { %7953 = vmatprep.subr.bf16.mxu1 %v9741_v58  ;;  %8281 = vmatprep.subr.bf16.mxu0 %v9744_v9  ;;  %v9822_v41 = vld [vmem:[%s11082_s7 + $0xed4] ss:$8 sps:$4 sm:$0xff]   ;;  %v9817_v58 = vld [vmem:[%s11082_s7 + $0x6d0] ss:$8 sps:$4 sm:$0xff]  }
 0x299   : > { %v9820_v9 = vld [vmem:[%s11082_s7 + $0xed0] ss:$8 sps:$4 sm:$0xff]  }
 0x29a   : > { %7945 = vmatmul.mubr.bf16.vlgmr.msra.gmra.mrb[0].mxu1 %v5013_v12  ;;  %8273 = vmatmul.mubr.bf16.vlgmr.msra.gmra.mrb[0].mxu0 %v5111_v13  ;;  %v9823_v12 = vld [vmem:[%s11082_s7 + $0x6e0] ss:$8 sps:$4 sm:$0xff]  }
 0x29b   : > { %7954 = vmatpush1.bf16.msra.mxu1 %v9739_v14  ;;  %8282 = vmatpush1.bf16.msra.mxu0 %v9742_v17  ;;  %v9826_v13 = vld [vmem:[%s11082_s7 + $0xee0] ss:$8 sps:$4 sm:$0xff]   ;;  %v9831_v14 = vld [vmem:[%s11082_s7 + $0x6f4] ss:$8 sps:$4 sm:$0xff]  }
 0x29c   : > { %7955 = vmatprep.subr.bf16.mxu1 %v9747_v18  ;;  %8283 = vmatprep.subr.bf16.mxu0 %v9750_v19  ;;  %v9834_v17 = vld [vmem:[%s11082_s7 + $0xef4] ss:$8 sps:$4 sm:$0xff]   ;;  %v9829_v18 = vld [vmem:[%s11082_s7 + $0x6f0] ss:$8 sps:$4 sm:$0xff]  }
 0x29d   : > { %7985 = vmatprep.mubr.bf16.mxu1 %v11618_v20  ;;  %8313 = vmatprep.mubr.bf16.mxu0 %v11621_v62  ;;  %v9832_v19 = vld [vmem:[%s11082_s7 + $0xef0] ss:$8 sps:$4 sm:$0xff]  }
 0x29f   : > { %7956 = vmatpush1.bf16.msra.mxu1 %v9745_v63  ;;  %8284 = vmatpush1.bf16.msra.mxu0 %v9748_v21  ;;  %v9838_v63 = vld [vmem:[%s11082_s7 + $0x704] ss:$8 sps:$4 sm:$0xff]  }
 0x2a0   : > { %7957 = vmatprep.subr.bf16.mxu1 %v9753_v22  ;;  %8285 = vmatprep.subr.bf16.mxu0 %v9756_v23  ;;  %v9842_v21 = vld [vmem:[%s11082_s7 + $0xf04] ss:$8 sps:$4 sm:$0xff]   ;;  %v11687_v22 = vrot.slane %v11596_v16, %v11089_v11  ;;  %v11691_v23 = vrot.slane %v11599_v8, %v11089_v11  ;;  %v5016_v16 = vcombine.high %v11618_v20, %v11618_v20  ;;  %v9843_v8 = vld [vmem:[%s11082_s7 + $0x710] ss:$8 sps:$4 sm:$0xff]  }
 0x2a1   : > { %v9851_v20 = vld [vmem:[%s11082_s7 + $0x724] ss:$8 sps:$4 sm:$0xff]  }
 0x2a3   : > { %7958 = vmatpush1.bf16.msra.mxu1 %v9751_v28  ;;  %8286 = vmatpush1.bf16.msra.mxu0 %v9754_v29  ;;  %v9836_v28 = vld [vmem:[%s11082_s7 + $0x700] ss:$8 sps:$4 sm:$0xff]  }
 0x2a4   : > { %7959 = vmatprep.subr.bf16.mxu1 %v9759_v30  ;;  %8287 = vmatprep.subr.bf16.mxu0 %v9762_v15  ;;  %v9840_v29 = vld [vmem:[%s11082_s7 + $0xf00] ss:$8 sps:$4 sm:$0xff]   ;;  %v9845_v30 = vld [vmem:[%s11082_s7 + $0x714] ss:$8 sps:$4 sm:$0xff]  }
 0x2a5   : > { %v9848_v15 = vld [vmem:[%s11082_s7 + $0xf14] ss:$8 sps:$4 sm:$0xff]  }
 0x2a7   : > { %7960 = vmatpush1.bf16.msra.mxu1 %v9757_v31  ;;  %8288 = vmatpush1.bf16.msra.mxu0 %v9760_v5  ;;  %v5114_v31 = vcombine.high %v11621_v62, %v11621_v62  ;;  %v9846_v5 = vld [vmem:[%s11082_s7 + $0xf10] ss:$8 sps:$4 sm:$0xff]   ;;  %v9849_v62 = vld [vmem:[%s11082_s7 + $0x720] ss:$8 sps:$4 sm:$0xff]  }
 0x2a8   : > { %7961 = vmatprep.subr.bf16.mxu1 %v9765_v32  ;;  %8289 = vmatprep.subr.bf16.mxu0 %v9768_v25  ;;  %v9854_v32 = vld [vmem:[%s11082_s7 + $0xf24] ss:$8 sps:$4 sm:$0xff]   ;;  %v9852_v25 = vld [vmem:[%s11082_s7 + $0xf20] ss:$8 sps:$4 sm:$0xff]  }
 0x2ab   : > { %7962 = vmatpush1.bf16.msra.mxu1 %v9763_v26  ;;  %8290 = vmatpush1.bf16.msra.mxu0 %v9766_v33  ;;  %v9857_v26 = vld [vmem:[%s11082_s7 + $0x734] ss:$8 sps:$4 sm:$0xff]  }
 0x2ac   : > { %7963 = vmatprep.subr.bf16.mxu1 %v9771_v34  ;;  %8291 = vmatprep.subr.bf16.mxu0 %v9774_v35  ;;  %v9860_v33 = vld [vmem:[%s11082_s7 + $0xf34] ss:$8 sps:$4 sm:$0xff]   ;;  %v9855_v34 = vld [vmem:[%s11082_s7 + $0x730] ss:$8 sps:$4 sm:$0xff]  }
 0x2ad   : > { %v9858_v35 = vld [vmem:[%s11082_s7 + $0xf30] ss:$8 sps:$4 sm:$0xff]  }
 0x2af   : > { %7964 = vmatpush1.bf16.msra.mxu1 %v9769_v36  ;;  %8292 = vmatpush1.bf16.msra.mxu0 %v9772_v37  ;;  %v9863_v36 = vld [vmem:[%s11082_s7 + $0x744] ss:$8 sps:$4 sm:$0xff]  }
 0x2b0   : > { %7965 = vmatprep.subr.bf16.mxu1 %v9777_v38  ;;  %8293 = vmatprep.subr.bf16.mxu0 %v9780_v39  ;;  %v9866_v37 = vld [vmem:[%s11082_s7 + $0xf44] ss:$8 sps:$4 sm:$0xff]   ;;  %v9861_v38 = vld [vmem:[%s11082_s7 + $0x740] ss:$8 sps:$4 sm:$0xff]  }
 0x2b1   : > { %v9864_v39 = vld [vmem:[%s11082_s7 + $0xf40] ss:$8 sps:$4 sm:$0xff]  }
 0x2b3   : > { %7966 = vmatpush1.bf16.msra.mxu1 %v9775_v42  ;;  %8294 = vmatpush1.bf16.msra.mxu0 %v9778_v43  ;;  %v9869_v42 = vld [vmem:[%s11082_s7 + $0x754] ss:$8 sps:$4 sm:$0xff]  }
 0x2b4   : > { %7967 = vmatprep.subr.bf16.mxu1 %v9783_v46  ;;  %8295 = vmatprep.subr.bf16.mxu0 %v9786_v47  ;;  %v9872_v43 = vld [vmem:[%s11082_s7 + $0xf54] ss:$8 sps:$4 sm:$0xff]   ;;  %v9867_v46 = vld [vmem:[%s11082_s7 + $0x750] ss:$8 sps:$4 sm:$0xff]  }
 0x2b5   : > { %v9870_v47 = vld [vmem:[%s11082_s7 + $0xf50] ss:$8 sps:$4 sm:$0xff]  }
 0x2b7   : > { %7968 = vmatpush1.bf16.msra.mxu1 %v9781_v3  ;;  %8296 = vmatpush1.bf16.msra.mxu0 %v9784_v49  ;;  %v9875_v3 = vld [vmem:[%s11082_s7 + $0x764] ss:$8 sps:$4 sm:$0xff]  }
 0x2b8   : > { %7969 = vmatprep.subr.bf16.mxu1 %v9789_v50  ;;  %8297 = vmatprep.subr.bf16.mxu0 %v9792_v40  ;;  %v9878_v49 = vld [vmem:[%s11082_s7 + $0xf64] ss:$8 sps:$4 sm:$0xff]   ;;  %v9873_v50 = vld [vmem:[%s11082_s7 + $0x760] ss:$8 sps:$4 sm:$0xff]  }
 0x2b9   : > { %v9876_v40 = vld [vmem:[%s11082_s7 + $0xf60] ss:$8 sps:$4 sm:$0xff]  }
 0x2bb   : > { %7970 = vmatpush1.bf16.msra.mxu1 %v9787_v24  ;;  %8298 = vmatpush1.bf16.msra.mxu0 %v9790_v51  ;;  %v9881_v24 = vld [vmem:[%s11082_s7 + $0x774] ss:$8 sps:$4 sm:$0xff]  }
 0x2bc   : > { %7971 = vmatprep.subr.bf16.mxu1 %v9795_v52  ;;  %8299 = vmatprep.subr.bf16.mxu0 %v9798_v53  ;;  %v9884_v51 = vld [vmem:[%s11082_s7 + $0xf74] ss:$8 sps:$4 sm:$0xff]   ;;  %v9879_v52 = vld [vmem:[%s11082_s7 + $0x770] ss:$8 sps:$4 sm:$0xff]  }
 0x2bd   : > { %v9882_v53 = vld [vmem:[%s11082_s7 + $0xf70] ss:$8 sps:$4 sm:$0xff]  }
 0x2bf   : > { %7972 = vmatpush1.bf16.msra.mxu1 %v9793_v54  ;;  %8300 = vmatpush1.bf16.msra.mxu0 %v9796_v55  ;;  %v9887_v54 = vld [vmem:[%s11082_s7 + $0x784] ss:$8 sps:$4 sm:$0xff]  }
 0x2c0   : > { %7973 = vmatprep.subr.bf16.mxu1 %v9801_v56  ;;  %8301 = vmatprep.subr.bf16.mxu0 %v9804_v57  ;;  %v9890_v55 = vld [vmem:[%s11082_s7 + $0xf84] ss:$8 sps:$4 sm:$0xff]   ;;  %v9885_v56 = vld [vmem:[%s11082_s7 + $0x780] ss:$8 sps:$4 sm:$0xff]  }
 0x2c1   : > { %v9888_v57 = vld [vmem:[%s11082_s7 + $0xf80] ss:$8 sps:$4 sm:$0xff]  }
 0x2c3   : > { %7974 = vmatpush1.bf16.msra.mxu1 %v9799_v45  ;;  %8302 = vmatpush1.bf16.msra.mxu0 %v9802_v59  ;;  %v9893_v45 = vld [vmem:[%s11082_s7 + $0x794] ss:$8 sps:$4 sm:$0xff]  }
 0x2c4   : > { %7975 = vmatprep.subr.bf16.mxu1 %v9807_v60  ;;  %8303 = vmatprep.subr.bf16.mxu0 %v9810_v61  ;;  %v9896_v59 = vld [vmem:[%s11082_s7 + $0xf94] ss:$8 sps:$4 sm:$0xff]   ;;  %v9891_v60 = vld [vmem:[%s11082_s7 + $0x790] ss:$8 sps:$4 sm:$0xff]  }
 0x2c5   : > { %v9894_v61 = vld [vmem:[%s11082_s7 + $0xf90] ss:$8 sps:$4 sm:$0xff]  }
 0x2c7   : > { %7976 = vmatpush1.bf16.msra.mxu1 %v9805_v0  ;;  %8304 = vmatpush1.bf16.msra.mxu0 %v9808_v1  ;;  %v9899_v0 = vld [vmem:[%s11082_s7 + $0x7a4] ss:$8 sps:$4 sm:$0xff]  }
 0x2c8   : > { %7977 = vmatprep.subr.bf16.mxu1 %v9813_v2  ;;  %8305 = vmatprep.subr.bf16.mxu0 %v9816_v6  ;;  %v9902_v1 = vld [vmem:[%s11082_s7 + $0xfa4] ss:$8 sps:$4 sm:$0xff]   ;;  %v9897_v2 = vld [vmem:[%s11082_s7 + $0x7a0] ss:$8 sps:$4 sm:$0xff]  }
 0x2c9   : > { %v9900_v6 = vld [vmem:[%s11082_s7 + $0xfa0] ss:$8 sps:$4 sm:$0xff]  }
 0x2cb   : > { %7978 = vmatpush1.bf16.msra.mxu1 %v9811_v48  ;;  %8306 = vmatpush1.bf16.msra.mxu0 %v9814_v7  ;;  %v9905_v48 = vld [vmem:[%s11082_s7 + $0x7b4] ss:$8 sps:$4 sm:$0xff]  }
 0x2cc   : > { %7979 = vmatprep.subr.bf16.mxu1 %v9819_v27  ;;  %8307 = vmatprep.subr.bf16.mxu0 %v9822_v41  ;;  %v9908_v7 = vld [vmem:[%s11082_s7 + $0xfb4] ss:$8 sps:$4 sm:$0xff]   ;;  %v9903_v27 = vld [vmem:[%s11082_s7 + $0x7b0] ss:$8 sps:$4 sm:$0xff]  }
 0x2cd   : > { %v9906_v41 = vld [vmem:[%s11082_s7 + $0xfb0] ss:$8 sps:$4 sm:$0xff]  }
 0x2cf   : > { %7980 = vmatpush1.bf16.msra.mxu1 %v9817_v58  ;;  %8308 = vmatpush1.bf16.msra.mxu0 %v9820_v9  ;;  %v9911_v58 = vld [vmem:[%s11082_s7 + $0x7c4] ss:$8 sps:$4 sm:$0xff]  }
 0x2d0   : > { %7981 = vmatprep.subr.bf16.mxu1 %v9825_v44  ;;  %8309 = vmatprep.subr.bf16.mxu0 %v9828_v10  ;;  %v9914_v9 = vld [vmem:[%s11082_s7 + $0xfc4] ss:$8 sps:$4 sm:$0xff]   ;;  %v9909_v44 = vld [vmem:[%s11082_s7 + $0x7c0] ss:$8 sps:$4 sm:$0xff]  }
 0x2d1   : > { %v9912_v10 = vld [vmem:[%s11082_s7 + $0xfc0] ss:$8 sps:$4 sm:$0xff]  }
 0x2d3   : > { %7982 = vmatpush1.bf16.msra.mxu1 %v9823_v12  ;;  %8310 = vmatpush1.bf16.msra.mxu0 %v9826_v13  ;;  %v9917_v12 = vld [vmem:[%s11082_s7 + $0x7d4] ss:$8 sps:$4 sm:$0xff]  }
 0x2d4   : > { %7983 = vmatprep.subr.bf16.mxu1 %v9831_v14  ;;  %8311 = vmatprep.subr.bf16.mxu0 %v9834_v17  ;;  %v9920_v13 = vld [vmem:[%s11082_s7 + $0xfd4] ss:$8 sps:$4 sm:$0xff]   ;;  %v9915_v14 = vld [vmem:[%s11082_s7 + $0x7d0] ss:$8 sps:$4 sm:$0xff]  }
 0x2d5   : > { %v9918_v17 = vld [vmem:[%s11082_s7 + $0xfd0] ss:$8 sps:$4 sm:$0xff]  }
 0x2d7   : > { %7984 = vmatpush1.bf16.msra.mxu1 %v9829_v18  ;;  %8312 = vmatpush1.bf16.msra.mxu0 %v9832_v19  ;;  %v9923_v18 = vld [vmem:[%s11082_s7 + $0x7e4] ss:$8 sps:$4 sm:$0xff]  }
 0x2d8   : > { %7994 = vmatprep.subr.bf16.mxu1 %v9838_v63  ;;  %8322 = vmatprep.subr.bf16.mxu0 %v9842_v21  ;;  %v9926_v19 = vld [vmem:[%s11082_s7 + $0xfe4] ss:$8 sps:$4 sm:$0xff]   ;;  %v9921_v63 = vld [vmem:[%s11082_s7 + $0x7e0] ss:$8 sps:$4 sm:$0xff]  }
 0x2d9   : > { %v9924_v21 = vld [vmem:[%s11082_s7 + $0xfe0] ss:$8 sps:$4 sm:$0xff]  }
 0x2da   : > { %7986 = vmatmul.mubr.bf16.vlgmr.msra.gmra.mrb[0].mxu1 %v11687_v22  ;;  %8314 = vmatmul.mubr.bf16.vlgmr.msra.gmra.mrb[0].mxu0 %v11691_v23 }
 0x2db   : > { %7995 = vmatpush1.bf16.msra.mxu1 %v9836_v28  ;;  %8323 = vmatpush1.bf16.msra.mxu0 %v9840_v29  ;;  %v9929_v28 = vld [vmem:[%s11082_s7 + $0x7f4] ss:$8 sps:$4 sm:$0xff]  }
 0x2dc   : > { %7996 = vmatprep.subr.bf16.mxu1 %v9845_v30  ;;  %8324 = vmatprep.subr.bf16.mxu0 %v9848_v15  ;;  %v9932_v29 = vld [vmem:[%s11082_s7 + $0xff4] ss:$8 sps:$4 sm:$0xff]   ;;  %v9927_v30 = vld [vmem:[%s11082_s7 + $0x7f0] ss:$8 sps:$4 sm:$0xff]  }
 0x2dd   : > { %8026 = vmatprep.mubr.bf16.mxu1 %v5016_v16  ;;  %8354 = vmatprep.mubr.bf16.mxu0 %v5114_v31  ;;  %v9930_v15 = vld [vmem:[%s11082_s7 + $0xff0] ss:$8 sps:$4 sm:$0xff]   ;;  %v5014_v16 = vcombine.high %v11687_v22, %v11687_v22  ;;  %v5112_v31 = vcombine.high %v11691_v23, %v11691_v23 }
 0x2df   : > { %7997 = vmatpush1.bf16.msra.mxu1 %v9843_v8  ;;  %8325 = vmatpush1.bf16.msra.mxu0 %v9846_v5  ;;  %v9974_v8 = vmov 0.0   ;;  %v9975_v5 = vmov 1983009808  }
 0x2e0   : > { %7998 = vmatprep.subr.bf16.mxu1 %v9851_v20  ;;  %8326 = vmatprep.subr.bf16.mxu0 %v9854_v32  ;;  %4397 = vst [vmem:[#allocation2] sm:$0xf] %v9974_v8  ;;  %v8367_v20 = vunpack.c.l.s4 %v9975_v5 }
 0x2e2   : > { %v8368_v32 = vunpack.c.0.s8 %v8367_v20 }
 0x2e3   : > { %7999 = vmatpush1.bf16.msra.mxu1 %v9849_v62  ;;  %8327 = vmatpush1.bf16.msra.mxu0 %v9852_v25 }
 0x2e4   : > { %8000 = vmatprep.subr.bf16.mxu1 %v9857_v26  ;;  %8328 = vmatprep.subr.bf16.mxu0 %v9860_v33 }
 0x2e7   : > { %8001 = vmatpush1.bf16.msra.mxu1 %v9855_v34  ;;  %8329 = vmatpush1.bf16.msra.mxu0 %v9858_v35  ;;  %v8371_v34 = vsub.s32 %v8368_v32, %v11075_v4  ;;  %v8384_v35 = vsub.s32 0, %v11075_v4 }
 0x2e8   : > { %8002 = vmatprep.subr.bf16.mxu1 %v9863_v36  ;;  %8330 = vmatprep.subr.bf16.mxu0 %v9866_v37  ;;  %v8388_v36 = vsub.s32 1, %v11075_v4 }
 0x2eb   : > { %8003 = vmatpush1.bf16.msra.mxu1 %v9861_v38  ;;  %8331 = vmatpush1.bf16.msra.mxu0 %v9864_v39  ;;  %v8380_v39 = vld [vmem:[%s4386_s21] sm:$0x3] }
 0x2ec   : > { %8004 = vmatprep.subr.bf16.mxu1 %v9869_v42  ;;  %8332 = vmatprep.subr.bf16.mxu0 %v9872_v43 }
 0x2ef   : > { %8005 = vmatpush1.bf16.msra.mxu1 %v9867_v46  ;;  %8333 = vmatpush1.bf16.msra.mxu0 %v9870_v47  ;;  %v4398_v47 = vld [vmem:[#allocation2] sm:$0xf] }
 0x2f0   : > { %8006 = vmatprep.subr.bf16.mxu1 %v9875_v3  ;;  %8334 = vmatprep.subr.bf16.mxu0 %v9878_v49  ;;  %v8385_v49 = vrot.slane %v8380_v39, %v8384_v35 }
 0x2f3   : > { %8007 = vmatpush1.bf16.msra.mxu1 %v9873_v50  ;;  %8335 = vmatpush1.bf16.msra.mxu0 %v9876_v40  ;;  %v8389_v50 = vrot.slane %v8380_v39, %v8388_v36 }
 0x2f4   : > { %8008 = vmatprep.subr.bf16.mxu1 %v9881_v24  ;;  %8336 = vmatprep.subr.bf16.mxu0 %v9884_v51 }
 0x2f5   : > { %v8390_v24 = vcombine.low %v8385_v49, %v8389_v50 }
 0x2f7   : > { %8009 = vmatpush1.bf16.msra.mxu1 %v9879_v52  ;;  %8337 = vmatpush1.bf16.msra.mxu0 %v9882_v53  ;;  %v8397_v51 = vrot.slane %v8390_v24, %v8371_v34 }
 0x2f8   : > { %8010 = vmatprep.subr.bf16.mxu1 %v9887_v54  ;;  %8338 = vmatprep.subr.bf16.mxu0 %v9890_v55 }
 0x2fb   : > { %8011 = vmatpush1.bf16.msra.mxu1 %v9885_v56  ;;  %8339 = vmatpush1.bf16.msra.mxu0 %v9888_v57 }
 0x2fc   : > { %8012 = vmatprep.subr.bf16.mxu1 %v9893_v45  ;;  %8340 = vmatprep.subr.bf16.mxu0 %v9896_v59 }
 0x2ff   : > { %8013 = vmatpush1.bf16.msra.mxu1 %v9891_v60  ;;  %8341 = vmatpush1.bf16.msra.mxu0 %v9894_v61 }
 0x300   : > { %8014 = vmatprep.subr.bf16.mxu1 %v9899_v0  ;;  %8342 = vmatprep.subr.bf16.mxu0 %v9902_v1 }
 0x303   : > { %8015 = vmatpush1.bf16.msra.mxu1 %v9897_v2  ;;  %8343 = vmatpush1.bf16.msra.mxu0 %v9900_v6 }
 0x304   : > { %8016 = vmatprep.subr.bf16.mxu1 %v9905_v48  ;;  %8344 = vmatprep.subr.bf16.mxu0 %v9908_v7 }
 0x307   : > { %8017 = vmatpush1.bf16.msra.mxu1 %v9903_v27  ;;  %8345 = vmatpush1.bf16.msra.mxu0 %v9906_v41 }
 0x308   : > { %8018 = vmatprep.subr.bf16.mxu1 %v9911_v58  ;;  %8346 = vmatprep.subr.bf16.mxu0 %v9914_v9 }
 0x30b   : > { %8019 = vmatpush1.bf16.msra.mxu1 %v9909_v44  ;;  %8347 = vmatpush1.bf16.msra.mxu0 %v9912_v10 }
 0x30c   : > { %8020 = vmatprep.subr.bf16.mxu1 %v9917_v12  ;;  %8348 = vmatprep.subr.bf16.mxu0 %v9920_v13 }
 0x30f   : > { %8021 = vmatpush1.bf16.msra.mxu1 %v9915_v14  ;;  %8349 = vmatpush1.bf16.msra.mxu0 %v9918_v17 }
 0x310   : > { %8022 = vmatprep.subr.bf16.mxu1 %v9923_v18  ;;  %8350 = vmatprep.subr.bf16.mxu0 %v9926_v19 }
 0x313   : > { %8023 = vmatpush1.bf16.msra.mxu1 %v9921_v63  ;;  %8351 = vmatpush1.bf16.msra.mxu0 %v9924_v21 }
 0x314   : > { %8024 = vmatprep.subr.bf16.mxu1 %v9929_v28  ;;  %8352 = vmatprep.subr.bf16.mxu0 %v9932_v29 }
 0x317   : > { %8025 = vmatpush1.bf16.msra.mxu1 %v9927_v30  ;;  %8353 = vmatpush1.bf16.msra.mxu0 %v9930_v15 }
 0x31a   : > { %8027 = vmatmul.mubr.bf16.vlgmr.msra.gmra.mrb[0].mxu1 %v5014_v16  ;;  %8355 = vmatmul.mubr.bf16.vlgmr.msra.gmra.mrb[0].mxu0 %v5112_v31 }
 0x3ed   : > { %v8028_v62 = vpop.f32.mrb[0].mxu1  ;;  %v8356_v25 = vpop.f32.mrb[0].mxu0 }
 0x3ee   : > { %v9060_v22 = vadd.f32 %v8356_v25, %v8028_v62  ;;  %v8030_v23 = vpop.f32.mrb[1].mxu1  ;;  %v8358_v26 = vpop.f32.mrb[1].mxu0 }
 0x3ef   : > { %v9061_v33 = vadd.f32 %v8358_v26, %v8030_v23  ;;  %v8032_v37 = vpop.f32.mrb[2].mxu1  ;;  %v8360_v38 = vpop.f32.mrb[2].mxu0 }
 0x3f0   : > { %v8033_v42 = vpop.f32.mrb[3].mxu1  ;;  %v8361_v43 = vpop.f32.mrb[3].mxu0 }
 0x3f1   : > { %v8365_v46 = vcombine.low %v9060_v22, %v9061_v33 }
 0x3f3   : > { %v8372_v3 = vrot.slane %v8365_v46, %v8371_v34 }
 0x3f5   : > { %v8374_v40 = vadd.f32 %v8372_v3, %v4398_v47 }
 0x3f7   : > { %8375 = vst [vmem:[#allocation2] sm:$0xf] %v8374_v40 }
 0x3fe   : > { %v8379_v52 = vld [vmem:[#allocation2] sm:$0xf] }
 0x3ff   : > { %v8399_v53 = vadd.f32 %v8397_v51, %v8379_v52 }
 0x401   : > { %v8400_v54 = vmax.f32 %v8399_v53, 0.0 }
 0x403   : > { %v8408_v55 = vrot.slane %v8400_v54, %v8371_v34 }
 0x405   : > { %v8409_v4 = vcombine.high %v8408_v55, %v8408_v55 }
 0x407   : > { %v9055_v56 = vpack.c.bf16 %v8409_v4, %v8408_v55 }
 0x409   : > { %v8423_v57 = vrot.slane %v9055_v56, %v11089_v11 }
 0x40b   : > { %9056 = vst.sshfl [vmem:[%s4391_s23] sm:$0x5 pattern:$0x73625140] %v8423_v57 }
 0x40c PF: > { %s13_s16 = sadd.s32 1, %s9971_s16   ;;  %s11799_s12 = smov %s9959_s13 }
 0x40d   : > { %p10_p10 = scmp.ge.s32.totalorder %s13_s16, 4   ;;  %s11800_s13 = smov %s10031_s20 }
 0x40e   : > { %s11801_s14 = smov %s9967_s15  ;;  %s11802_s15 = smov %s11804_s17 }
 0x40f   :  { %12 = sbr.rel (!%p10_p10) target bundleno = 3 (0x3), region = 139 }

</bundles_post_ra>
